<compile_context>
chip_gen: v7x
topology: tpu7x:2x2x1
jax: 0.10.0
libtpu: 0.0.40
codegen_flags: <defaults>
</compile_context>

<pallas_src>
import functools

import jax
import jax.numpy as jnp
from jax import lax
from jax.experimental import pallas as pl
from jax.experimental.pallas import tpu as pltpu  # noqa: F401  (TPU backend)

# ----------------------------- model hyper-params -----------------------------
N = 16                 # nodes per graph (must match so x0 + x1_0 is valid)
NODE_FEATURES = 8      # node_features  (x)
INPUT_SIZE = 12        # input_size     (x1)
N_HIDDEN = 32          # n_hidden
OUTPUT_SIZE = 1        # output_size (MLP head defined in module but unused in forward)
HALF = N_HIDDEN // 2   # 16

GRID_SIZE = 5
SPLINE_ORDER = 3
N_COEFF = GRID_SIZE + SPLINE_ORDER           # 8 spline coefficients per input feature
GRID_PTS = GRID_SIZE + 2 * SPLINE_ORDER + 1  # 12 knots per input feature
_H = 2.0 / GRID_SIZE                         # uniform grid spacing, grid_range=[-1, 1]
# Static uniform knot positions (identical for every input feature — efficient-kan default).
KNOTS = tuple((j - SPLINE_ORDER) * _H - 1.0 for j in range(GRID_PTS))


# ----------------------------- Pallas helpers ---------------------------------
def _full_spec(shape):
    """Whole-array block in VMEM (grid = ())."""
    return pl.BlockSpec(tuple(shape), lambda *_, n=len(shape): (0,) * n)


def _silu(v):
    # x * sigmoid(x); exp + approx-reciprocal both land on the EUP slot.
    vc = jnp.maximum(v, -30.0)  # clamp so exp(-v) can't overflow to inf
    return v * pl.reciprocal(1.0 + jnp.exp(-vc), approx=True)


def _b_spline_bases(v):
    """Cox–de Boor recursion on the static uniform grid.

    v: (n, f_in) float32. Returns a list of N_COEFF arrays, each (n, f_in),
    using precomputed Python-constant reciprocal denominators (no divides).
    """
    bases = [jnp.where((v >= KNOTS[j]) & (v < KNOTS[j + 1]), 1.0, 0.0)
             for j in range(GRID_PTS - 1)]
    for k in range(1, SPLINE_ORDER + 1):
        nxt = []
        for j in range(len(bases) - 1):
            l_inv = 1.0 / (KNOTS[j + k] - KNOTS[j])
            r_inv = 1.0 / (KNOTS[j + k + 1] - KNOTS[j + 1])
            nxt.append((v - KNOTS[j]) * l_inv * bases[j]
                       + (KNOTS[j + k + 1] - v) * r_inv * bases[j + 1])
        bases = nxt
    return bases  # N_COEFF arrays of shape (n, f_in)


def _kan_layer(v, base_wt, spline_wt_ref):
    """KANLinear: silu(v) @ baseW^T + sum_c b_spline_c(v) @ scaled_splineW_c^T.

    base_wt: (f_in, f_out) array; spline_wt_ref: Ref of shape (N_COEFF, f_in, f_out).
    """
    out = jnp.dot(_silu(v), base_wt, preferred_element_type=jnp.float32)
    for c, b in enumerate(_b_spline_bases(v)):
        out = out + jnp.dot(b, spline_wt_ref[c], preferred_element_type=jnp.float32)
    return out


# ----------------------------- fused forward kernel ---------------------------
def _kan_gcn_kernel(
    a_ref, a1_ref, x_ref, x1_ref,
    g1wt_ref, g1b_ref, g2wt_ref, g2b_ref,
    s1wlt_ref, s1wrt_ref, s1b_ref,
    s2wlt_ref, s2wrt_ref, s2b_ref,
    k1bwt_ref, k1swt_ref, k2bwt_ref, k2swt_ref,
    o_ref,
):
    f32 = jnp.float32
    n = a_ref.shape[0]

    # ---- adjacency normalisation (folded in-kernel) ----
    row = lax.broadcasted_iota(jnp.int32, (n, n), 0)
    col = lax.broadcasted_iota(jnp.int32, (n, n), 1)
    eye = (row == col).astype(f32)

    def gcn_norm(a):
        a_hat = a + eye
        deg = jnp.sum(a_hat, axis=1, keepdims=True)                 # (n, 1)
        d_half = eye * jnp.where(deg > 0.0, lax.rsqrt(deg), 0.0)    # diag(D^-1/2)
        return jnp.dot(jnp.dot(d_half, a_hat, preferred_element_type=f32),
                       d_half, preferred_element_type=f32)

    def mean_norm(a):
        deg = jnp.sum(a, axis=1, keepdims=True)
        return a * jnp.where(deg > 0.0, 1.0 / deg, 0.0)             # row-normalised A

    a = a_ref[...]
    a1 = a1_ref[...]
    a_gcn, a_mean = gcn_norm(a), mean_norm(a)
    a_gcn1, a_mean1 = gcn_norm(a1), mean_norm(a1)

    # ---- GCNConv layers + relu + residual add (fused epilogue) ----
    h = jnp.dot(a_gcn,
                jnp.dot(x_ref[...], g1wt_ref[...], preferred_element_type=f32),
                preferred_element_type=f32) + g1b_ref[...]          # conv1_1   (n, 32)
    h1 = jnp.dot(a_gcn1,
                 jnp.dot(x1_ref[...], g2wt_ref[...], preferred_element_type=f32),
                 preferred_element_type=f32) + g2b_ref[...]         # conv2_1   (n, 32)
    x1_0 = jnp.maximum(h1, 0.0)
    x0 = jnp.maximum(h, 0.0) + x1_0

    # ---- SAGEConv (mean aggregation) + relu ----
    def sage(a_m, v, wlt, wrt, b):
        agg = jnp.dot(a_m, v, preferred_element_type=f32)
        return jnp.maximum(
            jnp.dot(agg, wlt, preferred_element_type=f32)
            + jnp.dot(v, wrt, preferred_element_type=f32) + b, 0.0)

    # Branch 1: conv1_2 -> relu -> dropout(identity, eval) -> KAN
    # TODO(synk): training-mode stochastic dropout (p=0.2) omitted (eval semantics).
    xa = sage(a_mean, x0, s1wlt_ref[...], s1wrt_ref[...], s1b_ref[...])      # (n, 16)
    ya = _kan_layer(_kan_layer(xa, k1bwt_ref[...], k1swt_ref),
                    k2bwt_ref[...], k2swt_ref)                               # (n, 1)

    # Branch 2: x1_0 + h1 (relu(h1) + h1, as in the reference) -> conv2_2 -> relu -> KAN
    x1s = x1_0 + h1
    xb = sage(a_mean1, x1s, s2wlt_ref[...], s2wrt_ref[...], s2b_ref[...])    # (n, 16)
    yb = _kan_layer(_kan_layer(xb, k1bwt_ref[...], k1swt_ref),
                    k2bwt_ref[...], k2swt_ref)                               # (n, 1)

    # ---- mean over concat of the two (n,1) columns -> (1, 1) ----
    o_ref[...] = (jnp.sum(ya, keepdims=True)
                  + jnp.sum(yb, keepdims=True)) * (1.0 / float(2 * n))


# ----------------------------- graph preprocessing (glue) ----------------------
def to_dense_adj(edge_index, n):
    a = jnp.zeros((n, n), jnp.float32)
    return a.at[edge_index[1], edge_index[0]].set(1.0)  # A[dst, src] = 1


# ----------------------------- parameters --------------------------------------
def init_params(key):
    """Raw PyTorch-layout parameters."""
    ks = jax.random.split(key, 16)
    nrm = lambda k, shape, s=0.1: s * jax.random.normal(k, shape, jnp.float32)
    return {
        # GCNConv layers
        "gcn1_w": nrm(ks[0], (N_HIDDEN, NODE_FEATURES)),
        "gcn1_b": nrm(ks[1], (N_HIDDEN,)),
        "gcn2_w": nrm(ks[2], (N_HIDDEN, INPUT_SIZE)),
        "gcn2_b": nrm(ks[3], (N_HIDDEN,)),
        # SAGEConv layers (lin_l has bias, lin_r has none — PyG default)
        "sage1_wl": nrm(ks[4], (HALF, N_HIDDEN)),
        "sage1_wr": nrm(ks[5], (HALF, N_HIDDEN)),
        "sage1_b": nrm(ks[6], (HALF,)),
        "sage2_wl": nrm(ks[7], (HALF, N_HIDDEN)),
        "sage2_wr": nrm(ks[8], (HALF, N_HIDDEN)),
        "sage2_b": nrm(ks[9], (HALF,)),
        # KAN([HALF, HALF, 1])
        "kan1_base_w": nrm(ks[10], (HALF, HALF)),
        "kan1_spline_w": nrm(ks[11], (HALF, HALF, N_COEFF)),
        "kan1_scaler": 1.0 + nrm(ks[12], (HALF, HALF)),
        "kan2_base_w": nrm(ks[13], (OUTPUT_SIZE, HALF)),
        "kan2_spline_w": nrm(ks[14], (OUTPUT_SIZE, HALF, N_COEFF)),
        "kan2_scaler": 1.0 + nrm(ks[15], (OUTPUT_SIZE, HALF)),
    }


def pack_params(raw):
    """Precompute (once) all transposes, bias reshapes and scaled spline weights."""
    def spline_pack(w, scaler):
        scaled = w * scaler[..., None]              # (f_out, f_in, C)
        return jnp.transpose(scaled, (2, 1, 0))     # (C, f_in, f_out) — sliced per-coeff in kernel

    return {
        "gcn1_wt": raw["gcn1_w"].T, "gcn1_b": raw["gcn1_b"].reshape(1, -1),
        "gcn2_wt": raw["gcn2_w"].T, "gcn2_b": raw["gcn2_b"].reshape(1, -1),
        "sage1_wlt": raw["sage1_wl"].T, "sage1_wrt": raw["sage1_wr"].T,
        "sage1_b": raw["sage1_b"].reshape(1, -1),
        "sage2_wlt": raw["sage2_wl"].T, "sage2_wrt": raw["sage2_wr"].T,
        "sage2_b": raw["sage2_b"].reshape(1, -1),
        "kan1_base_wt": raw["kan1_base_w"].T,
        "kan1_spline_wt": spline_pack(raw["kan1_spline_w"], raw["kan1_scaler"]),
        "kan2_base_wt": raw["kan2_base_w"].T,
        "kan2_spline_wt": spline_pack(raw["kan2_spline_w"], raw["kan2_scaler"]),
    }


# ----------------------------- forward pass ------------------------------------
def kan_gcn_forward(p, x, x1, edge_index, edge_index1):
    n = x.shape[0]
    a = to_dense_adj(edge_index, n)    # scatter stays in XLA (no clean Pallas scatter)
    a1 = to_dense_adj(edge_index1, n)

    args = (a, a1, x, x1,
            p["gcn1_wt"], p["gcn1_b"], p["gcn2_wt"], p["gcn2_b"],
            p["sage1_wlt"], p["sage1_wrt"], p["sage1_b"],
            p["sage2_wlt"], p["sage2_wrt"], p["sage2_b"],
            p["kan1_base_wt"], p["kan1_spline_wt"],
            p["kan2_base_wt"], p["kan2_spline_wt"])

    return pl.pallas_call(
        _kan_gcn_kernel,
        out_shape=jax.ShapeDtypeStruct((1, 1), jnp.float32),
        in_specs=[_full_spec(v.shape) for v in args],
        out_specs=_full_spec((1, 1)),
    )(*args)


forward = jax.jit(kan_gcn_forward)


# ----------------------------- main --------------------------------------------
if __name__ == "__main__":
    key = jax.random.PRNGKey(0)
    kx, kx1 = jax.random.split(key)
    x = jax.random.normal(kx, (N, NODE_FEATURES), jnp.float32)
    x1 = jax.random.normal(kx1, (N, INPUT_SIZE), jnp.float32)

    # deterministic edge lists (directed both ways): ring graph and skip-2 ring
    src = jnp.arange(N)
    ring = jnp.stack([jnp.concatenate([src, (src + 1) % N]),
                      jnp.concatenate([(src + 1) % N, src])]).astype(jnp.int32)
    skip = jnp.stack([jnp.concatenate([src, (src + 2) % N]),
                      jnp.concatenate([(src + 2) % N, src])]).astype(jnp.int32)

    params = pack_params(init_params(jax.random.PRNGKey(1)))

    out = forward(params, x, x1, ring, skip)
    out = jax.block_until_ready(out)
    assert out.shape == (1, 1) and out.dtype == jnp.float32
    print("KERNEL_OK")
</pallas_src>

<mosaic_0001>
module attributes {stable_mosaic.version = 11 : i64} {
  func.func @_kan_gcn_kernel(%arg0: memref<16x16xf32, #tpu.memory_space<vmem>>, %arg1: memref<16x16xf32, #tpu.memory_space<vmem>>, %arg2: memref<16x8xf32, #tpu.memory_space<vmem>>, %arg3: memref<16x12xf32, #tpu.memory_space<vmem>>, %arg4: memref<8x32xf32, #tpu.memory_space<vmem>>, %arg5: memref<1x32xf32, #tpu.memory_space<vmem>>, %arg6: memref<12x32xf32, #tpu.memory_space<vmem>>, %arg7: memref<1x32xf32, #tpu.memory_space<vmem>>, %arg8: memref<32x16xf32, #tpu.memory_space<vmem>>, %arg9: memref<32x16xf32, #tpu.memory_space<vmem>>, %arg10: memref<1x16xf32, #tpu.memory_space<vmem>>, %arg11: memref<32x16xf32, #tpu.memory_space<vmem>>, %arg12: memref<32x16xf32, #tpu.memory_space<vmem>>, %arg13: memref<1x16xf32, #tpu.memory_space<vmem>>, %arg14: memref<16x16xf32, #tpu.memory_space<vmem>>, %arg15: memref<8x16x16xf32, #tpu.memory_space<vmem>>, %arg16: memref<16x1xf32, #tpu.memory_space<vmem>>, %arg17: memref<8x16x1xf32, #tpu.memory_space<vmem>>, %arg18: memref<1x1xf32, #tpu.memory_space<vmem>>) attributes {dimension_semantics = [], scalar_prefetch = 0 : i64, scratch_operands = 0 : i64, tpu.core_type = #tpu.core_type<tc>} {
    %0 = tpu.iota {dimensions = array<i32: 0>} : vector<16x16xi32>
    %1 = tpu.iota {dimensions = array<i32: 1>} : vector<16x16xi32>
    %2 = arith.cmpi eq, %0, %1 : vector<16x16xi32>
    %3 = arith.extui %2 : vector<16x16xi1> to vector<16x16xi32>
    %4 = arith.sitofp %3 : vector<16x16xi32> to vector<16x16xf32>
    %c0 = arith.constant 0 : index
    %c0_0 = arith.constant 0 : index
    %5 = vector.load %arg0[%c0, %c0_0] : memref<16x16xf32, #tpu.memory_space<vmem>>, vector<16x16xf32>
    %c0_1 = arith.constant 0 : index
    %c0_2 = arith.constant 0 : index
    %6 = vector.load %arg1[%c0_1, %c0_2] : memref<16x16xf32, #tpu.memory_space<vmem>>, vector<16x16xf32>
    %7 = arith.addf %5, %4 : vector<16x16xf32>
    %cst = arith.constant dense<0.000000e+00> : vector<16xf32>
    %8 = vector.multi_reduction <add>, %7, %cst [1] : vector<16x16xf32> to vector<16xf32>
    %9 = vector.shape_cast %8 : vector<16xf32> to vector<16x1xf32>
    %cst_3 = arith.constant 0.000000e+00 : f32
    %10 = vector.broadcast %cst_3 : f32 to vector<16x1xf32>
    %11 = arith.cmpf ogt, %9, %10 : vector<16x1xf32>
    %12 = math.rsqrt %9 : vector<16x1xf32>
    %cst_4 = arith.constant 0.000000e+00 : f32
    %13 = vector.broadcast %cst_4 : f32 to vector<16x1xf32>
    %14 = arith.select %11, %12, %13 : vector<16x1xi1>, vector<16x1xf32>
    %15 = vector.broadcast %14 : vector<16x1xf32> to vector<16x16xf32>
    %16 = arith.mulf %4, %15 : vector<16x16xf32>
    %cst_5 = arith.constant dense<0.000000e+00> : vector<16x16xf32>
    %17 = tpu.matmul %16, %7, %cst_5 {dimension_numbers = #tpu.dot_dimension_numbers<[1], [0], [0], [1], [0, 0, 1, 1], [], []>} : vector<16x16xf32>, vector<16x16xf32>, vector<16x16xf32> -> vector<16x16xf32>
    %cst_6 = arith.constant dense<0.000000e+00> : vector<16x16xf32>
    %18 = tpu.matmul %17, %16, %cst_6 {dimension_numbers = #tpu.dot_dimension_numbers<[1], [0], [0], [1], [0, 0, 1, 1], [], []>} : vector<16x16xf32>, vector<16x16xf32>, vector<16x16xf32> -> vector<16x16xf32>
    %cst_7 = arith.constant dense<0.000000e+00> : vector<16xf32>
    %19 = vector.multi_reduction <add>, %5, %cst_7 [1] : vector<16x16xf32> to vector<16xf32>
    %20 = vector.shape_cast %19 : vector<16xf32> to vector<16x1xf32>
    %cst_8 = arith.constant 0.000000e+00 : f32
    %21 = vector.broadcast %cst_8 : f32 to vector<16x1xf32>
    %22 = arith.cmpf ogt, %20, %21 : vector<16x1xf32>
    %cst_9 = arith.constant 1.000000e+00 : f32
    %23 = vector.broadcast %cst_9 : f32 to vector<16x1xf32>
    %24 = arith.divf %23, %20 : vector<16x1xf32>
    %cst_10 = arith.constant 0.000000e+00 : f32
    %25 = vector.broadcast %cst_10 : f32 to vector<16x1xf32>
    %26 = arith.select %22, %24, %25 : vector<16x1xi1>, vector<16x1xf32>
    %27 = vector.broadcast %26 : vector<16x1xf32> to vector<16x16xf32>
    %28 = arith.mulf %5, %27 : vector<16x16xf32>
    %29 = arith.addf %6, %4 : vector<16x16xf32>
    %cst_11 = arith.constant dense<0.000000e+00> : vector<16xf32>
    %30 = vector.multi_reduction <add>, %29, %cst_11 [1] : vector<16x16xf32> to vector<16xf32>
    %31 = vector.shape_cast %30 : vector<16xf32> to vector<16x1xf32>
    %cst_12 = arith.constant 0.000000e+00 : f32
    %32 = vector.broadcast %cst_12 : f32 to vector<16x1xf32>
    %33 = arith.cmpf ogt, %31, %32 : vector<16x1xf32>
    %34 = math.rsqrt %31 : vector<16x1xf32>
    %cst_13 = arith.constant 0.000000e+00 : f32
    %35 = vector.broadcast %cst_13 : f32 to vector<16x1xf32>
    %36 = arith.select %33, %34, %35 : vector<16x1xi1>, vector<16x1xf32>
    %37 = vector.broadcast %36 : vector<16x1xf32> to vector<16x16xf32>
    %38 = arith.mulf %4, %37 : vector<16x16xf32>
    %cst_14 = arith.constant dense<0.000000e+00> : vector<16x16xf32>
    %39 = tpu.matmul %38, %29, %cst_14 {dimension_numbers = #tpu.dot_dimension_numbers<[1], [0], [0], [1], [0, 0, 1, 1], [], []>} : vector<16x16xf32>, vector<16x16xf32>, vector<16x16xf32> -> vector<16x16xf32>
    %cst_15 = arith.constant dense<0.000000e+00> : vector<16x16xf32>
    %40 = tpu.matmul %39, %38, %cst_15 {dimension_numbers = #tpu.dot_dimension_numbers<[1], [0], [0], [1], [0, 0, 1, 1], [], []>} : vector<16x16xf32>, vector<16x16xf32>, vector<16x16xf32> -> vector<16x16xf32>
    %cst_16 = arith.constant dense<0.000000e+00> : vector<16xf32>
    %41 = vector.multi_reduction <add>, %6, %cst_16 [1] : vector<16x16xf32> to vector<16xf32>
    %42 = vector.shape_cast %41 : vector<16xf32> to vector<16x1xf32>
    %cst_17 = arith.constant 0.000000e+00 : f32
    %43 = vector.broadcast %cst_17 : f32 to vector<16x1xf32>
    %44 = arith.cmpf ogt, %42, %43 : vector<16x1xf32>
    %cst_18 = arith.constant 1.000000e+00 : f32
    %45 = vector.broadcast %cst_18 : f32 to vector<16x1xf32>
    %46 = arith.divf %45, %42 : vector<16x1xf32>
    %cst_19 = arith.constant 0.000000e+00 : f32
    %47 = vector.broadcast %cst_19 : f32 to vector<16x1xf32>
    %48 = arith.select %44, %46, %47 : vector<16x1xi1>, vector<16x1xf32>
    %49 = vector.broadcast %48 : vector<16x1xf32> to vector<16x16xf32>
    %50 = arith.mulf %6, %49 : vector<16x16xf32>
    %c0_20 = arith.constant 0 : index
    %c0_21 = arith.constant 0 : index
    %51 = vector.load %arg2[%c0_20, %c0_21] : memref<16x8xf32, #tpu.memory_space<vmem>>, vector<16x8xf32>
    %c0_22 = arith.constant 0 : index
    %c0_23 = arith.constant 0 : index
    %52 = vector.load %arg4[%c0_22, %c0_23] : memref<8x32xf32, #tpu.memory_space<vmem>>, vector<8x32xf32>
    %cst_24 = arith.constant dense<0.000000e+00> : vector<16x32xf32>
    %53 = tpu.matmul %51, %52, %cst_24 {dimension_numbers = #tpu.dot_dimension_numbers<[1], [0], [0], [1], [0, 0, 1, 1], [], []>} : vector<16x8xf32>, vector<8x32xf32>, vector<16x32xf32> -> vector<16x32xf32>
    %cst_25 = arith.constant dense<0.000000e+00> : vector<16x32xf32>
    %54 = tpu.matmul %18, %53, %cst_25 {dimension_numbers = #tpu.dot_dimension_numbers<[1], [0], [0], [1], [0, 0, 1, 1], [], []>} : vector<16x16xf32>, vector<16x32xf32>, vector<16x32xf32> -> vector<16x32xf32>
    %c0_26 = arith.constant 0 : index
    %c0_27 = arith.constant 0 : index
    %55 = vector.load %arg5[%c0_26, %c0_27] : memref<1x32xf32, #tpu.memory_space<vmem>>, vector<1x32xf32>
    %56 = vector.broadcast %55 : vector<1x32xf32> to vector<16x32xf32>
    %57 = arith.addf %54, %56 : vector<16x32xf32>
    %c0_28 = arith.constant 0 : index
    %c0_29 = arith.constant 0 : index
    %58 = vector.load %arg3[%c0_28, %c0_29] : memref<16x12xf32, #tpu.memory_space<vmem>>, vector<16x12xf32>
    %c0_30 = arith.constant 0 : index
    %c0_31 = arith.constant 0 : index
    %59 = vector.load %arg6[%c0_30, %c0_31] : memref<12x32xf32, #tpu.memory_space<vmem>>, vector<12x32xf32>
    %cst_32 = arith.constant dense<0.000000e+00> : vector<16x32xf32>
    %60 = tpu.matmul %58, %59, %cst_32 {dimension_numbers = #tpu.dot_dimension_numbers<[1], [0], [0], [1], [0, 0, 1, 1], [], []>} : vector<16x12xf32>, vector<12x32xf32>, vector<16x32xf32> -> vector<16x32xf32>
    %cst_33 = arith.constant dense<0.000000e+00> : vector<16x32xf32>
    %61 = tpu.matmul %40, %60, %cst_33 {dimension_numbers = #tpu.dot_dimension_numbers<[1], [0], [0], [1], [0, 0, 1, 1], [], []>} : vector<16x16xf32>, vector<16x32xf32>, vector<16x32xf32> -> vector<16x32xf32>
    %c0_34 = arith.constant 0 : index
    %c0_35 = arith.constant 0 : index
    %62 = vector.load %arg7[%c0_34, %c0_35] : memref<1x32xf32, #tpu.memory_space<vmem>>, vector<1x32xf32>
    %63 = vector.broadcast %62 : vector<1x32xf32> to vector<16x32xf32>
    %64 = arith.addf %61, %63 : vector<16x32xf32>
    %cst_36 = arith.constant 0.000000e+00 : f32
    %65 = vector.broadcast %cst_36 : f32 to vector<16x32xf32>
    %66 = arith.maximumf %64, %65 : vector<16x32xf32>
    %cst_37 = arith.constant 0.000000e+00 : f32
    %67 = vector.broadcast %cst_37 : f32 to vector<16x32xf32>
    %68 = arith.maximumf %57, %67 : vector<16x32xf32>
    %69 = arith.addf %68, %66 : vector<16x32xf32>
    %c0_38 = arith.constant 0 : index
    %c0_39 = arith.constant 0 : index
    %70 = vector.load %arg8[%c0_38, %c0_39] : memref<32x16xf32, #tpu.memory_space<vmem>>, vector<32x16xf32>
    %c0_40 = arith.constant 0 : index
    %c0_41 = arith.constant 0 : index
    %71 = vector.load %arg9[%c0_40, %c0_41] : memref<32x16xf32, #tpu.memory_space<vmem>>, vector<32x16xf32>
    %c0_42 = arith.constant 0 : index
    %c0_43 = arith.constant 0 : index
    %72 = vector.load %arg10[%c0_42, %c0_43] : memref<1x16xf32, #tpu.memory_space<vmem>>, vector<1x16xf32>
    %cst_44 = arith.constant dense<0.000000e+00> : vector<16x32xf32>
    %73 = tpu.matmul %28, %69, %cst_44 {dimension_numbers = #tpu.dot_dimension_numbers<[1], [0], [0], [1], [0, 0, 1, 1], [], []>} : vector<16x16xf32>, vector<16x32xf32>, vector<16x32xf32> -> vector<16x32xf32>
    %cst_45 = arith.constant dense<0.000000e+00> : vector<16x16xf32>
    %74 = tpu.matmul %73, %70, %cst_45 {dimension_numbers = #tpu.dot_dimension_numbers<[1], [0], [0], [1], [0, 0, 1, 1], [], []>} : vector<16x32xf32>, vector<32x16xf32>, vector<16x16xf32> -> vector<16x16xf32>
    %cst_46 = arith.constant dense<0.000000e+00> : vector<16x16xf32>
    %75 = tpu.matmul %69, %71, %cst_46 {dimension_numbers = #tpu.dot_dimension_numbers<[1], [0], [0], [1], [0, 0, 1, 1], [], []>} : vector<16x32xf32>, vector<32x16xf32>, vector<16x16xf32> -> vector<16x16xf32>
    %76 = arith.addf %74, %75 : vector<16x16xf32>
    %77 = vector.broadcast %72 : vector<1x16xf32> to vector<16x16xf32>
    %78 = arith.addf %76, %77 : vector<16x16xf32>
    %cst_47 = arith.constant 0.000000e+00 : f32
    %79 = vector.broadcast %cst_47 : f32 to vector<16x16xf32>
    %80 = arith.maximumf %78, %79 : vector<16x16xf32>
    %c0_48 = arith.constant 0 : index
    %c0_49 = arith.constant 0 : index
    %81 = vector.load %arg14[%c0_48, %c0_49] : memref<16x16xf32, #tpu.memory_space<vmem>>, vector<16x16xf32>
    %cst_50 = arith.constant -3.000000e+01 : f32
    %82 = vector.broadcast %cst_50 : f32 to vector<16x16xf32>
    %83 = arith.maximumf %80, %82 : vector<16x16xf32>
    %cst_51 = arith.constant 0.000000e+00 : f32
    %84 = vector.broadcast %cst_51 : f32 to vector<16x16xf32>
    %85 = arith.subf %84, %83 : vector<16x16xf32>
    %86 = math.exp %85 : vector<16x16xf32>
    %cst_52 = arith.constant 1.000000e+00 : f32
    %87 = vector.broadcast %cst_52 : f32 to vector<16x16xf32>
    %88 = arith.addf %87, %86 : vector<16x16xf32>
    %89 = tpu.reciprocal %88 {approx = true} : vector<16x16xf32> -> vector<16x16xf32>
    %90 = arith.mulf %80, %89 : vector<16x16xf32>
    %cst_53 = arith.constant dense<0.000000e+00> : vector<16x16xf32>
    %91 = tpu.matmul %90, %81, %cst_53 {dimension_numbers = #tpu.dot_dimension_numbers<[1], [0], [0], [1], [0, 0, 1, 1], [], []>} : vector<16x16xf32>, vector<16x16xf32>, vector<16x16xf32> -> vector<16x16xf32>
    %cst_54 = arith.constant -2.200000e+00 : f32
    %92 = vector.broadcast %cst_54 : f32 to vector<16x16xf32>
    %93 = arith.cmpf oge, %80, %92 : vector<16x16xf32>
    %cst_55 = arith.constant -1.800000e+00 : f32
    %94 = vector.broadcast %cst_55 : f32 to vector<16x16xf32>
    %95 = arith.cmpf olt, %80, %94 : vector<16x16xf32>
    %96 = arith.andi %93, %95 : vector<16x16xi1>
    %cst_56 = arith.constant 1.000000e+00 : f32
    %cst_57 = arith.constant 0.000000e+00 : f32
    %97 = vector.broadcast %cst_56 : f32 to vector<16x16xf32>
    %98 = vector.broadcast %cst_57 : f32 to vector<16x16xf32>
    %99 = arith.select %96, %97, %98 : vector<16x16xi1>, vector<16x16xf32>
    %cst_58 = arith.constant -1.800000e+00 : f32
    %100 = vector.broadcast %cst_58 : f32 to vector<16x16xf32>
    %101 = arith.cmpf oge, %80, %100 : vector<16x16xf32>
    %cst_59 = arith.constant -1.400000e+00 : f32
    %102 = vector.broadcast %cst_59 : f32 to vector<16x16xf32>
    %103 = arith.cmpf olt, %80, %102 : vector<16x16xf32>
    %104 = arith.andi %101, %103 : vector<16x16xi1>
    %cst_60 = arith.constant 1.000000e+00 : f32
    %cst_61 = arith.constant 0.000000e+00 : f32
    %105 = vector.broadcast %cst_60 : f32 to vector<16x16xf32>
    %106 = vector.broadcast %cst_61 : f32 to vector<16x16xf32>
    %107 = arith.select %104, %105, %106 : vector<16x16xi1>, vector<16x16xf32>
    %cst_62 = arith.constant -1.400000e+00 : f32
    %108 = vector.broadcast %cst_62 : f32 to vector<16x16xf32>
    %109 = arith.cmpf oge, %80, %108 : vector<16x16xf32>
    %cst_63 = arith.constant -1.000000e+00 : f32
    %110 = vector.broadcast %cst_63 : f32 to vector<16x16xf32>
    %111 = arith.cmpf olt, %80, %110 : vector<16x16xf32>
    %112 = arith.andi %109, %111 : vector<16x16xi1>
    %cst_64 = arith.constant 1.000000e+00 : f32
    %cst_65 = arith.constant 0.000000e+00 : f32
    %113 = vector.broadcast %cst_64 : f32 to vector<16x16xf32>
    %114 = vector.broadcast %cst_65 : f32 to vector<16x16xf32>
    %115 = arith.select %112, %113, %114 : vector<16x16xi1>, vector<16x16xf32>
    %cst_66 = arith.constant -1.000000e+00 : f32
    %116 = vector.broadcast %cst_66 : f32 to vector<16x16xf32>
    %117 = arith.cmpf oge, %80, %116 : vector<16x16xf32>
    %cst_67 = arith.constant -6.000000e-01 : f32
    %118 = vector.broadcast %cst_67 : f32 to vector<16x16xf32>
    %119 = arith.cmpf olt, %80, %118 : vector<16x16xf32>
    %120 = arith.andi %117, %119 : vector<16x16xi1>
    %cst_68 = arith.constant 1.000000e+00 : f32
    %cst_69 = arith.constant 0.000000e+00 : f32
    %121 = vector.broadcast %cst_68 : f32 to vector<16x16xf32>
    %122 = vector.broadcast %cst_69 : f32 to vector<16x16xf32>
    %123 = arith.select %120, %121, %122 : vector<16x16xi1>, vector<16x16xf32>
    %cst_70 = arith.constant -6.000000e-01 : f32
    %124 = vector.broadcast %cst_70 : f32 to vector<16x16xf32>
    %125 = arith.cmpf oge, %80, %124 : vector<16x16xf32>
    %cst_71 = arith.constant -2.000000e-01 : f32
    %126 = vector.broadcast %cst_71 : f32 to vector<16x16xf32>
    %127 = arith.cmpf olt, %80, %126 : vector<16x16xf32>
    %128 = arith.andi %125, %127 : vector<16x16xi1>
    %cst_72 = arith.constant 1.000000e+00 : f32
    %cst_73 = arith.constant 0.000000e+00 : f32
    %129 = vector.broadcast %cst_72 : f32 to vector<16x16xf32>
    %130 = vector.broadcast %cst_73 : f32 to vector<16x16xf32>
    %131 = arith.select %128, %129, %130 : vector<16x16xi1>, vector<16x16xf32>
    %cst_74 = arith.constant -2.000000e-01 : f32
    %132 = vector.broadcast %cst_74 : f32 to vector<16x16xf32>
    %133 = arith.cmpf oge, %80, %132 : vector<16x16xf32>
    %cst_75 = arith.constant 2.000000e-01 : f32
    %134 = vector.broadcast %cst_75 : f32 to vector<16x16xf32>
    %135 = arith.cmpf olt, %80, %134 : vector<16x16xf32>
    %136 = arith.andi %133, %135 : vector<16x16xi1>
    %cst_76 = arith.constant 1.000000e+00 : f32
    %cst_77 = arith.constant 0.000000e+00 : f32
    %137 = vector.broadcast %cst_76 : f32 to vector<16x16xf32>
    %138 = vector.broadcast %cst_77 : f32 to vector<16x16xf32>
    %139 = arith.select %136, %137, %138 : vector<16x16xi1>, vector<16x16xf32>
    %cst_78 = arith.constant 2.000000e-01 : f32
    %140 = vector.broadcast %cst_78 : f32 to vector<16x16xf32>
    %141 = arith.cmpf oge, %80, %140 : vector<16x16xf32>
    %cst_79 = arith.constant 6.000000e-01 : f32
    %142 = vector.broadcast %cst_79 : f32 to vector<16x16xf32>
    %143 = arith.cmpf olt, %80, %142 : vector<16x16xf32>
    %144 = arith.andi %141, %143 : vector<16x16xi1>
    %cst_80 = arith.constant 1.000000e+00 : f32
    %cst_81 = arith.constant 0.000000e+00 : f32
    %145 = vector.broadcast %cst_80 : f32 to vector<16x16xf32>
    %146 = vector.broadcast %cst_81 : f32 to vector<16x16xf32>
    %147 = arith.select %144, %145, %146 : vector<16x16xi1>, vector<16x16xf32>
    %cst_82 = arith.constant 6.000000e-01 : f32
    %148 = vector.broadcast %cst_82 : f32 to vector<16x16xf32>
    %149 = arith.cmpf oge, %80, %148 : vector<16x16xf32>
    %cst_83 = arith.constant 1.000000e+00 : f32
    %150 = vector.broadcast %cst_83 : f32 to vector<16x16xf32>
    %151 = arith.cmpf olt, %80, %150 : vector<16x16xf32>
    %152 = arith.andi %149, %151 : vector<16x16xi1>
    %cst_84 = arith.constant 1.000000e+00 : f32
    %cst_85 = arith.constant 0.000000e+00 : f32
    %153 = vector.broadcast %cst_84 : f32 to vector<16x16xf32>
    %154 = vector.broadcast %cst_85 : f32 to vector<16x16xf32>
    %155 = arith.select %152, %153, %154 : vector<16x16xi1>, vector<16x16xf32>
    %cst_86 = arith.constant 1.000000e+00 : f32
    %156 = vector.broadcast %cst_86 : f32 to vector<16x16xf32>
    %157 = arith.cmpf oge, %80, %156 : vector<16x16xf32>
    %cst_87 = arith.constant 1.400000e+00 : f32
    %158 = vector.broadcast %cst_87 : f32 to vector<16x16xf32>
    %159 = arith.cmpf olt, %80, %158 : vector<16x16xf32>
    %160 = arith.andi %157, %159 : vector<16x16xi1>
    %cst_88 = arith.constant 1.000000e+00 : f32
    %cst_89 = arith.constant 0.000000e+00 : f32
    %161 = vector.broadcast %cst_88 : f32 to vector<16x16xf32>
    %162 = vector.broadcast %cst_89 : f32 to vector<16x16xf32>
    %163 = arith.select %160, %161, %162 : vector<16x16xi1>, vector<16x16xf32>
    %cst_90 = arith.constant 1.400000e+00 : f32
    %164 = vector.broadcast %cst_90 : f32 to vector<16x16xf32>
    %165 = arith.cmpf oge, %80, %164 : vector<16x16xf32>
    %cst_91 = arith.constant 1.800000e+00 : f32
    %166 = vector.broadcast %cst_91 : f32 to vector<16x16xf32>
    %167 = arith.cmpf olt, %80, %166 : vector<16x16xf32>
    %168 = arith.andi %165, %167 : vector<16x16xi1>
    %cst_92 = arith.constant 1.000000e+00 : f32
    %cst_93 = arith.constant 0.000000e+00 : f32
    %169 = vector.broadcast %cst_92 : f32 to vector<16x16xf32>
    %170 = vector.broadcast %cst_93 : f32 to vector<16x16xf32>
    %171 = arith.select %168, %169, %170 : vector<16x16xi1>, vector<16x16xf32>
    %cst_94 = arith.constant 1.800000e+00 : f32
    %172 = vector.broadcast %cst_94 : f32 to vector<16x16xf32>
    %173 = arith.cmpf oge, %80, %172 : vector<16x16xf32>
    %cst_95 = arith.constant 2.200000e+00 : f32
    %174 = vector.broadcast %cst_95 : f32 to vector<16x16xf32>
    %175 = arith.cmpf olt, %80, %174 : vector<16x16xf32>
    %176 = arith.andi %173, %175 : vector<16x16xi1>
    %cst_96 = arith.constant 1.000000e+00 : f32
    %cst_97 = arith.constant 0.000000e+00 : f32
    %177 = vector.broadcast %cst_96 : f32 to vector<16x16xf32>
    %178 = vector.broadcast %cst_97 : f32 to vector<16x16xf32>
    %179 = arith.select %176, %177, %178 : vector<16x16xi1>, vector<16x16xf32>
    %cst_98 = arith.constant -2.200000e+00 : f32
    %180 = vector.broadcast %cst_98 : f32 to vector<16x16xf32>
    %181 = arith.subf %80, %180 : vector<16x16xf32>
    %cst_99 = arith.constant 2.500000e+00 : f32
    %182 = vector.broadcast %cst_99 : f32 to vector<16x16xf32>
    %183 = arith.mulf %181, %182 : vector<16x16xf32>
    %184 = arith.mulf %183, %99 : vector<16x16xf32>
    %cst_100 = arith.constant -1.400000e+00 : f32
    %185 = vector.broadcast %cst_100 : f32 to vector<16x16xf32>
    %186 = arith.subf %185, %80 : vector<16x16xf32>
    %cst_101 = arith.constant 2.500000e+00 : f32
    %187 = vector.broadcast %cst_101 : f32 to vector<16x16xf32>
    %188 = arith.mulf %186, %187 : vector<16x16xf32>
    %189 = arith.mulf %188, %107 : vector<16x16xf32>
    %190 = arith.addf %184, %189 : vector<16x16xf32>
    %cst_102 = arith.constant -1.800000e+00 : f32
    %191 = vector.broadcast %cst_102 : f32 to vector<16x16xf32>
    %192 = arith.subf %80, %191 : vector<16x16xf32>
    %cst_103 = arith.constant 2.500000e+00 : f32
    %193 = vector.broadcast %cst_103 : f32 to vector<16x16xf32>
    %194 = arith.mulf %192, %193 : vector<16x16xf32>
    %195 = arith.mulf %194, %107 : vector<16x16xf32>
    %cst_104 = arith.constant -1.000000e+00 : f32
    %196 = vector.broadcast %cst_104 : f32 to vector<16x16xf32>
    %197 = arith.subf %196, %80 : vector<16x16xf32>
    %cst_105 = arith.constant 2.500000e+00 : f32
    %198 = vector.broadcast %cst_105 : f32 to vector<16x16xf32>
    %199 = arith.mulf %197, %198 : vector<16x16xf32>
    %200 = arith.mulf %199, %115 : vector<16x16xf32>
    %201 = arith.addf %195, %200 : vector<16x16xf32>
    %cst_106 = arith.constant -1.400000e+00 : f32
    %202 = vector.broadcast %cst_106 : f32 to vector<16x16xf32>
    %203 = arith.subf %80, %202 : vector<16x16xf32>
    %cst_107 = arith.constant 2.500000e+00 : f32
    %204 = vector.broadcast %cst_107 : f32 to vector<16x16xf32>
    %205 = arith.mulf %203, %204 : vector<16x16xf32>
    %206 = arith.mulf %205, %115 : vector<16x16xf32>
    %cst_108 = arith.constant -6.000000e-01 : f32
    %207 = vector.broadcast %cst_108 : f32 to vector<16x16xf32>
    %208 = arith.subf %207, %80 : vector<16x16xf32>
    %cst_109 = arith.constant 2.500000e+00 : f32
    %209 = vector.broadcast %cst_109 : f32 to vector<16x16xf32>
    %210 = arith.mulf %208, %209 : vector<16x16xf32>
    %211 = arith.mulf %210, %123 : vector<16x16xf32>
    %212 = arith.addf %206, %211 : vector<16x16xf32>
    %cst_110 = arith.constant -1.000000e+00 : f32
    %213 = vector.broadcast %cst_110 : f32 to vector<16x16xf32>
    %214 = arith.subf %80, %213 : vector<16x16xf32>
    %cst_111 = arith.constant 2.500000e+00 : f32
    %215 = vector.broadcast %cst_111 : f32 to vector<16x16xf32>
    %216 = arith.mulf %214, %215 : vector<16x16xf32>
    %217 = arith.mulf %216, %123 : vector<16x16xf32>
    %cst_112 = arith.constant -2.000000e-01 : f32
    %218 = vector.broadcast %cst_112 : f32 to vector<16x16xf32>
    %219 = arith.subf %218, %80 : vector<16x16xf32>
    %cst_113 = arith.constant 2.500000e+00 : f32
    %220 = vector.broadcast %cst_113 : f32 to vector<16x16xf32>
    %221 = arith.mulf %219, %220 : vector<16x16xf32>
    %222 = arith.mulf %221, %131 : vector<16x16xf32>
    %223 = arith.addf %217, %222 : vector<16x16xf32>
    %cst_114 = arith.constant -6.000000e-01 : f32
    %224 = vector.broadcast %cst_114 : f32 to vector<16x16xf32>
    %225 = arith.subf %80, %224 : vector<16x16xf32>
    %cst_115 = arith.constant 2.500000e+00 : f32
    %226 = vector.broadcast %cst_115 : f32 to vector<16x16xf32>
    %227 = arith.mulf %225, %226 : vector<16x16xf32>
    %228 = arith.mulf %227, %131 : vector<16x16xf32>
    %cst_116 = arith.constant 2.000000e-01 : f32
    %229 = vector.broadcast %cst_116 : f32 to vector<16x16xf32>
    %230 = arith.subf %229, %80 : vector<16x16xf32>
    %cst_117 = arith.constant 2.500000e+00 : f32
    %231 = vector.broadcast %cst_117 : f32 to vector<16x16xf32>
    %232 = arith.mulf %230, %231 : vector<16x16xf32>
    %233 = arith.mulf %232, %139 : vector<16x16xf32>
    %234 = arith.addf %228, %233 : vector<16x16xf32>
    %cst_118 = arith.constant -2.000000e-01 : f32
    %235 = vector.broadcast %cst_118 : f32 to vector<16x16xf32>
    %236 = arith.subf %80, %235 : vector<16x16xf32>
    %cst_119 = arith.constant 2.500000e+00 : f32
    %237 = vector.broadcast %cst_119 : f32 to vector<16x16xf32>
    %238 = arith.mulf %236, %237 : vector<16x16xf32>
    %239 = arith.mulf %238, %139 : vector<16x16xf32>
    %cst_120 = arith.constant 6.000000e-01 : f32
    %240 = vector.broadcast %cst_120 : f32 to vector<16x16xf32>
    %241 = arith.subf %240, %80 : vector<16x16xf32>
    %cst_121 = arith.constant 2.500000e+00 : f32
    %242 = vector.broadcast %cst_121 : f32 to vector<16x16xf32>
    %243 = arith.mulf %241, %242 : vector<16x16xf32>
    %244 = arith.mulf %243, %147 : vector<16x16xf32>
    %245 = arith.addf %239, %244 : vector<16x16xf32>
    %cst_122 = arith.constant 2.000000e-01 : f32
    %246 = vector.broadcast %cst_122 : f32 to vector<16x16xf32>
    %247 = arith.subf %80, %246 : vector<16x16xf32>
    %cst_123 = arith.constant 2.500000e+00 : f32
    %248 = vector.broadcast %cst_123 : f32 to vector<16x16xf32>
    %249 = arith.mulf %247, %248 : vector<16x16xf32>
    %250 = arith.mulf %249, %147 : vector<16x16xf32>
    %cst_124 = arith.constant 1.000000e+00 : f32
    %251 = vector.broadcast %cst_124 : f32 to vector<16x16xf32>
    %252 = arith.subf %251, %80 : vector<16x16xf32>
    %cst_125 = arith.constant 2.500000e+00 : f32
    %253 = vector.broadcast %cst_125 : f32 to vector<16x16xf32>
    %254 = arith.mulf %252, %253 : vector<16x16xf32>
    %255 = arith.mulf %254, %155 : vector<16x16xf32>
    %256 = arith.addf %250, %255 : vector<16x16xf32>
    %cst_126 = arith.constant 6.000000e-01 : f32
    %257 = vector.broadcast %cst_126 : f32 to vector<16x16xf32>
    %258 = arith.subf %80, %257 : vector<16x16xf32>
    %cst_127 = arith.constant 2.500000e+00 : f32
    %259 = vector.broadcast %cst_127 : f32 to vector<16x16xf32>
    %260 = arith.mulf %258, %259 : vector<16x16xf32>
    %261 = arith.mulf %260, %155 : vector<16x16xf32>
    %cst_128 = arith.constant 1.400000e+00 : f32
    %262 = vector.broadcast %cst_128 : f32 to vector<16x16xf32>
    %263 = arith.subf %262, %80 : vector<16x16xf32>
    %cst_129 = arith.constant 2.500000e+00 : f32
    %264 = vector.broadcast %cst_129 : f32 to vector<16x16xf32>
    %265 = arith.mulf %263, %264 : vector<16x16xf32>
    %266 = arith.mulf %265, %163 : vector<16x16xf32>
    %267 = arith.addf %261, %266 : vector<16x16xf32>
    %cst_130 = arith.constant 1.000000e+00 : f32
    %268 = vector.broadcast %cst_130 : f32 to vector<16x16xf32>
    %269 = arith.subf %80, %268 : vector<16x16xf32>
    %cst_131 = arith.constant 2.500000e+00 : f32
    %270 = vector.broadcast %cst_131 : f32 to vector<16x16xf32>
    %271 = arith.mulf %269, %270 : vector<16x16xf32>
    %272 = arith.mulf %271, %163 : vector<16x16xf32>
    %cst_132 = arith.constant 1.800000e+00 : f32
    %273 = vector.broadcast %cst_132 : f32 to vector<16x16xf32>
    %274 = arith.subf %273, %80 : vector<16x16xf32>
    %cst_133 = arith.constant 2.500000e+00 : f32
    %275 = vector.broadcast %cst_133 : f32 to vector<16x16xf32>
    %276 = arith.mulf %274, %275 : vector<16x16xf32>
    %277 = arith.mulf %276, %171 : vector<16x16xf32>
    %278 = arith.addf %272, %277 : vector<16x16xf32>
    %cst_134 = arith.constant 1.400000e+00 : f32
    %279 = vector.broadcast %cst_134 : f32 to vector<16x16xf32>
    %280 = arith.subf %80, %279 : vector<16x16xf32>
    %cst_135 = arith.constant 2.500000e+00 : f32
    %281 = vector.broadcast %cst_135 : f32 to vector<16x16xf32>
    %282 = arith.mulf %280, %281 : vector<16x16xf32>
    %283 = arith.mulf %282, %171 : vector<16x16xf32>
    %cst_136 = arith.constant 2.200000e+00 : f32
    %284 = vector.broadcast %cst_136 : f32 to vector<16x16xf32>
    %285 = arith.subf %284, %80 : vector<16x16xf32>
    %cst_137 = arith.constant 2.500000e+00 : f32
    %286 = vector.broadcast %cst_137 : f32 to vector<16x16xf32>
    %287 = arith.mulf %285, %286 : vector<16x16xf32>
    %288 = arith.mulf %287, %179 : vector<16x16xf32>
    %289 = arith.addf %283, %288 : vector<16x16xf32>
    %cst_138 = arith.constant -2.200000e+00 : f32
    %290 = vector.broadcast %cst_138 : f32 to vector<16x16xf32>
    %291 = arith.subf %80, %290 : vector<16x16xf32>
    %cst_139 = arith.constant 1.250000e+00 : f32
    %292 = vector.broadcast %cst_139 : f32 to vector<16x16xf32>
    %293 = arith.mulf %291, %292 : vector<16x16xf32>
    %294 = arith.mulf %293, %190 : vector<16x16xf32>
    %cst_140 = arith.constant -1.000000e+00 : f32
    %295 = vector.broadcast %cst_140 : f32 to vector<16x16xf32>
    %296 = arith.subf %295, %80 : vector<16x16xf32>
    %cst_141 = arith.constant 1.250000e+00 : f32
    %297 = vector.broadcast %cst_141 : f32 to vector<16x16xf32>
    %298 = arith.mulf %296, %297 : vector<16x16xf32>
    %299 = arith.mulf %298, %201 : vector<16x16xf32>
    %300 = arith.addf %294, %299 : vector<16x16xf32>
    %cst_142 = arith.constant -1.800000e+00 : f32
    %301 = vector.broadcast %cst_142 : f32 to vector<16x16xf32>
    %302 = arith.subf %80, %301 : vector<16x16xf32>
    %cst_143 = arith.constant 1.250000e+00 : f32
    %303 = vector.broadcast %cst_143 : f32 to vector<16x16xf32>
    %304 = arith.mulf %302, %303 : vector<16x16xf32>
    %305 = arith.mulf %304, %201 : vector<16x16xf32>
    %cst_144 = arith.constant -6.000000e-01 : f32
    %306 = vector.broadcast %cst_144 : f32 to vector<16x16xf32>
    %307 = arith.subf %306, %80 : vector<16x16xf32>
    %cst_145 = arith.constant 1.250000e+00 : f32
    %308 = vector.broadcast %cst_145 : f32 to vector<16x16xf32>
    %309 = arith.mulf %307, %308 : vector<16x16xf32>
    %310 = arith.mulf %309, %212 : vector<16x16xf32>
    %311 = arith.addf %305, %310 : vector<16x16xf32>
    %cst_146 = arith.constant -1.400000e+00 : f32
    %312 = vector.broadcast %cst_146 : f32 to vector<16x16xf32>
    %313 = arith.subf %80, %312 : vector<16x16xf32>
    %cst_147 = arith.constant 1.250000e+00 : f32
    %314 = vector.broadcast %cst_147 : f32 to vector<16x16xf32>
    %315 = arith.mulf %313, %314 : vector<16x16xf32>
    %316 = arith.mulf %315, %212 : vector<16x16xf32>
    %cst_148 = arith.constant -2.000000e-01 : f32
    %317 = vector.broadcast %cst_148 : f32 to vector<16x16xf32>
    %318 = arith.subf %317, %80 : vector<16x16xf32>
    %cst_149 = arith.constant 1.250000e+00 : f32
    %319 = vector.broadcast %cst_149 : f32 to vector<16x16xf32>
    %320 = arith.mulf %318, %319 : vector<16x16xf32>
    %321 = arith.mulf %320, %223 : vector<16x16xf32>
    %322 = arith.addf %316, %321 : vector<16x16xf32>
    %cst_150 = arith.constant -1.000000e+00 : f32
    %323 = vector.broadcast %cst_150 : f32 to vector<16x16xf32>
    %324 = arith.subf %80, %323 : vector<16x16xf32>
    %cst_151 = arith.constant 1.250000e+00 : f32
    %325 = vector.broadcast %cst_151 : f32 to vector<16x16xf32>
    %326 = arith.mulf %324, %325 : vector<16x16xf32>
    %327 = arith.mulf %326, %223 : vector<16x16xf32>
    %cst_152 = arith.constant 2.000000e-01 : f32
    %328 = vector.broadcast %cst_152 : f32 to vector<16x16xf32>
    %329 = arith.subf %328, %80 : vector<16x16xf32>
    %cst_153 = arith.constant 1.250000e+00 : f32
    %330 = vector.broadcast %cst_153 : f32 to vector<16x16xf32>
    %331 = arith.mulf %329, %330 : vector<16x16xf32>
    %332 = arith.mulf %331, %234 : vector<16x16xf32>
    %333 = arith.addf %327, %332 : vector<16x16xf32>
    %cst_154 = arith.constant -6.000000e-01 : f32
    %334 = vector.broadcast %cst_154 : f32 to vector<16x16xf32>
    %335 = arith.subf %80, %334 : vector<16x16xf32>
    %cst_155 = arith.constant 1.250000e+00 : f32
    %336 = vector.broadcast %cst_155 : f32 to vector<16x16xf32>
    %337 = arith.mulf %335, %336 : vector<16x16xf32>
    %338 = arith.mulf %337, %234 : vector<16x16xf32>
    %cst_156 = arith.constant 6.000000e-01 : f32
    %339 = vector.broadcast %cst_156 : f32 to vector<16x16xf32>
    %340 = arith.subf %339, %80 : vector<16x16xf32>
    %cst_157 = arith.constant 1.250000e+00 : f32
    %341 = vector.broadcast %cst_157 : f32 to vector<16x16xf32>
    %342 = arith.mulf %340, %341 : vector<16x16xf32>
    %343 = arith.mulf %342, %245 : vector<16x16xf32>
    %344 = arith.addf %338, %343 : vector<16x16xf32>
    %cst_158 = arith.constant -2.000000e-01 : f32
    %345 = vector.broadcast %cst_158 : f32 to vector<16x16xf32>
    %346 = arith.subf %80, %345 : vector<16x16xf32>
    %cst_159 = arith.constant 1.250000e+00 : f32
    %347 = vector.broadcast %cst_159 : f32 to vector<16x16xf32>
    %348 = arith.mulf %346, %347 : vector<16x16xf32>
    %349 = arith.mulf %348, %245 : vector<16x16xf32>
    %cst_160 = arith.constant 1.000000e+00 : f32
    %350 = vector.broadcast %cst_160 : f32 to vector<16x16xf32>
    %351 = arith.subf %350, %80 : vector<16x16xf32>
    %cst_161 = arith.constant 1.250000e+00 : f32
    %352 = vector.broadcast %cst_161 : f32 to vector<16x16xf32>
    %353 = arith.mulf %351, %352 : vector<16x16xf32>
    %354 = arith.mulf %353, %256 : vector<16x16xf32>
    %355 = arith.addf %349, %354 : vector<16x16xf32>
    %cst_162 = arith.constant 2.000000e-01 : f32
    %356 = vector.broadcast %cst_162 : f32 to vector<16x16xf32>
    %357 = arith.subf %80, %356 : vector<16x16xf32>
    %cst_163 = arith.constant 1.250000e+00 : f32
    %358 = vector.broadcast %cst_163 : f32 to vector<16x16xf32>
    %359 = arith.mulf %357, %358 : vector<16x16xf32>
    %360 = arith.mulf %359, %256 : vector<16x16xf32>
    %cst_164 = arith.constant 1.400000e+00 : f32
    %361 = vector.broadcast %cst_164 : f32 to vector<16x16xf32>
    %362 = arith.subf %361, %80 : vector<16x16xf32>
    %cst_165 = arith.constant 1.250000e+00 : f32
    %363 = vector.broadcast %cst_165 : f32 to vector<16x16xf32>
    %364 = arith.mulf %362, %363 : vector<16x16xf32>
    %365 = arith.mulf %364, %267 : vector<16x16xf32>
    %366 = arith.addf %360, %365 : vector<16x16xf32>
    %cst_166 = arith.constant 6.000000e-01 : f32
    %367 = vector.broadcast %cst_166 : f32 to vector<16x16xf32>
    %368 = arith.subf %80, %367 : vector<16x16xf32>
    %cst_167 = arith.constant 1.250000e+00 : f32
    %369 = vector.broadcast %cst_167 : f32 to vector<16x16xf32>
    %370 = arith.mulf %368, %369 : vector<16x16xf32>
    %371 = arith.mulf %370, %267 : vector<16x16xf32>
    %cst_168 = arith.constant 1.800000e+00 : f32
    %372 = vector.broadcast %cst_168 : f32 to vector<16x16xf32>
    %373 = arith.subf %372, %80 : vector<16x16xf32>
    %cst_169 = arith.constant 1.250000e+00 : f32
    %374 = vector.broadcast %cst_169 : f32 to vector<16x16xf32>
    %375 = arith.mulf %373, %374 : vector<16x16xf32>
    %376 = arith.mulf %375, %278 : vector<16x16xf32>
    %377 = arith.addf %371, %376 : vector<16x16xf32>
    %cst_170 = arith.constant 1.000000e+00 : f32
    %378 = vector.broadcast %cst_170 : f32 to vector<16x16xf32>
    %379 = arith.subf %80, %378 : vector<16x16xf32>
    %cst_171 = arith.constant 1.250000e+00 : f32
    %380 = vector.broadcast %cst_171 : f32 to vector<16x16xf32>
    %381 = arith.mulf %379, %380 : vector<16x16xf32>
    %382 = arith.mulf %381, %278 : vector<16x16xf32>
    %cst_172 = arith.constant 2.200000e+00 : f32
    %383 = vector.broadcast %cst_172 : f32 to vector<16x16xf32>
    %384 = arith.subf %383, %80 : vector<16x16xf32>
    %cst_173 = arith.constant 1.250000e+00 : f32
    %385 = vector.broadcast %cst_173 : f32 to vector<16x16xf32>
    %386 = arith.mulf %384, %385 : vector<16x16xf32>
    %387 = arith.mulf %386, %289 : vector<16x16xf32>
    %388 = arith.addf %382, %387 : vector<16x16xf32>
    %cst_174 = arith.constant -2.200000e+00 : f32
    %389 = vector.broadcast %cst_174 : f32 to vector<16x16xf32>
    %390 = arith.subf %80, %389 : vector<16x16xf32>
    %cst_175 = arith.constant 0.833333313 : f32
    %391 = vector.broadcast %cst_175 : f32 to vector<16x16xf32>
    %392 = arith.mulf %390, %391 : vector<16x16xf32>
    %393 = arith.mulf %392, %300 : vector<16x16xf32>
    %cst_176 = arith.constant -6.000000e-01 : f32
    %394 = vector.broadcast %cst_176 : f32 to vector<16x16xf32>
    %395 = arith.subf %394, %80 : vector<16x16xf32>
    %cst_177 = arith.constant 0.833333313 : f32
    %396 = vector.broadcast %cst_177 : f32 to vector<16x16xf32>
    %397 = arith.mulf %395, %396 : vector<16x16xf32>
    %398 = arith.mulf %397, %311 : vector<16x16xf32>
    %399 = arith.addf %393, %398 : vector<16x16xf32>
    %cst_178 = arith.constant -1.800000e+00 : f32
    %400 = vector.broadcast %cst_178 : f32 to vector<16x16xf32>
    %401 = arith.subf %80, %400 : vector<16x16xf32>
    %cst_179 = arith.constant 0.833333313 : f32
    %402 = vector.broadcast %cst_179 : f32 to vector<16x16xf32>
    %403 = arith.mulf %401, %402 : vector<16x16xf32>
    %404 = arith.mulf %403, %311 : vector<16x16xf32>
    %cst_180 = arith.constant -2.000000e-01 : f32
    %405 = vector.broadcast %cst_180 : f32 to vector<16x16xf32>
    %406 = arith.subf %405, %80 : vector<16x16xf32>
    %cst_181 = arith.constant 0.833333313 : f32
    %407 = vector.broadcast %cst_181 : f32 to vector<16x16xf32>
    %408 = arith.mulf %406, %407 : vector<16x16xf32>
    %409 = arith.mulf %408, %322 : vector<16x16xf32>
    %410 = arith.addf %404, %409 : vector<16x16xf32>
    %cst_182 = arith.constant -1.400000e+00 : f32
    %411 = vector.broadcast %cst_182 : f32 to vector<16x16xf32>
    %412 = arith.subf %80, %411 : vector<16x16xf32>
    %cst_183 = arith.constant 0.833333313 : f32
    %413 = vector.broadcast %cst_183 : f32 to vector<16x16xf32>
    %414 = arith.mulf %412, %413 : vector<16x16xf32>
    %415 = arith.mulf %414, %322 : vector<16x16xf32>
    %cst_184 = arith.constant 2.000000e-01 : f32
    %416 = vector.broadcast %cst_184 : f32 to vector<16x16xf32>
    %417 = arith.subf %416, %80 : vector<16x16xf32>
    %cst_185 = arith.constant 0.833333313 : f32
    %418 = vector.broadcast %cst_185 : f32 to vector<16x16xf32>
    %419 = arith.mulf %417, %418 : vector<16x16xf32>
    %420 = arith.mulf %419, %333 : vector<16x16xf32>
    %421 = arith.addf %415, %420 : vector<16x16xf32>
    %cst_186 = arith.constant -1.000000e+00 : f32
    %422 = vector.broadcast %cst_186 : f32 to vector<16x16xf32>
    %423 = arith.subf %80, %422 : vector<16x16xf32>
    %cst_187 = arith.constant 0.833333313 : f32
    %424 = vector.broadcast %cst_187 : f32 to vector<16x16xf32>
    %425 = arith.mulf %423, %424 : vector<16x16xf32>
    %426 = arith.mulf %425, %333 : vector<16x16xf32>
    %cst_188 = arith.constant 6.000000e-01 : f32
    %427 = vector.broadcast %cst_188 : f32 to vector<16x16xf32>
    %428 = arith.subf %427, %80 : vector<16x16xf32>
    %cst_189 = arith.constant 0.833333313 : f32
    %429 = vector.broadcast %cst_189 : f32 to vector<16x16xf32>
    %430 = arith.mulf %428, %429 : vector<16x16xf32>
    %431 = arith.mulf %430, %344 : vector<16x16xf32>
    %432 = arith.addf %426, %431 : vector<16x16xf32>
    %cst_190 = arith.constant -6.000000e-01 : f32
    %433 = vector.broadcast %cst_190 : f32 to vector<16x16xf32>
    %434 = arith.subf %80, %433 : vector<16x16xf32>
    %cst_191 = arith.constant 0.833333313 : f32
    %435 = vector.broadcast %cst_191 : f32 to vector<16x16xf32>
    %436 = arith.mulf %434, %435 : vector<16x16xf32>
    %437 = arith.mulf %436, %344 : vector<16x16xf32>
    %cst_192 = arith.constant 1.000000e+00 : f32
    %438 = vector.broadcast %cst_192 : f32 to vector<16x16xf32>
    %439 = arith.subf %438, %80 : vector<16x16xf32>
    %cst_193 = arith.constant 0.833333313 : f32
    %440 = vector.broadcast %cst_193 : f32 to vector<16x16xf32>
    %441 = arith.mulf %439, %440 : vector<16x16xf32>
    %442 = arith.mulf %441, %355 : vector<16x16xf32>
    %443 = arith.addf %437, %442 : vector<16x16xf32>
    %cst_194 = arith.constant -2.000000e-01 : f32
    %444 = vector.broadcast %cst_194 : f32 to vector<16x16xf32>
    %445 = arith.subf %80, %444 : vector<16x16xf32>
    %cst_195 = arith.constant 0.833333313 : f32
    %446 = vector.broadcast %cst_195 : f32 to vector<16x16xf32>
    %447 = arith.mulf %445, %446 : vector<16x16xf32>
    %448 = arith.mulf %447, %355 : vector<16x16xf32>
    %cst_196 = arith.constant 1.400000e+00 : f32
    %449 = vector.broadcast %cst_196 : f32 to vector<16x16xf32>
    %450 = arith.subf %449, %80 : vector<16x16xf32>
    %cst_197 = arith.constant 0.833333313 : f32
    %451 = vector.broadcast %cst_197 : f32 to vector<16x16xf32>
    %452 = arith.mulf %450, %451 : vector<16x16xf32>
    %453 = arith.mulf %452, %366 : vector<16x16xf32>
    %454 = arith.addf %448, %453 : vector<16x16xf32>
    %cst_198 = arith.constant 2.000000e-01 : f32
    %455 = vector.broadcast %cst_198 : f32 to vector<16x16xf32>
    %456 = arith.subf %80, %455 : vector<16x16xf32>
    %cst_199 = arith.constant 0.833333313 : f32
    %457 = vector.broadcast %cst_199 : f32 to vector<16x16xf32>
    %458 = arith.mulf %456, %457 : vector<16x16xf32>
    %459 = arith.mulf %458, %366 : vector<16x16xf32>
    %cst_200 = arith.constant 1.800000e+00 : f32
    %460 = vector.broadcast %cst_200 : f32 to vector<16x16xf32>
    %461 = arith.subf %460, %80 : vector<16x16xf32>
    %cst_201 = arith.constant 0.833333313 : f32
    %462 = vector.broadcast %cst_201 : f32 to vector<16x16xf32>
    %463 = arith.mulf %461, %462 : vector<16x16xf32>
    %464 = arith.mulf %463, %377 : vector<16x16xf32>
    %465 = arith.addf %459, %464 : vector<16x16xf32>
    %cst_202 = arith.constant 6.000000e-01 : f32
    %466 = vector.broadcast %cst_202 : f32 to vector<16x16xf32>
    %467 = arith.subf %80, %466 : vector<16x16xf32>
    %cst_203 = arith.constant 0.833333313 : f32
    %468 = vector.broadcast %cst_203 : f32 to vector<16x16xf32>
    %469 = arith.mulf %467, %468 : vector<16x16xf32>
    %470 = arith.mulf %469, %377 : vector<16x16xf32>
    %cst_204 = arith.constant 2.200000e+00 : f32
    %471 = vector.broadcast %cst_204 : f32 to vector<16x16xf32>
    %472 = arith.subf %471, %80 : vector<16x16xf32>
    %cst_205 = arith.constant 0.833333313 : f32
    %473 = vector.broadcast %cst_205 : f32 to vector<16x16xf32>
    %474 = arith.mulf %472, %473 : vector<16x16xf32>
    %475 = arith.mulf %474, %388 : vector<16x16xf32>
    %476 = arith.addf %470, %475 : vector<16x16xf32>
    %c0_206 = arith.constant 0 : index
    %c0_207 = arith.constant 0 : index
    %c0_208 = arith.constant 0 : index
    %477 = vector.load %arg15[%c0_206, %c0_207, %c0_208] : memref<8x16x16xf32, #tpu.memory_space<vmem>>, vector<1x16x16xf32>
    %478 = vector.shape_cast %477 : vector<1x16x16xf32> to vector<16x16xf32>
    %cst_209 = arith.constant dense<0.000000e+00> : vector<16x16xf32>
    %479 = tpu.matmul %399, %478, %cst_209 {dimension_numbers = #tpu.dot_dimension_numbers<[1], [0], [0], [1], [0, 0, 1, 1], [], []>} : vector<16x16xf32>, vector<16x16xf32>, vector<16x16xf32> -> vector<16x16xf32>
    %480 = arith.addf %91, %479 : vector<16x16xf32>
    %c1 = arith.constant 1 : index
    %c0_210 = arith.constant 0 : index
    %c0_211 = arith.constant 0 : index
    %481 = vector.load %arg15[%c1, %c0_210, %c0_211] : memref<8x16x16xf32, #tpu.memory_space<vmem>>, vector<1x16x16xf32>
    %482 = vector.shape_cast %481 : vector<1x16x16xf32> to vector<16x16xf32>
    %cst_212 = arith.constant dense<0.000000e+00> : vector<16x16xf32>
    %483 = tpu.matmul %410, %482, %cst_212 {dimension_numbers = #tpu.dot_dimension_numbers<[1], [0], [0], [1], [0, 0, 1, 1], [], []>} : vector<16x16xf32>, vector<16x16xf32>, vector<16x16xf32> -> vector<16x16xf32>
    %484 = arith.addf %480, %483 : vector<16x16xf32>
    %c2 = arith.constant 2 : index
    %c0_213 = arith.constant 0 : index
    %c0_214 = arith.constant 0 : index
    %485 = vector.load %arg15[%c2, %c0_213, %c0_214] : memref<8x16x16xf32, #tpu.memory_space<vmem>>, vector<1x16x16xf32>
    %486 = vector.shape_cast %485 : vector<1x16x16xf32> to vector<16x16xf32>
    %cst_215 = arith.constant dense<0.000000e+00> : vector<16x16xf32>
    %487 = tpu.matmul %421, %486, %cst_215 {dimension_numbers = #tpu.dot_dimension_numbers<[1], [0], [0], [1], [0, 0, 1, 1], [], []>} : vector<16x16xf32>, vector<16x16xf32>, vector<16x16xf32> -> vector<16x16xf32>
    %488 = arith.addf %484, %487 : vector<16x16xf32>
    %c3 = arith.constant 3 : index
    %c0_216 = arith.constant 0 : index
    %c0_217 = arith.constant 0 : index
    %489 = vector.load %arg15[%c3, %c0_216, %c0_217] : memref<8x16x16xf32, #tpu.memory_space<vmem>>, vector<1x16x16xf32>
    %490 = vector.shape_cast %489 : vector<1x16x16xf32> to vector<16x16xf32>
    %cst_218 = arith.constant dense<0.000000e+00> : vector<16x16xf32>
    %491 = tpu.matmul %432, %490, %cst_218 {dimension_numbers = #tpu.dot_dimension_numbers<[1], [0], [0], [1], [0, 0, 1, 1], [], []>} : vector<16x16xf32>, vector<16x16xf32>, vector<16x16xf32> -> vector<16x16xf32>
    %492 = arith.addf %488, %491 : vector<16x16xf32>
    %c4 = arith.constant 4 : index
    %c0_219 = arith.constant 0 : index
    %c0_220 = arith.constant 0 : index
    %493 = vector.load %arg15[%c4, %c0_219, %c0_220] : memref<8x16x16xf32, #tpu.memory_space<vmem>>, vector<1x16x16xf32>
    %494 = vector.shape_cast %493 : vector<1x16x16xf32> to vector<16x16xf32>
    %cst_221 = arith.constant dense<0.000000e+00> : vector<16x16xf32>
    %495 = tpu.matmul %443, %494, %cst_221 {dimension_numbers = #tpu.dot_dimension_numbers<[1], [0], [0], [1], [0, 0, 1, 1], [], []>} : vector<16x16xf32>, vector<16x16xf32>, vector<16x16xf32> -> vector<16x16xf32>
    %496 = arith.addf %492, %495 : vector<16x16xf32>
    %c5 = arith.constant 5 : index
    %c0_222 = arith.constant 0 : index
    %c0_223 = arith.constant 0 : index
    %497 = vector.load %arg15[%c5, %c0_222, %c0_223] : memref<8x16x16xf32, #tpu.memory_space<vmem>>, vector<1x16x16xf32>
    %498 = vector.shape_cast %497 : vector<1x16x16xf32> to vector<16x16xf32>
    %cst_224 = arith.constant dense<0.000000e+00> : vector<16x16xf32>
    %499 = tpu.matmul %454, %498, %cst_224 {dimension_numbers = #tpu.dot_dimension_numbers<[1], [0], [0], [1], [0, 0, 1, 1], [], []>} : vector<16x16xf32>, vector<16x16xf32>, vector<16x16xf32> -> vector<16x16xf32>
    %500 = arith.addf %496, %499 : vector<16x16xf32>
    %c6 = arith.constant 6 : index
    %c0_225 = arith.constant 0 : index
    %c0_226 = arith.constant 0 : index
    %501 = vector.load %arg15[%c6, %c0_225, %c0_226] : memref<8x16x16xf32, #tpu.memory_space<vmem>>, vector<1x16x16xf32>
    %502 = vector.shape_cast %501 : vector<1x16x16xf32> to vector<16x16xf32>
    %cst_227 = arith.constant dense<0.000000e+00> : vector<16x16xf32>
    %503 = tpu.matmul %465, %502, %cst_227 {dimension_numbers = #tpu.dot_dimension_numbers<[1], [0], [0], [1], [0, 0, 1, 1], [], []>} : vector<16x16xf32>, vector<16x16xf32>, vector<16x16xf32> -> vector<16x16xf32>
    %504 = arith.addf %500, %503 : vector<16x16xf32>
    %c7 = arith.constant 7 : index
    %c0_228 = arith.constant 0 : index
    %c0_229 = arith.constant 0 : index
    %505 = vector.load %arg15[%c7, %c0_228, %c0_229] : memref<8x16x16xf32, #tpu.memory_space<vmem>>, vector<1x16x16xf32>
    %506 = vector.shape_cast %505 : vector<1x16x16xf32> to vector<16x16xf32>
    %cst_230 = arith.constant dense<0.000000e+00> : vector<16x16xf32>
    %507 = tpu.matmul %476, %506, %cst_230 {dimension_numbers = #tpu.dot_dimension_numbers<[1], [0], [0], [1], [0, 0, 1, 1], [], []>} : vector<16x16xf32>, vector<16x16xf32>, vector<16x16xf32> -> vector<16x16xf32>
    %508 = arith.addf %504, %507 : vector<16x16xf32>
    %c0_231 = arith.constant 0 : index
    %c0_232 = arith.constant 0 : index
    %509 = vector.load %arg16[%c0_231, %c0_232] : memref<16x1xf32, #tpu.memory_space<vmem>>, vector<16x1xf32>
    %cst_233 = arith.constant -3.000000e+01 : f32
    %510 = vector.broadcast %cst_233 : f32 to vector<16x16xf32>
    %511 = arith.maximumf %508, %510 : vector<16x16xf32>
    %cst_234 = arith.constant 0.000000e+00 : f32
    %512 = vector.broadcast %cst_234 : f32 to vector<16x16xf32>
    %513 = arith.subf %512, %511 : vector<16x16xf32>
    %514 = math.exp %513 : vector<16x16xf32>
    %cst_235 = arith.constant 1.000000e+00 : f32
    %515 = vector.broadcast %cst_235 : f32 to vector<16x16xf32>
    %516 = arith.addf %515, %514 : vector<16x16xf32>
    %517 = tpu.reciprocal %516 {approx = true} : vector<16x16xf32> -> vector<16x16xf32>
    %518 = arith.mulf %508, %517 : vector<16x16xf32>
    %cst_236 = arith.constant dense<0.000000e+00> : vector<16x1xf32>
    %519 = tpu.matmul %518, %509, %cst_236 {dimension_numbers = #tpu.dot_dimension_numbers<[1], [0], [0], [1], [0, 0, 1, 1], [], []>} : vector<16x16xf32>, vector<16x1xf32>, vector<16x1xf32> -> vector<16x1xf32>
    %cst_237 = arith.constant -2.200000e+00 : f32
    %520 = vector.broadcast %cst_237 : f32 to vector<16x16xf32>
    %521 = arith.cmpf oge, %508, %520 : vector<16x16xf32>
    %cst_238 = arith.constant -1.800000e+00 : f32
    %522 = vector.broadcast %cst_238 : f32 to vector<16x16xf32>
    %523 = arith.cmpf olt, %508, %522 : vector<16x16xf32>
    %524 = arith.andi %521, %523 : vector<16x16xi1>
    %cst_239 = arith.constant 1.000000e+00 : f32
    %cst_240 = arith.constant 0.000000e+00 : f32
    %525 = vector.broadcast %cst_239 : f32 to vector<16x16xf32>
    %526 = vector.broadcast %cst_240 : f32 to vector<16x16xf32>
    %527 = arith.select %524, %525, %526 : vector<16x16xi1>, vector<16x16xf32>
    %cst_241 = arith.constant -1.800000e+00 : f32
    %528 = vector.broadcast %cst_241 : f32 to vector<16x16xf32>
    %529 = arith.cmpf oge, %508, %528 : vector<16x16xf32>
    %cst_242 = arith.constant -1.400000e+00 : f32
    %530 = vector.broadcast %cst_242 : f32 to vector<16x16xf32>
    %531 = arith.cmpf olt, %508, %530 : vector<16x16xf32>
    %532 = arith.andi %529, %531 : vector<16x16xi1>
    %cst_243 = arith.constant 1.000000e+00 : f32
    %cst_244 = arith.constant 0.000000e+00 : f32
    %533 = vector.broadcast %cst_243 : f32 to vector<16x16xf32>
    %534 = vector.broadcast %cst_244 : f32 to vector<16x16xf32>
    %535 = arith.select %532, %533, %534 : vector<16x16xi1>, vector<16x16xf32>
    %cst_245 = arith.constant -1.400000e+00 : f32
    %536 = vector.broadcast %cst_245 : f32 to vector<16x16xf32>
    %537 = arith.cmpf oge, %508, %536 : vector<16x16xf32>
    %cst_246 = arith.constant -1.000000e+00 : f32
    %538 = vector.broadcast %cst_246 : f32 to vector<16x16xf32>
    %539 = arith.cmpf olt, %508, %538 : vector<16x16xf32>
    %540 = arith.andi %537, %539 : vector<16x16xi1>
    %cst_247 = arith.constant 1.000000e+00 : f32
    %cst_248 = arith.constant 0.000000e+00 : f32
    %541 = vector.broadcast %cst_247 : f32 to vector<16x16xf32>
    %542 = vector.broadcast %cst_248 : f32 to vector<16x16xf32>
    %543 = arith.select %540, %541, %542 : vector<16x16xi1>, vector<16x16xf32>
    %cst_249 = arith.constant -1.000000e+00 : f32
    %544 = vector.broadcast %cst_249 : f32 to vector<16x16xf32>
    %545 = arith.cmpf oge, %508, %544 : vector<16x16xf32>
    %cst_250 = arith.constant -6.000000e-01 : f32
    %546 = vector.broadcast %cst_250 : f32 to vector<16x16xf32>
    %547 = arith.cmpf olt, %508, %546 : vector<16x16xf32>
    %548 = arith.andi %545, %547 : vector<16x16xi1>
    %cst_251 = arith.constant 1.000000e+00 : f32
    %cst_252 = arith.constant 0.000000e+00 : f32
    %549 = vector.broadcast %cst_251 : f32 to vector<16x16xf32>
    %550 = vector.broadcast %cst_252 : f32 to vector<16x16xf32>
    %551 = arith.select %548, %549, %550 : vector<16x16xi1>, vector<16x16xf32>
    %cst_253 = arith.constant -6.000000e-01 : f32
    %552 = vector.broadcast %cst_253 : f32 to vector<16x16xf32>
    %553 = arith.cmpf oge, %508, %552 : vector<16x16xf32>
    %cst_254 = arith.constant -2.000000e-01 : f32
    %554 = vector.broadcast %cst_254 : f32 to vector<16x16xf32>
    %555 = arith.cmpf olt, %508, %554 : vector<16x16xf32>
    %556 = arith.andi %553, %555 : vector<16x16xi1>
    %cst_255 = arith.constant 1.000000e+00 : f32
    %cst_256 = arith.constant 0.000000e+00 : f32
    %557 = vector.broadcast %cst_255 : f32 to vector<16x16xf32>
    %558 = vector.broadcast %cst_256 : f32 to vector<16x16xf32>
    %559 = arith.select %556, %557, %558 : vector<16x16xi1>, vector<16x16xf32>
    %cst_257 = arith.constant -2.000000e-01 : f32
    %560 = vector.broadcast %cst_257 : f32 to vector<16x16xf32>
    %561 = arith.cmpf oge, %508, %560 : vector<16x16xf32>
    %cst_258 = arith.constant 2.000000e-01 : f32
    %562 = vector.broadcast %cst_258 : f32 to vector<16x16xf32>
    %563 = arith.cmpf olt, %508, %562 : vector<16x16xf32>
    %564 = arith.andi %561, %563 : vector<16x16xi1>
    %cst_259 = arith.constant 1.000000e+00 : f32
    %cst_260 = arith.constant 0.000000e+00 : f32
    %565 = vector.broadcast %cst_259 : f32 to vector<16x16xf32>
    %566 = vector.broadcast %cst_260 : f32 to vector<16x16xf32>
    %567 = arith.select %564, %565, %566 : vector<16x16xi1>, vector<16x16xf32>
    %cst_261 = arith.constant 2.000000e-01 : f32
    %568 = vector.broadcast %cst_261 : f32 to vector<16x16xf32>
    %569 = arith.cmpf oge, %508, %568 : vector<16x16xf32>
    %cst_262 = arith.constant 6.000000e-01 : f32
    %570 = vector.broadcast %cst_262 : f32 to vector<16x16xf32>
    %571 = arith.cmpf olt, %508, %570 : vector<16x16xf32>
    %572 = arith.andi %569, %571 : vector<16x16xi1>
    %cst_263 = arith.constant 1.000000e+00 : f32
    %cst_264 = arith.constant 0.000000e+00 : f32
    %573 = vector.broadcast %cst_263 : f32 to vector<16x16xf32>
    %574 = vector.broadcast %cst_264 : f32 to vector<16x16xf32>
    %575 = arith.select %572, %573, %574 : vector<16x16xi1>, vector<16x16xf32>
    %cst_265 = arith.constant 6.000000e-01 : f32
    %576 = vector.broadcast %cst_265 : f32 to vector<16x16xf32>
    %577 = arith.cmpf oge, %508, %576 : vector<16x16xf32>
    %cst_266 = arith.constant 1.000000e+00 : f32
    %578 = vector.broadcast %cst_266 : f32 to vector<16x16xf32>
    %579 = arith.cmpf olt, %508, %578 : vector<16x16xf32>
    %580 = arith.andi %577, %579 : vector<16x16xi1>
    %cst_267 = arith.constant 1.000000e+00 : f32
    %cst_268 = arith.constant 0.000000e+00 : f32
    %581 = vector.broadcast %cst_267 : f32 to vector<16x16xf32>
    %582 = vector.broadcast %cst_268 : f32 to vector<16x16xf32>
    %583 = arith.select %580, %581, %582 : vector<16x16xi1>, vector<16x16xf32>
    %cst_269 = arith.constant 1.000000e+00 : f32
    %584 = vector.broadcast %cst_269 : f32 to vector<16x16xf32>
    %585 = arith.cmpf oge, %508, %584 : vector<16x16xf32>
    %cst_270 = arith.constant 1.400000e+00 : f32
    %586 = vector.broadcast %cst_270 : f32 to vector<16x16xf32>
    %587 = arith.cmpf olt, %508, %586 : vector<16x16xf32>
    %588 = arith.andi %585, %587 : vector<16x16xi1>
    %cst_271 = arith.constant 1.000000e+00 : f32
    %cst_272 = arith.constant 0.000000e+00 : f32
    %589 = vector.broadcast %cst_271 : f32 to vector<16x16xf32>
    %590 = vector.broadcast %cst_272 : f32 to vector<16x16xf32>
    %591 = arith.select %588, %589, %590 : vector<16x16xi1>, vector<16x16xf32>
    %cst_273 = arith.constant 1.400000e+00 : f32
    %592 = vector.broadcast %cst_273 : f32 to vector<16x16xf32>
    %593 = arith.cmpf oge, %508, %592 : vector<16x16xf32>
    %cst_274 = arith.constant 1.800000e+00 : f32
    %594 = vector.broadcast %cst_274 : f32 to vector<16x16xf32>
    %595 = arith.cmpf olt, %508, %594 : vector<16x16xf32>
    %596 = arith.andi %593, %595 : vector<16x16xi1>
    %cst_275 = arith.constant 1.000000e+00 : f32
    %cst_276 = arith.constant 0.000000e+00 : f32
    %597 = vector.broadcast %cst_275 : f32 to vector<16x16xf32>
    %598 = vector.broadcast %cst_276 : f32 to vector<16x16xf32>
    %599 = arith.select %596, %597, %598 : vector<16x16xi1>, vector<16x16xf32>
    %cst_277 = arith.constant 1.800000e+00 : f32
    %600 = vector.broadcast %cst_277 : f32 to vector<16x16xf32>
    %601 = arith.cmpf oge, %508, %600 : vector<16x16xf32>
    %cst_278 = arith.constant 2.200000e+00 : f32
    %602 = vector.broadcast %cst_278 : f32 to vector<16x16xf32>
    %603 = arith.cmpf olt, %508, %602 : vector<16x16xf32>
    %604 = arith.andi %601, %603 : vector<16x16xi1>
    %cst_279 = arith.constant 1.000000e+00 : f32
    %cst_280 = arith.constant 0.000000e+00 : f32
    %605 = vector.broadcast %cst_279 : f32 to vector<16x16xf32>
    %606 = vector.broadcast %cst_280 : f32 to vector<16x16xf32>
    %607 = arith.select %604, %605, %606 : vector<16x16xi1>, vector<16x16xf32>
    %cst_281 = arith.constant -2.200000e+00 : f32
    %608 = vector.broadcast %cst_281 : f32 to vector<16x16xf32>
    %609 = arith.subf %508, %608 : vector<16x16xf32>
    %cst_282 = arith.constant 2.500000e+00 : f32
    %610 = vector.broadcast %cst_282 : f32 to vector<16x16xf32>
    %611 = arith.mulf %609, %610 : vector<16x16xf32>
    %612 = arith.mulf %611, %527 : vector<16x16xf32>
    %cst_283 = arith.constant -1.400000e+00 : f32
    %613 = vector.broadcast %cst_283 : f32 to vector<16x16xf32>
    %614 = arith.subf %613, %508 : vector<16x16xf32>
    %cst_284 = arith.constant 2.500000e+00 : f32
    %615 = vector.broadcast %cst_284 : f32 to vector<16x16xf32>
    %616 = arith.mulf %614, %615 : vector<16x16xf32>
    %617 = arith.mulf %616, %535 : vector<16x16xf32>
    %618 = arith.addf %612, %617 : vector<16x16xf32>
    %cst_285 = arith.constant -1.800000e+00 : f32
    %619 = vector.broadcast %cst_285 : f32 to vector<16x16xf32>
    %620 = arith.subf %508, %619 : vector<16x16xf32>
    %cst_286 = arith.constant 2.500000e+00 : f32
    %621 = vector.broadcast %cst_286 : f32 to vector<16x16xf32>
    %622 = arith.mulf %620, %621 : vector<16x16xf32>
    %623 = arith.mulf %622, %535 : vector<16x16xf32>
    %cst_287 = arith.constant -1.000000e+00 : f32
    %624 = vector.broadcast %cst_287 : f32 to vector<16x16xf32>
    %625 = arith.subf %624, %508 : vector<16x16xf32>
    %cst_288 = arith.constant 2.500000e+00 : f32
    %626 = vector.broadcast %cst_288 : f32 to vector<16x16xf32>
    %627 = arith.mulf %625, %626 : vector<16x16xf32>
    %628 = arith.mulf %627, %543 : vector<16x16xf32>
    %629 = arith.addf %623, %628 : vector<16x16xf32>
    %cst_289 = arith.constant -1.400000e+00 : f32
    %630 = vector.broadcast %cst_289 : f32 to vector<16x16xf32>
    %631 = arith.subf %508, %630 : vector<16x16xf32>
    %cst_290 = arith.constant 2.500000e+00 : f32
    %632 = vector.broadcast %cst_290 : f32 to vector<16x16xf32>
    %633 = arith.mulf %631, %632 : vector<16x16xf32>
    %634 = arith.mulf %633, %543 : vector<16x16xf32>
    %cst_291 = arith.constant -6.000000e-01 : f32
    %635 = vector.broadcast %cst_291 : f32 to vector<16x16xf32>
    %636 = arith.subf %635, %508 : vector<16x16xf32>
    %cst_292 = arith.constant 2.500000e+00 : f32
    %637 = vector.broadcast %cst_292 : f32 to vector<16x16xf32>
    %638 = arith.mulf %636, %637 : vector<16x16xf32>
    %639 = arith.mulf %638, %551 : vector<16x16xf32>
    %640 = arith.addf %634, %639 : vector<16x16xf32>
    %cst_293 = arith.constant -1.000000e+00 : f32
    %641 = vector.broadcast %cst_293 : f32 to vector<16x16xf32>
    %642 = arith.subf %508, %641 : vector<16x16xf32>
    %cst_294 = arith.constant 2.500000e+00 : f32
    %643 = vector.broadcast %cst_294 : f32 to vector<16x16xf32>
    %644 = arith.mulf %642, %643 : vector<16x16xf32>
    %645 = arith.mulf %644, %551 : vector<16x16xf32>
    %cst_295 = arith.constant -2.000000e-01 : f32
    %646 = vector.broadcast %cst_295 : f32 to vector<16x16xf32>
    %647 = arith.subf %646, %508 : vector<16x16xf32>
    %cst_296 = arith.constant 2.500000e+00 : f32
    %648 = vector.broadcast %cst_296 : f32 to vector<16x16xf32>
    %649 = arith.mulf %647, %648 : vector<16x16xf32>
    %650 = arith.mulf %649, %559 : vector<16x16xf32>
    %651 = arith.addf %645, %650 : vector<16x16xf32>
    %cst_297 = arith.constant -6.000000e-01 : f32
    %652 = vector.broadcast %cst_297 : f32 to vector<16x16xf32>
    %653 = arith.subf %508, %652 : vector<16x16xf32>
    %cst_298 = arith.constant 2.500000e+00 : f32
    %654 = vector.broadcast %cst_298 : f32 to vector<16x16xf32>
    %655 = arith.mulf %653, %654 : vector<16x16xf32>
    %656 = arith.mulf %655, %559 : vector<16x16xf32>
    %cst_299 = arith.constant 2.000000e-01 : f32
    %657 = vector.broadcast %cst_299 : f32 to vector<16x16xf32>
    %658 = arith.subf %657, %508 : vector<16x16xf32>
    %cst_300 = arith.constant 2.500000e+00 : f32
    %659 = vector.broadcast %cst_300 : f32 to vector<16x16xf32>
    %660 = arith.mulf %658, %659 : vector<16x16xf32>
    %661 = arith.mulf %660, %567 : vector<16x16xf32>
    %662 = arith.addf %656, %661 : vector<16x16xf32>
    %cst_301 = arith.constant -2.000000e-01 : f32
    %663 = vector.broadcast %cst_301 : f32 to vector<16x16xf32>
    %664 = arith.subf %508, %663 : vector<16x16xf32>
    %cst_302 = arith.constant 2.500000e+00 : f32
    %665 = vector.broadcast %cst_302 : f32 to vector<16x16xf32>
    %666 = arith.mulf %664, %665 : vector<16x16xf32>
    %667 = arith.mulf %666, %567 : vector<16x16xf32>
    %cst_303 = arith.constant 6.000000e-01 : f32
    %668 = vector.broadcast %cst_303 : f32 to vector<16x16xf32>
    %669 = arith.subf %668, %508 : vector<16x16xf32>
    %cst_304 = arith.constant 2.500000e+00 : f32
    %670 = vector.broadcast %cst_304 : f32 to vector<16x16xf32>
    %671 = arith.mulf %669, %670 : vector<16x16xf32>
    %672 = arith.mulf %671, %575 : vector<16x16xf32>
    %673 = arith.addf %667, %672 : vector<16x16xf32>
    %cst_305 = arith.constant 2.000000e-01 : f32
    %674 = vector.broadcast %cst_305 : f32 to vector<16x16xf32>
    %675 = arith.subf %508, %674 : vector<16x16xf32>
    %cst_306 = arith.constant 2.500000e+00 : f32
    %676 = vector.broadcast %cst_306 : f32 to vector<16x16xf32>
    %677 = arith.mulf %675, %676 : vector<16x16xf32>
    %678 = arith.mulf %677, %575 : vector<16x16xf32>
    %cst_307 = arith.constant 1.000000e+00 : f32
    %679 = vector.broadcast %cst_307 : f32 to vector<16x16xf32>
    %680 = arith.subf %679, %508 : vector<16x16xf32>
    %cst_308 = arith.constant 2.500000e+00 : f32
    %681 = vector.broadcast %cst_308 : f32 to vector<16x16xf32>
    %682 = arith.mulf %680, %681 : vector<16x16xf32>
    %683 = arith.mulf %682, %583 : vector<16x16xf32>
    %684 = arith.addf %678, %683 : vector<16x16xf32>
    %cst_309 = arith.constant 6.000000e-01 : f32
    %685 = vector.broadcast %cst_309 : f32 to vector<16x16xf32>
    %686 = arith.subf %508, %685 : vector<16x16xf32>
    %cst_310 = arith.constant 2.500000e+00 : f32
    %687 = vector.broadcast %cst_310 : f32 to vector<16x16xf32>
    %688 = arith.mulf %686, %687 : vector<16x16xf32>
    %689 = arith.mulf %688, %583 : vector<16x16xf32>
    %cst_311 = arith.constant 1.400000e+00 : f32
    %690 = vector.broadcast %cst_311 : f32 to vector<16x16xf32>
    %691 = arith.subf %690, %508 : vector<16x16xf32>
    %cst_312 = arith.constant 2.500000e+00 : f32
    %692 = vector.broadcast %cst_312 : f32 to vector<16x16xf32>
    %693 = arith.mulf %691, %692 : vector<16x16xf32>
    %694 = arith.mulf %693, %591 : vector<16x16xf32>
    %695 = arith.addf %689, %694 : vector<16x16xf32>
    %cst_313 = arith.constant 1.000000e+00 : f32
    %696 = vector.broadcast %cst_313 : f32 to vector<16x16xf32>
    %697 = arith.subf %508, %696 : vector<16x16xf32>
    %cst_314 = arith.constant 2.500000e+00 : f32
    %698 = vector.broadcast %cst_314 : f32 to vector<16x16xf32>
    %699 = arith.mulf %697, %698 : vector<16x16xf32>
    %700 = arith.mulf %699, %591 : vector<16x16xf32>
    %cst_315 = arith.constant 1.800000e+00 : f32
    %701 = vector.broadcast %cst_315 : f32 to vector<16x16xf32>
    %702 = arith.subf %701, %508 : vector<16x16xf32>
    %cst_316 = arith.constant 2.500000e+00 : f32
    %703 = vector.broadcast %cst_316 : f32 to vector<16x16xf32>
    %704 = arith.mulf %702, %703 : vector<16x16xf32>
    %705 = arith.mulf %704, %599 : vector<16x16xf32>
    %706 = arith.addf %700, %705 : vector<16x16xf32>
    %cst_317 = arith.constant 1.400000e+00 : f32
    %707 = vector.broadcast %cst_317 : f32 to vector<16x16xf32>
    %708 = arith.subf %508, %707 : vector<16x16xf32>
    %cst_318 = arith.constant 2.500000e+00 : f32
    %709 = vector.broadcast %cst_318 : f32 to vector<16x16xf32>
    %710 = arith.mulf %708, %709 : vector<16x16xf32>
    %711 = arith.mulf %710, %599 : vector<16x16xf32>
    %cst_319 = arith.constant 2.200000e+00 : f32
    %712 = vector.broadcast %cst_319 : f32 to vector<16x16xf32>
    %713 = arith.subf %712, %508 : vector<16x16xf32>
    %cst_320 = arith.constant 2.500000e+00 : f32
    %714 = vector.broadcast %cst_320 : f32 to vector<16x16xf32>
    %715 = arith.mulf %713, %714 : vector<16x16xf32>
    %716 = arith.mulf %715, %607 : vector<16x16xf32>
    %717 = arith.addf %711, %716 : vector<16x16xf32>
    %cst_321 = arith.constant -2.200000e+00 : f32
    %718 = vector.broadcast %cst_321 : f32 to vector<16x16xf32>
    %719 = arith.subf %508, %718 : vector<16x16xf32>
    %cst_322 = arith.constant 1.250000e+00 : f32
    %720 = vector.broadcast %cst_322 : f32 to vector<16x16xf32>
    %721 = arith.mulf %719, %720 : vector<16x16xf32>
    %722 = arith.mulf %721, %618 : vector<16x16xf32>
    %cst_323 = arith.constant -1.000000e+00 : f32
    %723 = vector.broadcast %cst_323 : f32 to vector<16x16xf32>
    %724 = arith.subf %723, %508 : vector<16x16xf32>
    %cst_324 = arith.constant 1.250000e+00 : f32
    %725 = vector.broadcast %cst_324 : f32 to vector<16x16xf32>
    %726 = arith.mulf %724, %725 : vector<16x16xf32>
    %727 = arith.mulf %726, %629 : vector<16x16xf32>
    %728 = arith.addf %722, %727 : vector<16x16xf32>
    %cst_325 = arith.constant -1.800000e+00 : f32
    %729 = vector.broadcast %cst_325 : f32 to vector<16x16xf32>
    %730 = arith.subf %508, %729 : vector<16x16xf32>
    %cst_326 = arith.constant 1.250000e+00 : f32
    %731 = vector.broadcast %cst_326 : f32 to vector<16x16xf32>
    %732 = arith.mulf %730, %731 : vector<16x16xf32>
    %733 = arith.mulf %732, %629 : vector<16x16xf32>
    %cst_327 = arith.constant -6.000000e-01 : f32
    %734 = vector.broadcast %cst_327 : f32 to vector<16x16xf32>
    %735 = arith.subf %734, %508 : vector<16x16xf32>
    %cst_328 = arith.constant 1.250000e+00 : f32
    %736 = vector.broadcast %cst_328 : f32 to vector<16x16xf32>
    %737 = arith.mulf %735, %736 : vector<16x16xf32>
    %738 = arith.mulf %737, %640 : vector<16x16xf32>
    %739 = arith.addf %733, %738 : vector<16x16xf32>
    %cst_329 = arith.constant -1.400000e+00 : f32
    %740 = vector.broadcast %cst_329 : f32 to vector<16x16xf32>
    %741 = arith.subf %508, %740 : vector<16x16xf32>
    %cst_330 = arith.constant 1.250000e+00 : f32
    %742 = vector.broadcast %cst_330 : f32 to vector<16x16xf32>
    %743 = arith.mulf %741, %742 : vector<16x16xf32>
    %744 = arith.mulf %743, %640 : vector<16x16xf32>
    %cst_331 = arith.constant -2.000000e-01 : f32
    %745 = vector.broadcast %cst_331 : f32 to vector<16x16xf32>
    %746 = arith.subf %745, %508 : vector<16x16xf32>
    %cst_332 = arith.constant 1.250000e+00 : f32
    %747 = vector.broadcast %cst_332 : f32 to vector<16x16xf32>
    %748 = arith.mulf %746, %747 : vector<16x16xf32>
    %749 = arith.mulf %748, %651 : vector<16x16xf32>
    %750 = arith.addf %744, %749 : vector<16x16xf32>
    %cst_333 = arith.constant -1.000000e+00 : f32
    %751 = vector.broadcast %cst_333 : f32 to vector<16x16xf32>
    %752 = arith.subf %508, %751 : vector<16x16xf32>
    %cst_334 = arith.constant 1.250000e+00 : f32
    %753 = vector.broadcast %cst_334 : f32 to vector<16x16xf32>
    %754 = arith.mulf %752, %753 : vector<16x16xf32>
    %755 = arith.mulf %754, %651 : vector<16x16xf32>
    %cst_335 = arith.constant 2.000000e-01 : f32
    %756 = vector.broadcast %cst_335 : f32 to vector<16x16xf32>
    %757 = arith.subf %756, %508 : vector<16x16xf32>
    %cst_336 = arith.constant 1.250000e+00 : f32
    %758 = vector.broadcast %cst_336 : f32 to vector<16x16xf32>
    %759 = arith.mulf %757, %758 : vector<16x16xf32>
    %760 = arith.mulf %759, %662 : vector<16x16xf32>
    %761 = arith.addf %755, %760 : vector<16x16xf32>
    %cst_337 = arith.constant -6.000000e-01 : f32
    %762 = vector.broadcast %cst_337 : f32 to vector<16x16xf32>
    %763 = arith.subf %508, %762 : vector<16x16xf32>
    %cst_338 = arith.constant 1.250000e+00 : f32
    %764 = vector.broadcast %cst_338 : f32 to vector<16x16xf32>
    %765 = arith.mulf %763, %764 : vector<16x16xf32>
    %766 = arith.mulf %765, %662 : vector<16x16xf32>
    %cst_339 = arith.constant 6.000000e-01 : f32
    %767 = vector.broadcast %cst_339 : f32 to vector<16x16xf32>
    %768 = arith.subf %767, %508 : vector<16x16xf32>
    %cst_340 = arith.constant 1.250000e+00 : f32
    %769 = vector.broadcast %cst_340 : f32 to vector<16x16xf32>
    %770 = arith.mulf %768, %769 : vector<16x16xf32>
    %771 = arith.mulf %770, %673 : vector<16x16xf32>
    %772 = arith.addf %766, %771 : vector<16x16xf32>
    %cst_341 = arith.constant -2.000000e-01 : f32
    %773 = vector.broadcast %cst_341 : f32 to vector<16x16xf32>
    %774 = arith.subf %508, %773 : vector<16x16xf32>
    %cst_342 = arith.constant 1.250000e+00 : f32
    %775 = vector.broadcast %cst_342 : f32 to vector<16x16xf32>
    %776 = arith.mulf %774, %775 : vector<16x16xf32>
    %777 = arith.mulf %776, %673 : vector<16x16xf32>
    %cst_343 = arith.constant 1.000000e+00 : f32
    %778 = vector.broadcast %cst_343 : f32 to vector<16x16xf32>
    %779 = arith.subf %778, %508 : vector<16x16xf32>
    %cst_344 = arith.constant 1.250000e+00 : f32
    %780 = vector.broadcast %cst_344 : f32 to vector<16x16xf32>
    %781 = arith.mulf %779, %780 : vector<16x16xf32>
    %782 = arith.mulf %781, %684 : vector<16x16xf32>
    %783 = arith.addf %777, %782 : vector<16x16xf32>
    %cst_345 = arith.constant 2.000000e-01 : f32
    %784 = vector.broadcast %cst_345 : f32 to vector<16x16xf32>
    %785 = arith.subf %508, %784 : vector<16x16xf32>
    %cst_346 = arith.constant 1.250000e+00 : f32
    %786 = vector.broadcast %cst_346 : f32 to vector<16x16xf32>
    %787 = arith.mulf %785, %786 : vector<16x16xf32>
    %788 = arith.mulf %787, %684 : vector<16x16xf32>
    %cst_347 = arith.constant 1.400000e+00 : f32
    %789 = vector.broadcast %cst_347 : f32 to vector<16x16xf32>
    %790 = arith.subf %789, %508 : vector<16x16xf32>
    %cst_348 = arith.constant 1.250000e+00 : f32
    %791 = vector.broadcast %cst_348 : f32 to vector<16x16xf32>
    %792 = arith.mulf %790, %791 : vector<16x16xf32>
    %793 = arith.mulf %792, %695 : vector<16x16xf32>
    %794 = arith.addf %788, %793 : vector<16x16xf32>
    %cst_349 = arith.constant 6.000000e-01 : f32
    %795 = vector.broadcast %cst_349 : f32 to vector<16x16xf32>
    %796 = arith.subf %508, %795 : vector<16x16xf32>
    %cst_350 = arith.constant 1.250000e+00 : f32
    %797 = vector.broadcast %cst_350 : f32 to vector<16x16xf32>
    %798 = arith.mulf %796, %797 : vector<16x16xf32>
    %799 = arith.mulf %798, %695 : vector<16x16xf32>
    %cst_351 = arith.constant 1.800000e+00 : f32
    %800 = vector.broadcast %cst_351 : f32 to vector<16x16xf32>
    %801 = arith.subf %800, %508 : vector<16x16xf32>
    %cst_352 = arith.constant 1.250000e+00 : f32
    %802 = vector.broadcast %cst_352 : f32 to vector<16x16xf32>
    %803 = arith.mulf %801, %802 : vector<16x16xf32>
    %804 = arith.mulf %803, %706 : vector<16x16xf32>
    %805 = arith.addf %799, %804 : vector<16x16xf32>
    %cst_353 = arith.constant 1.000000e+00 : f32
    %806 = vector.broadcast %cst_353 : f32 to vector<16x16xf32>
    %807 = arith.subf %508, %806 : vector<16x16xf32>
    %cst_354 = arith.constant 1.250000e+00 : f32
    %808 = vector.broadcast %cst_354 : f32 to vector<16x16xf32>
    %809 = arith.mulf %807, %808 : vector<16x16xf32>
    %810 = arith.mulf %809, %706 : vector<16x16xf32>
    %cst_355 = arith.constant 2.200000e+00 : f32
    %811 = vector.broadcast %cst_355 : f32 to vector<16x16xf32>
    %812 = arith.subf %811, %508 : vector<16x16xf32>
    %cst_356 = arith.constant 1.250000e+00 : f32
    %813 = vector.broadcast %cst_356 : f32 to vector<16x16xf32>
    %814 = arith.mulf %812, %813 : vector<16x16xf32>
    %815 = arith.mulf %814, %717 : vector<16x16xf32>
    %816 = arith.addf %810, %815 : vector<16x16xf32>
    %cst_357 = arith.constant -2.200000e+00 : f32
    %817 = vector.broadcast %cst_357 : f32 to vector<16x16xf32>
    %818 = arith.subf %508, %817 : vector<16x16xf32>
    %cst_358 = arith.constant 0.833333313 : f32
    %819 = vector.broadcast %cst_358 : f32 to vector<16x16xf32>
    %820 = arith.mulf %818, %819 : vector<16x16xf32>
    %821 = arith.mulf %820, %728 : vector<16x16xf32>
    %cst_359 = arith.constant -6.000000e-01 : f32
    %822 = vector.broadcast %cst_359 : f32 to vector<16x16xf32>
    %823 = arith.subf %822, %508 : vector<16x16xf32>
    %cst_360 = arith.constant 0.833333313 : f32
    %824 = vector.broadcast %cst_360 : f32 to vector<16x16xf32>
    %825 = arith.mulf %823, %824 : vector<16x16xf32>
    %826 = arith.mulf %825, %739 : vector<16x16xf32>
    %827 = arith.addf %821, %826 : vector<16x16xf32>
    %cst_361 = arith.constant -1.800000e+00 : f32
    %828 = vector.broadcast %cst_361 : f32 to vector<16x16xf32>
    %829 = arith.subf %508, %828 : vector<16x16xf32>
    %cst_362 = arith.constant 0.833333313 : f32
    %830 = vector.broadcast %cst_362 : f32 to vector<16x16xf32>
    %831 = arith.mulf %829, %830 : vector<16x16xf32>
    %832 = arith.mulf %831, %739 : vector<16x16xf32>
    %cst_363 = arith.constant -2.000000e-01 : f32
    %833 = vector.broadcast %cst_363 : f32 to vector<16x16xf32>
    %834 = arith.subf %833, %508 : vector<16x16xf32>
    %cst_364 = arith.constant 0.833333313 : f32
    %835 = vector.broadcast %cst_364 : f32 to vector<16x16xf32>
    %836 = arith.mulf %834, %835 : vector<16x16xf32>
    %837 = arith.mulf %836, %750 : vector<16x16xf32>
    %838 = arith.addf %832, %837 : vector<16x16xf32>
    %cst_365 = arith.constant -1.400000e+00 : f32
    %839 = vector.broadcast %cst_365 : f32 to vector<16x16xf32>
    %840 = arith.subf %508, %839 : vector<16x16xf32>
    %cst_366 = arith.constant 0.833333313 : f32
    %841 = vector.broadcast %cst_366 : f32 to vector<16x16xf32>
    %842 = arith.mulf %840, %841 : vector<16x16xf32>
    %843 = arith.mulf %842, %750 : vector<16x16xf32>
    %cst_367 = arith.constant 2.000000e-01 : f32
    %844 = vector.broadcast %cst_367 : f32 to vector<16x16xf32>
    %845 = arith.subf %844, %508 : vector<16x16xf32>
    %cst_368 = arith.constant 0.833333313 : f32
    %846 = vector.broadcast %cst_368 : f32 to vector<16x16xf32>
    %847 = arith.mulf %845, %846 : vector<16x16xf32>
    %848 = arith.mulf %847, %761 : vector<16x16xf32>
    %849 = arith.addf %843, %848 : vector<16x16xf32>
    %cst_369 = arith.constant -1.000000e+00 : f32
    %850 = vector.broadcast %cst_369 : f32 to vector<16x16xf32>
    %851 = arith.subf %508, %850 : vector<16x16xf32>
    %cst_370 = arith.constant 0.833333313 : f32
    %852 = vector.broadcast %cst_370 : f32 to vector<16x16xf32>
    %853 = arith.mulf %851, %852 : vector<16x16xf32>
    %854 = arith.mulf %853, %761 : vector<16x16xf32>
    %cst_371 = arith.constant 6.000000e-01 : f32
    %855 = vector.broadcast %cst_371 : f32 to vector<16x16xf32>
    %856 = arith.subf %855, %508 : vector<16x16xf32>
    %cst_372 = arith.constant 0.833333313 : f32
    %857 = vector.broadcast %cst_372 : f32 to vector<16x16xf32>
    %858 = arith.mulf %856, %857 : vector<16x16xf32>
    %859 = arith.mulf %858, %772 : vector<16x16xf32>
    %860 = arith.addf %854, %859 : vector<16x16xf32>
    %cst_373 = arith.constant -6.000000e-01 : f32
    %861 = vector.broadcast %cst_373 : f32 to vector<16x16xf32>
    %862 = arith.subf %508, %861 : vector<16x16xf32>
    %cst_374 = arith.constant 0.833333313 : f32
    %863 = vector.broadcast %cst_374 : f32 to vector<16x16xf32>
    %864 = arith.mulf %862, %863 : vector<16x16xf32>
    %865 = arith.mulf %864, %772 : vector<16x16xf32>
    %cst_375 = arith.constant 1.000000e+00 : f32
    %866 = vector.broadcast %cst_375 : f32 to vector<16x16xf32>
    %867 = arith.subf %866, %508 : vector<16x16xf32>
    %cst_376 = arith.constant 0.833333313 : f32
    %868 = vector.broadcast %cst_376 : f32 to vector<16x16xf32>
    %869 = arith.mulf %867, %868 : vector<16x16xf32>
    %870 = arith.mulf %869, %783 : vector<16x16xf32>
    %871 = arith.addf %865, %870 : vector<16x16xf32>
    %cst_377 = arith.constant -2.000000e-01 : f32
    %872 = vector.broadcast %cst_377 : f32 to vector<16x16xf32>
    %873 = arith.subf %508, %872 : vector<16x16xf32>
    %cst_378 = arith.constant 0.833333313 : f32
    %874 = vector.broadcast %cst_378 : f32 to vector<16x16xf32>
    %875 = arith.mulf %873, %874 : vector<16x16xf32>
    %876 = arith.mulf %875, %783 : vector<16x16xf32>
    %cst_379 = arith.constant 1.400000e+00 : f32
    %877 = vector.broadcast %cst_379 : f32 to vector<16x16xf32>
    %878 = arith.subf %877, %508 : vector<16x16xf32>
    %cst_380 = arith.constant 0.833333313 : f32
    %879 = vector.broadcast %cst_380 : f32 to vector<16x16xf32>
    %880 = arith.mulf %878, %879 : vector<16x16xf32>
    %881 = arith.mulf %880, %794 : vector<16x16xf32>
    %882 = arith.addf %876, %881 : vector<16x16xf32>
    %cst_381 = arith.constant 2.000000e-01 : f32
    %883 = vector.broadcast %cst_381 : f32 to vector<16x16xf32>
    %884 = arith.subf %508, %883 : vector<16x16xf32>
    %cst_382 = arith.constant 0.833333313 : f32
    %885 = vector.broadcast %cst_382 : f32 to vector<16x16xf32>
    %886 = arith.mulf %884, %885 : vector<16x16xf32>
    %887 = arith.mulf %886, %794 : vector<16x16xf32>
    %cst_383 = arith.constant 1.800000e+00 : f32
    %888 = vector.broadcast %cst_383 : f32 to vector<16x16xf32>
    %889 = arith.subf %888, %508 : vector<16x16xf32>
    %cst_384 = arith.constant 0.833333313 : f32
    %890 = vector.broadcast %cst_384 : f32 to vector<16x16xf32>
    %891 = arith.mulf %889, %890 : vector<16x16xf32>
    %892 = arith.mulf %891, %805 : vector<16x16xf32>
    %893 = arith.addf %887, %892 : vector<16x16xf32>
    %cst_385 = arith.constant 6.000000e-01 : f32
    %894 = vector.broadcast %cst_385 : f32 to vector<16x16xf32>
    %895 = arith.subf %508, %894 : vector<16x16xf32>
    %cst_386 = arith.constant 0.833333313 : f32
    %896 = vector.broadcast %cst_386 : f32 to vector<16x16xf32>
    %897 = arith.mulf %895, %896 : vector<16x16xf32>
    %898 = arith.mulf %897, %805 : vector<16x16xf32>
    %cst_387 = arith.constant 2.200000e+00 : f32
    %899 = vector.broadcast %cst_387 : f32 to vector<16x16xf32>
    %900 = arith.subf %899, %508 : vector<16x16xf32>
    %cst_388 = arith.constant 0.833333313 : f32
    %901 = vector.broadcast %cst_388 : f32 to vector<16x16xf32>
    %902 = arith.mulf %900, %901 : vector<16x16xf32>
    %903 = arith.mulf %902, %816 : vector<16x16xf32>
    %904 = arith.addf %898, %903 : vector<16x16xf32>
    %c0_389 = arith.constant 0 : index
    %c0_390 = arith.constant 0 : index
    %c0_391 = arith.constant 0 : index
    %905 = vector.load %arg17[%c0_389, %c0_390, %c0_391] : memref<8x16x1xf32, #tpu.memory_space<vmem>>, vector<1x16x1xf32>
    %906 = vector.shape_cast %905 : vector<1x16x1xf32> to vector<16x1xf32>
    %cst_392 = arith.constant dense<0.000000e+00> : vector<16x1xf32>
    %907 = tpu.matmul %827, %906, %cst_392 {dimension_numbers = #tpu.dot_dimension_numbers<[1], [0], [0], [1], [0, 0, 1, 1], [], []>} : vector<16x16xf32>, vector<16x1xf32>, vector<16x1xf32> -> vector<16x1xf32>
    %908 = arith.addf %519, %907 : vector<16x1xf32>
    %c1_393 = arith.constant 1 : index
    %c0_394 = arith.constant 0 : index
    %c0_395 = arith.constant 0 : index
    %909 = vector.load %arg17[%c1_393, %c0_394, %c0_395] : memref<8x16x1xf32, #tpu.memory_space<vmem>>, vector<1x16x1xf32>
    %910 = vector.shape_cast %909 : vector<1x16x1xf32> to vector<16x1xf32>
    %cst_396 = arith.constant dense<0.000000e+00> : vector<16x1xf32>
    %911 = tpu.matmul %838, %910, %cst_396 {dimension_numbers = #tpu.dot_dimension_numbers<[1], [0], [0], [1], [0, 0, 1, 1], [], []>} : vector<16x16xf32>, vector<16x1xf32>, vector<16x1xf32> -> vector<16x1xf32>
    %912 = arith.addf %908, %911 : vector<16x1xf32>
    %c2_397 = arith.constant 2 : index
    %c0_398 = arith.constant 0 : index
    %c0_399 = arith.constant 0 : index
    %913 = vector.load %arg17[%c2_397, %c0_398, %c0_399] : memref<8x16x1xf32, #tpu.memory_space<vmem>>, vector<1x16x1xf32>
    %914 = vector.shape_cast %913 : vector<1x16x1xf32> to vector<16x1xf32>
    %cst_400 = arith.constant dense<0.000000e+00> : vector<16x1xf32>
    %915 = tpu.matmul %849, %914, %cst_400 {dimension_numbers = #tpu.dot_dimension_numbers<[1], [0], [0], [1], [0, 0, 1, 1], [], []>} : vector<16x16xf32>, vector<16x1xf32>, vector<16x1xf32> -> vector<16x1xf32>
    %916 = arith.addf %912, %915 : vector<16x1xf32>
    %c3_401 = arith.constant 3 : index
    %c0_402 = arith.constant 0 : index
    %c0_403 = arith.constant 0 : index
    %917 = vector.load %arg17[%c3_401, %c0_402, %c0_403] : memref<8x16x1xf32, #tpu.memory_space<vmem>>, vector<1x16x1xf32>
    %918 = vector.shape_cast %917 : vector<1x16x1xf32> to vector<16x1xf32>
    %cst_404 = arith.constant dense<0.000000e+00> : vector<16x1xf32>
    %919 = tpu.matmul %860, %918, %cst_404 {dimension_numbers = #tpu.dot_dimension_numbers<[1], [0], [0], [1], [0, 0, 1, 1], [], []>} : vector<16x16xf32>, vector<16x1xf32>, vector<16x1xf32> -> vector<16x1xf32>
    %920 = arith.addf %916, %919 : vector<16x1xf32>
    %c4_405 = arith.constant 4 : index
    %c0_406 = arith.constant 0 : index
    %c0_407 = arith.constant 0 : index
    %921 = vector.load %arg17[%c4_405, %c0_406, %c0_407] : memref<8x16x1xf32, #tpu.memory_space<vmem>>, vector<1x16x1xf32>
    %922 = vector.shape_cast %921 : vector<1x16x1xf32> to vector<16x1xf32>
    %cst_408 = arith.constant dense<0.000000e+00> : vector<16x1xf32>
    %923 = tpu.matmul %871, %922, %cst_408 {dimension_numbers = #tpu.dot_dimension_numbers<[1], [0], [0], [1], [0, 0, 1, 1], [], []>} : vector<16x16xf32>, vector<16x1xf32>, vector<16x1xf32> -> vector<16x1xf32>
    %924 = arith.addf %920, %923 : vector<16x1xf32>
    %c5_409 = arith.constant 5 : index
    %c0_410 = arith.constant 0 : index
    %c0_411 = arith.constant 0 : index
    %925 = vector.load %arg17[%c5_409, %c0_410, %c0_411] : memref<8x16x1xf32, #tpu.memory_space<vmem>>, vector<1x16x1xf32>
    %926 = vector.shape_cast %925 : vector<1x16x1xf32> to vector<16x1xf32>
    %cst_412 = arith.constant dense<0.000000e+00> : vector<16x1xf32>
    %927 = tpu.matmul %882, %926, %cst_412 {dimension_numbers = #tpu.dot_dimension_numbers<[1], [0], [0], [1], [0, 0, 1, 1], [], []>} : vector<16x16xf32>, vector<16x1xf32>, vector<16x1xf32> -> vector<16x1xf32>
    %928 = arith.addf %924, %927 : vector<16x1xf32>
    %c6_413 = arith.constant 6 : index
    %c0_414 = arith.constant 0 : index
    %c0_415 = arith.constant 0 : index
    %929 = vector.load %arg17[%c6_413, %c0_414, %c0_415] : memref<8x16x1xf32, #tpu.memory_space<vmem>>, vector<1x16x1xf32>
    %930 = vector.shape_cast %929 : vector<1x16x1xf32> to vector<16x1xf32>
    %cst_416 = arith.constant dense<0.000000e+00> : vector<16x1xf32>
    %931 = tpu.matmul %893, %930, %cst_416 {dimension_numbers = #tpu.dot_dimension_numbers<[1], [0], [0], [1], [0, 0, 1, 1], [], []>} : vector<16x16xf32>, vector<16x1xf32>, vector<16x1xf32> -> vector<16x1xf32>
    %932 = arith.addf %928, %931 : vector<16x1xf32>
    %c7_417 = arith.constant 7 : index
    %c0_418 = arith.constant 0 : index
    %c0_419 = arith.constant 0 : index
    %933 = vector.load %arg17[%c7_417, %c0_418, %c0_419] : memref<8x16x1xf32, #tpu.memory_space<vmem>>, vector<1x16x1xf32>
    %934 = vector.shape_cast %933 : vector<1x16x1xf32> to vector<16x1xf32>
    %cst_420 = arith.constant dense<0.000000e+00> : vector<16x1xf32>
    %935 = tpu.matmul %904, %934, %cst_420 {dimension_numbers = #tpu.dot_dimension_numbers<[1], [0], [0], [1], [0, 0, 1, 1], [], []>} : vector<16x16xf32>, vector<16x1xf32>, vector<16x1xf32> -> vector<16x1xf32>
    %936 = arith.addf %932, %935 : vector<16x1xf32>
    %937 = arith.addf %66, %64 : vector<16x32xf32>
    %c0_421 = arith.constant 0 : index
    %c0_422 = arith.constant 0 : index
    %938 = vector.load %arg11[%c0_421, %c0_422] : memref<32x16xf32, #tpu.memory_space<vmem>>, vector<32x16xf32>
    %c0_423 = arith.constant 0 : index
    %c0_424 = arith.constant 0 : index
    %939 = vector.load %arg12[%c0_423, %c0_424] : memref<32x16xf32, #tpu.memory_space<vmem>>, vector<32x16xf32>
    %c0_425 = arith.constant 0 : index
    %c0_426 = arith.constant 0 : index
    %940 = vector.load %arg13[%c0_425, %c0_426] : memref<1x16xf32, #tpu.memory_space<vmem>>, vector<1x16xf32>
    %cst_427 = arith.constant dense<0.000000e+00> : vector<16x32xf32>
    %941 = tpu.matmul %50, %937, %cst_427 {dimension_numbers = #tpu.dot_dimension_numbers<[1], [0], [0], [1], [0, 0, 1, 1], [], []>} : vector<16x16xf32>, vector<16x32xf32>, vector<16x32xf32> -> vector<16x32xf32>
    %cst_428 = arith.constant dense<0.000000e+00> : vector<16x16xf32>
    %942 = tpu.matmul %941, %938, %cst_428 {dimension_numbers = #tpu.dot_dimension_numbers<[1], [0], [0], [1], [0, 0, 1, 1], [], []>} : vector<16x32xf32>, vector<32x16xf32>, vector<16x16xf32> -> vector<16x16xf32>
    %cst_429 = arith.constant dense<0.000000e+00> : vector<16x16xf32>
    %943 = tpu.matmul %937, %939, %cst_429 {dimension_numbers = #tpu.dot_dimension_numbers<[1], [0], [0], [1], [0, 0, 1, 1], [], []>} : vector<16x32xf32>, vector<32x16xf32>, vector<16x16xf32> -> vector<16x16xf32>
    %944 = arith.addf %942, %943 : vector<16x16xf32>
    %945 = vector.broadcast %940 : vector<1x16xf32> to vector<16x16xf32>
    %946 = arith.addf %944, %945 : vector<16x16xf32>
    %cst_430 = arith.constant 0.000000e+00 : f32
    %947 = vector.broadcast %cst_430 : f32 to vector<16x16xf32>
    %948 = arith.maximumf %946, %947 : vector<16x16xf32>
    %c0_431 = arith.constant 0 : index
    %c0_432 = arith.constant 0 : index
    %949 = vector.load %arg14[%c0_431, %c0_432] : memref<16x16xf32, #tpu.memory_space<vmem>>, vector<16x16xf32>
    %cst_433 = arith.constant -3.000000e+01 : f32
    %950 = vector.broadcast %cst_433 : f32 to vector<16x16xf32>
    %951 = arith.maximumf %948, %950 : vector<16x16xf32>
    %cst_434 = arith.constant 0.000000e+00 : f32
    %952 = vector.broadcast %cst_434 : f32 to vector<16x16xf32>
    %953 = arith.subf %952, %951 : vector<16x16xf32>
    %954 = math.exp %953 : vector<16x16xf32>
    %cst_435 = arith.constant 1.000000e+00 : f32
    %955 = vector.broadcast %cst_435 : f32 to vector<16x16xf32>
    %956 = arith.addf %955, %954 : vector<16x16xf32>
    %957 = tpu.reciprocal %956 {approx = true} : vector<16x16xf32> -> vector<16x16xf32>
    %958 = arith.mulf %948, %957 : vector<16x16xf32>
    %cst_436 = arith.constant dense<0.000000e+00> : vector<16x16xf32>
    %959 = tpu.matmul %958, %949, %cst_436 {dimension_numbers = #tpu.dot_dimension_numbers<[1], [0], [0], [1], [0, 0, 1, 1], [], []>} : vector<16x16xf32>, vector<16x16xf32>, vector<16x16xf32> -> vector<16x16xf32>
    %cst_437 = arith.constant -2.200000e+00 : f32
    %960 = vector.broadcast %cst_437 : f32 to vector<16x16xf32>
    %961 = arith.cmpf oge, %948, %960 : vector<16x16xf32>
    %cst_438 = arith.constant -1.800000e+00 : f32
    %962 = vector.broadcast %cst_438 : f32 to vector<16x16xf32>
    %963 = arith.cmpf olt, %948, %962 : vector<16x16xf32>
    %964 = arith.andi %961, %963 : vector<16x16xi1>
    %cst_439 = arith.constant 1.000000e+00 : f32
    %cst_440 = arith.constant 0.000000e+00 : f32
    %965 = vector.broadcast %cst_439 : f32 to vector<16x16xf32>
    %966 = vector.broadcast %cst_440 : f32 to vector<16x16xf32>
    %967 = arith.select %964, %965, %966 : vector<16x16xi1>, vector<16x16xf32>
    %cst_441 = arith.constant -1.800000e+00 : f32
    %968 = vector.broadcast %cst_441 : f32 to vector<16x16xf32>
    %969 = arith.cmpf oge, %948, %968 : vector<16x16xf32>
    %cst_442 = arith.constant -1.400000e+00 : f32
    %970 = vector.broadcast %cst_442 : f32 to vector<16x16xf32>
    %971 = arith.cmpf olt, %948, %970 : vector<16x16xf32>
    %972 = arith.andi %969, %971 : vector<16x16xi1>
    %cst_443 = arith.constant 1.000000e+00 : f32
    %cst_444 = arith.constant 0.000000e+00 : f32
    %973 = vector.broadcast %cst_443 : f32 to vector<16x16xf32>
    %974 = vector.broadcast %cst_444 : f32 to vector<16x16xf32>
    %975 = arith.select %972, %973, %974 : vector<16x16xi1>, vector<16x16xf32>
    %cst_445 = arith.constant -1.400000e+00 : f32
    %976 = vector.broadcast %cst_445 : f32 to vector<16x16xf32>
    %977 = arith.cmpf oge, %948, %976 : vector<16x16xf32>
    %cst_446 = arith.constant -1.000000e+00 : f32
    %978 = vector.broadcast %cst_446 : f32 to vector<16x16xf32>
    %979 = arith.cmpf olt, %948, %978 : vector<16x16xf32>
    %980 = arith.andi %977, %979 : vector<16x16xi1>
    %cst_447 = arith.constant 1.000000e+00 : f32
    %cst_448 = arith.constant 0.000000e+00 : f32
    %981 = vector.broadcast %cst_447 : f32 to vector<16x16xf32>
    %982 = vector.broadcast %cst_448 : f32 to vector<16x16xf32>
    %983 = arith.select %980, %981, %982 : vector<16x16xi1>, vector<16x16xf32>
    %cst_449 = arith.constant -1.000000e+00 : f32
    %984 = vector.broadcast %cst_449 : f32 to vector<16x16xf32>
    %985 = arith.cmpf oge, %948, %984 : vector<16x16xf32>
    %cst_450 = arith.constant -6.000000e-01 : f32
    %986 = vector.broadcast %cst_450 : f32 to vector<16x16xf32>
    %987 = arith.cmpf olt, %948, %986 : vector<16x16xf32>
    %988 = arith.andi %985, %987 : vector<16x16xi1>
    %cst_451 = arith.constant 1.000000e+00 : f32
    %cst_452 = arith.constant 0.000000e+00 : f32
    %989 = vector.broadcast %cst_451 : f32 to vector<16x16xf32>
    %990 = vector.broadcast %cst_452 : f32 to vector<16x16xf32>
    %991 = arith.select %988, %989, %990 : vector<16x16xi1>, vector<16x16xf32>
    %cst_453 = arith.constant -6.000000e-01 : f32
    %992 = vector.broadcast %cst_453 : f32 to vector<16x16xf32>
    %993 = arith.cmpf oge, %948, %992 : vector<16x16xf32>
    %cst_454 = arith.constant -2.000000e-01 : f32
    %994 = vector.broadcast %cst_454 : f32 to vector<16x16xf32>
    %995 = arith.cmpf olt, %948, %994 : vector<16x16xf32>
    %996 = arith.andi %993, %995 : vector<16x16xi1>
    %cst_455 = arith.constant 1.000000e+00 : f32
    %cst_456 = arith.constant 0.000000e+00 : f32
    %997 = vector.broadcast %cst_455 : f32 to vector<16x16xf32>
    %998 = vector.broadcast %cst_456 : f32 to vector<16x16xf32>
    %999 = arith.select %996, %997, %998 : vector<16x16xi1>, vector<16x16xf32>
    %cst_457 = arith.constant -2.000000e-01 : f32
    %1000 = vector.broadcast %cst_457 : f32 to vector<16x16xf32>
    %1001 = arith.cmpf oge, %948, %1000 : vector<16x16xf32>
    %cst_458 = arith.constant 2.000000e-01 : f32
    %1002 = vector.broadcast %cst_458 : f32 to vector<16x16xf32>
    %1003 = arith.cmpf olt, %948, %1002 : vector<16x16xf32>
    %1004 = arith.andi %1001, %1003 : vector<16x16xi1>
    %cst_459 = arith.constant 1.000000e+00 : f32
    %cst_460 = arith.constant 0.000000e+00 : f32
    %1005 = vector.broadcast %cst_459 : f32 to vector<16x16xf32>
    %1006 = vector.broadcast %cst_460 : f32 to vector<16x16xf32>
    %1007 = arith.select %1004, %1005, %1006 : vector<16x16xi1>, vector<16x16xf32>
    %cst_461 = arith.constant 2.000000e-01 : f32
    %1008 = vector.broadcast %cst_461 : f32 to vector<16x16xf32>
    %1009 = arith.cmpf oge, %948, %1008 : vector<16x16xf32>
    %cst_462 = arith.constant 6.000000e-01 : f32
    %1010 = vector.broadcast %cst_462 : f32 to vector<16x16xf32>
    %1011 = arith.cmpf olt, %948, %1010 : vector<16x16xf32>
    %1012 = arith.andi %1009, %1011 : vector<16x16xi1>
    %cst_463 = arith.constant 1.000000e+00 : f32
    %cst_464 = arith.constant 0.000000e+00 : f32
    %1013 = vector.broadcast %cst_463 : f32 to vector<16x16xf32>
    %1014 = vector.broadcast %cst_464 : f32 to vector<16x16xf32>
    %1015 = arith.select %1012, %1013, %1014 : vector<16x16xi1>, vector<16x16xf32>
    %cst_465 = arith.constant 6.000000e-01 : f32
    %1016 = vector.broadcast %cst_465 : f32 to vector<16x16xf32>
    %1017 = arith.cmpf oge, %948, %1016 : vector<16x16xf32>
    %cst_466 = arith.constant 1.000000e+00 : f32
    %1018 = vector.broadcast %cst_466 : f32 to vector<16x16xf32>
    %1019 = arith.cmpf olt, %948, %1018 : vector<16x16xf32>
    %1020 = arith.andi %1017, %1019 : vector<16x16xi1>
    %cst_467 = arith.constant 1.000000e+00 : f32
    %cst_468 = arith.constant 0.000000e+00 : f32
    %1021 = vector.broadcast %cst_467 : f32 to vector<16x16xf32>
    %1022 = vector.broadcast %cst_468 : f32 to vector<16x16xf32>
    %1023 = arith.select %1020, %1021, %1022 : vector<16x16xi1>, vector<16x16xf32>
    %cst_469 = arith.constant 1.000000e+00 : f32
    %1024 = vector.broadcast %cst_469 : f32 to vector<16x16xf32>
    %1025 = arith.cmpf oge, %948, %1024 : vector<16x16xf32>
    %cst_470 = arith.constant 1.400000e+00 : f32
    %1026 = vector.broadcast %cst_470 : f32 to vector<16x16xf32>
    %1027 = arith.cmpf olt, %948, %1026 : vector<16x16xf32>
    %1028 = arith.andi %1025, %1027 : vector<16x16xi1>
    %cst_471 = arith.constant 1.000000e+00 : f32
    %cst_472 = arith.constant 0.000000e+00 : f32
    %1029 = vector.broadcast %cst_471 : f32 to vector<16x16xf32>
    %1030 = vector.broadcast %cst_472 : f32 to vector<16x16xf32>
    %1031 = arith.select %1028, %1029, %1030 : vector<16x16xi1>, vector<16x16xf32>
    %cst_473 = arith.constant 1.400000e+00 : f32
    %1032 = vector.broadcast %cst_473 : f32 to vector<16x16xf32>
    %1033 = arith.cmpf oge, %948, %1032 : vector<16x16xf32>
    %cst_474 = arith.constant 1.800000e+00 : f32
    %1034 = vector.broadcast %cst_474 : f32 to vector<16x16xf32>
    %1035 = arith.cmpf olt, %948, %1034 : vector<16x16xf32>
    %1036 = arith.andi %1033, %1035 : vector<16x16xi1>
    %cst_475 = arith.constant 1.000000e+00 : f32
    %cst_476 = arith.constant 0.000000e+00 : f32
    %1037 = vector.broadcast %cst_475 : f32 to vector<16x16xf32>
    %1038 = vector.broadcast %cst_476 : f32 to vector<16x16xf32>
    %1039 = arith.select %1036, %1037, %1038 : vector<16x16xi1>, vector<16x16xf32>
    %cst_477 = arith.constant 1.800000e+00 : f32
    %1040 = vector.broadcast %cst_477 : f32 to vector<16x16xf32>
    %1041 = arith.cmpf oge, %948, %1040 : vector<16x16xf32>
    %cst_478 = arith.constant 2.200000e+00 : f32
    %1042 = vector.broadcast %cst_478 : f32 to vector<16x16xf32>
    %1043 = arith.cmpf olt, %948, %1042 : vector<16x16xf32>
    %1044 = arith.andi %1041, %1043 : vector<16x16xi1>
    %cst_479 = arith.constant 1.000000e+00 : f32
    %cst_480 = arith.constant 0.000000e+00 : f32
    %1045 = vector.broadcast %cst_479 : f32 to vector<16x16xf32>
    %1046 = vector.broadcast %cst_480 : f32 to vector<16x16xf32>
    %1047 = arith.select %1044, %1045, %1046 : vector<16x16xi1>, vector<16x16xf32>
    %cst_481 = arith.constant -2.200000e+00 : f32
    %1048 = vector.broadcast %cst_481 : f32 to vector<16x16xf32>
    %1049 = arith.subf %948, %1048 : vector<16x16xf32>
    %cst_482 = arith.constant 2.500000e+00 : f32
    %1050 = vector.broadcast %cst_482 : f32 to vector<16x16xf32>
    %1051 = arith.mulf %1049, %1050 : vector<16x16xf32>
    %1052 = arith.mulf %1051, %967 : vector<16x16xf32>
    %cst_483 = arith.constant -1.400000e+00 : f32
    %1053 = vector.broadcast %cst_483 : f32 to vector<16x16xf32>
    %1054 = arith.subf %1053, %948 : vector<16x16xf32>
    %cst_484 = arith.constant 2.500000e+00 : f32
    %1055 = vector.broadcast %cst_484 : f32 to vector<16x16xf32>
    %1056 = arith.mulf %1054, %1055 : vector<16x16xf32>
    %1057 = arith.mulf %1056, %975 : vector<16x16xf32>
    %1058 = arith.addf %1052, %1057 : vector<16x16xf32>
    %cst_485 = arith.constant -1.800000e+00 : f32
    %1059 = vector.broadcast %cst_485 : f32 to vector<16x16xf32>
    %1060 = arith.subf %948, %1059 : vector<16x16xf32>
    %cst_486 = arith.constant 2.500000e+00 : f32
    %1061 = vector.broadcast %cst_486 : f32 to vector<16x16xf32>
    %1062 = arith.mulf %1060, %1061 : vector<16x16xf32>
    %1063 = arith.mulf %1062, %975 : vector<16x16xf32>
    %cst_487 = arith.constant -1.000000e+00 : f32
    %1064 = vector.broadcast %cst_487 : f32 to vector<16x16xf32>
    %1065 = arith.subf %1064, %948 : vector<16x16xf32>
    %cst_488 = arith.constant 2.500000e+00 : f32
    %1066 = vector.broadcast %cst_488 : f32 to vector<16x16xf32>
    %1067 = arith.mulf %1065, %1066 : vector<16x16xf32>
    %1068 = arith.mulf %1067, %983 : vector<16x16xf32>
    %1069 = arith.addf %1063, %1068 : vector<16x16xf32>
    %cst_489 = arith.constant -1.400000e+00 : f32
    %1070 = vector.broadcast %cst_489 : f32 to vector<16x16xf32>
    %1071 = arith.subf %948, %1070 : vector<16x16xf32>
    %cst_490 = arith.constant 2.500000e+00 : f32
    %1072 = vector.broadcast %cst_490 : f32 to vector<16x16xf32>
    %1073 = arith.mulf %1071, %1072 : vector<16x16xf32>
    %1074 = arith.mulf %1073, %983 : vector<16x16xf32>
    %cst_491 = arith.constant -6.000000e-01 : f32
    %1075 = vector.broadcast %cst_491 : f32 to vector<16x16xf32>
    %1076 = arith.subf %1075, %948 : vector<16x16xf32>
    %cst_492 = arith.constant 2.500000e+00 : f32
    %1077 = vector.broadcast %cst_492 : f32 to vector<16x16xf32>
    %1078 = arith.mulf %1076, %1077 : vector<16x16xf32>
    %1079 = arith.mulf %1078, %991 : vector<16x16xf32>
    %1080 = arith.addf %1074, %1079 : vector<16x16xf32>
    %cst_493 = arith.constant -1.000000e+00 : f32
    %1081 = vector.broadcast %cst_493 : f32 to vector<16x16xf32>
    %1082 = arith.subf %948, %1081 : vector<16x16xf32>
    %cst_494 = arith.constant 2.500000e+00 : f32
    %1083 = vector.broadcast %cst_494 : f32 to vector<16x16xf32>
    %1084 = arith.mulf %1082, %1083 : vector<16x16xf32>
    %1085 = arith.mulf %1084, %991 : vector<16x16xf32>
    %cst_495 = arith.constant -2.000000e-01 : f32
    %1086 = vector.broadcast %cst_495 : f32 to vector<16x16xf32>
    %1087 = arith.subf %1086, %948 : vector<16x16xf32>
    %cst_496 = arith.constant 2.500000e+00 : f32
    %1088 = vector.broadcast %cst_496 : f32 to vector<16x16xf32>
    %1089 = arith.mulf %1087, %1088 : vector<16x16xf32>
    %1090 = arith.mulf %1089, %999 : vector<16x16xf32>
    %1091 = arith.addf %1085, %1090 : vector<16x16xf32>
    %cst_497 = arith.constant -6.000000e-01 : f32
    %1092 = vector.broadcast %cst_497 : f32 to vector<16x16xf32>
    %1093 = arith.subf %948, %1092 : vector<16x16xf32>
    %cst_498 = arith.constant 2.500000e+00 : f32
    %1094 = vector.broadcast %cst_498 : f32 to vector<16x16xf32>
    %1095 = arith.mulf %1093, %1094 : vector<16x16xf32>
    %1096 = arith.mulf %1095, %999 : vector<16x16xf32>
    %cst_499 = arith.constant 2.000000e-01 : f32
    %1097 = vector.broadcast %cst_499 : f32 to vector<16x16xf32>
    %1098 = arith.subf %1097, %948 : vector<16x16xf32>
    %cst_500 = arith.constant 2.500000e+00 : f32
    %1099 = vector.broadcast %cst_500 : f32 to vector<16x16xf32>
    %1100 = arith.mulf %1098, %1099 : vector<16x16xf32>
    %1101 = arith.mulf %1100, %1007 : vector<16x16xf32>
    %1102 = arith.addf %1096, %1101 : vector<16x16xf32>
    %cst_501 = arith.constant -2.000000e-01 : f32
    %1103 = vector.broadcast %cst_501 : f32 to vector<16x16xf32>
    %1104 = arith.subf %948, %1103 : vector<16x16xf32>
    %cst_502 = arith.constant 2.500000e+00 : f32
    %1105 = vector.broadcast %cst_502 : f32 to vector<16x16xf32>
    %1106 = arith.mulf %1104, %1105 : vector<16x16xf32>
    %1107 = arith.mulf %1106, %1007 : vector<16x16xf32>
    %cst_503 = arith.constant 6.000000e-01 : f32
    %1108 = vector.broadcast %cst_503 : f32 to vector<16x16xf32>
    %1109 = arith.subf %1108, %948 : vector<16x16xf32>
    %cst_504 = arith.constant 2.500000e+00 : f32
    %1110 = vector.broadcast %cst_504 : f32 to vector<16x16xf32>
    %1111 = arith.mulf %1109, %1110 : vector<16x16xf32>
    %1112 = arith.mulf %1111, %1015 : vector<16x16xf32>
    %1113 = arith.addf %1107, %1112 : vector<16x16xf32>
    %cst_505 = arith.constant 2.000000e-01 : f32
    %1114 = vector.broadcast %cst_505 : f32 to vector<16x16xf32>
    %1115 = arith.subf %948, %1114 : vector<16x16xf32>
    %cst_506 = arith.constant 2.500000e+00 : f32
    %1116 = vector.broadcast %cst_506 : f32 to vector<16x16xf32>
    %1117 = arith.mulf %1115, %1116 : vector<16x16xf32>
    %1118 = arith.mulf %1117, %1015 : vector<16x16xf32>
    %cst_507 = arith.constant 1.000000e+00 : f32
    %1119 = vector.broadcast %cst_507 : f32 to vector<16x16xf32>
    %1120 = arith.subf %1119, %948 : vector<16x16xf32>
    %cst_508 = arith.constant 2.500000e+00 : f32
    %1121 = vector.broadcast %cst_508 : f32 to vector<16x16xf32>
    %1122 = arith.mulf %1120, %1121 : vector<16x16xf32>
    %1123 = arith.mulf %1122, %1023 : vector<16x16xf32>
    %1124 = arith.addf %1118, %1123 : vector<16x16xf32>
    %cst_509 = arith.constant 6.000000e-01 : f32
    %1125 = vector.broadcast %cst_509 : f32 to vector<16x16xf32>
    %1126 = arith.subf %948, %1125 : vector<16x16xf32>
    %cst_510 = arith.constant 2.500000e+00 : f32
    %1127 = vector.broadcast %cst_510 : f32 to vector<16x16xf32>
    %1128 = arith.mulf %1126, %1127 : vector<16x16xf32>
    %1129 = arith.mulf %1128, %1023 : vector<16x16xf32>
    %cst_511 = arith.constant 1.400000e+00 : f32
    %1130 = vector.broadcast %cst_511 : f32 to vector<16x16xf32>
    %1131 = arith.subf %1130, %948 : vector<16x16xf32>
    %cst_512 = arith.constant 2.500000e+00 : f32
    %1132 = vector.broadcast %cst_512 : f32 to vector<16x16xf32>
    %1133 = arith.mulf %1131, %1132 : vector<16x16xf32>
    %1134 = arith.mulf %1133, %1031 : vector<16x16xf32>
    %1135 = arith.addf %1129, %1134 : vector<16x16xf32>
    %cst_513 = arith.constant 1.000000e+00 : f32
    %1136 = vector.broadcast %cst_513 : f32 to vector<16x16xf32>
    %1137 = arith.subf %948, %1136 : vector<16x16xf32>
    %cst_514 = arith.constant 2.500000e+00 : f32
    %1138 = vector.broadcast %cst_514 : f32 to vector<16x16xf32>
    %1139 = arith.mulf %1137, %1138 : vector<16x16xf32>
    %1140 = arith.mulf %1139, %1031 : vector<16x16xf32>
    %cst_515 = arith.constant 1.800000e+00 : f32
    %1141 = vector.broadcast %cst_515 : f32 to vector<16x16xf32>
    %1142 = arith.subf %1141, %948 : vector<16x16xf32>
    %cst_516 = arith.constant 2.500000e+00 : f32
    %1143 = vector.broadcast %cst_516 : f32 to vector<16x16xf32>
    %1144 = arith.mulf %1142, %1143 : vector<16x16xf32>
    %1145 = arith.mulf %1144, %1039 : vector<16x16xf32>
    %1146 = arith.addf %1140, %1145 : vector<16x16xf32>
    %cst_517 = arith.constant 1.400000e+00 : f32
    %1147 = vector.broadcast %cst_517 : f32 to vector<16x16xf32>
    %1148 = arith.subf %948, %1147 : vector<16x16xf32>
    %cst_518 = arith.constant 2.500000e+00 : f32
    %1149 = vector.broadcast %cst_518 : f32 to vector<16x16xf32>
    %1150 = arith.mulf %1148, %1149 : vector<16x16xf32>
    %1151 = arith.mulf %1150, %1039 : vector<16x16xf32>
    %cst_519 = arith.constant 2.200000e+00 : f32
    %1152 = vector.broadcast %cst_519 : f32 to vector<16x16xf32>
    %1153 = arith.subf %1152, %948 : vector<16x16xf32>
    %cst_520 = arith.constant 2.500000e+00 : f32
    %1154 = vector.broadcast %cst_520 : f32 to vector<16x16xf32>
    %1155 = arith.mulf %1153, %1154 : vector<16x16xf32>
    %1156 = arith.mulf %1155, %1047 : vector<16x16xf32>
    %1157 = arith.addf %1151, %1156 : vector<16x16xf32>
    %cst_521 = arith.constant -2.200000e+00 : f32
    %1158 = vector.broadcast %cst_521 : f32 to vector<16x16xf32>
    %1159 = arith.subf %948, %1158 : vector<16x16xf32>
    %cst_522 = arith.constant 1.250000e+00 : f32
    %1160 = vector.broadcast %cst_522 : f32 to vector<16x16xf32>
    %1161 = arith.mulf %1159, %1160 : vector<16x16xf32>
    %1162 = arith.mulf %1161, %1058 : vector<16x16xf32>
    %cst_523 = arith.constant -1.000000e+00 : f32
    %1163 = vector.broadcast %cst_523 : f32 to vector<16x16xf32>
    %1164 = arith.subf %1163, %948 : vector<16x16xf32>
    %cst_524 = arith.constant 1.250000e+00 : f32
    %1165 = vector.broadcast %cst_524 : f32 to vector<16x16xf32>
    %1166 = arith.mulf %1164, %1165 : vector<16x16xf32>
    %1167 = arith.mulf %1166, %1069 : vector<16x16xf32>
    %1168 = arith.addf %1162, %1167 : vector<16x16xf32>
    %cst_525 = arith.constant -1.800000e+00 : f32
    %1169 = vector.broadcast %cst_525 : f32 to vector<16x16xf32>
    %1170 = arith.subf %948, %1169 : vector<16x16xf32>
    %cst_526 = arith.constant 1.250000e+00 : f32
    %1171 = vector.broadcast %cst_526 : f32 to vector<16x16xf32>
    %1172 = arith.mulf %1170, %1171 : vector<16x16xf32>
    %1173 = arith.mulf %1172, %1069 : vector<16x16xf32>
    %cst_527 = arith.constant -6.000000e-01 : f32
    %1174 = vector.broadcast %cst_527 : f32 to vector<16x16xf32>
    %1175 = arith.subf %1174, %948 : vector<16x16xf32>
    %cst_528 = arith.constant 1.250000e+00 : f32
    %1176 = vector.broadcast %cst_528 : f32 to vector<16x16xf32>
    %1177 = arith.mulf %1175, %1176 : vector<16x16xf32>
    %1178 = arith.mulf %1177, %1080 : vector<16x16xf32>
    %1179 = arith.addf %1173, %1178 : vector<16x16xf32>
    %cst_529 = arith.constant -1.400000e+00 : f32
    %1180 = vector.broadcast %cst_529 : f32 to vector<16x16xf32>
    %1181 = arith.subf %948, %1180 : vector<16x16xf32>
    %cst_530 = arith.constant 1.250000e+00 : f32
    %1182 = vector.broadcast %cst_530 : f32 to vector<16x16xf32>
    %1183 = arith.mulf %1181, %1182 : vector<16x16xf32>
    %1184 = arith.mulf %1183, %1080 : vector<16x16xf32>
    %cst_531 = arith.constant -2.000000e-01 : f32
    %1185 = vector.broadcast %cst_531 : f32 to vector<16x16xf32>
    %1186 = arith.subf %1185, %948 : vector<16x16xf32>
    %cst_532 = arith.constant 1.250000e+00 : f32
    %1187 = vector.broadcast %cst_532 : f32 to vector<16x16xf32>
    %1188 = arith.mulf %1186, %1187 : vector<16x16xf32>
    %1189 = arith.mulf %1188, %1091 : vector<16x16xf32>
    %1190 = arith.addf %1184, %1189 : vector<16x16xf32>
    %cst_533 = arith.constant -1.000000e+00 : f32
    %1191 = vector.broadcast %cst_533 : f32 to vector<16x16xf32>
    %1192 = arith.subf %948, %1191 : vector<16x16xf32>
    %cst_534 = arith.constant 1.250000e+00 : f32
    %1193 = vector.broadcast %cst_534 : f32 to vector<16x16xf32>
    %1194 = arith.mulf %1192, %1193 : vector<16x16xf32>
    %1195 = arith.mulf %1194, %1091 : vector<16x16xf32>
    %cst_535 = arith.constant 2.000000e-01 : f32
    %1196 = vector.broadcast %cst_535 : f32 to vector<16x16xf32>
    %1197 = arith.subf %1196, %948 : vector<16x16xf32>
    %cst_536 = arith.constant 1.250000e+00 : f32
    %1198 = vector.broadcast %cst_536 : f32 to vector<16x16xf32>
    %1199 = arith.mulf %1197, %1198 : vector<16x16xf32>
    %1200 = arith.mulf %1199, %1102 : vector<16x16xf32>
    %1201 = arith.addf %1195, %1200 : vector<16x16xf32>
    %cst_537 = arith.constant -6.000000e-01 : f32
    %1202 = vector.broadcast %cst_537 : f32 to vector<16x16xf32>
    %1203 = arith.subf %948, %1202 : vector<16x16xf32>
    %cst_538 = arith.constant 1.250000e+00 : f32
    %1204 = vector.broadcast %cst_538 : f32 to vector<16x16xf32>
    %1205 = arith.mulf %1203, %1204 : vector<16x16xf32>
    %1206 = arith.mulf %1205, %1102 : vector<16x16xf32>
    %cst_539 = arith.constant 6.000000e-01 : f32
    %1207 = vector.broadcast %cst_539 : f32 to vector<16x16xf32>
    %1208 = arith.subf %1207, %948 : vector<16x16xf32>
    %cst_540 = arith.constant 1.250000e+00 : f32
    %1209 = vector.broadcast %cst_540 : f32 to vector<16x16xf32>
    %1210 = arith.mulf %1208, %1209 : vector<16x16xf32>
    %1211 = arith.mulf %1210, %1113 : vector<16x16xf32>
    %1212 = arith.addf %1206, %1211 : vector<16x16xf32>
    %cst_541 = arith.constant -2.000000e-01 : f32
    %1213 = vector.broadcast %cst_541 : f32 to vector<16x16xf32>
    %1214 = arith.subf %948, %1213 : vector<16x16xf32>
    %cst_542 = arith.constant 1.250000e+00 : f32
    %1215 = vector.broadcast %cst_542 : f32 to vector<16x16xf32>
    %1216 = arith.mulf %1214, %1215 : vector<16x16xf32>
    %1217 = arith.mulf %1216, %1113 : vector<16x16xf32>
    %cst_543 = arith.constant 1.000000e+00 : f32
    %1218 = vector.broadcast %cst_543 : f32 to vector<16x16xf32>
    %1219 = arith.subf %1218, %948 : vector<16x16xf32>
    %cst_544 = arith.constant 1.250000e+00 : f32
    %1220 = vector.broadcast %cst_544 : f32 to vector<16x16xf32>
    %1221 = arith.mulf %1219, %1220 : vector<16x16xf32>
    %1222 = arith.mulf %1221, %1124 : vector<16x16xf32>
    %1223 = arith.addf %1217, %1222 : vector<16x16xf32>
    %cst_545 = arith.constant 2.000000e-01 : f32
    %1224 = vector.broadcast %cst_545 : f32 to vector<16x16xf32>
    %1225 = arith.subf %948, %1224 : vector<16x16xf32>
    %cst_546 = arith.constant 1.250000e+00 : f32
    %1226 = vector.broadcast %cst_546 : f32 to vector<16x16xf32>
    %1227 = arith.mulf %1225, %1226 : vector<16x16xf32>
    %1228 = arith.mulf %1227, %1124 : vector<16x16xf32>
    %cst_547 = arith.constant 1.400000e+00 : f32
    %1229 = vector.broadcast %cst_547 : f32 to vector<16x16xf32>
    %1230 = arith.subf %1229, %948 : vector<16x16xf32>
    %cst_548 = arith.constant 1.250000e+00 : f32
    %1231 = vector.broadcast %cst_548 : f32 to vector<16x16xf32>
    %1232 = arith.mulf %1230, %1231 : vector<16x16xf32>
    %1233 = arith.mulf %1232, %1135 : vector<16x16xf32>
    %1234 = arith.addf %1228, %1233 : vector<16x16xf32>
    %cst_549 = arith.constant 6.000000e-01 : f32
    %1235 = vector.broadcast %cst_549 : f32 to vector<16x16xf32>
    %1236 = arith.subf %948, %1235 : vector<16x16xf32>
    %cst_550 = arith.constant 1.250000e+00 : f32
    %1237 = vector.broadcast %cst_550 : f32 to vector<16x16xf32>
    %1238 = arith.mulf %1236, %1237 : vector<16x16xf32>
    %1239 = arith.mulf %1238, %1135 : vector<16x16xf32>
    %cst_551 = arith.constant 1.800000e+00 : f32
    %1240 = vector.broadcast %cst_551 : f32 to vector<16x16xf32>
    %1241 = arith.subf %1240, %948 : vector<16x16xf32>
    %cst_552 = arith.constant 1.250000e+00 : f32
    %1242 = vector.broadcast %cst_552 : f32 to vector<16x16xf32>
    %1243 = arith.mulf %1241, %1242 : vector<16x16xf32>
    %1244 = arith.mulf %1243, %1146 : vector<16x16xf32>
    %1245 = arith.addf %1239, %1244 : vector<16x16xf32>
    %cst_553 = arith.constant 1.000000e+00 : f32
    %1246 = vector.broadcast %cst_553 : f32 to vector<16x16xf32>
    %1247 = arith.subf %948, %1246 : vector<16x16xf32>
    %cst_554 = arith.constant 1.250000e+00 : f32
    %1248 = vector.broadcast %cst_554 : f32 to vector<16x16xf32>
    %1249 = arith.mulf %1247, %1248 : vector<16x16xf32>
    %1250 = arith.mulf %1249, %1146 : vector<16x16xf32>
    %cst_555 = arith.constant 2.200000e+00 : f32
    %1251 = vector.broadcast %cst_555 : f32 to vector<16x16xf32>
    %1252 = arith.subf %1251, %948 : vector<16x16xf32>
    %cst_556 = arith.constant 1.250000e+00 : f32
    %1253 = vector.broadcast %cst_556 : f32 to vector<16x16xf32>
    %1254 = arith.mulf %1252, %1253 : vector<16x16xf32>
    %1255 = arith.mulf %1254, %1157 : vector<16x16xf32>
    %1256 = arith.addf %1250, %1255 : vector<16x16xf32>
    %cst_557 = arith.constant -2.200000e+00 : f32
    %1257 = vector.broadcast %cst_557 : f32 to vector<16x16xf32>
    %1258 = arith.subf %948, %1257 : vector<16x16xf32>
    %cst_558 = arith.constant 0.833333313 : f32
    %1259 = vector.broadcast %cst_558 : f32 to vector<16x16xf32>
    %1260 = arith.mulf %1258, %1259 : vector<16x16xf32>
    %1261 = arith.mulf %1260, %1168 : vector<16x16xf32>
    %cst_559 = arith.constant -6.000000e-01 : f32
    %1262 = vector.broadcast %cst_559 : f32 to vector<16x16xf32>
    %1263 = arith.subf %1262, %948 : vector<16x16xf32>
    %cst_560 = arith.constant 0.833333313 : f32
    %1264 = vector.broadcast %cst_560 : f32 to vector<16x16xf32>
    %1265 = arith.mulf %1263, %1264 : vector<16x16xf32>
    %1266 = arith.mulf %1265, %1179 : vector<16x16xf32>
    %1267 = arith.addf %1261, %1266 : vector<16x16xf32>
    %cst_561 = arith.constant -1.800000e+00 : f32
    %1268 = vector.broadcast %cst_561 : f32 to vector<16x16xf32>
    %1269 = arith.subf %948, %1268 : vector<16x16xf32>
    %cst_562 = arith.constant 0.833333313 : f32
    %1270 = vector.broadcast %cst_562 : f32 to vector<16x16xf32>
    %1271 = arith.mulf %1269, %1270 : vector<16x16xf32>
    %1272 = arith.mulf %1271, %1179 : vector<16x16xf32>
    %cst_563 = arith.constant -2.000000e-01 : f32
    %1273 = vector.broadcast %cst_563 : f32 to vector<16x16xf32>
    %1274 = arith.subf %1273, %948 : vector<16x16xf32>
    %cst_564 = arith.constant 0.833333313 : f32
    %1275 = vector.broadcast %cst_564 : f32 to vector<16x16xf32>
    %1276 = arith.mulf %1274, %1275 : vector<16x16xf32>
    %1277 = arith.mulf %1276, %1190 : vector<16x16xf32>
    %1278 = arith.addf %1272, %1277 : vector<16x16xf32>
    %cst_565 = arith.constant -1.400000e+00 : f32
    %1279 = vector.broadcast %cst_565 : f32 to vector<16x16xf32>
    %1280 = arith.subf %948, %1279 : vector<16x16xf32>
    %cst_566 = arith.constant 0.833333313 : f32
    %1281 = vector.broadcast %cst_566 : f32 to vector<16x16xf32>
    %1282 = arith.mulf %1280, %1281 : vector<16x16xf32>
    %1283 = arith.mulf %1282, %1190 : vector<16x16xf32>
    %cst_567 = arith.constant 2.000000e-01 : f32
    %1284 = vector.broadcast %cst_567 : f32 to vector<16x16xf32>
    %1285 = arith.subf %1284, %948 : vector<16x16xf32>
    %cst_568 = arith.constant 0.833333313 : f32
    %1286 = vector.broadcast %cst_568 : f32 to vector<16x16xf32>
    %1287 = arith.mulf %1285, %1286 : vector<16x16xf32>
    %1288 = arith.mulf %1287, %1201 : vector<16x16xf32>
    %1289 = arith.addf %1283, %1288 : vector<16x16xf32>
    %cst_569 = arith.constant -1.000000e+00 : f32
    %1290 = vector.broadcast %cst_569 : f32 to vector<16x16xf32>
    %1291 = arith.subf %948, %1290 : vector<16x16xf32>
    %cst_570 = arith.constant 0.833333313 : f32
    %1292 = vector.broadcast %cst_570 : f32 to vector<16x16xf32>
    %1293 = arith.mulf %1291, %1292 : vector<16x16xf32>
    %1294 = arith.mulf %1293, %1201 : vector<16x16xf32>
    %cst_571 = arith.constant 6.000000e-01 : f32
    %1295 = vector.broadcast %cst_571 : f32 to vector<16x16xf32>
    %1296 = arith.subf %1295, %948 : vector<16x16xf32>
    %cst_572 = arith.constant 0.833333313 : f32
    %1297 = vector.broadcast %cst_572 : f32 to vector<16x16xf32>
    %1298 = arith.mulf %1296, %1297 : vector<16x16xf32>
    %1299 = arith.mulf %1298, %1212 : vector<16x16xf32>
    %1300 = arith.addf %1294, %1299 : vector<16x16xf32>
    %cst_573 = arith.constant -6.000000e-01 : f32
    %1301 = vector.broadcast %cst_573 : f32 to vector<16x16xf32>
    %1302 = arith.subf %948, %1301 : vector<16x16xf32>
    %cst_574 = arith.constant 0.833333313 : f32
    %1303 = vector.broadcast %cst_574 : f32 to vector<16x16xf32>
    %1304 = arith.mulf %1302, %1303 : vector<16x16xf32>
    %1305 = arith.mulf %1304, %1212 : vector<16x16xf32>
    %cst_575 = arith.constant 1.000000e+00 : f32
    %1306 = vector.broadcast %cst_575 : f32 to vector<16x16xf32>
    %1307 = arith.subf %1306, %948 : vector<16x16xf32>
    %cst_576 = arith.constant 0.833333313 : f32
    %1308 = vector.broadcast %cst_576 : f32 to vector<16x16xf32>
    %1309 = arith.mulf %1307, %1308 : vector<16x16xf32>
    %1310 = arith.mulf %1309, %1223 : vector<16x16xf32>
    %1311 = arith.addf %1305, %1310 : vector<16x16xf32>
    %cst_577 = arith.constant -2.000000e-01 : f32
    %1312 = vector.broadcast %cst_577 : f32 to vector<16x16xf32>
    %1313 = arith.subf %948, %1312 : vector<16x16xf32>
    %cst_578 = arith.constant 0.833333313 : f32
    %1314 = vector.broadcast %cst_578 : f32 to vector<16x16xf32>
    %1315 = arith.mulf %1313, %1314 : vector<16x16xf32>
    %1316 = arith.mulf %1315, %1223 : vector<16x16xf32>
    %cst_579 = arith.constant 1.400000e+00 : f32
    %1317 = vector.broadcast %cst_579 : f32 to vector<16x16xf32>
    %1318 = arith.subf %1317, %948 : vector<16x16xf32>
    %cst_580 = arith.constant 0.833333313 : f32
    %1319 = vector.broadcast %cst_580 : f32 to vector<16x16xf32>
    %1320 = arith.mulf %1318, %1319 : vector<16x16xf32>
    %1321 = arith.mulf %1320, %1234 : vector<16x16xf32>
    %1322 = arith.addf %1316, %1321 : vector<16x16xf32>
    %cst_581 = arith.constant 2.000000e-01 : f32
    %1323 = vector.broadcast %cst_581 : f32 to vector<16x16xf32>
    %1324 = arith.subf %948, %1323 : vector<16x16xf32>
    %cst_582 = arith.constant 0.833333313 : f32
    %1325 = vector.broadcast %cst_582 : f32 to vector<16x16xf32>
    %1326 = arith.mulf %1324, %1325 : vector<16x16xf32>
    %1327 = arith.mulf %1326, %1234 : vector<16x16xf32>
    %cst_583 = arith.constant 1.800000e+00 : f32
    %1328 = vector.broadcast %cst_583 : f32 to vector<16x16xf32>
    %1329 = arith.subf %1328, %948 : vector<16x16xf32>
    %cst_584 = arith.constant 0.833333313 : f32
    %1330 = vector.broadcast %cst_584 : f32 to vector<16x16xf32>
    %1331 = arith.mulf %1329, %1330 : vector<16x16xf32>
    %1332 = arith.mulf %1331, %1245 : vector<16x16xf32>
    %1333 = arith.addf %1327, %1332 : vector<16x16xf32>
    %cst_585 = arith.constant 6.000000e-01 : f32
    %1334 = vector.broadcast %cst_585 : f32 to vector<16x16xf32>
    %1335 = arith.subf %948, %1334 : vector<16x16xf32>
    %cst_586 = arith.constant 0.833333313 : f32
    %1336 = vector.broadcast %cst_586 : f32 to vector<16x16xf32>
    %1337 = arith.mulf %1335, %1336 : vector<16x16xf32>
    %1338 = arith.mulf %1337, %1245 : vector<16x16xf32>
    %cst_587 = arith.constant 2.200000e+00 : f32
    %1339 = vector.broadcast %cst_587 : f32 to vector<16x16xf32>
    %1340 = arith.subf %1339, %948 : vector<16x16xf32>
    %cst_588 = arith.constant 0.833333313 : f32
    %1341 = vector.broadcast %cst_588 : f32 to vector<16x16xf32>
    %1342 = arith.mulf %1340, %1341 : vector<16x16xf32>
    %1343 = arith.mulf %1342, %1256 : vector<16x16xf32>
    %1344 = arith.addf %1338, %1343 : vector<16x16xf32>
    %c0_589 = arith.constant 0 : index
    %c0_590 = arith.constant 0 : index
    %c0_591 = arith.constant 0 : index
    %1345 = vector.load %arg15[%c0_589, %c0_590, %c0_591] : memref<8x16x16xf32, #tpu.memory_space<vmem>>, vector<1x16x16xf32>
    %1346 = vector.shape_cast %1345 : vector<1x16x16xf32> to vector<16x16xf32>
    %cst_592 = arith.constant dense<0.000000e+00> : vector<16x16xf32>
    %1347 = tpu.matmul %1267, %1346, %cst_592 {dimension_numbers = #tpu.dot_dimension_numbers<[1], [0], [0], [1], [0, 0, 1, 1], [], []>} : vector<16x16xf32>, vector<16x16xf32>, vector<16x16xf32> -> vector<16x16xf32>
    %1348 = arith.addf %959, %1347 : vector<16x16xf32>
    %c1_593 = arith.constant 1 : index
    %c0_594 = arith.constant 0 : index
    %c0_595 = arith.constant 0 : index
    %1349 = vector.load %arg15[%c1_593, %c0_594, %c0_595] : memref<8x16x16xf32, #tpu.memory_space<vmem>>, vector<1x16x16xf32>
    %1350 = vector.shape_cast %1349 : vector<1x16x16xf32> to vector<16x16xf32>
    %cst_596 = arith.constant dense<0.000000e+00> : vector<16x16xf32>
    %1351 = tpu.matmul %1278, %1350, %cst_596 {dimension_numbers = #tpu.dot_dimension_numbers<[1], [0], [0], [1], [0, 0, 1, 1], [], []>} : vector<16x16xf32>, vector<16x16xf32>, vector<16x16xf32> -> vector<16x16xf32>
    %1352 = arith.addf %1348, %1351 : vector<16x16xf32>
    %c2_597 = arith.constant 2 : index
    %c0_598 = arith.constant 0 : index
    %c0_599 = arith.constant 0 : index
    %1353 = vector.load %arg15[%c2_597, %c0_598, %c0_599] : memref<8x16x16xf32, #tpu.memory_space<vmem>>, vector<1x16x16xf32>
    %1354 = vector.shape_cast %1353 : vector<1x16x16xf32> to vector<16x16xf32>
    %cst_600 = arith.constant dense<0.000000e+00> : vector<16x16xf32>
    %1355 = tpu.matmul %1289, %1354, %cst_600 {dimension_numbers = #tpu.dot_dimension_numbers<[1], [0], [0], [1], [0, 0, 1, 1], [], []>} : vector<16x16xf32>, vector<16x16xf32>, vector<16x16xf32> -> vector<16x16xf32>
    %1356 = arith.addf %1352, %1355 : vector<16x16xf32>
    %c3_601 = arith.constant 3 : index
    %c0_602 = arith.constant 0 : index
    %c0_603 = arith.constant 0 : index
    %1357 = vector.load %arg15[%c3_601, %c0_602, %c0_603] : memref<8x16x16xf32, #tpu.memory_space<vmem>>, vector<1x16x16xf32>
    %1358 = vector.shape_cast %1357 : vector<1x16x16xf32> to vector<16x16xf32>
    %cst_604 = arith.constant dense<0.000000e+00> : vector<16x16xf32>
    %1359 = tpu.matmul %1300, %1358, %cst_604 {dimension_numbers = #tpu.dot_dimension_numbers<[1], [0], [0], [1], [0, 0, 1, 1], [], []>} : vector<16x16xf32>, vector<16x16xf32>, vector<16x16xf32> -> vector<16x16xf32>
    %1360 = arith.addf %1356, %1359 : vector<16x16xf32>
    %c4_605 = arith.constant 4 : index
    %c0_606 = arith.constant 0 : index
    %c0_607 = arith.constant 0 : index
    %1361 = vector.load %arg15[%c4_605, %c0_606, %c0_607] : memref<8x16x16xf32, #tpu.memory_space<vmem>>, vector<1x16x16xf32>
    %1362 = vector.shape_cast %1361 : vector<1x16x16xf32> to vector<16x16xf32>
    %cst_608 = arith.constant dense<0.000000e+00> : vector<16x16xf32>
    %1363 = tpu.matmul %1311, %1362, %cst_608 {dimension_numbers = #tpu.dot_dimension_numbers<[1], [0], [0], [1], [0, 0, 1, 1], [], []>} : vector<16x16xf32>, vector<16x16xf32>, vector<16x16xf32> -> vector<16x16xf32>
    %1364 = arith.addf %1360, %1363 : vector<16x16xf32>
    %c5_609 = arith.constant 5 : index
    %c0_610 = arith.constant 0 : index
    %c0_611 = arith.constant 0 : index
    %1365 = vector.load %arg15[%c5_609, %c0_610, %c0_611] : memref<8x16x16xf32, #tpu.memory_space<vmem>>, vector<1x16x16xf32>
    %1366 = vector.shape_cast %1365 : vector<1x16x16xf32> to vector<16x16xf32>
    %cst_612 = arith.constant dense<0.000000e+00> : vector<16x16xf32>
    %1367 = tpu.matmul %1322, %1366, %cst_612 {dimension_numbers = #tpu.dot_dimension_numbers<[1], [0], [0], [1], [0, 0, 1, 1], [], []>} : vector<16x16xf32>, vector<16x16xf32>, vector<16x16xf32> -> vector<16x16xf32>
    %1368 = arith.addf %1364, %1367 : vector<16x16xf32>
    %c6_613 = arith.constant 6 : index
    %c0_614 = arith.constant 0 : index
    %c0_615 = arith.constant 0 : index
    %1369 = vector.load %arg15[%c6_613, %c0_614, %c0_615] : memref<8x16x16xf32, #tpu.memory_space<vmem>>, vector<1x16x16xf32>
    %1370 = vector.shape_cast %1369 : vector<1x16x16xf32> to vector<16x16xf32>
    %cst_616 = arith.constant dense<0.000000e+00> : vector<16x16xf32>
    %1371 = tpu.matmul %1333, %1370, %cst_616 {dimension_numbers = #tpu.dot_dimension_numbers<[1], [0], [0], [1], [0, 0, 1, 1], [], []>} : vector<16x16xf32>, vector<16x16xf32>, vector<16x16xf32> -> vector<16x16xf32>
    %1372 = arith.addf %1368, %1371 : vector<16x16xf32>
    %c7_617 = arith.constant 7 : index
    %c0_618 = arith.constant 0 : index
    %c0_619 = arith.constant 0 : index
    %1373 = vector.load %arg15[%c7_617, %c0_618, %c0_619] : memref<8x16x16xf32, #tpu.memory_space<vmem>>, vector<1x16x16xf32>
    %1374 = vector.shape_cast %1373 : vector<1x16x16xf32> to vector<16x16xf32>
    %cst_620 = arith.constant dense<0.000000e+00> : vector<16x16xf32>
    %1375 = tpu.matmul %1344, %1374, %cst_620 {dimension_numbers = #tpu.dot_dimension_numbers<[1], [0], [0], [1], [0, 0, 1, 1], [], []>} : vector<16x16xf32>, vector<16x16xf32>, vector<16x16xf32> -> vector<16x16xf32>
    %1376 = arith.addf %1372, %1375 : vector<16x16xf32>
    %c0_621 = arith.constant 0 : index
    %c0_622 = arith.constant 0 : index
    %1377 = vector.load %arg16[%c0_621, %c0_622] : memref<16x1xf32, #tpu.memory_space<vmem>>, vector<16x1xf32>
    %cst_623 = arith.constant -3.000000e+01 : f32
    %1378 = vector.broadcast %cst_623 : f32 to vector<16x16xf32>
    %1379 = arith.maximumf %1376, %1378 : vector<16x16xf32>
    %cst_624 = arith.constant 0.000000e+00 : f32
    %1380 = vector.broadcast %cst_624 : f32 to vector<16x16xf32>
    %1381 = arith.subf %1380, %1379 : vector<16x16xf32>
    %1382 = math.exp %1381 : vector<16x16xf32>
    %cst_625 = arith.constant 1.000000e+00 : f32
    %1383 = vector.broadcast %cst_625 : f32 to vector<16x16xf32>
    %1384 = arith.addf %1383, %1382 : vector<16x16xf32>
    %1385 = tpu.reciprocal %1384 {approx = true} : vector<16x16xf32> -> vector<16x16xf32>
    %1386 = arith.mulf %1376, %1385 : vector<16x16xf32>
    %cst_626 = arith.constant dense<0.000000e+00> : vector<16x1xf32>
    %1387 = tpu.matmul %1386, %1377, %cst_626 {dimension_numbers = #tpu.dot_dimension_numbers<[1], [0], [0], [1], [0, 0, 1, 1], [], []>} : vector<16x16xf32>, vector<16x1xf32>, vector<16x1xf32> -> vector<16x1xf32>
    %cst_627 = arith.constant -2.200000e+00 : f32
    %1388 = vector.broadcast %cst_627 : f32 to vector<16x16xf32>
    %1389 = arith.cmpf oge, %1376, %1388 : vector<16x16xf32>
    %cst_628 = arith.constant -1.800000e+00 : f32
    %1390 = vector.broadcast %cst_628 : f32 to vector<16x16xf32>
    %1391 = arith.cmpf olt, %1376, %1390 : vector<16x16xf32>
    %1392 = arith.andi %1389, %1391 : vector<16x16xi1>
    %cst_629 = arith.constant 1.000000e+00 : f32
    %cst_630 = arith.constant 0.000000e+00 : f32
    %1393 = vector.broadcast %cst_629 : f32 to vector<16x16xf32>
    %1394 = vector.broadcast %cst_630 : f32 to vector<16x16xf32>
    %1395 = arith.select %1392, %1393, %1394 : vector<16x16xi1>, vector<16x16xf32>
    %cst_631 = arith.constant -1.800000e+00 : f32
    %1396 = vector.broadcast %cst_631 : f32 to vector<16x16xf32>
    %1397 = arith.cmpf oge, %1376, %1396 : vector<16x16xf32>
    %cst_632 = arith.constant -1.400000e+00 : f32
    %1398 = vector.broadcast %cst_632 : f32 to vector<16x16xf32>
    %1399 = arith.cmpf olt, %1376, %1398 : vector<16x16xf32>
    %1400 = arith.andi %1397, %1399 : vector<16x16xi1>
    %cst_633 = arith.constant 1.000000e+00 : f32
    %cst_634 = arith.constant 0.000000e+00 : f32
    %1401 = vector.broadcast %cst_633 : f32 to vector<16x16xf32>
    %1402 = vector.broadcast %cst_634 : f32 to vector<16x16xf32>
    %1403 = arith.select %1400, %1401, %1402 : vector<16x16xi1>, vector<16x16xf32>
    %cst_635 = arith.constant -1.400000e+00 : f32
    %1404 = vector.broadcast %cst_635 : f32 to vector<16x16xf32>
    %1405 = arith.cmpf oge, %1376, %1404 : vector<16x16xf32>
    %cst_636 = arith.constant -1.000000e+00 : f32
    %1406 = vector.broadcast %cst_636 : f32 to vector<16x16xf32>
    %1407 = arith.cmpf olt, %1376, %1406 : vector<16x16xf32>
    %1408 = arith.andi %1405, %1407 : vector<16x16xi1>
    %cst_637 = arith.constant 1.000000e+00 : f32
    %cst_638 = arith.constant 0.000000e+00 : f32
    %1409 = vector.broadcast %cst_637 : f32 to vector<16x16xf32>
    %1410 = vector.broadcast %cst_638 : f32 to vector<16x16xf32>
    %1411 = arith.select %1408, %1409, %1410 : vector<16x16xi1>, vector<16x16xf32>
    %cst_639 = arith.constant -1.000000e+00 : f32
    %1412 = vector.broadcast %cst_639 : f32 to vector<16x16xf32>
    %1413 = arith.cmpf oge, %1376, %1412 : vector<16x16xf32>
    %cst_640 = arith.constant -6.000000e-01 : f32
    %1414 = vector.broadcast %cst_640 : f32 to vector<16x16xf32>
    %1415 = arith.cmpf olt, %1376, %1414 : vector<16x16xf32>
    %1416 = arith.andi %1413, %1415 : vector<16x16xi1>
    %cst_641 = arith.constant 1.000000e+00 : f32
    %cst_642 = arith.constant 0.000000e+00 : f32
    %1417 = vector.broadcast %cst_641 : f32 to vector<16x16xf32>
    %1418 = vector.broadcast %cst_642 : f32 to vector<16x16xf32>
    %1419 = arith.select %1416, %1417, %1418 : vector<16x16xi1>, vector<16x16xf32>
    %cst_643 = arith.constant -6.000000e-01 : f32
    %1420 = vector.broadcast %cst_643 : f32 to vector<16x16xf32>
    %1421 = arith.cmpf oge, %1376, %1420 : vector<16x16xf32>
    %cst_644 = arith.constant -2.000000e-01 : f32
    %1422 = vector.broadcast %cst_644 : f32 to vector<16x16xf32>
    %1423 = arith.cmpf olt, %1376, %1422 : vector<16x16xf32>
    %1424 = arith.andi %1421, %1423 : vector<16x16xi1>
    %cst_645 = arith.constant 1.000000e+00 : f32
    %cst_646 = arith.constant 0.000000e+00 : f32
    %1425 = vector.broadcast %cst_645 : f32 to vector<16x16xf32>
    %1426 = vector.broadcast %cst_646 : f32 to vector<16x16xf32>
    %1427 = arith.select %1424, %1425, %1426 : vector<16x16xi1>, vector<16x16xf32>
    %cst_647 = arith.constant -2.000000e-01 : f32
    %1428 = vector.broadcast %cst_647 : f32 to vector<16x16xf32>
    %1429 = arith.cmpf oge, %1376, %1428 : vector<16x16xf32>
    %cst_648 = arith.constant 2.000000e-01 : f32
    %1430 = vector.broadcast %cst_648 : f32 to vector<16x16xf32>
    %1431 = arith.cmpf olt, %1376, %1430 : vector<16x16xf32>
    %1432 = arith.andi %1429, %1431 : vector<16x16xi1>
    %cst_649 = arith.constant 1.000000e+00 : f32
    %cst_650 = arith.constant 0.000000e+00 : f32
    %1433 = vector.broadcast %cst_649 : f32 to vector<16x16xf32>
    %1434 = vector.broadcast %cst_650 : f32 to vector<16x16xf32>
    %1435 = arith.select %1432, %1433, %1434 : vector<16x16xi1>, vector<16x16xf32>
    %cst_651 = arith.constant 2.000000e-01 : f32
    %1436 = vector.broadcast %cst_651 : f32 to vector<16x16xf32>
    %1437 = arith.cmpf oge, %1376, %1436 : vector<16x16xf32>
    %cst_652 = arith.constant 6.000000e-01 : f32
    %1438 = vector.broadcast %cst_652 : f32 to vector<16x16xf32>
    %1439 = arith.cmpf olt, %1376, %1438 : vector<16x16xf32>
    %1440 = arith.andi %1437, %1439 : vector<16x16xi1>
    %cst_653 = arith.constant 1.000000e+00 : f32
    %cst_654 = arith.constant 0.000000e+00 : f32
    %1441 = vector.broadcast %cst_653 : f32 to vector<16x16xf32>
    %1442 = vector.broadcast %cst_654 : f32 to vector<16x16xf32>
    %1443 = arith.select %1440, %1441, %1442 : vector<16x16xi1>, vector<16x16xf32>
    %cst_655 = arith.constant 6.000000e-01 : f32
    %1444 = vector.broadcast %cst_655 : f32 to vector<16x16xf32>
    %1445 = arith.cmpf oge, %1376, %1444 : vector<16x16xf32>
    %cst_656 = arith.constant 1.000000e+00 : f32
    %1446 = vector.broadcast %cst_656 : f32 to vector<16x16xf32>
    %1447 = arith.cmpf olt, %1376, %1446 : vector<16x16xf32>
    %1448 = arith.andi %1445, %1447 : vector<16x16xi1>
    %cst_657 = arith.constant 1.000000e+00 : f32
    %cst_658 = arith.constant 0.000000e+00 : f32
    %1449 = vector.broadcast %cst_657 : f32 to vector<16x16xf32>
    %1450 = vector.broadcast %cst_658 : f32 to vector<16x16xf32>
    %1451 = arith.select %1448, %1449, %1450 : vector<16x16xi1>, vector<16x16xf32>
    %cst_659 = arith.constant 1.000000e+00 : f32
    %1452 = vector.broadcast %cst_659 : f32 to vector<16x16xf32>
    %1453 = arith.cmpf oge, %1376, %1452 : vector<16x16xf32>
    %cst_660 = arith.constant 1.400000e+00 : f32
    %1454 = vector.broadcast %cst_660 : f32 to vector<16x16xf32>
    %1455 = arith.cmpf olt, %1376, %1454 : vector<16x16xf32>
    %1456 = arith.andi %1453, %1455 : vector<16x16xi1>
    %cst_661 = arith.constant 1.000000e+00 : f32
    %cst_662 = arith.constant 0.000000e+00 : f32
    %1457 = vector.broadcast %cst_661 : f32 to vector<16x16xf32>
    %1458 = vector.broadcast %cst_662 : f32 to vector<16x16xf32>
    %1459 = arith.select %1456, %1457, %1458 : vector<16x16xi1>, vector<16x16xf32>
    %cst_663 = arith.constant 1.400000e+00 : f32
    %1460 = vector.broadcast %cst_663 : f32 to vector<16x16xf32>
    %1461 = arith.cmpf oge, %1376, %1460 : vector<16x16xf32>
    %cst_664 = arith.constant 1.800000e+00 : f32
    %1462 = vector.broadcast %cst_664 : f32 to vector<16x16xf32>
    %1463 = arith.cmpf olt, %1376, %1462 : vector<16x16xf32>
    %1464 = arith.andi %1461, %1463 : vector<16x16xi1>
    %cst_665 = arith.constant 1.000000e+00 : f32
    %cst_666 = arith.constant 0.000000e+00 : f32
    %1465 = vector.broadcast %cst_665 : f32 to vector<16x16xf32>
    %1466 = vector.broadcast %cst_666 : f32 to vector<16x16xf32>
    %1467 = arith.select %1464, %1465, %1466 : vector<16x16xi1>, vector<16x16xf32>
    %cst_667 = arith.constant 1.800000e+00 : f32
    %1468 = vector.broadcast %cst_667 : f32 to vector<16x16xf32>
    %1469 = arith.cmpf oge, %1376, %1468 : vector<16x16xf32>
    %cst_668 = arith.constant 2.200000e+00 : f32
    %1470 = vector.broadcast %cst_668 : f32 to vector<16x16xf32>
    %1471 = arith.cmpf olt, %1376, %1470 : vector<16x16xf32>
    %1472 = arith.andi %1469, %1471 : vector<16x16xi1>
    %cst_669 = arith.constant 1.000000e+00 : f32
    %cst_670 = arith.constant 0.000000e+00 : f32
    %1473 = vector.broadcast %cst_669 : f32 to vector<16x16xf32>
    %1474 = vector.broadcast %cst_670 : f32 to vector<16x16xf32>
    %1475 = arith.select %1472, %1473, %1474 : vector<16x16xi1>, vector<16x16xf32>
    %cst_671 = arith.constant -2.200000e+00 : f32
    %1476 = vector.broadcast %cst_671 : f32 to vector<16x16xf32>
    %1477 = arith.subf %1376, %1476 : vector<16x16xf32>
    %cst_672 = arith.constant 2.500000e+00 : f32
    %1478 = vector.broadcast %cst_672 : f32 to vector<16x16xf32>
    %1479 = arith.mulf %1477, %1478 : vector<16x16xf32>
    %1480 = arith.mulf %1479, %1395 : vector<16x16xf32>
    %cst_673 = arith.constant -1.400000e+00 : f32
    %1481 = vector.broadcast %cst_673 : f32 to vector<16x16xf32>
    %1482 = arith.subf %1481, %1376 : vector<16x16xf32>
    %cst_674 = arith.constant 2.500000e+00 : f32
    %1483 = vector.broadcast %cst_674 : f32 to vector<16x16xf32>
    %1484 = arith.mulf %1482, %1483 : vector<16x16xf32>
    %1485 = arith.mulf %1484, %1403 : vector<16x16xf32>
    %1486 = arith.addf %1480, %1485 : vector<16x16xf32>
    %cst_675 = arith.constant -1.800000e+00 : f32
    %1487 = vector.broadcast %cst_675 : f32 to vector<16x16xf32>
    %1488 = arith.subf %1376, %1487 : vector<16x16xf32>
    %cst_676 = arith.constant 2.500000e+00 : f32
    %1489 = vector.broadcast %cst_676 : f32 to vector<16x16xf32>
    %1490 = arith.mulf %1488, %1489 : vector<16x16xf32>
    %1491 = arith.mulf %1490, %1403 : vector<16x16xf32>
    %cst_677 = arith.constant -1.000000e+00 : f32
    %1492 = vector.broadcast %cst_677 : f32 to vector<16x16xf32>
    %1493 = arith.subf %1492, %1376 : vector<16x16xf32>
    %cst_678 = arith.constant 2.500000e+00 : f32
    %1494 = vector.broadcast %cst_678 : f32 to vector<16x16xf32>
    %1495 = arith.mulf %1493, %1494 : vector<16x16xf32>
    %1496 = arith.mulf %1495, %1411 : vector<16x16xf32>
    %1497 = arith.addf %1491, %1496 : vector<16x16xf32>
    %cst_679 = arith.constant -1.400000e+00 : f32
    %1498 = vector.broadcast %cst_679 : f32 to vector<16x16xf32>
    %1499 = arith.subf %1376, %1498 : vector<16x16xf32>
    %cst_680 = arith.constant 2.500000e+00 : f32
    %1500 = vector.broadcast %cst_680 : f32 to vector<16x16xf32>
    %1501 = arith.mulf %1499, %1500 : vector<16x16xf32>
    %1502 = arith.mulf %1501, %1411 : vector<16x16xf32>
    %cst_681 = arith.constant -6.000000e-01 : f32
    %1503 = vector.broadcast %cst_681 : f32 to vector<16x16xf32>
    %1504 = arith.subf %1503, %1376 : vector<16x16xf32>
    %cst_682 = arith.constant 2.500000e+00 : f32
    %1505 = vector.broadcast %cst_682 : f32 to vector<16x16xf32>
    %1506 = arith.mulf %1504, %1505 : vector<16x16xf32>
    %1507 = arith.mulf %1506, %1419 : vector<16x16xf32>
    %1508 = arith.addf %1502, %1507 : vector<16x16xf32>
    %cst_683 = arith.constant -1.000000e+00 : f32
    %1509 = vector.broadcast %cst_683 : f32 to vector<16x16xf32>
    %1510 = arith.subf %1376, %1509 : vector<16x16xf32>
    %cst_684 = arith.constant 2.500000e+00 : f32
    %1511 = vector.broadcast %cst_684 : f32 to vector<16x16xf32>
    %1512 = arith.mulf %1510, %1511 : vector<16x16xf32>
    %1513 = arith.mulf %1512, %1419 : vector<16x16xf32>
    %cst_685 = arith.constant -2.000000e-01 : f32
    %1514 = vector.broadcast %cst_685 : f32 to vector<16x16xf32>
    %1515 = arith.subf %1514, %1376 : vector<16x16xf32>
    %cst_686 = arith.constant 2.500000e+00 : f32
    %1516 = vector.broadcast %cst_686 : f32 to vector<16x16xf32>
    %1517 = arith.mulf %1515, %1516 : vector<16x16xf32>
    %1518 = arith.mulf %1517, %1427 : vector<16x16xf32>
    %1519 = arith.addf %1513, %1518 : vector<16x16xf32>
    %cst_687 = arith.constant -6.000000e-01 : f32
    %1520 = vector.broadcast %cst_687 : f32 to vector<16x16xf32>
    %1521 = arith.subf %1376, %1520 : vector<16x16xf32>
    %cst_688 = arith.constant 2.500000e+00 : f32
    %1522 = vector.broadcast %cst_688 : f32 to vector<16x16xf32>
    %1523 = arith.mulf %1521, %1522 : vector<16x16xf32>
    %1524 = arith.mulf %1523, %1427 : vector<16x16xf32>
    %cst_689 = arith.constant 2.000000e-01 : f32
    %1525 = vector.broadcast %cst_689 : f32 to vector<16x16xf32>
    %1526 = arith.subf %1525, %1376 : vector<16x16xf32>
    %cst_690 = arith.constant 2.500000e+00 : f32
    %1527 = vector.broadcast %cst_690 : f32 to vector<16x16xf32>
    %1528 = arith.mulf %1526, %1527 : vector<16x16xf32>
    %1529 = arith.mulf %1528, %1435 : vector<16x16xf32>
    %1530 = arith.addf %1524, %1529 : vector<16x16xf32>
    %cst_691 = arith.constant -2.000000e-01 : f32
    %1531 = vector.broadcast %cst_691 : f32 to vector<16x16xf32>
    %1532 = arith.subf %1376, %1531 : vector<16x16xf32>
    %cst_692 = arith.constant 2.500000e+00 : f32
    %1533 = vector.broadcast %cst_692 : f32 to vector<16x16xf32>
    %1534 = arith.mulf %1532, %1533 : vector<16x16xf32>
    %1535 = arith.mulf %1534, %1435 : vector<16x16xf32>
    %cst_693 = arith.constant 6.000000e-01 : f32
    %1536 = vector.broadcast %cst_693 : f32 to vector<16x16xf32>
    %1537 = arith.subf %1536, %1376 : vector<16x16xf32>
    %cst_694 = arith.constant 2.500000e+00 : f32
    %1538 = vector.broadcast %cst_694 : f32 to vector<16x16xf32>
    %1539 = arith.mulf %1537, %1538 : vector<16x16xf32>
    %1540 = arith.mulf %1539, %1443 : vector<16x16xf32>
    %1541 = arith.addf %1535, %1540 : vector<16x16xf32>
    %cst_695 = arith.constant 2.000000e-01 : f32
    %1542 = vector.broadcast %cst_695 : f32 to vector<16x16xf32>
    %1543 = arith.subf %1376, %1542 : vector<16x16xf32>
    %cst_696 = arith.constant 2.500000e+00 : f32
    %1544 = vector.broadcast %cst_696 : f32 to vector<16x16xf32>
    %1545 = arith.mulf %1543, %1544 : vector<16x16xf32>
    %1546 = arith.mulf %1545, %1443 : vector<16x16xf32>
    %cst_697 = arith.constant 1.000000e+00 : f32
    %1547 = vector.broadcast %cst_697 : f32 to vector<16x16xf32>
    %1548 = arith.subf %1547, %1376 : vector<16x16xf32>
    %cst_698 = arith.constant 2.500000e+00 : f32
    %1549 = vector.broadcast %cst_698 : f32 to vector<16x16xf32>
    %1550 = arith.mulf %1548, %1549 : vector<16x16xf32>
    %1551 = arith.mulf %1550, %1451 : vector<16x16xf32>
    %1552 = arith.addf %1546, %1551 : vector<16x16xf32>
    %cst_699 = arith.constant 6.000000e-01 : f32
    %1553 = vector.broadcast %cst_699 : f32 to vector<16x16xf32>
    %1554 = arith.subf %1376, %1553 : vector<16x16xf32>
    %cst_700 = arith.constant 2.500000e+00 : f32
    %1555 = vector.broadcast %cst_700 : f32 to vector<16x16xf32>
    %1556 = arith.mulf %1554, %1555 : vector<16x16xf32>
    %1557 = arith.mulf %1556, %1451 : vector<16x16xf32>
    %cst_701 = arith.constant 1.400000e+00 : f32
    %1558 = vector.broadcast %cst_701 : f32 to vector<16x16xf32>
    %1559 = arith.subf %1558, %1376 : vector<16x16xf32>
    %cst_702 = arith.constant 2.500000e+00 : f32
    %1560 = vector.broadcast %cst_702 : f32 to vector<16x16xf32>
    %1561 = arith.mulf %1559, %1560 : vector<16x16xf32>
    %1562 = arith.mulf %1561, %1459 : vector<16x16xf32>
    %1563 = arith.addf %1557, %1562 : vector<16x16xf32>
    %cst_703 = arith.constant 1.000000e+00 : f32
    %1564 = vector.broadcast %cst_703 : f32 to vector<16x16xf32>
    %1565 = arith.subf %1376, %1564 : vector<16x16xf32>
    %cst_704 = arith.constant 2.500000e+00 : f32
    %1566 = vector.broadcast %cst_704 : f32 to vector<16x16xf32>
    %1567 = arith.mulf %1565, %1566 : vector<16x16xf32>
    %1568 = arith.mulf %1567, %1459 : vector<16x16xf32>
    %cst_705 = arith.constant 1.800000e+00 : f32
    %1569 = vector.broadcast %cst_705 : f32 to vector<16x16xf32>
    %1570 = arith.subf %1569, %1376 : vector<16x16xf32>
    %cst_706 = arith.constant 2.500000e+00 : f32
    %1571 = vector.broadcast %cst_706 : f32 to vector<16x16xf32>
    %1572 = arith.mulf %1570, %1571 : vector<16x16xf32>
    %1573 = arith.mulf %1572, %1467 : vector<16x16xf32>
    %1574 = arith.addf %1568, %1573 : vector<16x16xf32>
    %cst_707 = arith.constant 1.400000e+00 : f32
    %1575 = vector.broadcast %cst_707 : f32 to vector<16x16xf32>
    %1576 = arith.subf %1376, %1575 : vector<16x16xf32>
    %cst_708 = arith.constant 2.500000e+00 : f32
    %1577 = vector.broadcast %cst_708 : f32 to vector<16x16xf32>
    %1578 = arith.mulf %1576, %1577 : vector<16x16xf32>
    %1579 = arith.mulf %1578, %1467 : vector<16x16xf32>
    %cst_709 = arith.constant 2.200000e+00 : f32
    %1580 = vector.broadcast %cst_709 : f32 to vector<16x16xf32>
    %1581 = arith.subf %1580, %1376 : vector<16x16xf32>
    %cst_710 = arith.constant 2.500000e+00 : f32
    %1582 = vector.broadcast %cst_710 : f32 to vector<16x16xf32>
    %1583 = arith.mulf %1581, %1582 : vector<16x16xf32>
    %1584 = arith.mulf %1583, %1475 : vector<16x16xf32>
    %1585 = arith.addf %1579, %1584 : vector<16x16xf32>
    %cst_711 = arith.constant -2.200000e+00 : f32
    %1586 = vector.broadcast %cst_711 : f32 to vector<16x16xf32>
    %1587 = arith.subf %1376, %1586 : vector<16x16xf32>
    %cst_712 = arith.constant 1.250000e+00 : f32
    %1588 = vector.broadcast %cst_712 : f32 to vector<16x16xf32>
    %1589 = arith.mulf %1587, %1588 : vector<16x16xf32>
    %1590 = arith.mulf %1589, %1486 : vector<16x16xf32>
    %cst_713 = arith.constant -1.000000e+00 : f32
    %1591 = vector.broadcast %cst_713 : f32 to vector<16x16xf32>
    %1592 = arith.subf %1591, %1376 : vector<16x16xf32>
    %cst_714 = arith.constant 1.250000e+00 : f32
    %1593 = vector.broadcast %cst_714 : f32 to vector<16x16xf32>
    %1594 = arith.mulf %1592, %1593 : vector<16x16xf32>
    %1595 = arith.mulf %1594, %1497 : vector<16x16xf32>
    %1596 = arith.addf %1590, %1595 : vector<16x16xf32>
    %cst_715 = arith.constant -1.800000e+00 : f32
    %1597 = vector.broadcast %cst_715 : f32 to vector<16x16xf32>
    %1598 = arith.subf %1376, %1597 : vector<16x16xf32>
    %cst_716 = arith.constant 1.250000e+00 : f32
    %1599 = vector.broadcast %cst_716 : f32 to vector<16x16xf32>
    %1600 = arith.mulf %1598, %1599 : vector<16x16xf32>
    %1601 = arith.mulf %1600, %1497 : vector<16x16xf32>
    %cst_717 = arith.constant -6.000000e-01 : f32
    %1602 = vector.broadcast %cst_717 : f32 to vector<16x16xf32>
    %1603 = arith.subf %1602, %1376 : vector<16x16xf32>
    %cst_718 = arith.constant 1.250000e+00 : f32
    %1604 = vector.broadcast %cst_718 : f32 to vector<16x16xf32>
    %1605 = arith.mulf %1603, %1604 : vector<16x16xf32>
    %1606 = arith.mulf %1605, %1508 : vector<16x16xf32>
    %1607 = arith.addf %1601, %1606 : vector<16x16xf32>
    %cst_719 = arith.constant -1.400000e+00 : f32
    %1608 = vector.broadcast %cst_719 : f32 to vector<16x16xf32>
    %1609 = arith.subf %1376, %1608 : vector<16x16xf32>
    %cst_720 = arith.constant 1.250000e+00 : f32
    %1610 = vector.broadcast %cst_720 : f32 to vector<16x16xf32>
    %1611 = arith.mulf %1609, %1610 : vector<16x16xf32>
    %1612 = arith.mulf %1611, %1508 : vector<16x16xf32>
    %cst_721 = arith.constant -2.000000e-01 : f32
    %1613 = vector.broadcast %cst_721 : f32 to vector<16x16xf32>
    %1614 = arith.subf %1613, %1376 : vector<16x16xf32>
    %cst_722 = arith.constant 1.250000e+00 : f32
    %1615 = vector.broadcast %cst_722 : f32 to vector<16x16xf32>
    %1616 = arith.mulf %1614, %1615 : vector<16x16xf32>
    %1617 = arith.mulf %1616, %1519 : vector<16x16xf32>
    %1618 = arith.addf %1612, %1617 : vector<16x16xf32>
    %cst_723 = arith.constant -1.000000e+00 : f32
    %1619 = vector.broadcast %cst_723 : f32 to vector<16x16xf32>
    %1620 = arith.subf %1376, %1619 : vector<16x16xf32>
    %cst_724 = arith.constant 1.250000e+00 : f32
    %1621 = vector.broadcast %cst_724 : f32 to vector<16x16xf32>
    %1622 = arith.mulf %1620, %1621 : vector<16x16xf32>
    %1623 = arith.mulf %1622, %1519 : vector<16x16xf32>
    %cst_725 = arith.constant 2.000000e-01 : f32
    %1624 = vector.broadcast %cst_725 : f32 to vector<16x16xf32>
    %1625 = arith.subf %1624, %1376 : vector<16x16xf32>
    %cst_726 = arith.constant 1.250000e+00 : f32
    %1626 = vector.broadcast %cst_726 : f32 to vector<16x16xf32>
    %1627 = arith.mulf %1625, %1626 : vector<16x16xf32>
    %1628 = arith.mulf %1627, %1530 : vector<16x16xf32>
    %1629 = arith.addf %1623, %1628 : vector<16x16xf32>
    %cst_727 = arith.constant -6.000000e-01 : f32
    %1630 = vector.broadcast %cst_727 : f32 to vector<16x16xf32>
    %1631 = arith.subf %1376, %1630 : vector<16x16xf32>
    %cst_728 = arith.constant 1.250000e+00 : f32
    %1632 = vector.broadcast %cst_728 : f32 to vector<16x16xf32>
    %1633 = arith.mulf %1631, %1632 : vector<16x16xf32>
    %1634 = arith.mulf %1633, %1530 : vector<16x16xf32>
    %cst_729 = arith.constant 6.000000e-01 : f32
    %1635 = vector.broadcast %cst_729 : f32 to vector<16x16xf32>
    %1636 = arith.subf %1635, %1376 : vector<16x16xf32>
    %cst_730 = arith.constant 1.250000e+00 : f32
    %1637 = vector.broadcast %cst_730 : f32 to vector<16x16xf32>
    %1638 = arith.mulf %1636, %1637 : vector<16x16xf32>
    %1639 = arith.mulf %1638, %1541 : vector<16x16xf32>
    %1640 = arith.addf %1634, %1639 : vector<16x16xf32>
    %cst_731 = arith.constant -2.000000e-01 : f32
    %1641 = vector.broadcast %cst_731 : f32 to vector<16x16xf32>
    %1642 = arith.subf %1376, %1641 : vector<16x16xf32>
    %cst_732 = arith.constant 1.250000e+00 : f32
    %1643 = vector.broadcast %cst_732 : f32 to vector<16x16xf32>
    %1644 = arith.mulf %1642, %1643 : vector<16x16xf32>
    %1645 = arith.mulf %1644, %1541 : vector<16x16xf32>
    %cst_733 = arith.constant 1.000000e+00 : f32
    %1646 = vector.broadcast %cst_733 : f32 to vector<16x16xf32>
    %1647 = arith.subf %1646, %1376 : vector<16x16xf32>
    %cst_734 = arith.constant 1.250000e+00 : f32
    %1648 = vector.broadcast %cst_734 : f32 to vector<16x16xf32>
    %1649 = arith.mulf %1647, %1648 : vector<16x16xf32>
    %1650 = arith.mulf %1649, %1552 : vector<16x16xf32>
    %1651 = arith.addf %1645, %1650 : vector<16x16xf32>
    %cst_735 = arith.constant 2.000000e-01 : f32
    %1652 = vector.broadcast %cst_735 : f32 to vector<16x16xf32>
    %1653 = arith.subf %1376, %1652 : vector<16x16xf32>
    %cst_736 = arith.constant 1.250000e+00 : f32
    %1654 = vector.broadcast %cst_736 : f32 to vector<16x16xf32>
    %1655 = arith.mulf %1653, %1654 : vector<16x16xf32>
    %1656 = arith.mulf %1655, %1552 : vector<16x16xf32>
    %cst_737 = arith.constant 1.400000e+00 : f32
    %1657 = vector.broadcast %cst_737 : f32 to vector<16x16xf32>
    %1658 = arith.subf %1657, %1376 : vector<16x16xf32>
    %cst_738 = arith.constant 1.250000e+00 : f32
    %1659 = vector.broadcast %cst_738 : f32 to vector<16x16xf32>
    %1660 = arith.mulf %1658, %1659 : vector<16x16xf32>
    %1661 = arith.mulf %1660, %1563 : vector<16x16xf32>
    %1662 = arith.addf %1656, %1661 : vector<16x16xf32>
    %cst_739 = arith.constant 6.000000e-01 : f32
    %1663 = vector.broadcast %cst_739 : f32 to vector<16x16xf32>
    %1664 = arith.subf %1376, %1663 : vector<16x16xf32>
    %cst_740 = arith.constant 1.250000e+00 : f32
    %1665 = vector.broadcast %cst_740 : f32 to vector<16x16xf32>
    %1666 = arith.mulf %1664, %1665 : vector<16x16xf32>
    %1667 = arith.mulf %1666, %1563 : vector<16x16xf32>
    %cst_741 = arith.constant 1.800000e+00 : f32
    %1668 = vector.broadcast %cst_741 : f32 to vector<16x16xf32>
    %1669 = arith.subf %1668, %1376 : vector<16x16xf32>
    %cst_742 = arith.constant 1.250000e+00 : f32
    %1670 = vector.broadcast %cst_742 : f32 to vector<16x16xf32>
    %1671 = arith.mulf %1669, %1670 : vector<16x16xf32>
    %1672 = arith.mulf %1671, %1574 : vector<16x16xf32>
    %1673 = arith.addf %1667, %1672 : vector<16x16xf32>
    %cst_743 = arith.constant 1.000000e+00 : f32
    %1674 = vector.broadcast %cst_743 : f32 to vector<16x16xf32>
    %1675 = arith.subf %1376, %1674 : vector<16x16xf32>
    %cst_744 = arith.constant 1.250000e+00 : f32
    %1676 = vector.broadcast %cst_744 : f32 to vector<16x16xf32>
    %1677 = arith.mulf %1675, %1676 : vector<16x16xf32>
    %1678 = arith.mulf %1677, %1574 : vector<16x16xf32>
    %cst_745 = arith.constant 2.200000e+00 : f32
    %1679 = vector.broadcast %cst_745 : f32 to vector<16x16xf32>
    %1680 = arith.subf %1679, %1376 : vector<16x16xf32>
    %cst_746 = arith.constant 1.250000e+00 : f32
    %1681 = vector.broadcast %cst_746 : f32 to vector<16x16xf32>
    %1682 = arith.mulf %1680, %1681 : vector<16x16xf32>
    %1683 = arith.mulf %1682, %1585 : vector<16x16xf32>
    %1684 = arith.addf %1678, %1683 : vector<16x16xf32>
    %cst_747 = arith.constant -2.200000e+00 : f32
    %1685 = vector.broadcast %cst_747 : f32 to vector<16x16xf32>
    %1686 = arith.subf %1376, %1685 : vector<16x16xf32>
    %cst_748 = arith.constant 0.833333313 : f32
    %1687 = vector.broadcast %cst_748 : f32 to vector<16x16xf32>
    %1688 = arith.mulf %1686, %1687 : vector<16x16xf32>
    %1689 = arith.mulf %1688, %1596 : vector<16x16xf32>
    %cst_749 = arith.constant -6.000000e-01 : f32
    %1690 = vector.broadcast %cst_749 : f32 to vector<16x16xf32>
    %1691 = arith.subf %1690, %1376 : vector<16x16xf32>
    %cst_750 = arith.constant 0.833333313 : f32
    %1692 = vector.broadcast %cst_750 : f32 to vector<16x16xf32>
    %1693 = arith.mulf %1691, %1692 : vector<16x16xf32>
    %1694 = arith.mulf %1693, %1607 : vector<16x16xf32>
    %1695 = arith.addf %1689, %1694 : vector<16x16xf32>
    %cst_751 = arith.constant -1.800000e+00 : f32
    %1696 = vector.broadcast %cst_751 : f32 to vector<16x16xf32>
    %1697 = arith.subf %1376, %1696 : vector<16x16xf32>
    %cst_752 = arith.constant 0.833333313 : f32
    %1698 = vector.broadcast %cst_752 : f32 to vector<16x16xf32>
    %1699 = arith.mulf %1697, %1698 : vector<16x16xf32>
    %1700 = arith.mulf %1699, %1607 : vector<16x16xf32>
    %cst_753 = arith.constant -2.000000e-01 : f32
    %1701 = vector.broadcast %cst_753 : f32 to vector<16x16xf32>
    %1702 = arith.subf %1701, %1376 : vector<16x16xf32>
    %cst_754 = arith.constant 0.833333313 : f32
    %1703 = vector.broadcast %cst_754 : f32 to vector<16x16xf32>
    %1704 = arith.mulf %1702, %1703 : vector<16x16xf32>
    %1705 = arith.mulf %1704, %1618 : vector<16x16xf32>
    %1706 = arith.addf %1700, %1705 : vector<16x16xf32>
    %cst_755 = arith.constant -1.400000e+00 : f32
    %1707 = vector.broadcast %cst_755 : f32 to vector<16x16xf32>
    %1708 = arith.subf %1376, %1707 : vector<16x16xf32>
    %cst_756 = arith.constant 0.833333313 : f32
    %1709 = vector.broadcast %cst_756 : f32 to vector<16x16xf32>
    %1710 = arith.mulf %1708, %1709 : vector<16x16xf32>
    %1711 = arith.mulf %1710, %1618 : vector<16x16xf32>
    %cst_757 = arith.constant 2.000000e-01 : f32
    %1712 = vector.broadcast %cst_757 : f32 to vector<16x16xf32>
    %1713 = arith.subf %1712, %1376 : vector<16x16xf32>
    %cst_758 = arith.constant 0.833333313 : f32
    %1714 = vector.broadcast %cst_758 : f32 to vector<16x16xf32>
    %1715 = arith.mulf %1713, %1714 : vector<16x16xf32>
    %1716 = arith.mulf %1715, %1629 : vector<16x16xf32>
    %1717 = arith.addf %1711, %1716 : vector<16x16xf32>
    %cst_759 = arith.constant -1.000000e+00 : f32
    %1718 = vector.broadcast %cst_759 : f32 to vector<16x16xf32>
    %1719 = arith.subf %1376, %1718 : vector<16x16xf32>
    %cst_760 = arith.constant 0.833333313 : f32
    %1720 = vector.broadcast %cst_760 : f32 to vector<16x16xf32>
    %1721 = arith.mulf %1719, %1720 : vector<16x16xf32>
    %1722 = arith.mulf %1721, %1629 : vector<16x16xf32>
    %cst_761 = arith.constant 6.000000e-01 : f32
    %1723 = vector.broadcast %cst_761 : f32 to vector<16x16xf32>
    %1724 = arith.subf %1723, %1376 : vector<16x16xf32>
    %cst_762 = arith.constant 0.833333313 : f32
    %1725 = vector.broadcast %cst_762 : f32 to vector<16x16xf32>
    %1726 = arith.mulf %1724, %1725 : vector<16x16xf32>
    %1727 = arith.mulf %1726, %1640 : vector<16x16xf32>
    %1728 = arith.addf %1722, %1727 : vector<16x16xf32>
    %cst_763 = arith.constant -6.000000e-01 : f32
    %1729 = vector.broadcast %cst_763 : f32 to vector<16x16xf32>
    %1730 = arith.subf %1376, %1729 : vector<16x16xf32>
    %cst_764 = arith.constant 0.833333313 : f32
    %1731 = vector.broadcast %cst_764 : f32 to vector<16x16xf32>
    %1732 = arith.mulf %1730, %1731 : vector<16x16xf32>
    %1733 = arith.mulf %1732, %1640 : vector<16x16xf32>
    %cst_765 = arith.constant 1.000000e+00 : f32
    %1734 = vector.broadcast %cst_765 : f32 to vector<16x16xf32>
    %1735 = arith.subf %1734, %1376 : vector<16x16xf32>
    %cst_766 = arith.constant 0.833333313 : f32
    %1736 = vector.broadcast %cst_766 : f32 to vector<16x16xf32>
    %1737 = arith.mulf %1735, %1736 : vector<16x16xf32>
    %1738 = arith.mulf %1737, %1651 : vector<16x16xf32>
    %1739 = arith.addf %1733, %1738 : vector<16x16xf32>
    %cst_767 = arith.constant -2.000000e-01 : f32
    %1740 = vector.broadcast %cst_767 : f32 to vector<16x16xf32>
    %1741 = arith.subf %1376, %1740 : vector<16x16xf32>
    %cst_768 = arith.constant 0.833333313 : f32
    %1742 = vector.broadcast %cst_768 : f32 to vector<16x16xf32>
    %1743 = arith.mulf %1741, %1742 : vector<16x16xf32>
    %1744 = arith.mulf %1743, %1651 : vector<16x16xf32>
    %cst_769 = arith.constant 1.400000e+00 : f32
    %1745 = vector.broadcast %cst_769 : f32 to vector<16x16xf32>
    %1746 = arith.subf %1745, %1376 : vector<16x16xf32>
    %cst_770 = arith.constant 0.833333313 : f32
    %1747 = vector.broadcast %cst_770 : f32 to vector<16x16xf32>
    %1748 = arith.mulf %1746, %1747 : vector<16x16xf32>
    %1749 = arith.mulf %1748, %1662 : vector<16x16xf32>
    %1750 = arith.addf %1744, %1749 : vector<16x16xf32>
    %cst_771 = arith.constant 2.000000e-01 : f32
    %1751 = vector.broadcast %cst_771 : f32 to vector<16x16xf32>
    %1752 = arith.subf %1376, %1751 : vector<16x16xf32>
    %cst_772 = arith.constant 0.833333313 : f32
    %1753 = vector.broadcast %cst_772 : f32 to vector<16x16xf32>
    %1754 = arith.mulf %1752, %1753 : vector<16x16xf32>
    %1755 = arith.mulf %1754, %1662 : vector<16x16xf32>
    %cst_773 = arith.constant 1.800000e+00 : f32
    %1756 = vector.broadcast %cst_773 : f32 to vector<16x16xf32>
    %1757 = arith.subf %1756, %1376 : vector<16x16xf32>
    %cst_774 = arith.constant 0.833333313 : f32
    %1758 = vector.broadcast %cst_774 : f32 to vector<16x16xf32>
    %1759 = arith.mulf %1757, %1758 : vector<16x16xf32>
    %1760 = arith.mulf %1759, %1673 : vector<16x16xf32>
    %1761 = arith.addf %1755, %1760 : vector<16x16xf32>
    %cst_775 = arith.constant 6.000000e-01 : f32
    %1762 = vector.broadcast %cst_775 : f32 to vector<16x16xf32>
    %1763 = arith.subf %1376, %1762 : vector<16x16xf32>
    %cst_776 = arith.constant 0.833333313 : f32
    %1764 = vector.broadcast %cst_776 : f32 to vector<16x16xf32>
    %1765 = arith.mulf %1763, %1764 : vector<16x16xf32>
    %1766 = arith.mulf %1765, %1673 : vector<16x16xf32>
    %cst_777 = arith.constant 2.200000e+00 : f32
    %1767 = vector.broadcast %cst_777 : f32 to vector<16x16xf32>
    %1768 = arith.subf %1767, %1376 : vector<16x16xf32>
    %cst_778 = arith.constant 0.833333313 : f32
    %1769 = vector.broadcast %cst_778 : f32 to vector<16x16xf32>
    %1770 = arith.mulf %1768, %1769 : vector<16x16xf32>
    %1771 = arith.mulf %1770, %1684 : vector<16x16xf32>
    %1772 = arith.addf %1766, %1771 : vector<16x16xf32>
    %c0_779 = arith.constant 0 : index
    %c0_780 = arith.constant 0 : index
    %c0_781 = arith.constant 0 : index
    %1773 = vector.load %arg17[%c0_779, %c0_780, %c0_781] : memref<8x16x1xf32, #tpu.memory_space<vmem>>, vector<1x16x1xf32>
    %1774 = vector.shape_cast %1773 : vector<1x16x1xf32> to vector<16x1xf32>
    %cst_782 = arith.constant dense<0.000000e+00> : vector<16x1xf32>
    %1775 = tpu.matmul %1695, %1774, %cst_782 {dimension_numbers = #tpu.dot_dimension_numbers<[1], [0], [0], [1], [0, 0, 1, 1], [], []>} : vector<16x16xf32>, vector<16x1xf32>, vector<16x1xf32> -> vector<16x1xf32>
    %1776 = arith.addf %1387, %1775 : vector<16x1xf32>
    %c1_783 = arith.constant 1 : index
    %c0_784 = arith.constant 0 : index
    %c0_785 = arith.constant 0 : index
    %1777 = vector.load %arg17[%c1_783, %c0_784, %c0_785] : memref<8x16x1xf32, #tpu.memory_space<vmem>>, vector<1x16x1xf32>
    %1778 = vector.shape_cast %1777 : vector<1x16x1xf32> to vector<16x1xf32>
    %cst_786 = arith.constant dense<0.000000e+00> : vector<16x1xf32>
    %1779 = tpu.matmul %1706, %1778, %cst_786 {dimension_numbers = #tpu.dot_dimension_numbers<[1], [0], [0], [1], [0, 0, 1, 1], [], []>} : vector<16x16xf32>, vector<16x1xf32>, vector<16x1xf32> -> vector<16x1xf32>
    %1780 = arith.addf %1776, %1779 : vector<16x1xf32>
    %c2_787 = arith.constant 2 : index
    %c0_788 = arith.constant 0 : index
    %c0_789 = arith.constant 0 : index
    %1781 = vector.load %arg17[%c2_787, %c0_788, %c0_789] : memref<8x16x1xf32, #tpu.memory_space<vmem>>, vector<1x16x1xf32>
    %1782 = vector.shape_cast %1781 : vector<1x16x1xf32> to vector<16x1xf32>
    %cst_790 = arith.constant dense<0.000000e+00> : vector<16x1xf32>
    %1783 = tpu.matmul %1717, %1782, %cst_790 {dimension_numbers = #tpu.dot_dimension_numbers<[1], [0], [0], [1], [0, 0, 1, 1], [], []>} : vector<16x16xf32>, vector<16x1xf32>, vector<16x1xf32> -> vector<16x1xf32>
    %1784 = arith.addf %1780, %1783 : vector<16x1xf32>
    %c3_791 = arith.constant 3 : index
    %c0_792 = arith.constant 0 : index
    %c0_793 = arith.constant 0 : index
    %1785 = vector.load %arg17[%c3_791, %c0_792, %c0_793] : memref<8x16x1xf32, #tpu.memory_space<vmem>>, vector<1x16x1xf32>
    %1786 = vector.shape_cast %1785 : vector<1x16x1xf32> to vector<16x1xf32>
    %cst_794 = arith.constant dense<0.000000e+00> : vector<16x1xf32>
    %1787 = tpu.matmul %1728, %1786, %cst_794 {dimension_numbers = #tpu.dot_dimension_numbers<[1], [0], [0], [1], [0, 0, 1, 1], [], []>} : vector<16x16xf32>, vector<16x1xf32>, vector<16x1xf32> -> vector<16x1xf32>
    %1788 = arith.addf %1784, %1787 : vector<16x1xf32>
    %c4_795 = arith.constant 4 : index
    %c0_796 = arith.constant 0 : index
    %c0_797 = arith.constant 0 : index
    %1789 = vector.load %arg17[%c4_795, %c0_796, %c0_797] : memref<8x16x1xf32, #tpu.memory_space<vmem>>, vector<1x16x1xf32>
    %1790 = vector.shape_cast %1789 : vector<1x16x1xf32> to vector<16x1xf32>
    %cst_798 = arith.constant dense<0.000000e+00> : vector<16x1xf32>
    %1791 = tpu.matmul %1739, %1790, %cst_798 {dimension_numbers = #tpu.dot_dimension_numbers<[1], [0], [0], [1], [0, 0, 1, 1], [], []>} : vector<16x16xf32>, vector<16x1xf32>, vector<16x1xf32> -> vector<16x1xf32>
    %1792 = arith.addf %1788, %1791 : vector<16x1xf32>
    %c5_799 = arith.constant 5 : index
    %c0_800 = arith.constant 0 : index
    %c0_801 = arith.constant 0 : index
    %1793 = vector.load %arg17[%c5_799, %c0_800, %c0_801] : memref<8x16x1xf32, #tpu.memory_space<vmem>>, vector<1x16x1xf32>
    %1794 = vector.shape_cast %1793 : vector<1x16x1xf32> to vector<16x1xf32>
    %cst_802 = arith.constant dense<0.000000e+00> : vector<16x1xf32>
    %1795 = tpu.matmul %1750, %1794, %cst_802 {dimension_numbers = #tpu.dot_dimension_numbers<[1], [0], [0], [1], [0, 0, 1, 1], [], []>} : vector<16x16xf32>, vector<16x1xf32>, vector<16x1xf32> -> vector<16x1xf32>
    %1796 = arith.addf %1792, %1795 : vector<16x1xf32>
    %c6_803 = arith.constant 6 : index
    %c0_804 = arith.constant 0 : index
    %c0_805 = arith.constant 0 : index
    %1797 = vector.load %arg17[%c6_803, %c0_804, %c0_805] : memref<8x16x1xf32, #tpu.memory_space<vmem>>, vector<1x16x1xf32>
    %1798 = vector.shape_cast %1797 : vector<1x16x1xf32> to vector<16x1xf32>
    %cst_806 = arith.constant dense<0.000000e+00> : vector<16x1xf32>
    %1799 = tpu.matmul %1761, %1798, %cst_806 {dimension_numbers = #tpu.dot_dimension_numbers<[1], [0], [0], [1], [0, 0, 1, 1], [], []>} : vector<16x16xf32>, vector<16x1xf32>, vector<16x1xf32> -> vector<16x1xf32>
    %1800 = arith.addf %1796, %1799 : vector<16x1xf32>
    %c7_807 = arith.constant 7 : index
    %c0_808 = arith.constant 0 : index
    %c0_809 = arith.constant 0 : index
    %1801 = vector.load %arg17[%c7_807, %c0_808, %c0_809] : memref<8x16x1xf32, #tpu.memory_space<vmem>>, vector<1x16x1xf32>
    %1802 = vector.shape_cast %1801 : vector<1x16x1xf32> to vector<16x1xf32>
    %cst_810 = arith.constant dense<0.000000e+00> : vector<16x1xf32>
    %1803 = tpu.matmul %1772, %1802, %cst_810 {dimension_numbers = #tpu.dot_dimension_numbers<[1], [0], [0], [1], [0, 0, 1, 1], [], []>} : vector<16x16xf32>, vector<16x1xf32>, vector<16x1xf32> -> vector<16x1xf32>
    %1804 = arith.addf %1800, %1803 : vector<16x1xf32>
    %1805 = vector.shape_cast %936 : vector<16x1xf32> to vector<1x16x1xf32>
    %cst_811 = arith.constant dense<0.000000e+00> : vector<1xf32>
    %1806 = vector.multi_reduction <add>, %1805, %cst_811 [1, 2] : vector<1x16x1xf32> to vector<1xf32>
    %1807 = vector.shape_cast %1806 : vector<1xf32> to vector<1x1x1xf32>
    %1808 = vector.extract %1807[0, 0, 0] : f32 from vector<1x1x1xf32>
    %1809 = vector.broadcast %1808 : f32 to vector<1x1xf32>
    %1810 = vector.shape_cast %1804 : vector<16x1xf32> to vector<1x16x1xf32>
    %cst_812 = arith.constant dense<0.000000e+00> : vector<1xf32>
    %1811 = vector.multi_reduction <add>, %1810, %cst_812 [1, 2] : vector<1x16x1xf32> to vector<1xf32>
    %1812 = vector.shape_cast %1811 : vector<1xf32> to vector<1x1x1xf32>
    %1813 = vector.extract %1812[0, 0, 0] : f32 from vector<1x1x1xf32>
    %1814 = vector.broadcast %1813 : f32 to vector<1x1xf32>
    %1815 = arith.addf %1809, %1814 : vector<1x1xf32>
    %cst_813 = arith.constant 3.125000e-02 : f32
    %1816 = vector.broadcast %cst_813 : f32 to vector<1x1xf32>
    %1817 = arith.mulf %1815, %1816 : vector<1x1xf32>
    %c0_814 = arith.constant 0 : index
    %c0_815 = arith.constant 0 : index
    %1818 = vector.load %arg18[%c0_814, %c0_815] : memref<1x1xf32, #tpu.memory_space<vmem>>, vector<1x1xf32>
    tpu.vector_store %arg18[%c0_814, %c0_815], %1817 {strides = array<i32>} : memref<1x1xf32, #tpu.memory_space<vmem>>, vector<1x1xf32>,
    return
  }
}

</mosaic_0001>

<bundles_post_ra>
// kernel: kan_gcn_forward.1
= control target key start
LH: loop header
LB: loop body
LE: loop exit
PB: predicated region body
PF: predicated region fallthrough
CT: control target
= control target key end

     0   :  { %s8712_s0 = inlined_call_operand.vmem [shape: f32[16,16], index: 0, kind: input, shape index: {}]   ;;  %s8713_s1 = inlined_call_operand.vmem [shape: f32[16,16], index: 1, kind: input, shape index: {}]   ;;  %s8714_s2 = inlined_call_operand.vmem [shape: f32[16,8], index: 2, kind: input, shape index: {}]   ;;  %s8715_s3 = inlined_call_operand.vmem [shape: f32[16,12], index: 3, kind: input, shape index: {}]   ;;  %s8716_s4 = inlined_call_operand.vmem [shape: f32[8,32], index: 4, kind: input, shape index: {}]   ;;  %s8717_s5 = inlined_call_operand.vmem [shape: f32[1,32], index: 5, kind: input, shape index: {}]   ;;  %s8718_s6 = inlined_call_operand.vmem [shape: f32[12,32], index: 6, kind: input, shape index: {}]   ;;  %s8719_s7 = inlined_call_operand.vmem [shape: f32[1,32], index: 7, kind: input, shape index: {}]   ;;  %s8720_s8 = inlined_call_operand.vmem [shape: f32[32,16], index: 8, kind: input, shape index: {}]   ;;  %s8721_s9 = inlined_call_operand.vmem [shape: f32[32,16], index: 9, kind: input, shape index: {}]   ;;  %s8722_s10 = inlined_call_operand.vmem [shape: f32[1,16], index: 10, kind: input, shape index: {}]   ;;  %s8723_s11 = inlined_call_operand.vmem [shape: f32[32,16], index: 11, kind: input, shape index: {}]   ;;  %s8724_s12 = inlined_call_operand.vmem [shape: f32[32,16], index: 12, kind: input, shape index: {}]   ;;  %s8725_s13 = inlined_call_operand.vmem [shape: f32[1,16], index: 13, kind: input, shape index: {}]   ;;  %s8726_s14 = inlined_call_operand.vmem [shape: f32[16,16], index: 14, kind: input, shape index: {}]   ;;  %s8727_s15 = inlined_call_operand.vmem [shape: f32[8,16,16], index: 15, kind: input, shape index: {}]   ;;  %s8728_s16 = inlined_call_operand.vmem [shape: f32[16,1], index: 16, kind: input, shape index: {}]   ;;  %s8729_s17 = inlined_call_operand.vmem [shape: f32[8,16,1], index: 17, kind: input, shape index: {}]   ;;  %s8730_s18 = inlined_call_operand.hbm [shape: f32[1,1], index: 18, kind: output, shape index: {}]  }
   0x1   :  { %8734 = sst [smem:[#allocation5_spill]] %s8712_s0 }
   0x2   :  { %8735 = sst [smem:[#allocation6_spill]] %s8713_s1 }
   0x3   :  { %8736 = sst [smem:[#allocation7_spill]] %s8714_s2 }
   0x4   :  { %v60_v0 = vlaneseq }
   0x5   :  { %23 = vsyncpa [#allocation3], 0  ;;  %s8737_s29 = sld [smem:[#allocation6_spill]]  ;;  %s8738_s19 = sld [smem:[#allocation5_spill]]  ;;  %v7212_v6 = vmov 0.0   ;;  %vm77_vm1 = vcmask 130048  }
   0x6   :  { %v61_v1 = vshrl.u32 %v60_v0, 7  ;;  %v64_v2 = vand.u32 127, %v60_v0  ;;  %v466_v21 = vld [vmem:[%s8716_s4] sm:$0xff]  ;;  %v640_v33 = vld [vmem:[%s8718_s6 + $0x8] sm:$0xf]  ;;  %vm648_vm6 = vcmask 1043456  }
   0x7   :  { %v639_v32 = vld [vmem:[%s8718_s6] sm:$0xff]  ;;  %s8739_s30 = sld [smem:[#allocation7_spill]]  ;;  %vm467_vm8 = vcmask 64512   ;;  %vm7213_vm9 = vmmov 1   ;;  %vm641_vm11 = vcmask 97280   ;;  %v638_v46 = vld [vmem:[%s8715_s3 + $0x8] sm:$0xff] }
   0x8   :  { %vm65_vm0 = vcmp.eq.s32.totalorder %v61_v1, %v64_v2  ;;  %v62_v5 = vadd.s32 8, %v61_v1  ;;  %v6869_v39 = vpack.c.bf16 %v640_v33, %v639_v32  ;;  %vm6870_vm10 = vmpackc.low %vm648_vm6, %vm7213_vm9  ;;  %v637_v45 = vld [vmem:[%s8715_s3] sm:$0xff]  ;;  %v824_v32 = vld [vmem:[%s8720_s8 + $0x18] sm:$0xff]  ;;  %vm911_vm13 = vcmask 261120  }
   0x9   :  { %v6063_v7 = vsel %vm65_vm0, 1.0, %v7212_v6 }
   0xa   :  { %vm66_vm2 = vcmp.eq.s32.totalorder %v62_v5, %v64_v2  ;;  %v825_v5 = vld [vmem:[%s8721_s9] sm:$0xff] }
   0xb   :  { %v7313_v3 = vld [vmem:[%s8737_s29] sm:$0xff]  ;;  %v7324_v8 = vld [vmem:[%s8737_s29 + $0x8] sm:$0xff]  ;;  %v6064_v12 = vsel %vm66_vm2, 1.0, %v7212_v6 }
   0xc   :  { %v7318_v4 = vld [vmem:[%s8738_s19] sm:$0xff]  ;;  %v7329_v9 = vld [vmem:[%s8738_s19 + $0x8] sm:$0xff]  ;;  %v270_v10 = vadd.f32 %v6063_v7, %v7313_v3  ;;  %v271_v15 = vadd.f32 %v6064_v12, %v7324_v8  ;;  %s7214_s19 = smov [#allocation2]  }
   0xd   :  { %v75_v11 = vadd.f32 %v6063_v7, %v7318_v4  ;;  %v76_v16 = vadd.f32 %v6064_v12, %v7329_v9  ;;  %v464_v41 = vld [vmem:[%s8739_s30] sm:$0xff]  ;;  %v465_v43 = vld [vmem:[%s8739_s30 + $0x8] sm:$0xff]  ;;  %v254_v57 = vsel %vm77_vm1, %v7318_v4, 0.0  ;;  %v257_v58 = vsel %vm77_vm1, %v7329_v9, 0.0 }
   0xe   :  { %v272_v13 = vsel %vm77_vm1, %v270_v10, 0.0  ;;  %v275_v17 = vsel %vm77_vm1, %v271_v15, 0.0  ;;  %v6857_v20 = vpack.c.bf16 %v271_v15, %v270_v10 }
   0xf   :  { %v78_v14 = vsel %vm77_vm1, %v75_v11, 0.0  ;;  %273 = vadd.xlane.f32.xlu1 %v272_v13  ;;  %v81_v18 = vsel %vm77_vm1, %v76_v16, 0.0  ;;  %v6849_v19 = vpack.c.bf16 %v76_v16, %v75_v11  ;;  %v827_v11 = vld [vmem:[%s8721_s9 + $0x10] sm:$0xff]  ;;  %v821_v13 = vld [vmem:[%s8720_s8] sm:$0xff] }
  0x10   :  { %79 = vadd.xlane.f32.xlu0 %v78_v14  ;;  %6858 = vmatprep.subr.bf16.mxu0 %v6857_v20  ;;  %v822_v14 = vld [vmem:[%s8720_s8 + $0x8] sm:$0xff] }
  0x11   :  { %6850 = vmatprep.subr.bf16.mxu1 %v6849_v19  ;;  %6860 = vmatpush3.bf16.msra.mxu0 %v6857_v20  ;;  %v6891_v15 = vpack.c.bf16 %v822_v14, %v821_v13  ;;  %v6081_v20 = vld [vmem:[%s8719_s7] ss:$0 sm:$0xff] }
  0x12   :  { %6852 = vmatpush3.bf16.msra.mxu1 %v6849_v19  ;;  %6513 = vmatprep.subr.mxu0 %v466_v21 }
  0x13   :  { %276 = vadd.xlane.f32.xlu1 %v275_v17 }
  0x14   :  { %82 = vadd.xlane.f32.xlu0 %v81_v18  ;;  %v6075_v18 = vld [vmem:[%s8717_s5] ss:$0 sm:$0xff] }
  0x17   :  { %258 = vadd.xlane.f32.xlu1 %v257_v58 }
  0x18   :  { %255 = vadd.xlane.f32.xlu0 %v254_v57 }
  0x9c   :  { %v274_v22 = vpop.xlane.xlu1 %273 }
  0x9d   :  { %v80_v23 = vpop.xlane.xlu0 %79  ;;  %7138 = vrsqrt.f32 %v274_v22  ;;  %vm278_vm3 = vcmp.gt.f32.partialorder %v274_v22, 0.0 }
  0x9e   :  { %7140 = vrsqrt.f32 %v80_v23  ;;  %vm84_vm4 = vcmp.gt.f32.partialorder %v80_v23, 0.0 }
  0xa0   :  { %v277_v24 = vpop.xlane.xlu1 %276 }
  0xa1   :  { %v83_v25 = vpop.xlane.xlu0 %82  ;;  %7142 = vrsqrt.f32 %v277_v24  ;;  %vm279_vm5 = vcmp.gt.f32.partialorder %v277_v24, 0.0 }
  0xa2   :  { %7144 = vrsqrt.f32 %v83_v25  ;;  %vm85_vm7 = vcmp.gt.f32.partialorder %v83_v25, 0.0 }
  0xa4   :  { %v259_v16 = vpop.xlane.xlu1 %258 }
  0xa5   :  { %v256_v63 = vpop.xlane.xlu0 %255  ;;  %vm261_vm14 = vcmp.gt.f32.partialorder %v259_v16, 0.0 }
  0xa6   :  { %7146 = vrcp.f32 %v256_v63  ;;  %vm260_vm12 = vcmp.gt.f32.partialorder %v256_v63, 0.0 }
  0xa7   :  { %v7139_v26 = vpop.eup %7138  ;;  %7148 = vrcp.f32 %v259_v16 }
  0xa8   :  { %v7141_v27 = vpop.eup %7140  ;;  %v282_v28 = vsel %vm278_vm3, %v7139_v26, 0.0 }
  0xa9   :  { %v88_v29 = vsel %vm84_vm4, %v7141_v27, 0.0  ;;  %v284_v30 = vmul.f32 %v6063_v7, %v282_v28 }
  0xaa   :  { %v90_v31 = vmul.f32 %v6063_v7, %v88_v29  ;;  %v826_v7 = vld [vmem:[%s8721_s9 + $0x8] sm:$0xff] }
  0xab   :  { %v7143_v34 = vpop.eup %7142  ;;  %6503 = vmatprep.mubr.msk.f32.mxu0 %vm77_vm1, %v284_v30  ;;  %v6883_v10 = vpack.c.bf16 %v826_v7, %v825_v5 }
  0xac   :  { %v7145_v35 = vpop.eup %7144  ;;  %v283_v36 = vsel %vm279_vm5, %v7143_v34, 0.0  ;;  %6489 = vmatprep.mubr.msk.f32.mxu1 %vm77_vm1, %v90_v31 }
  0xad   :  { %v285_v37 = vmul.f32 %v6064_v12, %v283_v36  ;;  %v89_v38 = vsel %vm85_vm7, %v7145_v35, 0.0 }
  0xae   :  { %v91_v40 = vmul.f32 %v6064_v12, %v89_v38 }
  0xaf   :  { %6504 = vmatmul.mubr.msk.f32.vlgmr.msra.gmra.mrb[0].mxu0 %vm77_vm1, %v285_v37  ;;  %v6861_v44 = vpack.c.bf16 %v285_v37, %v284_v30 }
  0xb0   :  { %v6853_v42 = vpack.c.bf16 %v91_v40, %v90_v31  ;;  %6490 = vmatmul.mubr.msk.f32.vlgmr.msra.gmra.mrb[0].mxu1 %vm77_vm1, %v91_v40  ;;  %6514 = vmatpush3.msra.mxu0 %v466_v21  ;;  %v7147_v0 = vpop.eup %7146  ;;  %v823_v31 = vld [vmem:[%s8720_s8 + $0x10] sm:$0xff] }
  0xb1   :  { %6515 = vmatprep.mubr.msk.f32.mxu0 %vm467_vm8, %v464_v41  ;;  %6871 = vmatprep.subr.msk.bf16.mxu0 %vm6870_vm10, %v6869_v39  ;;  %v266_v1 = vsel %vm260_vm12, %v7147_v0, 0.0  ;;  %v7149_v35 = vpop.eup %7148  ;;  %v6895_v38 = vpack.c.bf16 %v824_v32, %v823_v31 }
  0xb2   :  { %6854 = vmatprep.subr.bf16.mxu1 %v6853_v42  ;;  %v268_v2 = vmul.f32 %v266_v1, %v7318_v4  ;;  %v828_v4 = vld [vmem:[%s8721_s9 + $0x18] sm:$0xff]  ;;  %v267_v41 = vsel %vm261_vm14, %v7149_v35, 0.0  ;;  %s6055_s9 = sshll.u32 %s7214_s19, 4  ;;  %s6056_s9 = int_to_ptr.vmem [resolvable:$true] %s6055_s9 }
  0xb3   :  { %6856 = vmatpush3.bf16.msra.mxu1 %v6853_v42  ;;  %6516 = vmatmul.mubr.msk.f32.vlgmr.msra.gmra.mrb[2].mxu0 %vm467_vm8, %v465_v43  ;;  %v6887_v12 = vpack.c.bf16 %v828_v4, %v827_v11  ;;  %v269_v42 = vmul.f32 %v267_v41, %v7329_v9  ;;  %v448_v43 = vsel %vm77_vm1, %v7313_v3, 0.0  ;;  %v1498_v9 = vld [vmem:[%s8727_s15] sm:$0xff]  ;;  %s7188_s1 = scalar_lea.vmem %s6056_s9, 16  ;;  %s7192_s20 = scalar_lea.vmem %s6056_s9, 32 }
  0xb4   :  { %6862 = vmatprep.subr.bf16.mxu1 %v6861_v44  ;;  %6874 = vmatpush3.bf16.msk.msra.mxu0 %vm6870_vm10, %v6869_v39  ;;  %p7189_p0 = scmp.ne.s32.totalorder %s6056_s9, %s7188_s1  ;;  %p7193_p1 = scmp.lt.s32.totalorder %s6056_s9, %s6056_s9 }
  0xb5   :  { %6529 = vmatprep.mubr.msk.f32.mxu0 %vm641_vm11, %v637_v45  ;;  %449 = vadd.xlane.f32.xlu0 %v448_v43  ;;  %p7194_p2 = scmp.lt.s32.totalorder %s7192_s20, %s7188_s1 }
  0xb7   :  { %6530 = vmatmul.mubr.msk.f32.vlgmr.msra.gmra.mrb[4].mxu0 %vm641_vm11, %v638_v46  ;;  %p7195_p3 = por %p7194_p2, %p7193_p1 }
  0xb8   :  { %6543 = vmatprep.mubr.msk.f32.mxu0 %vm77_vm1, %v268_v2 }
  0xb9   :  { %p7196_p4 = pnand %p7195_p3, %p7189_p0 }
 0x182   :  { %v6505_v47 = vpop.f32.mrb[0].mxu0 }
 0x183   :  { %v6491_v48 = vpop.f32.mrb[0].mxu1  ;;  %v358_v49 = vpop.f32.mrb[1].mxu0 }
 0x184   :  { %v164_v50 = vpop.f32.mrb[1].mxu1 }
 0x185   :  { %6496 = vmatprep.mubr.msk.f32.mxu1 %vm77_vm1, %v164_v50  ;;  %v6090_v50 = vld [vmem:[%s8722_s10] ss:$0 sm:$0xff] }
 0x186   :  { %6497 = vmatmul.mubr.msk.f32.vlgmr.msra.gmra.mrb[2].mxu1 %vm77_vm1, %v6491_v48  ;;  %v6517_v51 = vpop.f32.mrb[2].mxu0  ;;  %v1085_v48 = vld [vmem:[%s8726_s14 + $0x8] sm:$0xff] }
 0x187   :  { %6864 = vmatpush3.bf16.msra.mxu1 %v6861_v44  ;;  %6510 = vmatprep.mubr.msk.f32.mxu1 %vm77_vm1, %v358_v49  ;;  %v540_v52 = vpop.f32.mrb[3].mxu0  ;;  %v451_v44 = vsel %vm77_vm1, %v7324_v8, 0.0  ;;  %v1084_v8 = vld [vmem:[%s8726_s14] sm:$0xff] }
 0x188   :  { %v6865_v53 = vpack.c.bf16 %v6517_v51, %v540_v52  ;;  %452 = vadd.xlane.f32.xlu1 %v451_v44  ;;  %v7443_v49 = vpack.c.bf16 %v1085_v48, %v1084_v8 }
 0x18a   :  { %6511 = vmatmul.mubr.msk.f32.vlgmr.msra.gmra.mrb[4].mxu1 %vm77_vm1, %v6505_v47  ;;  %6866 = vmatprep.subr.bf16.mxu1 %v6865_v53  ;;  %v6531_v54 = vpop.f32.mrb[4].mxu0  ;;  %v1499_v47 = vld [vmem:[%s8727_s15 + $0x8] sm:$0xff] }
 0x18b   :  { %6868 = vmatpush3.bf16.msra.mxu1 %v6865_v53  ;;  %v718_v55 = vpop.f32.mrb[5].mxu0  ;;  %v7433_v3 = vpack.c.bf16 %v1499_v47, %v1498_v9 }
 0x18c   :  { %v6875_v56 = vpack.c.bf16 %v6531_v54, %v718_v55 }
 0x18e   :  { %6876 = vmatprep.subr.bf16.mxu1 %v6875_v56 }
 0x259   :  { %v6498_v59 = vpop.f32.mrb[2].mxu1 }
 0x25a   :  { %v245_v60 = vpop.f32.mrb[3].mxu1 }
 0x25b   :  { %6522 = vmatprep.mubr.msk.f32.mxu1 %vm77_vm1, %v245_v60 }
 0x25c   :  { %6523 = vmatmul.mubr.msk.f32.vlgmr.msra.gmra.mrb[6].mxu1 %vm77_vm1, %v6498_v59 }
 0x25d   :  { %6878 = vmatpush3.bf16.msra.mxu1 %v6875_v56  ;;  %v6512_v61 = vpop.f32.mrb[4].mxu1 }
 0x25e   :  { %v439_v62 = vpop.f32.mrb[5].mxu1  ;;  %6884 = vmatprep.subr.bf16.mxu1 %v6883_v10 }
 0x25f   :  { %6536 = vmatprep.mubr.msk.f32.mxu1 %vm77_vm1, %v439_v62 }
 0x260   :  { %6537 = vmatmul.mubr.msk.f32.vlgmr.msra.gmra.mrb[8].mxu1 %vm77_vm1, %v6512_v61 }
 0x261   :  { %6886 = vmatpush3.bf16.msra.mxu1 %v6883_v10 }
 0x262   :  { %6888 = vmatprep.subr.bf16.mxu1 %v6887_v12 }
 0x265   :  { %6890 = vmatpush3.bf16.msra.mxu1 %v6887_v12 }
 0x266   :  { %6892 = vmatprep.subr.bf16.mxu1 %v6891_v15 }
 0x32f   :  { %v6524_v17 = vpop.f32.mrb[6].mxu1 }
 0x330   :  { %v628_v19 = vpop.f32.mrb[7].mxu1  ;;  %v634_v21 = vadd.f32 %v6524_v17, %v6075_v18 }
 0x331   :  { %v629_v22 = vadd.f32 %v6075_v18, %v628_v19 }
 0x332   :  { %v818_v27 = vmax.f32 %v634_v21, 0.0 }
 0x333   :  { %v6538_v23 = vpop.f32.mrb[8].mxu1  ;;  %v817_v29 = vmax.f32 %v629_v22, 0.0 }
 0x334   :  { %v812_v24 = vadd.f32 %v6538_v23, %v6081_v20  ;;  %v806_v25 = vpop.f32.mrb[9].mxu1 }
 0x335   :  { %v807_v26 = vadd.f32 %v6081_v20, %v806_v25 }
 0x336   :  { %v816_v28 = vmax.f32 %v812_v24, 0.0 }
 0x337   :  { %v815_v30 = vmax.f32 %v807_v26, 0.0 }
 0x338   :  { %v820_v33 = vadd.f32 %v818_v27, %v816_v28  ;;  %v7409_v34 = vadd.f32 %v816_v28, %v812_v24 }
 0x339   :  { %v819_v36 = vadd.f32 %v817_v29, %v815_v30  ;;  %v7411_v37 = vadd.f32 %v815_v30, %v807_v26 }
 0x33b   :  { %6554 = vmatprep.mubr.msk.f32.mxu1 %vm911_vm13, %v819_v36  ;;  %v6879_v39 = vpack.c.bf16 %v820_v33, %v819_v36  ;;  %v7416_v40 = vpack.c.bf16 %v7409_v34, %v7411_v37 }
 0x33c   :  { %6555 = vmatmul.mubr.msk.f32.vlgmr.msra.gmra.mrb[10].mxu1 %vm911_vm13, %v820_v33 }
 0x33d   :  { %6880 = vmatprep.subr.bf16.mxu0 %v6879_v39  ;;  %6894 = vmatpush3.bf16.msra.mxu1 %v6891_v15 }
 0x33e   :  { %6882 = vmatpush3.bf16.msra.mxu0 %v6879_v39  ;;  %6896 = vmatprep.subr.bf16.mxu1 %v6895_v38 }
 0x33f   :  { %6900 = vmatprep.subr.bf16.mxu0 %v7433_v3 }
 0x341   :  { %6544 = vmatmul.mubr.msk.f32.vlgmr.msra.gmra.mrb[6].mxu0 %vm77_vm1, %v269_v42  ;;  %6898 = vmatpush3.bf16.msra.mxu1 %v6895_v38 }
 0x342   :  { %6902 = vmatpush3.bf16.msra.mxu0 %v7433_v3 }
 0x343   :  { %6904 = vmatprep.subr.bf16.mxu0 %v7443_v49 }
 0x414   :  { %v6545_v45 = vpop.f32.mrb[6].mxu0 }
 0x415   :  { %v902_v46 = vpop.f32.mrb[7].mxu0 }
 0x416   :  { %6565 = vmatprep.mubr.msk.f32.mxu1 %vm911_vm13, %v902_v46 }
 0x417   :  { %6566 = vmatmul.mubr.msk.f32.vlgmr.msra.gmra.mrb[10].mxu1 %vm911_vm13, %v6545_v45 }
 0x4ea   :  { %v6567_v51 = vpop.f32.mrb[10].mxu1 }
 0x4eb   :  { %v1081_v52 = vadd.f32 %v6567_v51, %v6090_v50  ;;  %v1065_v53 = vpop.f32.mrb[11].mxu1 }
 0x4ec   :  { %v1080_v54 = vadd.f32 %v6090_v50, %v1065_v53 }
 0x4ed   :  { %v7449_v55 = vmax.f32 %v1081_v52, 0.0 }
 0x4ee   :  { %v7451_v56 = vmax.f32 %v1080_v54, 0.0 }
 0x4ef   :  { %vm1101_vm15 = vcmp.ge.f32.partialorder %v7449_v55, -2.2  ;;  %vm1103_vm0 = vcmp.lt.f32.partialorder %v7449_v55, -1.8  ;;  %vm1109_vm5 = vcmp.ge.f32.partialorder %v7449_v55, -1.8 }
 0x4f0   :  { %vm1100_vm2 = vcmp.ge.f32.partialorder %v7451_v56, -2.2  ;;  %vm1102_vm3 = vcmp.lt.f32.partialorder %v7451_v56, -1.8  ;;  %vm1108_vm4 = vcmp.ge.f32.partialorder %v7451_v56, -1.8 }
 0x4f1   :  { %vm1104_vm6 = vmand %vm1100_vm2, %vm1102_vm3  ;;  %vm1110_vm7 = vcmp.lt.f32.partialorder %v7451_v56, -1.4  ;;  %vm1116_vm8 = vcmp.ge.f32.partialorder %v7451_v56, -1.4  ;;  %vm1118_vm9 = vcmp.lt.f32.partialorder %v7451_v56, -1.0  ;;  %vm1124_vm10 = vcmp.ge.f32.partialorder %v7451_v56, -1.0 }
 0x4f2   :  { %vm1112_vm11 = vmand %vm1108_vm4, %vm1110_vm7  ;;  %vm1126_vm12 = vcmp.lt.f32.partialorder %v7451_v56, -0.6  ;;  %v6091_v57 = vadd.f32 2.2, %v7451_v56  ;;  %v1208_v58 = vsub.f32 -1.0, %v7451_v56  ;;  %v1106_v59 = vsel %vm1104_vm6, 1.0, %v7212_v6 }
 0x4f3   :  { %v1114_v60 = vsel %vm1112_vm11, 1.0, %v7212_v6  ;;  %vm1120_vm14 = vmand %vm1116_vm8, %vm1118_vm9  ;;  %v1194_v61 = vsub.f32 -1.4, %v7451_v56  ;;  %v7470_v62 = vadd.f32 1.8, %v7451_v56  ;;  %vm1119_vm7 = vcmp.lt.f32.partialorder %v7449_v55, -1.0 }
 0x4f4   :  { %v1122_v63 = vsel %vm1120_vm14, 1.0, %v7212_v6  ;;  %vm1128_vm2 = vmand %vm1124_vm10, %vm1126_vm12  ;;  %v1190_v0 = vmul.f32 2.5, %v6091_v57  ;;  %v1210_v1 = vmul.f32 2.5, %v1208_v58  ;;  %v7474_v2 = vadd.f32 1.4, %v7451_v56 }
 0x4f5   :  { %v7477_v5 = vsel %vm1128_vm2, 1.0, %v7212_v6  ;;  %v1196_v7 = vmul.f32 2.5, %v1194_v61  ;;  %v1204_v10 = vmul.f32 2.5, %v7470_v62  ;;  %v1222_v11 = vsub.f32 -0.6, %v7451_v56  ;;  %vm1105_vm3 = vmand %vm1101_vm15, %vm1103_vm0 }
 0x4f6   :  { %v1192_v4 = vmul.f32 %v1190_v0, %v1106_v59  ;;  %v1212_v12 = vmul.f32 %v1210_v1, %v1122_v63  ;;  %v1218_v13 = vmul.f32 2.5, %v7474_v2  ;;  %v1328_v14 = vmul.f32 1.25, %v6091_v57 }
 0x4f7   :  { %v1198_v15 = vmul.f32 %v1196_v7, %v1114_v60  ;;  %v1206_v16 = vmul.f32 %v1204_v10, %v1114_v60  ;;  %v1224_v17 = vmul.f32 2.5, %v1222_v11  ;;  %v1332_v18 = vmul.f32 1.25, %v1208_v58 }
 0x4f8   :  { %v1220_v19 = vmul.f32 %v1218_v13, %v1122_v63  ;;  %v1338_v20 = vmul.f32 1.25, %v7470_v62  ;;  %v1342_v21 = vmul.f32 1.25, %v1222_v11  ;;  %v1418_v22 = vmul.f32 0.8333333, %v6091_v57 }
 0x4f9   :  { %v1200_v23 = vadd.f32 %v1198_v15, %v1192_v4  ;;  %v1214_v24 = vadd.f32 %v1212_v12, %v1206_v16  ;;  %v1226_v25 = vmul.f32 %v1224_v17, %v7477_v5  ;;  %v1422_v26 = vmul.f32 0.8333333, %v1222_v11 }
 0x4fa   :  { %vm1111_vm4 = vcmp.lt.f32.partialorder %v7449_v55, -1.4  ;;  %vm1117_vm6 = vcmp.ge.f32.partialorder %v7449_v55, -1.4  ;;  %vm1125_vm8 = vcmp.ge.f32.partialorder %v7449_v55, -1.0  ;;  %v1107_v31 = vsel %vm1105_vm3, 1.0, %v7212_v6 }
 0x4fb   :  { %v7492_v27 = vadd.f32 %v1226_v25, %v1220_v19  ;;  %v1330_v28 = vmul.f32 %v1328_v14, %v1200_v23  ;;  %v1334_v29 = vmul.f32 %v1332_v18, %v1214_v24  ;;  %v1340_v30 = vmul.f32 %v1338_v20, %v1214_v24  ;;  %vm1113_vm9 = vmand %vm1109_vm5, %vm1111_vm4  ;;  %v6115_v18 = vld [vmem:[%s8727_s15 + $0x10] sm:$0xff] }
 0x4fc   :  { %vm1121_vm10 = vmand %vm1117_vm6, %vm1119_vm7  ;;  %vm1127_vm15 = vcmp.lt.f32.partialorder %v7449_v55, -0.6  ;;  %v6092_v32 = vadd.f32 2.2, %v7449_v55  ;;  %v1209_v33 = vsub.f32 -1.0, %v7449_v55  ;;  %v1115_v41 = vsel %vm1113_vm9, 1.0, %v7212_v6 }
 0x4fd   :  { %v1336_v35 = vadd.f32 %v1334_v29, %v1330_v28  ;;  %v1344_v36 = vmul.f32 %v1342_v21, %v7492_v27  ;;  %v1123_v38 = vsel %vm1121_vm10, 1.0, %v7212_v6  ;;  %v1195_v39 = vsub.f32 -1.4, %v7449_v55  ;;  %vm1129_vm0 = vmand %vm1125_vm8, %vm1127_vm15  ;;  %v6116_v21 = vld [vmem:[%s8727_s15 + $0x18] sm:$0xff]  ;;  %v6119_v29 = vld [vmem:[%s8727_s15 + $0x20] sm:$0xff] }
 0x4fe   :  { %v1191_v42 = vmul.f32 2.5, %v6092_v32  ;;  %v7507_v43 = vadd.f32 1.8, %v7449_v55  ;;  %v1211_v44 = vmul.f32 2.5, %v1209_v33  ;;  %v7512_v47 = vadd.f32 1.4, %v7449_v55 }
 0x4ff   :  { %v7509_v45 = vadd.f32 %v1344_v36, %v1340_v30  ;;  %v1420_v46 = vmul.f32 %v1418_v22, %v1336_v35  ;;  %v1197_v9 = vmul.f32 2.5, %v1195_v39  ;;  %v1223_v51 = vsub.f32 -0.6, %v7449_v55  ;;  %v6120_v30 = vld [vmem:[%s8727_s15 + $0x28] sm:$0xff] }
 0x500   :  { %v1193_v8 = vmul.f32 %v1191_v42, %v1107_v31  ;;  %v1205_v48 = vmul.f32 2.5, %v7507_v43  ;;  %v1213_v50 = vmul.f32 %v1211_v44, %v1123_v38  ;;  %v7518_v53 = vsel %vm1129_vm0, 1.0, %v7212_v6 }
 0x501   :  { %v1424_v52 = vmul.f32 %v1422_v26, %v7509_v45  ;;  %v1199_v54 = vmul.f32 %v1197_v9, %v1115_v41  ;;  %v1219_v57 = vmul.f32 2.5, %v7512_v47  ;;  %v1225_v59 = vmul.f32 2.5, %v1223_v51  ;;  %v6123_v9 = vld [vmem:[%s8727_s15 + $0x30] sm:$0xff] }
 0x502   :  { %v1207_v58 = vmul.f32 %v1205_v48, %v1115_v41  ;;  %v1329_v60 = vmul.f32 1.25, %v6092_v32  ;;  %v1333_v1 = vmul.f32 1.25, %v1209_v33  ;;  %v1339_v11 = vmul.f32 1.25, %v7507_v43 }
 0x503   :  { %v1426_v61 = vadd.f32 %v1424_v52, %v1420_v46  ;;  %v1201_v63 = vadd.f32 %v1199_v54, %v1193_v8  ;;  %v1221_v0 = vmul.f32 %v1219_v57, %v1123_v38  ;;  %v1227_v10 = vmul.f32 %v1225_v59, %v7518_v53  ;;  %v6124_v8 = vld [vmem:[%s8727_s15 + $0x38] sm:$0xff] }
 0x504   :  { %v1215_v7 = vadd.f32 %v1213_v50, %v1207_v58  ;;  %v1343_v4 = vmul.f32 1.25, %v1223_v51  ;;  %v1086_v13 = vmax.f32 %v7451_v56, -30.0  ;;  %v1087_v14 = vmax.f32 %v7449_v55, -30.0  ;;  %v6131_v58 = vld [vmem:[%s8727_s15 + $0x50] sm:$0xff]  ;;  %v6132_v59 = vld [vmem:[%s8727_s15 + $0x58] sm:$0xff] }
 0x505   :  { %6572 = vmatprep.mubr.msk.f32.mxu0 %vm77_vm1, %v1426_v61  ;;  %v1331_v12 = vmul.f32 %v1329_v60, %v1201_v63  ;;  %vm1132_vm5 = vcmp.ge.f32.partialorder %v7451_v56, -0.6  ;;  %v7527_v15 = vadd.f32 %v1227_v10, %v1221_v0  ;;  %vm1134_vm11 = vcmp.lt.f32.partialorder %v7451_v56, -0.2  ;;  %v7586_v60 = vpop.xlane.xlu0 %449  ;;  %v6136_v10 = vld [vmem:[%s8727_s15 + $0x68] sm:$0xff] }
 0x506   :  { %v1335_v16 = vmul.f32 %v1333_v1, %v1215_v7  ;;  %v1341_v17 = vmul.f32 %v1339_v11, %v1215_v7  ;;  %v1088_v19 = vsub.f32 0.0, %v1086_v13  ;;  %v1089_v20 = vsub.f32 0.0, %v1087_v14  ;;  %vm1136_vm12 = vmand %vm1132_vm5, %vm1134_vm11  ;;  %v6135_v7 = vld [vmem:[%s8727_s15 + $0x60] sm:$0xff] }
 0x507   :  { %v7537_v22 = vadd.f32 1.0, %v7451_v56  ;;  %v1236_v23 = vsub.f32 -0.2, %v7451_v56  ;;  %v1345_v25 = vmul.f32 %v1343_v4, %v7527_v15  ;;  %v1419_v26 = vmul.f32 0.8333333, %v6092_v32 }
 0x508   :  { %v1337_v24 = vadd.f32 %v1335_v16, %v1331_v12  ;;  %v7542_v28 = vsel %vm1136_vm12, 1.0, %v7212_v6  ;;  %v1090_v31 = vmul.f32 1.442695, %v1088_v19  ;;  %v1092_v33 = vmul.f32 1.442695, %v1089_v20 }
 0x509   :  { %v1232_v35 = vmul.f32 2.5, %v7537_v22  ;;  %v1238_v36 = vmul.f32 2.5, %v1236_v23  ;;  %v7551_v38 = vadd.f32 %v1345_v25, %v1341_v17  ;;  %v1423_v32 = vmul.f32 0.8333333, %v1223_v51  ;;  %v6128_v51 = vld [vmem:[%s8727_s15 + $0x48] sm:$0xff] }
 0x50a   :  { %v1421_v39 = vmul.f32 %v1419_v26, %v1337_v24  ;;  %v7553_v41 = vpack.c.bf16 %v6116_v21, %v6115_v18  ;;  %7150 = vpow2.f32 %v1090_v31  ;;  %v7557_v46 = vpack.c.bf16 %v6120_v30, %v6119_v29 }
 0x50b   :  { %v1234_v42 = vmul.f32 %v1232_v35, %v7477_v5  ;;  %v1240_v44 = vmul.f32 %v1238_v36, %v7542_v28  ;;  %v1425_v48 = vmul.f32 %v1423_v32, %v7551_v38  ;;  %7152 = vpow2.f32 %v1092_v33  ;;  %v6127_v5 = vld [vmem:[%s8727_s15 + $0x40] sm:$0xff] }
 0x50c   :  { %v1348_v50 = vmul.f32 1.25, %v7474_v2  ;;  %vm1133_vm14 = vcmp.ge.f32.partialorder %v7449_v55, -0.6  ;;  %v1352_v54 = vmul.f32 1.25, %v1236_v23  ;;  %vm1135_vm2 = vcmp.lt.f32.partialorder %v7449_v55, -0.2 }
 0x50d   :  { %v7574_v52 = vadd.f32 %v1240_v44, %v1234_v42  ;;  %v7578_v57 = vadd.f32 1.0, %v7449_v55  ;;  %v1427_v61 = vadd.f32 %v1425_v48, %v1421_v39  ;;  %vm1137_vm3 = vmand %vm1133_vm14, %vm1135_vm2  ;;  %v1237_v0 = vsub.f32 -0.2, %v7449_v55 }
 0x50e   :  { %v1350_v63 = vmul.f32 %v1348_v50, %v7492_v27  ;;  %v7590_v1 = vpack.c.bf16 %v6124_v8, %v6123_v9  ;;  %v1139_v4 = vsel %vm1137_vm3, 1.0, %v7212_v6  ;;  %vm1140_vm4 = vcmp.ge.f32.partialorder %v7451_v56, -0.2 }
 0x50f   :  { %v1354_v11 = vmul.f32 %v1352_v54, %v7574_v52  ;;  %v1233_v12 = vmul.f32 2.5, %v7578_v57  ;;  %6573 = vmatmul.mubr.msk.f32.vlgmr.msra.gmra.mrb[8].mxu0 %vm77_vm1, %v1427_v61  ;;  %v1239_v27 = vmul.f32 2.5, %v1237_v0  ;;  %v7603_v13 = vpack.c.bf16 %v6128_v51, %v6127_v5 }
 0x510   :  { %v7605_v14 = vpack.c.bf16 %v6132_v59, %v6131_v58  ;;  %7154 = vrcp.f32 %v7586_v60  ;;  %6906 = vmatpush3.bf16.msra.mxu0 %v7443_v49  ;;  %v1428_v16 = vmul.f32 0.8333333, %v7470_v62  ;;  %vm1142_vm6 = vcmp.lt.f32.partialorder %v7451_v56, 0.2 }
 0x511   :  { %v1235_v17 = vmul.f32 %v1233_v12, %v7518_v53  ;;  %v7612_v18 = vpack.c.bf16 %v6136_v10, %v6135_v7  ;;  %6908 = vmatprep.subr.bf16.mxu0 %v7553_v41  ;;  %v1356_v19 = vadd.f32 %v1354_v11, %v1350_v63  ;;  %v1241_v20 = vmul.f32 %v1239_v27, %v1139_v4  ;;  %vm1144_vm7 = vmand %vm1140_vm4, %vm1142_vm6 }
 0x512   :  { %v7616_v21 = vadd.f32 0.6, %v7451_v56  ;;  %v1250_v24 = vsub.f32 0.2, %v7451_v56  ;;  %v1430_v25 = vmul.f32 %v1428_v16, %v7509_v45  ;;  %v1432_v26 = vmul.f32 0.8333333, %v1236_v23 }
 0x513   :  { %v1349_v62 = vmul.f32 1.25, %v7512_v47  ;;  %v1146_v53 = vsel %vm1144_vm7, 1.0, %v7212_v6  ;;  %v1243_v29 = vadd.f32 %v1241_v20, %v1235_v17  ;;  %v1429_v30 = vmul.f32 0.8333333, %v7507_v43 }
 0x514   :  { %v1246_v31 = vmul.f32 2.5, %v7616_v21  ;;  %v1252_v33 = vmul.f32 2.5, %v1250_v24  ;;  %v7151_v35 = vpop.eup %7150  ;;  %v1353_v39 = vmul.f32 1.25, %v1237_v0  ;;  %v1358_v32 = vmul.f32 1.25, %v7537_v22 }
 0x515   :  { %v1351_v36 = vmul.f32 %v1349_v62, %v7527_v15  ;;  %vm1141_vm8 = vcmp.ge.f32.partialorder %v7449_v55, -0.2  ;;  %v7153_v45 = vpop.eup %7152  ;;  %v1094_v23 = vadd.f32 1.0, %v7151_v35  ;;  %v1434_v42 = vmul.f32 %v1432_v26, %v1356_v19 }
 0x516   :  { %v1248_v44 = vmul.f32 %v1246_v31, %v7542_v28  ;;  %v1254_v9 = vmul.f32 %v1252_v33, %v1146_v53  ;;  %v1095_v8 = vadd.f32 1.0, %v7153_v45  ;;  %v1355_v48 = vmul.f32 %v1353_v39, %v1243_v29 }
 0x517   :  { %vm1143_vm9 = vcmp.lt.f32.partialorder %v7449_v55, 0.2  ;;  %v7630_v43 = vadd.f32 0.6, %v7449_v55  ;;  %7156 = vrcp.f32 %v1094_v23  ;;  %v1362_v50 = vmul.f32 1.25, %v1250_v24 }
 0x518   :  { %v1256_v15 = vadd.f32 %v1254_v9, %v1248_v44  ;;  %vm1145_vm10 = vmand %vm1141_vm8, %vm1143_vm9  ;;  %v1251_v5 = vsub.f32 0.2, %v7449_v55  ;;  %7158 = vrcp.f32 %v1095_v8  ;;  %v1431_v51 = vmul.f32 %v1429_v30, %v7551_v38 }
 0x519   :  { %v1147_v54 = vsel %vm1145_vm10, 1.0, %v7212_v6  ;;  %v1247_v28 = vmul.f32 2.5, %v7630_v43  ;;  %v1433_v59 = vmul.f32 0.8333333, %v1237_v0  ;;  %v1360_v61 = vmul.f32 %v1358_v32, %v7574_v52 }
 0x51a   :  { %v7636_v58 = vpop.eup %7154  ;;  %v1364_v63 = vmul.f32 %v1362_v50, %v1256_v15  ;;  %v1253_v7 = vmul.f32 2.5, %v1251_v5  ;;  %v1357_v10 = vadd.f32 %v1355_v48, %v1351_v36  ;;  %v1438_v11 = vmul.f32 0.8333333, %v7474_v2 }
 0x51b   :  { %v1249_v12 = vmul.f32 %v1247_v28, %v1139_v4  ;;  %vm1148_vm15 = vcmp.ge.f32.partialorder %v7451_v56, 0.2  ;;  %v1436_v27 = vadd.f32 %v1434_v42, %v1430_v25  ;;  %v1442_v16 = vmul.f32 0.8333333, %v1250_v24 }
 0x51c   :  { %v1255_v38 = vmul.f32 %v1253_v7, %v1147_v54  ;;  %vm1150_vm0 = vcmp.lt.f32.partialorder %v7451_v56, 0.6  ;;  %v1440_v17 = vmul.f32 %v1438_v11, %v1356_v19  ;;  %v1359_v20 = vmul.f32 1.25, %v7578_v57 }
 0x51d   :  { %vm1152_vm5 = vmand %vm1148_vm15, %vm1150_vm0  ;;  %v7644_v0 = vadd.f32 0.2, %v7451_v56  ;;  %v1264_v52 = vsub.f32 0.6, %v7451_v56  ;;  %v1366_v26 = vadd.f32 %v1364_v63, %v1360_v61  ;;  %v1363_v2 = vmul.f32 1.25, %v1251_v5 }
 0x51e   :  { %v1257_v62 = vadd.f32 %v1255_v38, %v1249_v12  ;;  %v1154_v4 = vsel %vm1152_vm5, 1.0, %v7212_v6  ;;  %v1435_v30 = vmul.f32 %v1433_v59, %v1357_v10  ;;  %v1361_v25 = vmul.f32 %v1359_v20, %v1243_v29 }
 0x51f   :  { %v1260_v24 = vmul.f32 2.5, %v7644_v0  ;;  %v1266_v31 = vmul.f32 2.5, %v1264_v52  ;;  %v1439_v19 = vmul.f32 0.8333333, %v7512_v47  ;;  %v1443_v35 = vmul.f32 0.8333333, %v1251_v5 }
 0x520   :  { %v1365_v33 = vmul.f32 %v1363_v2, %v1257_v62  ;;  %v1368_v36 = vmul.f32 1.25, %v7616_v21  ;;  %vm1149_vm11 = vcmp.ge.f32.partialorder %v7449_v55, 0.2  ;;  %vm1151_vm12 = vcmp.lt.f32.partialorder %v7449_v55, 0.6 }
 0x521   :  { %v1262_v39 = vmul.f32 %v1260_v24, %v1146_v53  ;;  %v1268_v32 = vmul.f32 %v1266_v31, %v1154_v4  ;;  %v7157_v45 = vpop.eup %7156  ;;  %v1444_v23 = vmul.f32 %v1442_v16, %v1366_v26  ;;  %v1372_v42 = vmul.f32 1.25, %v1264_v52  ;;  %vm1153_vm14 = vmand %vm1149_vm11, %vm1151_vm12 }
 0x522   :  { %v7654_v29 = vadd.f32 0.2, %v7449_v55  ;;  %v1265_v44 = vsub.f32 0.6, %v7449_v55  ;;  %v7159_v9 = vpop.eup %7158  ;;  %v1098_v47 = vmul.f32 %v7157_v45, %v7451_v56  ;;  %v1367_v8 = vadd.f32 %v1365_v33, %v1361_v25 }
 0x523   :  { %v1270_v48 = vadd.f32 %v1268_v32, %v1262_v39  ;;  %v7659_v53 = vsel %vm1153_vm14, 1.0, %v7212_v6  ;;  %v1099_v50 = vmul.f32 %v7159_v9, %v7449_v55  ;;  %v1370_v5 = vmul.f32 %v1368_v36, %v1256_v15 }
 0x524   :  { %v1261_v28 = vmul.f32 2.5, %v7654_v29  ;;  %v1267_v59 = vmul.f32 2.5, %v1265_v44  ;;  %6579 = vmatprep.mubr.msk.f32.mxu0 %vm77_vm1, %v1098_v47  ;;  %v1437_v61 = vadd.f32 %v1435_v30, %v1431_v51  ;;  %v1441_v63 = vmul.f32 %v1439_v19, %v1357_v10 }
 0x525   :  { %v1374_v7 = vmul.f32 %v1372_v42, %v1270_v48  ;;  %v1448_v11 = vmul.f32 0.8333333, %v7537_v22  ;;  %6580 = vmatmul.mubr.msk.f32.vlgmr.msra.gmra.mrb[8].mxu0 %vm77_vm1, %v1099_v50  ;;  %v1446_v12 = vadd.f32 %v1444_v23, %v1440_v17  ;;  %v1369_v20 = vmul.f32 1.25, %v7630_v43 }
 0x526   :  { %v1263_v16 = vmul.f32 %v1261_v28, %v1147_v54  ;;  %v1269_v38 = vmul.f32 %v1267_v59, %v7659_v53  ;;  %6910 = vmatpush3.bf16.msra.mxu0 %v7553_v41  ;;  %6586 = vmatprep.mubr.msk.f32.mxu0 %vm77_vm1, %v1436_v27  ;;  %v1445_v15 = vmul.f32 %v1443_v35, %v1367_v8  ;;  %vm1156_vm2 = vcmp.ge.f32.partialorder %v7451_v56, 0.6 }
 0x527   :  { %vm1158_vm3 = vcmp.lt.f32.partialorder %v7451_v56, 1.0  ;;  %v7673_v51 = vadd.f32 -0.2, %v7451_v56  ;;  %6912 = vmatprep.subr.bf16.mxu0 %v7557_v46  ;;  %v1376_v22 = vadd.f32 %v1374_v7, %v1370_v5  ;;  %v1373_v10 = vmul.f32 1.25, %v1265_v44 }
 0x528   :  { %v1271_v54 = vadd.f32 %v1269_v38, %v1263_v16  ;;  %vm1160_vm4 = vmand %vm1156_vm2, %vm1158_vm3  ;;  %v1278_v17 = vsub.f32 1.0, %v7451_v56  ;;  %v1452_v2 = vmul.f32 0.8333333, %v1264_v52  ;;  %v1449_v30 = vmul.f32 0.8333333, %v7578_v57 }
 0x529   :  { %v1162_v27 = vsel %vm1160_vm4, 1.0, %v7212_v6  ;;  %v1274_v25 = vmul.f32 2.5, %v7673_v51  ;;  %v1371_v24 = vmul.f32 %v1369_v20, %v1257_v62  ;;  %vm1157_vm6 = vcmp.ge.f32.partialorder %v7449_v55, 0.6 }
 0x52a   :  { %v1375_v31 = vmul.f32 %v1373_v10, %v1271_v54  ;;  %v1280_v33 = vmul.f32 2.5, %v1278_v17  ;;  %v1447_v19 = vadd.f32 %v1445_v15, %v1441_v63  ;;  %v1450_v35 = vmul.f32 %v1448_v11, %v1366_v26 }
 0x52b   :  { %v1451_v36 = vmul.f32 %v1449_v30, %v1367_v8  ;;  %v1276_v39 = vmul.f32 %v1274_v25, %v1154_v4  ;;  %v1454_v32 = vmul.f32 %v1452_v2, %v1376_v22  ;;  %vm1159_vm7 = vcmp.lt.f32.partialorder %v7449_v55, 1.0 }
 0x52c   :  { %v1282_v45 = vmul.f32 %v1280_v33, %v1162_v27  ;;  %v7683_v52 = vadd.f32 -0.2, %v7449_v55  ;;  %v1378_v57 = vmul.f32 1.25, %v7644_v0  ;;  %v1382_v23 = vmul.f32 1.25, %v1278_v17  ;;  %vm1161_vm8 = vmand %vm1157_vm6, %vm1159_vm7 }
 0x52d   :  { %v1458_v62 = vmul.f32 0.8333333, %v7616_v21  ;;  %v1279_v42 = vsub.f32 1.0, %v7449_v55  ;;  %6587 = vmatmul.mubr.msk.f32.vlgmr.msra.gmra.mrb[8].mxu0 %vm77_vm1, %v1437_v61  ;;  %v1377_v26 = vadd.f32 %v1375_v31, %v1371_v24  ;;  %v1163_v4 = vsel %vm1161_vm8, 1.0, %v7212_v6 }
 0x52e   :  { %v1284_v9 = vadd.f32 %v1282_v45, %v1276_v39  ;;  %v1275_v47 = vmul.f32 2.5, %v7683_v52  ;;  %6914 = vmatpush3.bf16.msra.mxu0 %v7557_v46  ;;  %6593 = vmatprep.mubr.msk.f32.mxu0 %vm77_vm1, %v1446_v12  ;;  %v1453_v8 = vmul.f32 0.8333333, %v1265_v44  ;;  %v1380_v50 = vmul.f32 %v1378_v57, %v1270_v48 }
 0x52f   :  { %v1281_v5 = vmul.f32 2.5, %v1279_v42  ;;  %vm1164_vm9 = vcmp.ge.f32.partialorder %v7451_v56, 1.0  ;;  %6916 = vmatprep.subr.bf16.mxu0 %v7590_v1  ;;  %v1456_v21 = vadd.f32 %v1454_v32, %v1450_v35  ;;  %v1460_v59 = vmul.f32 %v1458_v62, %v1376_v22 }
 0x530   :  { %v1384_v28 = vmul.f32 %v1382_v23, %v1284_v9  ;;  %v1277_v61 = vmul.f32 %v1275_v47, %v7659_v53  ;;  %vm1166_vm10 = vcmp.lt.f32.partialorder %v7451_v56, 1.4  ;;  %v7698_v7 = vadd.f32 -0.6, %v7451_v56 }
 0x531   :  { %v1283_v63 = vmul.f32 %v1281_v5, %v1163_v4  ;;  %v1292_v11 = vsub.f32 1.4, %v7451_v56  ;;  %v1455_v44 = vmul.f32 %v1453_v8, %v1377_v26  ;;  %v1462_v48 = vmul.f32 0.8333333, %v1278_v17  ;;  %vm1168_vm15 = vmand %vm1164_vm9, %vm1166_vm10 }
 0x532   :  { %v1379_v12 = vmul.f32 1.25, %v7654_v29  ;;  %v1459_v16 = vmul.f32 0.8333333, %v7630_v43  ;;  %v1170_v20 = vsel %vm1168_vm15, 1.0, %v7212_v6  ;;  %v1288_v53 = vmul.f32 2.5, %v7698_v7 }
 0x533   :  { %v1285_v38 = vadd.f32 %v1283_v63, %v1277_v61  ;;  %v1294_v15 = vmul.f32 2.5, %v1292_v11  ;;  %v1386_v22 = vadd.f32 %v1384_v28, %v1380_v50  ;;  %v1383_v2 = vmul.f32 1.25, %v1279_v42 }
 0x534   :  { %v1381_v10 = vmul.f32 %v1379_v12, %v1271_v54  ;;  %vm1165_vm0 = vcmp.ge.f32.partialorder %v7449_v55, 1.0  ;;  %v1290_v30 = vmul.f32 %v1288_v53, %v1162_v27  ;;  %v1388_v17 = vmul.f32 1.25, %v7673_v51 }
 0x535   :  { %v1296_v25 = vmul.f32 %v1294_v15, %v1170_v20  ;;  %v1468_v24 = vmul.f32 0.8333333, %v7644_v0  ;;  %6594 = vmatmul.mubr.msk.f32.vlgmr.msra.gmra.mrb[8].mxu0 %vm77_vm1, %v1447_v19  ;;  %v1461_v43 = vmul.f32 %v1459_v16, %v1377_v26  ;;  %vm1167_vm5 = vcmp.lt.f32.partialorder %v7449_v55, 1.4 }
 0x536   :  { %v7711_v31 = vadd.f32 -0.6, %v7449_v55  ;;  %v1293_v33 = vsub.f32 1.4, %v7449_v55  ;;  %6918 = vmatpush3.bf16.msra.mxu0 %v7590_v1  ;;  %6600 = vmatprep.mubr.msk.f32.mxu0 %vm77_vm1, %v1456_v21  ;;  %v1385_v54 = vmul.f32 %v1383_v2, %v1285_v38  ;;  %v1390_v35 = vmul.f32 %v1388_v17, %v1284_v9  ;;  %vm1169_vm11 = vmand %vm1165_vm0, %vm1167_vm5 }
 0x537   :  { %v1298_v27 = vadd.f32 %v1296_v25, %v1290_v30  ;;  %v1392_v39 = vmul.f32 1.25, %v1292_v11  ;;  %v1457_v0 = vadd.f32 %v1455_v44, %v1451_v36  ;;  %6920 = vmatprep.subr.bf16.mxu0 %v7603_v13  ;;  %v1171_v19 = vsel %vm1169_vm11, 1.0, %v7212_v6 }
 0x538   :  { %v1289_v32 = vmul.f32 2.5, %v7711_v31  ;;  %v1295_v45 = vmul.f32 2.5, %v1293_v33  ;;  %v1464_v57 = vmul.f32 %v1462_v48, %v1386_v22  ;;  %v1463_v23 = vmul.f32 0.8333333, %v1279_v42 }
 0x539   :  { %v1394_v62 = vmul.f32 %v1392_v39, %v1298_v27  ;;  %v1470_v26 = vmul.f32 %v1468_v24, %v1386_v22  ;;  %v1472_v47 = vmul.f32 0.8333333, %v1292_v11  ;;  %vm1172_vm12 = vcmp.ge.f32.partialorder %v7451_v56, 1.4 }
 0x53a   :  { %v1291_v8 = vmul.f32 %v1289_v32, %v1163_v4  ;;  %v1297_v50 = vmul.f32 %v1295_v45, %v1171_v19  ;;  %v1387_v9 = vadd.f32 %v1385_v54, %v1381_v10  ;;  %vm1174_vm14 = vcmp.lt.f32.partialorder %v7451_v56, 1.8 }
 0x53b   :  { %v7722_v5 = vadd.f32 %v1394_v62, %v1390_v35  ;;  %v7726_v36 = vadd.f32 -1.0, %v7451_v56  ;;  %v1389_v28 = vmul.f32 1.25, %v7683_v52  ;;  %v1393_v61 = vmul.f32 1.25, %v1293_v33  ;;  %vm1176_vm2 = vmand %vm1172_vm12, %vm1174_vm14 }
 0x53c   :  { %v1299_v21 = vadd.f32 %v1297_v50, %v1291_v8  ;;  %v1306_v42 = vsub.f32 1.8, %v7451_v56  ;;  %v1466_v63 = vadd.f32 %v1464_v57, %v1460_v59  ;;  %v1469_v4 = vmul.f32 0.8333333, %v7654_v29  ;;  %v6140_v50 = vld [vmem:[%s8727_s15 + $0x78] sm:$0xff] }
 0x53d   :  { %v1178_v11 = vsel %vm1176_vm2, 1.0, %v7212_v6  ;;  %v1302_v44 = vmul.f32 2.5, %v7726_v36  ;;  %6601 = vmatmul.mubr.msk.f32.vlgmr.msra.gmra.mrb[8].mxu0 %vm77_vm1, %v1457_v0  ;;  %v1391_v48 = vmul.f32 %v1389_v28, %v1285_v38  ;;  %vm1173_vm3 = vcmp.ge.f32.partialorder %v7449_v55, 1.4 }
 0x53e   :  { %v1395_v12 = vmul.f32 %v1393_v61, %v1299_v21  ;;  %v1308_v16 = vmul.f32 2.5, %v1306_v42  ;;  %6922 = vmatpush3.bf16.msra.mxu0 %v7603_v13  ;;  %6607 = vmatprep.mubr.msk.f32.mxu0 %vm77_vm1, %v1466_v63  ;;  %v1465_v53 = vmul.f32 %v1463_v23, %v1387_v9  ;;  %v1474_v59 = vmul.f32 %v1472_v47, %v7722_v5 }
 0x53f   :  { %v1304_v15 = vmul.f32 %v1302_v44, %v1170_v20  ;;  %v1398_v29 = vmul.f32 1.25, %v7698_v7  ;;  %6924 = vmatprep.subr.bf16.mxu0 %v7605_v14  ;;  %v1471_v22 = vmul.f32 %v1469_v4, %v1387_v9  ;;  %vm1175_vm4 = vcmp.lt.f32.partialorder %v7449_v55, 1.8 }
 0x540   :  { %v1310_v10 = vmul.f32 %v1308_v16, %v1178_v11  ;;  %v7742_v38 = vadd.f32 -1.0, %v7449_v55  ;;  %v1473_v2 = vmul.f32 0.8333333, %v1293_v33  ;;  %v1402_v25 = vmul.f32 1.25, %v1306_v42  ;;  %vm1177_vm6 = vmand %vm1173_vm3, %vm1175_vm4  ;;  %v453_v16 = vpop.xlane.xlu1 %452 }
 0x541   :  { %v1400_v30 = vmul.f32 %v1398_v29, %v1298_v27  ;;  %v1307_v17 = vsub.f32 1.8, %v7449_v55  ;;  %v7747_v20 = vadd.f32 %v1395_v12, %v1391_v48  ;;  %v1179_v54 = vsel %vm1177_vm6, 1.0, %v7212_v6 }
 0x542   :  { %v1312_v24 = vadd.f32 %v1310_v10, %v1304_v15  ;;  %v1303_v35 = vmul.f32 2.5, %v7742_v38  ;;  %v1467_v39 = vadd.f32 %v1465_v53, %v1461_v43  ;;  %v1476_v0 = vadd.f32 %v1474_v59, %v1470_v26 }
 0x543   :  { %v1478_v32 = vmul.f32 0.8333333, %v7673_v51  ;;  %v1309_v45 = vmul.f32 2.5, %v1307_v17  ;;  %v1482_v27 = vmul.f32 0.8333333, %v1306_v42  ;;  %v1399_v23 = vmul.f32 1.25, %v7711_v31 }
 0x544   :  { %v1404_v33 = vmul.f32 %v1402_v25, %v1312_v24  ;;  %v1305_v57 = vmul.f32 %v1303_v35, %v1171_v19  ;;  %vm1180_vm7 = vcmp.ge.f32.partialorder %v7451_v56, 1.8  ;;  %vm1182_vm8 = vcmp.lt.f32.partialorder %v7451_v56, 2.2  ;;  %v6139_v19 = vld [vmem:[%s8727_s15 + $0x70] sm:$0xff] }
 0x545   :  { %v1311_v62 = vmul.f32 %v1309_v45, %v1179_v54  ;;  %v6109_v47 = vadd.f32 -1.4, %v7451_v56  ;;  %6608 = vmatmul.mubr.msk.f32.vlgmr.msra.gmra.mrb[8].mxu0 %vm77_vm1, %v1467_v39  ;;  %v1475_v43 = vmul.f32 %v1473_v2, %v7747_v20  ;;  %v1403_v8 = vmul.f32 1.25, %v1307_v17  ;;  %vm1184_vm9 = vmand %vm1180_vm7, %vm1182_vm8 }
 0x546   :  { %v1406_v26 = vadd.f32 %v1404_v33, %v1400_v30  ;;  %v1320_v51 = vsub.f32 2.2, %v7451_v56  ;;  %6926 = vmatpush3.bf16.msra.mxu0 %v7605_v14  ;;  %6614 = vmatprep.mubr.msk.f32.mxu0 %vm77_vm1, %v1476_v0  ;;  %v1186_v28 = vsel %vm1184_vm9, 1.0, %v7212_v6  ;;  %vm1181_vm10 = vcmp.ge.f32.partialorder %v7449_v55, 1.8 }
 0x547   :  { %v1313_v9 = vadd.f32 %v1311_v62, %v1305_v57  ;;  %v1316_v61 = vmul.f32 2.5, %v6109_v47  ;;  %6928 = vmatprep.subr.bf16.mxu0 %v7612_v18  ;;  %v1480_v56 = vmul.f32 %v1478_v32, %v7722_v5  ;;  %v1401_v42 = vmul.f32 %v1399_v23, %v1299_v21 }
 0x548   :  { %v1322_v63 = vmul.f32 2.5, %v1320_v51  ;;  %v1408_v4 = vmul.f32 1.25, %v7726_v36  ;;  %v1484_v44 = vmul.f32 %v1482_v27, %v1406_v26  ;;  %vm1183_vm15 = vcmp.lt.f32.partialorder %v7449_v55, 2.2 }
 0x549   :  { %v1405_v48 = vmul.f32 %v1403_v8, %v1313_v9  ;;  %v1318_v12 = vmul.f32 %v1316_v61, %v1178_v11  ;;  %v7773_v53 = vpack.c.bf16 %v6140_v50, %v6139_v19  ;;  %vm1185_vm0 = vmand %vm1181_vm10, %vm1183_vm15  ;;  %v6110_v15 = vadd.f32 -1.4, %v7449_v55 }
 0x54a   :  { %v1324_v59 = vmul.f32 %v1322_v63, %v1186_v28  ;;  %v1321_v29 = vsub.f32 2.2, %v7449_v55  ;;  %v1477_v10 = vadd.f32 %v1475_v43, %v1471_v22  ;;  %v1410_v5 = vmul.f32 %v1408_v4, %v1312_v24  ;;  %v3452_v4 = vld [vmem:[%s8724_s12 + $0x10] sm:$0xff] }
 0x54b   :  { %v1412_v21 = vmul.f32 1.25, %v1320_v51  ;;  %v1187_v2 = vsel %vm1185_vm0, 1.0, %v7212_v6  ;;  %v1407_v36 = vadd.f32 %v1405_v48, %v1401_v42  ;;  %v1317_v25 = vmul.f32 2.5, %v6110_v15  ;;  %v3448_v15 = vld [vmem:[%s8723_s11 + $0x10] sm:$0xff] }
 0x54c   :  { %v1326_v30 = vadd.f32 %v1324_v59, %v1318_v12  ;;  %v1323_v11 = vmul.f32 2.5, %v1321_v29  ;;  %7160 = vrcp.f32 %v453_v16  ;;  %v1486_v35 = vadd.f32 %v1484_v44, %v1480_v56  ;;  %v7186_v56 = vld [vmem:[%s8737_s29] sm:$0xff]  ;;  %v3453_v44 = vld [vmem:[%s8724_s12 + $0x18] sm:$0xff]  ;;  %v3447_v59 = vld [vmem:[%s8723_s11 + $0x8] sm:$0xff] }
 0x54d   :  { %v1479_v39 = vmul.f32 0.8333333, %v7683_v52  ;;  %v1483_v0 = vmul.f32 0.8333333, %v1307_v17  ;;  %6615 = vmatmul.mubr.msk.f32.vlgmr.msra.gmra.mrb[8].mxu0 %vm77_vm1, %v1477_v10  ;;  %v1319_v45 = vmul.f32 %v1317_v25, %v1179_v54  ;;  %v1409_v55 = vmul.f32 1.25, %v7742_v38 }
 0x54e   :  { %v1414_v32 = vmul.f32 %v1412_v21, %v1326_v30  ;;  %v1325_v33 = vmul.f32 %v1323_v11, %v1187_v2  ;;  %6930 = vmatpush3.bf16.msra.mxu0 %v7612_v18  ;;  %6621 = vmatprep.mubr.msk.f32.mxu0 %vm77_vm1, %v1486_v35  ;;  %v1488_v24 = vmul.f32 0.8333333, %v7698_v7  ;;  %v1492_v27 = vmul.f32 0.8333333, %v1320_v51  ;;  %v2264_v21 = vld [vmem:[%s8728_s16] sm:$0xff]  ;;  %v2265_v2 = vld [vmem:[%s8728_s16 + $0x8] sm:$0xff] }
 0x54f   :  { %v1481_v22 = vmul.f32 %v1479_v39, %v7747_v20  ;;  %v1413_v57 = vmul.f32 1.25, %v1321_v29  ;;  %6932 = vmatprep.subr.bf16.mxu0 %v7773_v53  ;;  %v1485_v52 = vmul.f32 %v1483_v0, %v1407_v36  ;;  %v1411_v62 = vmul.f32 %v1409_v55, %v1313_v9  ;;  %v3450_v9 = vld [vmem:[%s8724_s12] sm:$0xff] }
 0x550   :  { %v1416_v17 = vadd.f32 %v1414_v32, %v1410_v5  ;;  %v1327_v23 = vadd.f32 %v1325_v33, %v1319_v45  ;;  %v1490_v54 = vmul.f32 %v1488_v24, %v1406_v26  ;;  %v1489_v20 = vmul.f32 0.8333333, %v7711_v31  ;;  %v3451_v31 = vld [vmem:[%s8724_s12 + $0x8] sm:$0xff] }
 0x551   :  { %v1487_v38 = vadd.f32 %v1485_v52, %v1481_v22  ;;  %v1493_v50 = vmul.f32 0.8333333, %v1321_v29  ;;  %vm454_vm5 = vcmp.gt.f32.partialorder %v7586_v60, 0.0  ;;  %vm455_vm11 = vcmp.gt.f32.partialorder %v453_v16, 0.0  ;;  %v3446_v16 = vld [vmem:[%s8723_s11] sm:$0xff]  ;;  %v3449_v29 = vld [vmem:[%s8723_s11 + $0x18] sm:$0xff] }
 0x552   :  { %v1494_v47 = vmul.f32 %v1492_v27, %v1416_v17  ;;  %v1415_v43 = vmul.f32 %v1413_v57, %v1327_v23  ;;  %v1491_v26 = vmul.f32 %v1489_v20, %v1407_v36  ;;  %v460_v28 = vsel %vm454_vm5, %v7636_v58, 0.0  ;;  %v7187_v58 = vld [vmem:[%s8737_s29 + $0x8] sm:$0xff] }
 0x553   :  { %v6975_v61 = vpack.c.bf16 %v3451_v31, %v3450_v9  ;;  %v462_v42 = vmul.f32 %v7186_v56, %v460_v28  ;;  %v6979_v12 = vpack.c.bf16 %v3453_v44, %v3452_v4  ;;  %v6987_v10 = vpack.c.bf16 %v3449_v29, %v3448_v15 }
 0x554   :  { %v1417_v8 = vadd.f32 %v1415_v43, %v1411_v62  ;;  %v1496_v19 = vadd.f32 %v1494_v47, %v1490_v54  ;;  %v7843_v36 = vpack.c.bf16 %v2265_v2, %v2264_v21 }
 0x555   :  { %6622 = vmatmul.mubr.msk.f32.vlgmr.msra.gmra.mrb[8].mxu0 %vm77_vm1, %v1487_v38 }
 0x556   :  { %v7161_v7 = vpop.eup %7160  ;;  %6934 = vmatpush3.bf16.msra.mxu0 %v7773_v53  ;;  %6628 = vmatprep.mubr.msk.f32.mxu0 %vm77_vm1, %v1496_v19  ;;  %v1495_v51 = vmul.f32 %v1493_v50, %v1417_v8 }
 0x557   :  { %6972 = vmatprep.subr.bf16.mxu0 %v7416_v40  ;;  %v461_v63 = vsel %vm455_vm11, %v7161_v7, 0.0 }
 0x558   :  { %v1497_v60 = vadd.f32 %v1495_v51, %v1491_v26  ;;  %v463_v48 = vmul.f32 %v7187_v58, %v461_v63 }
 0x55d   :  { %6629 = vmatmul.mubr.msk.f32.vlgmr.msra.gmra.mrb[8].mxu0 %vm77_vm1, %v1497_v60 }
 0x55e   :  { %6974 = vmatpush3.bf16.msra.mxu0 %v7416_v40  ;;  %6698 = vmatprep.mubr.msk.f32.mxu0 %vm77_vm1, %v462_v42  ;;  %v6983_v40 = vpack.c.bf16 %v3447_v59, %v3446_v16 }
 0x55f   :  { %6976 = vmatprep.subr.bf16.mxu0 %v6975_v61 }
 0x561   :  { %6699 = vmatmul.mubr.msk.f32.vlgmr.msra.gmra.mrb[10].mxu0 %vm77_vm1, %v463_v48 }
 0x562   :  { %6978 = vmatpush3.bf16.msra.mxu0 %v6975_v61  ;;  %6709 = vmatprep.mubr.msk.f32.mxu0 %vm911_vm13, %v7411_v37  ;;  %v2678_v37 = vld [vmem:[%s8729_s17] sm:$0xff] }
 0x563   :  { %6980 = vmatprep.subr.bf16.mxu0 %v6979_v12 }
 0x566   :  { %6982 = vmatpush3.bf16.msra.mxu0 %v6979_v12 }
 0x567   :  { %6984 = vmatprep.subr.bf16.mxu0 %v6983_v40 }
 0x569   :  { %6710 = vmatmul.mubr.msk.f32.vlgmr.msra.gmra.mrb[12].mxu0 %vm911_vm13, %v7409_v34  ;;  %v2679_v34 = vld [vmem:[%s8729_s17 + $0x8] sm:$0xff] }
 0x56a   :  { %6986 = vmatpush3.bf16.msra.mxu0 %v6983_v40  ;;  %v6935_v5 = vpack.c.bf16 %v2679_v34, %v2678_v37 }
 0x56b   :  { %6988 = vmatprep.subr.bf16.mxu0 %v6987_v10 }
 0x56c   :  { %6936 = vmatprep.subr.bf16.mxu1 %v6935_v5 }
 0x56d   :  { %6938 = vmatpush3.bf16.msra.mxu1 %v6935_v5 }
 0x56e   :  { %6990 = vmatpush3.bf16.msra.mxu0 %v6987_v10  ;;  %6940 = vmatprep.subr.bf16.mxu1 %v7843_v36 }
 0x56f   :  { %7028 = vmatprep.subr.bf16.mxu0 %v6935_v5 }
 0x630   :  { %v7846_v30 = vpop.f32.mrb[8].mxu0 }
 0x631   :  { %v7848_v25 = vpop.f32.mrb[9].mxu0  ;;  %vm2281_vm12 = vcmp.ge.f32.partialorder %v7846_v30, -2.2  ;;  %vm2283_vm14 = vcmp.lt.f32.partialorder %v7846_v30, -1.8  ;;  %vm2299_vm15 = vcmp.lt.f32.partialorder %v7846_v30, -1.0 }
 0x632   :  { %vm2280_vm2 = vcmp.ge.f32.partialorder %v7848_v25, -2.2  ;;  %vm2282_vm3 = vcmp.lt.f32.partialorder %v7848_v25, -1.8  ;;  %vm2288_vm4 = vcmp.ge.f32.partialorder %v7848_v25, -1.8 }
 0x633   :  { %vm2284_vm6 = vmand %vm2280_vm2, %vm2282_vm3  ;;  %vm2290_vm7 = vcmp.lt.f32.partialorder %v7848_v25, -1.4  ;;  %vm2296_vm8 = vcmp.ge.f32.partialorder %v7848_v25, -1.4  ;;  %vm2298_vm9 = vcmp.lt.f32.partialorder %v7848_v25, -1.0  ;;  %vm2304_vm10 = vcmp.ge.f32.partialorder %v7848_v25, -1.0 }
 0x634   :  { %v6700_v11 = vpop.f32.mrb[10].mxu0  ;;  %v2286_v35 = vsel %vm2284_vm6, 1.0, %v7212_v6  ;;  %vm2292_vm0 = vmand %vm2288_vm4, %vm2290_vm7  ;;  %vm2306_vm5 = vcmp.lt.f32.partialorder %v7848_v25, -0.6  ;;  %v6143_v39 = vadd.f32 2.2, %v7848_v25 }
 0x635   :  { %v3527_v0 = vpop.f32.mrb[11].mxu0  ;;  %v2294_v32 = vsel %vm2292_vm0, 1.0, %v7212_v6  ;;  %vm2300_vm11 = vmand %vm2296_vm8, %vm2298_vm9  ;;  %v2374_v45 = vsub.f32 -1.4, %v7848_v25  ;;  %v7866_v33 = vadd.f32 1.8, %v7848_v25 }
 0x636   :  { %6720 = vmatprep.mubr.msk.f32.mxu0 %vm911_vm13, %v3527_v0  ;;  %v2302_v55 = vsel %vm2300_vm11, 1.0, %v7212_v6  ;;  %vm2308_vm2 = vmand %vm2304_vm10, %vm2306_vm5  ;;  %v2370_v22 = vmul.f32 2.5, %v6143_v39  ;;  %v2388_v24 = vsub.f32 -1.0, %v7848_v25  ;;  %v7872_v27 = vadd.f32 1.4, %v7848_v25 }
 0x637   :  { %6721 = vmatmul.mubr.msk.f32.vlgmr.msra.gmra.mrb[12].mxu0 %vm911_vm13, %v6700_v11  ;;  %v7876_v57 = vsel %vm2308_vm2, 1.0, %v7212_v6  ;;  %v2376_v52 = vmul.f32 2.5, %v2374_v45  ;;  %v2384_v17 = vmul.f32 2.5, %v7866_v33  ;;  %v2402_v23 = vsub.f32 -0.6, %v7848_v25  ;;  %vm2285_vm13 = vmand %vm2281_vm12, %vm2283_vm14 }
 0x638   :  { %v2372_v62 = vmul.f32 %v2370_v22, %v2286_v35  ;;  %v2390_v54 = vmul.f32 2.5, %v2388_v24  ;;  %v2398_v47 = vmul.f32 2.5, %v7872_v27  ;;  %v2508_v43 = vmul.f32 1.25, %v6143_v39  ;;  %7030 = vmatpush3.bf16.msra.mxu0 %v6935_v5 }
 0x639   :  { %v2378_v38 = vmul.f32 %v2376_v52, %v2294_v32  ;;  %v2386_v8 = vmul.f32 %v2384_v17, %v2294_v32  ;;  %v2404_v19 = vmul.f32 2.5, %v2402_v23  ;;  %v2512_v20 = vmul.f32 1.25, %v2388_v24  ;;  %7032 = vmatprep.subr.bf16.mxu0 %v7843_v36 }
 0x63a   :  { %v2392_v50 = vmul.f32 %v2390_v54, %v2302_v55  ;;  %v2400_v7 = vmul.f32 %v2398_v47, %v2302_v55  ;;  %v2518_v26 = vmul.f32 1.25, %v7866_v33  ;;  %v2522_v51 = vmul.f32 1.25, %v2402_v23 }
 0x63b   :  { %v2380_v9 = vadd.f32 %v2378_v38, %v2372_v62  ;;  %v2406_v31 = vmul.f32 %v2404_v19, %v7876_v57  ;;  %v2598_v28 = vmul.f32 0.8333333, %v6143_v39  ;;  %v2602_v60 = vmul.f32 0.8333333, %v2402_v23 }
 0x63c   :  { %v2394_v61 = vadd.f32 %v2392_v50, %v2386_v8  ;;  %v2287_v56 = vsel %vm2285_vm13, 1.0, %v7212_v6  ;;  %vm2289_vm3 = vcmp.ge.f32.partialorder %v7846_v30, -1.8  ;;  %vm2291_vm4 = vcmp.lt.f32.partialorder %v7846_v30, -1.4 }
 0x63d   :  { %v7891_v42 = vadd.f32 %v2406_v31, %v2400_v7  ;;  %v2510_v63 = vmul.f32 %v2508_v43, %v2380_v9  ;;  %vm2293_vm12 = vmand %vm2289_vm3, %vm2291_vm4  ;;  %vm2297_vm14 = vcmp.ge.f32.partialorder %v7846_v30, -1.4  ;;  %vm2305_vm6 = vcmp.ge.f32.partialorder %v7846_v30, -1.0 }
 0x63e   :  { %v2514_v4 = vmul.f32 %v2512_v20, %v2394_v61  ;;  %v2520_v44 = vmul.f32 %v2518_v26, %v2394_v61  ;;  %v2295_v58 = vsel %vm2293_vm12, 1.0, %v7212_v6  ;;  %vm2301_vm7 = vmand %vm2297_vm14, %vm2299_vm15  ;;  %vm2307_vm8 = vcmp.lt.f32.partialorder %v7846_v30, -0.6 }
 0x63f   :  { %v2524_v48 = vmul.f32 %v2522_v51, %v7891_v42  ;;  %v2303_v12 = vsel %vm2301_vm7, 1.0, %v7212_v6  ;;  %vm2309_vm9 = vmand %vm2305_vm6, %vm2307_vm8  ;;  %v6144_v16 = vadd.f32 2.2, %v7846_v30  ;;  %v2375_v59 = vsub.f32 -1.4, %v7846_v30 }
 0x640   :  { %v2516_v40 = vadd.f32 %v2514_v4, %v2510_v63  ;;  %v7904_v15 = vsel %vm2309_vm9, 1.0, %v7212_v6  ;;  %v7907_v29 = vadd.f32 1.8, %v7846_v30  ;;  %v2389_v10 = vsub.f32 -1.0, %v7846_v30 }
 0x641   :  { %v7910_v37 = vadd.f32 %v2524_v48, %v2520_v44  ;;  %v2371_v34 = vmul.f32 2.5, %v6144_v16  ;;  %v2377_v5 = vmul.f32 2.5, %v2375_v59  ;;  %v7913_v21 = vadd.f32 1.4, %v7846_v30 }
 0x642   :  { %v2600_v2 = vmul.f32 %v2598_v28, %v2516_v40  ;;  %v2385_v11 = vmul.f32 2.5, %v7907_v29  ;;  %v2391_v35 = vmul.f32 2.5, %v2389_v10  ;;  %v2403_v39 = vsub.f32 -0.6, %v7846_v30 }
 0x643   :  { %v2604_v0 = vmul.f32 %v2602_v60, %v7910_v37  ;;  %v2373_v32 = vmul.f32 %v2371_v34, %v2287_v56  ;;  %v2379_v45 = vmul.f32 %v2377_v5, %v2295_v58  ;;  %v2399_v55 = vmul.f32 2.5, %v7913_v21  ;;  %v6167_v34 = vld [vmem:[%s8729_s17 + $0x10] sm:$0xff]  ;;  %v6168_v5 = vld [vmem:[%s8729_s17 + $0x18] sm:$0xff] }
 0x644   :  { %v2387_v22 = vmul.f32 %v2385_v11, %v2295_v58  ;;  %v2393_v24 = vmul.f32 %v2391_v35, %v2303_v12  ;;  %v2405_v52 = vmul.f32 2.5, %v2403_v39  ;;  %v2509_v54 = vmul.f32 1.25, %v6144_v16  ;;  %v6171_v11 = vld [vmem:[%s8729_s17 + $0x20] sm:$0xff] }
 0x645   :  { %v2606_v17 = vadd.f32 %v2604_v0, %v2600_v2  ;;  %v2381_v23 = vadd.f32 %v2379_v45, %v2373_v32  ;;  %v2401_v62 = vmul.f32 %v2399_v55, %v2303_v12  ;;  %v2513_v38 = vmul.f32 1.25, %v2389_v10  ;;  %v6172_v0 = vld [vmem:[%s8729_s17 + $0x28] sm:$0xff]  ;;  %v6175_v32 = vld [vmem:[%s8729_s17 + $0x30] sm:$0xff] }
 0x646   :  { %v2395_v47 = vadd.f32 %v2393_v24, %v2387_v22  ;;  %v2407_v43 = vmul.f32 %v2405_v52, %v7904_v15  ;;  %v2519_v8 = vmul.f32 1.25, %v7907_v29  ;;  %v2523_v20 = vmul.f32 1.25, %v2403_v39  ;;  %v6179_v22 = vld [vmem:[%s8729_s17 + $0x40] sm:$0xff] }
 0x647   :  { %6635 = vmatprep.mubr.msk.f32.mxu1 %vm77_vm1, %v2606_v17  ;;  %v2511_v19 = vmul.f32 %v2509_v54, %v2381_v23  ;;  %v2599_v50 = vmul.f32 0.8333333, %v6144_v16  ;;  %v2266_v7 = vmax.f32 %v7848_v25, -30.0  ;;  %v2267_v31 = vmax.f32 %v7846_v30, -30.0  ;;  %v6183_v54 = vld [vmem:[%s8729_s17 + $0x50] sm:$0xff] }
 0x648   :  { %v7923_v26 = vadd.f32 %v2407_v43, %v2401_v62  ;;  %v2515_v51 = vmul.f32 %v2513_v38, %v2395_v47  ;;  %v2521_v9 = vmul.f32 %v2519_v8, %v2395_v47  ;;  %vm2312_vm10 = vcmp.ge.f32.partialorder %v7848_v25, -0.6  ;;  %v6180_v62 = vld [vmem:[%s8729_s17 + $0x48] sm:$0xff] }
 0x649   :  { %v2268_v28 = vsub.f32 0.0, %v2266_v7  ;;  %vm2314_vm15 = vcmp.lt.f32.partialorder %v7848_v25, -0.2  ;;  %v7929_v60 = vadd.f32 1.0, %v7848_v25  ;;  %v2269_v63 = vsub.f32 0.0, %v2267_v31 }
 0x64a   :  { %v2517_v61 = vadd.f32 %v2515_v51, %v2511_v19  ;;  %v2525_v56 = vmul.f32 %v2523_v20, %v7923_v26  ;;  %vm2316_vm0 = vmand %vm2312_vm10, %vm2314_vm15  ;;  %v7933_v4 = vsub.f32 -0.2, %v7848_v25  ;;  %v2603_v44 = vmul.f32 0.8333333, %v2403_v39  ;;  %v6184_v19 = vld [vmem:[%s8729_s17 + $0x58] sm:$0xff]  ;;  %v6187_v20 = vld [vmem:[%s8729_s17 + $0x60] sm:$0xff] }
 0x64b   :  { %v2270_v58 = vmul.f32 1.442695, %v2268_v28  ;;  %v7936_v48 = vsel %vm2316_vm0, 1.0, %v7212_v6  ;;  %v2412_v12 = vmul.f32 2.5, %v7929_v60  ;;  %v2272_v40 = vmul.f32 1.442695, %v2269_v63 }
 0x64c   :  { %v7939_v16 = vadd.f32 %v2525_v56, %v2521_v9  ;;  %v2601_v59 = vmul.f32 %v2599_v50, %v2517_v61  ;;  %v2418_v10 = vmul.f32 2.5, %v7933_v4  ;;  %v2528_v45 = vmul.f32 1.25, %v7872_v27  ;;  %v6188_v50 = vld [vmem:[%s8729_s17 + $0x68] sm:$0xff] }
 0x64d   :  { %7162 = vpow2.f32 %v2270_v58  ;;  %v2414_v2 = vmul.f32 %v2412_v12, %v7876_v57  ;;  %v6176_v57 = vld [vmem:[%s8729_s17 + $0x38] sm:$0xff]  ;;  %v7964_v55 = vpack.c.bf16 %v6168_v5, %v6167_v34  ;;  %vm2313_vm5 = vcmp.ge.f32.partialorder %v7846_v30, -0.6 }
 0x64e   :  { %v2605_v35 = vmul.f32 %v2603_v44, %v7939_v16  ;;  %7164 = vpow2.f32 %v2272_v40  ;;  %v2420_v39 = vmul.f32 %v2418_v10, %v7936_v48  ;;  %vm2315_vm11 = vcmp.lt.f32.partialorder %v7846_v30, -0.2 }
 0x64f   :  { %v2532_v17 = vmul.f32 1.25, %v7933_v4  ;;  %vm2317_vm2 = vmand %vm2313_vm5, %vm2315_vm11  ;;  %v7975_v23 = vadd.f32 1.0, %v7846_v30  ;;  %v2530_v47 = vmul.f32 %v2528_v45, %v7891_v42  ;;  %v2417_v38 = vsub.f32 -0.2, %v7846_v30 }
 0x650   :  { %v2607_v24 = vadd.f32 %v2605_v35, %v2601_v59  ;;  %v7971_v52 = vadd.f32 %v2420_v39, %v2414_v2  ;;  %v7985_v43 = vsel %vm2317_vm2, 1.0, %v7212_v6  ;;  %v7988_v8 = vpack.c.bf16 %v6172_v0, %v6171_v11 }
 0x651   :  { %v2413_v7 = vmul.f32 2.5, %v7975_v23  ;;  %vm2320_vm13 = vcmp.ge.f32.partialorder %v7848_v25, -0.2  ;;  %vm2322_vm3 = vcmp.lt.f32.partialorder %v7848_v25, 0.2  ;;  %v2419_v51 = vmul.f32 2.5, %v2417_v38 }
 0x652   :  { %6636 = vmatmul.mubr.msk.f32.vlgmr.msra.gmra.mrb[12].mxu1 %vm77_vm1, %v2607_v24  ;;  %v2534_v42 = vmul.f32 %v2532_v17, %v7971_v52  ;;  %v2529_v9 = vmul.f32 1.25, %v7913_v21  ;;  %vm2324_vm4 = vmand %vm2320_vm13, %vm2322_vm3  ;;  %v8006_v31 = vpack.c.bf16 %v6176_v57, %v6175_v32  ;;  %v8008_v28 = vpack.c.bf16 %v6180_v62, %v6179_v22 }
 0x653   :  { %6942 = vmatpush3.bf16.msra.mxu1 %v7843_v36  ;;  %v2608_v61 = vmul.f32 0.8333333, %v7866_v33  ;;  %v2415_v56 = vmul.f32 %v2413_v7, %v7904_v15  ;;  %v8013_v63 = vpack.c.bf16 %v6184_v19, %v6183_v54  ;;  %v8015_v44 = vpack.c.bf16 %v6188_v50, %v6187_v20 }
 0x654   :  { %6944 = vmatprep.subr.bf16.mxu1 %v7964_v55  ;;  %v2421_v58 = vmul.f32 %v2419_v51, %v7985_v43  ;;  %v2531_v12 = vmul.f32 %v2529_v9, %v7923_v26  ;;  %v8020_v59 = vadd.f32 0.6, %v7848_v25  ;;  %v2430_v40 = vsub.f32 0.2, %v7848_v25 }
 0x655   :  { %v2536_v10 = vadd.f32 %v2534_v42, %v2530_v47  ;;  %v2326_v33 = vsel %vm2324_vm4, 1.0, %v7212_v6  ;;  %vm2321_vm12 = vcmp.ge.f32.partialorder %v7846_v30, -0.2  ;;  %vm2323_vm14 = vcmp.lt.f32.partialorder %v7846_v30, 0.2 }
 0x656   :  { %v2423_v34 = vadd.f32 %v2421_v58, %v2415_v56  ;;  %v2533_v5 = vmul.f32 1.25, %v2417_v38  ;;  %v2426_v2 = vmul.f32 2.5, %v8020_v59  ;;  %v2432_v11 = vmul.f32 2.5, %v2430_v40  ;;  %vm2325_vm6 = vmand %vm2321_vm12, %vm2323_vm14 }
 0x657   :  { %v7163_v15 = vpop.eup %7162  ;;  %v2610_v39 = vmul.f32 %v2608_v61, %v7910_v37  ;;  %v2612_v0 = vmul.f32 0.8333333, %v7933_v4  ;;  %v2609_v32 = vmul.f32 0.8333333, %v7907_v29  ;;  %v2613_v62 = vmul.f32 0.8333333, %v2417_v38 }
 0x658   :  { %v7165_v35 = vpop.eup %7164  ;;  %v2274_v26 = vadd.f32 1.0, %v7163_v15  ;;  %v2535_v45 = vmul.f32 %v2533_v5, %v2423_v34  ;;  %v2428_v22 = vmul.f32 %v2426_v2, %v7936_v48  ;;  %v2434_v24 = vmul.f32 %v2432_v11, %v2326_v33 }
 0x659   :  { %v2275_v57 = vadd.f32 1.0, %v7165_v35  ;;  %v2614_v17 = vmul.f32 %v2612_v0, %v2536_v10  ;;  %v8036_v54 = vadd.f32 0.6, %v7846_v30  ;;  %v2431_v29 = vsub.f32 0.2, %v7846_v30 }
 0x65a   :  { %7166 = vrcp.f32 %v2274_v26  ;;  %v2537_v37 = vadd.f32 %v2535_v45, %v2531_v12  ;;  %v2436_v4 = vadd.f32 %v2434_v24, %v2428_v22  ;;  %v2538_v47 = vmul.f32 1.25, %v7929_v60 }
 0x65b   :  { %7168 = vrcp.f32 %v2275_v57  ;;  %v2542_v48 = vmul.f32 1.25, %v2430_v40  ;;  %v2327_v19 = vsel %vm2325_vm6, 1.0, %v7212_v6  ;;  %v2427_v20 = vmul.f32 2.5, %v8036_v54 }
 0x65c   :  { %v2611_v50 = vmul.f32 %v2609_v32, %v7939_v16  ;;  %v2618_v42 = vmul.f32 0.8333333, %v7872_v27  ;;  %v2433_v38 = vmul.f32 2.5, %v2431_v29  ;;  %vm2328_vm7 = vcmp.ge.f32.partialorder %v7848_v25, 0.2 }
 0x65d   :  { %v2616_v7 = vadd.f32 %v2614_v17, %v2610_v39  ;;  %v2540_v51 = vmul.f32 %v2538_v47, %v7971_v52  ;;  %v2544_v9 = vmul.f32 %v2542_v48, %v2436_v4  ;;  %v2429_v61 = vmul.f32 %v2427_v20, %v7985_v43 }
 0x65e   :  { %v2615_v56 = vmul.f32 %v2613_v62, %v2537_v37  ;;  %v2622_v58 = vmul.f32 0.8333333, %v2430_v40  ;;  %v2435_v12 = vmul.f32 %v2433_v38, %v2327_v19  ;;  %vm2330_vm8 = vcmp.lt.f32.partialorder %v7848_v25, 0.6 }
 0x65f   :  { %v2620_v15 = vmul.f32 %v2618_v42, %v2536_v10  ;;  %v2539_v5 = vmul.f32 1.25, %v7975_v23  ;;  %vm2332_vm9 = vmand %vm2328_vm7, %vm2330_vm8  ;;  %v8050_v27 = vadd.f32 0.2, %v7848_v25  ;;  %v2444_v16 = vsub.f32 0.6, %v7848_v25 }
 0x660   :  { %v2437_v2 = vadd.f32 %v2435_v12, %v2429_v61  ;;  %v2543_v11 = vmul.f32 1.25, %v2431_v29  ;;  %v2619_v52 = vmul.f32 0.8333333, %v7913_v21  ;;  %v2334_v43 = vsel %vm2332_vm9, 1.0, %v7212_v6 }
 0x661   :  { %v2546_v35 = vadd.f32 %v2544_v9, %v2540_v51  ;;  %v2541_v40 = vmul.f32 %v2539_v5, %v2423_v34  ;;  %v2440_v26 = vmul.f32 2.5, %v8050_v27  ;;  %v2446_v39 = vmul.f32 2.5, %v2444_v16 }
 0x662   :  { %v2617_v10 = vadd.f32 %v2615_v56, %v2611_v50  ;;  %v2545_v0 = vmul.f32 %v2543_v11, %v2437_v2  ;;  %v2621_v32 = vmul.f32 %v2619_v52, %v2537_v37  ;;  %v2623_v57 = vmul.f32 0.8333333, %v2431_v29 }
 0x663   :  { %v2442_v22 = vmul.f32 %v2440_v26, %v2326_v33  ;;  %v2448_v24 = vmul.f32 %v2446_v39, %v2334_v43  ;;  %vm2329_vm10 = vcmp.ge.f32.partialorder %v7846_v30, 0.2  ;;  %vm2331_vm15 = vcmp.lt.f32.partialorder %v7846_v30, 0.6 }
 0x664   :  { %v7167_v45 = vpop.eup %7166  ;;  %v2548_v62 = vmul.f32 1.25, %v8020_v59  ;;  %vm2333_vm0 = vmand %vm2329_vm10, %vm2331_vm15  ;;  %v8061_v34 = vadd.f32 0.2, %v7846_v30  ;;  %v2445_v47 = vsub.f32 0.6, %v7846_v30  ;;  %v2624_v29 = vmul.f32 %v2622_v58, %v2546_v35 }
 0x665   :  { %v7169_v17 = vpop.eup %7168  ;;  %v2278_v21 = vmul.f32 %v7167_v45, %v7848_v25  ;;  %v2450_v33 = vadd.f32 %v2448_v24, %v2442_v22  ;;  %v2335_v48 = vsel %vm2333_vm0, 1.0, %v7212_v6  ;;  %v2547_v20 = vadd.f32 %v2545_v0, %v2541_v40 }
 0x666   :  { %v2279_v37 = vmul.f32 %v7169_v17, %v7846_v30  ;;  %v2552_v50 = vmul.f32 1.25, %v2444_v16  ;;  %v2441_v42 = vmul.f32 2.5, %v8061_v34  ;;  %v2447_v38 = vmul.f32 2.5, %v2445_v47 }
 0x667   :  { %6642 = vmatprep.mubr.msk.f32.mxu1 %vm77_vm1, %v2278_v21  ;;  %v2550_v51 = vmul.f32 %v2548_v62, %v2436_v4  ;;  %v2628_v9 = vmul.f32 0.8333333, %v7929_v60  ;;  %v2549_v61 = vmul.f32 1.25, %v8036_v54  ;;  %vm2336_vm5 = vcmp.ge.f32.partialorder %v7848_v25, 0.6 }
 0x668   :  { %6643 = vmatmul.mubr.msk.f32.vlgmr.msra.gmra.mrb[12].mxu1 %vm77_vm1, %v2279_v37  ;;  %v2554_v56 = vmul.f32 %v2552_v50, %v2450_v33  ;;  %v2443_v58 = vmul.f32 %v2441_v42, %v2327_v19  ;;  %v2449_v12 = vmul.f32 %v2447_v38, %v2335_v48  ;;  %vm2338_vm11 = vcmp.lt.f32.partialorder %v7848_v25, 1.0 }
 0x669   :  { %6649 = vmatprep.mubr.msk.f32.mxu1 %vm77_vm1, %v2616_v7  ;;  %6946 = vmatpush3.bf16.msra.mxu1 %v7964_v55  ;;  %v2626_v5 = vadd.f32 %v2624_v29, %v2620_v15  ;;  %v2630_v11 = vmul.f32 %v2628_v9, %v2546_v35  ;;  %vm2340_vm2 = vmand %vm2336_vm5, %vm2338_vm11  ;;  %v8077_v60 = vadd.f32 -0.2, %v7848_v25  ;;  %v2458_v4 = vsub.f32 1.0, %v7848_v25 }
 0x66a   :  { %6948 = vmatprep.subr.bf16.mxu1 %v7988_v8  ;;  %v2625_v52 = vmul.f32 %v2623_v57, %v2547_v20  ;;  %v2451_v40 = vadd.f32 %v2449_v12, %v2443_v58  ;;  %v2553_v7 = vmul.f32 1.25, %v2445_v47  ;;  %v2342_v26 = vsel %vm2340_vm2, 1.0, %v7212_v6 }
 0x66b   :  { %v2632_v39 = vmul.f32 0.8333333, %v2444_v16  ;;  %v2551_v19 = vmul.f32 %v2549_v61, %v2437_v2  ;;  %v2454_v0 = vmul.f32 2.5, %v8077_v60  ;;  %v2460_v45 = vmul.f32 2.5, %v2458_v4 }
 0x66c   :  { %v2556_v15 = vadd.f32 %v2554_v56, %v2550_v51  ;;  %v2555_v22 = vmul.f32 %v2553_v7, %v2451_v40  ;;  %v2629_v35 = vmul.f32 0.8333333, %v7975_v23  ;;  %v2633_v24 = vmul.f32 0.8333333, %v2445_v47 }
 0x66d   :  { %v2456_v17 = vmul.f32 %v2454_v0, %v2334_v43  ;;  %v2462_v21 = vmul.f32 %v2460_v45, %v2342_v26  ;;  %v2558_v62 = vmul.f32 1.25, %v8050_v27  ;;  %vm2337_vm13 = vcmp.ge.f32.partialorder %v7846_v30, 0.6 }
 0x66e   :  { %v2627_v57 = vadd.f32 %v2625_v52, %v2621_v32  ;;  %vm2339_vm3 = vcmp.lt.f32.partialorder %v7846_v30, 1.0  ;;  %v8087_v16 = vadd.f32 -0.2, %v7846_v30  ;;  %v2459_v2 = vsub.f32 1.0, %v7846_v30 }
 0x66f   :  { %v2631_v37 = vmul.f32 %v2629_v35, %v2547_v20  ;;  %v2464_v29 = vadd.f32 %v2462_v21, %v2456_v17  ;;  %v2560_v23 = vmul.f32 %v2558_v62, %v2450_v33  ;;  %v2562_v47 = vmul.f32 1.25, %v2458_v4  ;;  %vm2341_vm4 = vmand %vm2337_vm13, %vm2339_vm3 }
 0x670   :  { %6650 = vmatmul.mubr.msk.f32.vlgmr.msra.gmra.mrb[12].mxu1 %vm77_vm1, %v2617_v10  ;;  %v2557_v43 = vadd.f32 %v2555_v22, %v2551_v19  ;;  %v2343_v32 = vsel %vm2341_vm4, 1.0, %v7212_v6  ;;  %v2455_v50 = vmul.f32 2.5, %v8087_v16  ;;  %v2461_v42 = vmul.f32 2.5, %v2459_v2 }
 0x671   :  { %6656 = vmatprep.mubr.msk.f32.mxu1 %vm77_vm1, %v2626_v5  ;;  %6950 = vmatpush3.bf16.msra.mxu1 %v7988_v8  ;;  %v2634_v38 = vmul.f32 %v2632_v39, %v2556_v15  ;;  %v2564_v51 = vmul.f32 %v2562_v47, %v2464_v29  ;;  %v2638_v10 = vmul.f32 0.8333333, %v8020_v59  ;;  %vm2344_vm12 = vcmp.ge.f32.partialorder %v7848_v25, 1.0 }
 0x672   :  { %6952 = vmatprep.subr.bf16.mxu1 %v8006_v31  ;;  %v2642_v33 = vmul.f32 0.8333333, %v2458_v4  ;;  %v2457_v20 = vmul.f32 %v2455_v50, %v2335_v48  ;;  %v2463_v9 = vmul.f32 %v2461_v42, %v2343_v32  ;;  %v2559_v61 = vmul.f32 1.25, %v8061_v34 }
 0x673   :  { %v2640_v56 = vmul.f32 %v2638_v10, %v2556_v15  ;;  %vm2346_vm14 = vcmp.lt.f32.partialorder %v7848_v25, 1.4  ;;  %v8101_v58 = vadd.f32 -0.6, %v7848_v25  ;;  %v2472_v12 = vsub.f32 1.4, %v7848_v25 }
 0x674   :  { %v2635_v5 = vmul.f32 %v2633_v24, %v2557_v43  ;;  %v2566_v52 = vadd.f32 %v2564_v51, %v2560_v23  ;;  %v2465_v7 = vadd.f32 %v2463_v9, %v2457_v20  ;;  %v2639_v59 = vmul.f32 0.8333333, %v8036_v54  ;;  %vm2348_vm6 = vmand %vm2344_vm12, %vm2346_vm14 }
 0x675   :  { %v2563_v39 = vmul.f32 1.25, %v2459_v2  ;;  %v2350_v48 = vsel %vm2348_vm6, 1.0, %v7212_v6  ;;  %v2468_v4 = vmul.f32 2.5, %v8101_v58  ;;  %v2474_v19 = vmul.f32 2.5, %v2472_v12 }
 0x676   :  { %v2636_v0 = vadd.f32 %v2634_v38, %v2630_v11  ;;  %v2561_v45 = vmul.f32 %v2559_v61, %v2451_v40  ;;  %v2641_v15 = vmul.f32 %v2639_v59, %v2557_v43  ;;  %vm2345_vm7 = vcmp.ge.f32.partialorder %v7846_v30, 1.0 }
 0x677   :  { %v2565_v22 = vmul.f32 %v2563_v39, %v2465_v7  ;;  %v2470_v35 = vmul.f32 %v2468_v4, %v2342_v26  ;;  %v2476_v24 = vmul.f32 %v2474_v19, %v2350_v48  ;;  %v2568_v17 = vmul.f32 1.25, %v8077_v60 }
 0x678   :  { %6657 = vmatmul.mubr.msk.f32.vlgmr.msra.gmra.mrb[12].mxu1 %vm77_vm1, %v2627_v57  ;;  %v2644_v54 = vmul.f32 %v2642_v33, %v2566_v52  ;;  %vm2347_vm8 = vcmp.lt.f32.partialorder %v7846_v30, 1.4  ;;  %v8114_v11 = vadd.f32 -0.6, %v7846_v30  ;;  %v2473_v40 = vsub.f32 1.4, %v7846_v30 }
 0x679   :  { %6663 = vmatprep.mubr.msk.f32.mxu1 %vm77_vm1, %v2636_v0  ;;  %6954 = vmatpush3.bf16.msra.mxu1 %v8006_v31  ;;  %v2637_v21 = vadd.f32 %v2635_v5, %v2631_v37  ;;  %v2478_v62 = vadd.f32 %v2476_v24, %v2470_v35  ;;  %v2572_v26 = vmul.f32 1.25, %v2472_v12  ;;  %v2648_v57 = vmul.f32 0.8333333, %v8050_v27  ;;  %vm2349_vm9 = vmand %vm2345_vm7, %vm2347_vm8 }
 0x67a   :  { %6956 = vmatprep.subr.bf16.mxu1 %v8008_v28  ;;  %v2570_v23 = vmul.f32 %v2568_v17, %v2464_v29  ;;  %v2351_v47 = vsel %vm2349_vm9, 1.0, %v7212_v6  ;;  %v2469_v43 = vmul.f32 2.5, %v8114_v11  ;;  %v2475_v50 = vmul.f32 2.5, %v2473_v40 }
 0x67b   :  { %v2567_v42 = vadd.f32 %v2565_v22, %v2561_v45  ;;  %v2643_v38 = vmul.f32 0.8333333, %v2459_v2  ;;  %v2574_v51 = vmul.f32 %v2572_v26, %v2478_v62  ;;  %vm2352_vm10 = vcmp.ge.f32.partialorder %v7848_v25, 1.4 }
 0x67c   :  { %v2646_v37 = vadd.f32 %v2644_v54, %v2640_v56  ;;  %v2650_v10 = vmul.f32 %v2648_v57, %v2566_v52  ;;  %v2471_v33 = vmul.f32 %v2469_v43, %v2343_v32  ;;  %v2477_v20 = vmul.f32 %v2475_v50, %v2351_v47 }
 0x67d   :  { %v2569_v27 = vmul.f32 1.25, %v8087_v16  ;;  %vm2354_vm15 = vcmp.lt.f32.partialorder %v7848_v25, 1.8  ;;  %v8127_v29 = vadd.f32 -1.0, %v7848_v25  ;;  %v2486_v9 = vsub.f32 1.8, %v7848_v25 }
 0x67e   :  { %v2576_v61 = vadd.f32 %v2574_v51, %v2570_v23  ;;  %v2479_v5 = vadd.f32 %v2477_v20, %v2471_v33  ;;  %v2573_v59 = vmul.f32 1.25, %v2473_v40  ;;  %v2649_v2 = vmul.f32 0.8333333, %v8061_v34  ;;  %vm2356_vm0 = vmand %vm2352_vm10, %vm2354_vm15 }
 0x67f   :  { %v2645_v56 = vmul.f32 %v2643_v38, %v2567_v42  ;;  %v2358_v32 = vsel %vm2356_vm0, 1.0, %v7212_v6  ;;  %v2482_v52 = vmul.f32 2.5, %v8127_v29  ;;  %v2488_v39 = vmul.f32 2.5, %v2486_v9 }
 0x680   :  { %6664 = vmatmul.mubr.msk.f32.vlgmr.msra.gmra.mrb[12].mxu1 %vm77_vm1, %v2637_v21  ;;  %v2652_v4 = vmul.f32 0.8333333, %v2472_v12  ;;  %v2571_v19 = vmul.f32 %v2569_v27, %v2465_v7  ;;  %v2575_v0 = vmul.f32 %v2573_v59, %v2479_v5  ;;  %vm2353_vm5 = vcmp.ge.f32.partialorder %v7846_v30, 1.4  ;;  %v6191_v59 = vld [vmem:[%s8729_s17 + $0x70] sm:$0xff] }
 0x681   :  { %6670 = vmatprep.mubr.msk.f32.mxu1 %vm77_vm1, %v2646_v37  ;;  %6958 = vmatpush3.bf16.msra.mxu1 %v8008_v28  ;;  %v2651_v34 = vmul.f32 %v2649_v2, %v2567_v42  ;;  %v2484_v45 = vmul.f32 %v2482_v52, %v2350_v48  ;;  %v2490_v22 = vmul.f32 %v2488_v39, %v2358_v32  ;;  %v2578_v35 = vmul.f32 1.25, %v8101_v58  ;;  %v6192_v2 = vld [vmem:[%s8729_s17 + $0x78] sm:$0xff] }
 0x682   :  { %6960 = vmatprep.subr.bf16.mxu1 %v8013_v63  ;;  %v2654_v24 = vmul.f32 %v2652_v4, %v2576_v61  ;;  %vm2355_vm11 = vcmp.lt.f32.partialorder %v7846_v30, 1.8  ;;  %v8141_v17 = vadd.f32 -1.0, %v7846_v30  ;;  %v2487_v54 = vsub.f32 1.8, %v7846_v30 }
 0x683   :  { %v2647_v12 = vadd.f32 %v2645_v56, %v2641_v15  ;;  %v2492_v7 = vadd.f32 %v2490_v22, %v2484_v45  ;;  %v2580_v21 = vmul.f32 %v2578_v35, %v2478_v62  ;;  %v2582_v26 = vmul.f32 1.25, %v2486_v9  ;;  %vm2357_vm2 = vmand %vm2353_vm5, %vm2355_vm11 }
 0x684   :  { %v2577_v57 = vadd.f32 %v2575_v0, %v2571_v19  ;;  %v2359_v23 = vsel %vm2357_vm2, 1.0, %v7212_v6  ;;  %v2483_v48 = vmul.f32 2.5, %v8141_v17  ;;  %v2489_v43 = vmul.f32 2.5, %v2487_v54 }
 0x685   :  { %v2653_v50 = vmul.f32 0.8333333, %v2473_v40  ;;  %v2584_v42 = vmul.f32 %v2582_v26, %v2492_v7  ;;  %v2658_v38 = vmul.f32 0.8333333, %v8077_v60  ;;  %vm2360_vm13 = vcmp.ge.f32.partialorder %v7848_v25, 1.8 }
 0x686   :  { %v2656_v51 = vadd.f32 %v2654_v24, %v2650_v10  ;;  %v2485_v37 = vmul.f32 %v2483_v48, %v2351_v47  ;;  %v2491_v33 = vmul.f32 %v2489_v43, %v2359_v23  ;;  %v2579_v15 = vmul.f32 1.25, %v8114_v11 }
 0x687   :  { %v2586_v62 = vadd.f32 %v2584_v42, %v2580_v21  ;;  %vm2362_vm3 = vcmp.lt.f32.partialorder %v7848_v25, 2.2  ;;  %v6161_v20 = vadd.f32 -1.4, %v7848_v25  ;;  %v2500_v27 = vsub.f32 2.2, %v7848_v25 }
 0x688   :  { %6671 = vmatmul.mubr.msk.f32.vlgmr.msra.gmra.mrb[12].mxu1 %vm77_vm1, %v2647_v12  ;;  %v2655_v60 = vmul.f32 %v2653_v50, %v2577_v57  ;;  %v2662_v40 = vmul.f32 0.8333333, %v2486_v9  ;;  %v2493_v10 = vadd.f32 %v2491_v33, %v2485_v37  ;;  %v2583_v47 = vmul.f32 1.25, %v2487_v54  ;;  %vm2364_vm4 = vmand %vm2360_vm13, %vm2362_vm3 }
 0x689   :  { %6677 = vmatprep.mubr.msk.f32.mxu1 %vm77_vm1, %v2656_v51  ;;  %6962 = vmatpush3.bf16.msra.mxu1 %v8013_v63  ;;  %v2581_v56 = vmul.f32 %v2579_v15, %v2479_v5  ;;  %v2366_v52 = vsel %vm2364_vm4, 1.0, %v7212_v6  ;;  %v2496_v39 = vmul.f32 2.5, %v6161_v20  ;;  %v2502_v9 = vmul.f32 2.5, %v2500_v27 }
 0x68a   :  { %6964 = vmatprep.subr.bf16.mxu1 %v8015_v44  ;;  %v2660_v4 = vmul.f32 %v2658_v38, %v2576_v61  ;;  %v2664_v19 = vmul.f32 %v2662_v40, %v2586_v62  ;;  %v2585_v0 = vmul.f32 %v2583_v47, %v2493_v10  ;;  %vm2361_vm12 = vcmp.ge.f32.partialorder %v7846_v30, 1.8 }
 0x68b   :  { %v2498_v25 = vmul.f32 %v2496_v39, %v2358_v32  ;;  %v2504_v45 = vmul.f32 %v2502_v9, %v2366_v52  ;;  %v2588_v22 = vmul.f32 1.25, %v8127_v29  ;;  %v8167_v35 = vpack.c.bf16 %v6192_v2, %v6191_v59 }
 0x68c   :  { %v2657_v24 = vadd.f32 %v2655_v60, %v2651_v34  ;;  %vm2363_vm14 = vcmp.lt.f32.partialorder %v7846_v30, 2.2  ;;  %v6162_v5 = vadd.f32 -1.4, %v7846_v30  ;;  %v2501_v12 = vsub.f32 2.2, %v7846_v30 }
 0x68d   :  { %v2587_v21 = vadd.f32 %v2585_v0, %v2581_v56  ;;  %v2506_v26 = vadd.f32 %v2504_v45, %v2498_v25  ;;  %v2590_v61 = vmul.f32 %v2588_v22, %v2492_v7  ;;  %v2592_v48 = vmul.f32 1.25, %v2500_v27  ;;  %vm2365_vm6 = vmand %vm2361_vm12, %vm2363_vm14 }
 0x68e   :  { %v2666_v43 = vadd.f32 %v2664_v19, %v2660_v4  ;;  %v2367_v32 = vsel %vm2365_vm6, 1.0, %v7212_v6  ;;  %v2497_v50 = vmul.f32 2.5, %v6162_v5  ;;  %v2503_v42 = vmul.f32 2.5, %v2501_v12 }
 0x68f   :  { %v2659_v29 = vmul.f32 0.8333333, %v8087_v16  ;;  %v2663_v34 = vmul.f32 0.8333333, %v2487_v54  ;;  %v2594_v38 = vmul.f32 %v2592_v48, %v2506_v26  ;;  %v2668_v30 = vmul.f32 0.8333333, %v8101_v58 }
 0x690   :  { %6678 = vmatmul.mubr.msk.f32.vlgmr.msra.gmra.mrb[12].mxu1 %vm77_vm1, %v2657_v24  ;;  %v2499_v7 = vmul.f32 %v2497_v50, %v2359_v23  ;;  %v2505_v51 = vmul.f32 %v2503_v42, %v2367_v32  ;;  %v2589_v37 = vmul.f32 1.25, %v8141_v17  ;;  %v2672_v60 = vmul.f32 0.8333333, %v2500_v27 }
 0x691   :  { %6684 = vmatprep.mubr.msk.f32.mxu1 %vm77_vm1, %v2666_v43  ;;  %6966 = vmatpush3.bf16.msra.mxu1 %v8015_v44  ;;  %v2661_v33 = vmul.f32 %v2659_v29, %v2577_v57  ;;  %v2665_v15 = vmul.f32 %v2663_v34, %v2587_v21  ;;  %v2596_v20 = vadd.f32 %v2594_v38, %v2590_v61  ;;  %v2593_v47 = vmul.f32 1.25, %v2501_v12 }
 0x692   :  { %6968 = vmatprep.subr.bf16.mxu1 %v8167_v35  ;;  %v2670_v40 = vmul.f32 %v2668_v30, %v2586_v62  ;;  %v2507_v16 = vadd.f32 %v2505_v51, %v2499_v7  ;;  %v2591_v54 = vmul.f32 %v2589_v37, %v2493_v10  ;;  %v2669_v58 = vmul.f32 0.8333333, %v8114_v11  ;;  %v6201_v11 = vld [vmem:[%s8725_s13] ss:$0 sm:$0xff] }
 0x693   :  { %v2674_v59 = vmul.f32 %v2672_v60, %v2596_v20  ;;  %v2667_v56 = vadd.f32 %v2665_v15, %v2661_v33  ;;  %v2673_v17 = vmul.f32 0.8333333, %v2501_v12 }
 0x694   :  { %v2595_v2 = vmul.f32 %v2593_v47, %v2507_v16  ;;  %v2671_v57 = vmul.f32 %v2669_v58, %v2587_v21 }
 0x695   :  { %v2676_v52 = vadd.f32 %v2674_v59, %v2670_v40 }
 0x696   :  { %v2597_v39 = vadd.f32 %v2595_v2, %v2591_v54 }
 0x698   :  { %6685 = vmatmul.mubr.msk.f32.vlgmr.msra.gmra.mrb[12].mxu1 %vm77_vm1, %v2667_v56  ;;  %v2675_v23 = vmul.f32 %v2673_v17, %v2597_v39 }
 0x699   :  { %6691 = vmatprep.mubr.msk.f32.mxu1 %vm77_vm1, %v2676_v52  ;;  %6970 = vmatpush3.bf16.msra.mxu1 %v8167_v35 }
 0x69a   :  { %6992 = vmatprep.subr.bf16.mxu1 %v7433_v3  ;;  %v2677_v62 = vadd.f32 %v2675_v23, %v2671_v57 }
 0x6a0   :  { %6692 = vmatmul.mubr.msk.f32.vlgmr.msra.gmra.mrb[12].mxu1 %vm77_vm1, %v2677_v62 }
 0x6a1   :  { %6994 = vmatpush3.bf16.msra.mxu1 %v7433_v3 }
 0x6a2   :  { %6996 = vmatprep.subr.bf16.mxu1 %v7443_v49 }
 0x70a   :  { %v6722_v27 = vpop.f32.mrb[12].mxu0 }
 0x70b   :  { %v3705_v10 = vadd.f32 %v6722_v27, %v6201_v11  ;;  %v3689_v9 = vpop.f32.mrb[13].mxu0 }
 0x70c   :  { %v3704_v4 = vadd.f32 %v6201_v11, %v3689_v9 }
 0x70d   :  { %v8191_v19 = vmax.f32 %v3705_v10, 0.0 }
 0x70e   :  { %v8193_v0 = vmax.f32 %v3704_v4, 0.0 }
 0x70f   :  { %vm3723_vm7 = vcmp.ge.f32.partialorder %v8191_v19, -2.2  ;;  %vm3725_vm8 = vcmp.lt.f32.partialorder %v8191_v19, -1.8  ;;  %vm3731_vm0 = vcmp.ge.f32.partialorder %v8191_v19, -1.8 }
 0x710   :  { %vm3722_vm9 = vcmp.ge.f32.partialorder %v8193_v0, -2.2  ;;  %vm3724_vm10 = vcmp.lt.f32.partialorder %v8193_v0, -1.8  ;;  %vm3730_vm15 = vcmp.ge.f32.partialorder %v8193_v0, -1.8 }
 0x711   :  { %vm3726_vm5 = vmand %vm3722_vm9, %vm3724_vm10  ;;  %vm3732_vm11 = vcmp.lt.f32.partialorder %v8193_v0, -1.4  ;;  %vm3738_vm2 = vcmp.ge.f32.partialorder %v8193_v0, -1.4  ;;  %vm3740_vm13 = vcmp.lt.f32.partialorder %v8193_v0, -1.0  ;;  %vm3746_vm3 = vcmp.ge.f32.partialorder %v8193_v0, -1.0 }
 0x712   :  { %vm3734_vm4 = vmand %vm3730_vm15, %vm3732_vm11  ;;  %vm3748_vm12 = vcmp.lt.f32.partialorder %v8193_v0, -0.6  ;;  %v6202_v3 = vadd.f32 2.2, %v8193_v0  ;;  %v3830_v25 = vsub.f32 -1.0, %v8193_v0  ;;  %v3728_v45 = vsel %vm3726_vm5, 1.0, %v7212_v6 }
 0x713   :  { %v3736_v22 = vsel %vm3734_vm4, 1.0, %v7212_v6  ;;  %vm3742_vm14 = vmand %vm3738_vm2, %vm3740_vm13  ;;  %v3816_v24 = vsub.f32 -1.4, %v8193_v0  ;;  %v8212_v5 = vadd.f32 1.8, %v8193_v0  ;;  %vm3741_vm5 = vcmp.lt.f32.partialorder %v8191_v19, -1.0 }
 0x714   :  { %v3744_v12 = vsel %vm3742_vm14, 1.0, %v7212_v6  ;;  %vm3750_vm6 = vmand %vm3746_vm3, %vm3748_vm12  ;;  %v3812_v21 = vmul.f32 2.5, %v6202_v3  ;;  %v3832_v26 = vmul.f32 2.5, %v3830_v25  ;;  %v8216_v61 = vadd.f32 1.4, %v8193_v0 }
 0x715   :  { %v8219_v48 = vsel %vm3750_vm6, 1.0, %v7212_v6  ;;  %v3818_v43 = vmul.f32 2.5, %v3816_v24  ;;  %v3826_v32 = vmul.f32 2.5, %v8212_v5  ;;  %v3844_v50 = vsub.f32 -0.6, %v8193_v0  ;;  %vm3727_vm9 = vmand %vm3723_vm7, %vm3725_vm8 }
 0x716   :  { %v3814_v42 = vmul.f32 %v3812_v21, %v3728_v45  ;;  %v3834_v29 = vmul.f32 %v3832_v26, %v3744_v12  ;;  %v3840_v34 = vmul.f32 2.5, %v8216_v61  ;;  %v3950_v38 = vmul.f32 1.25, %v6202_v3 }
 0x717   :  { %v3820_v30 = vmul.f32 %v3818_v43, %v3736_v22  ;;  %v3828_v7 = vmul.f32 %v3826_v32, %v3736_v22  ;;  %v3846_v51 = vmul.f32 2.5, %v3844_v50  ;;  %v3954_v37 = vmul.f32 1.25, %v3830_v25 }
 0x718   :  { %v3842_v33 = vmul.f32 %v3840_v34, %v3744_v12  ;;  %v3960_v15 = vmul.f32 1.25, %v8212_v5  ;;  %v3964_v20 = vmul.f32 1.25, %v3844_v50  ;;  %v4040_v60 = vmul.f32 0.8333333, %v6202_v3 }
 0x719   :  { %v3822_v40 = vadd.f32 %v3820_v30, %v3814_v42  ;;  %v3836_v16 = vadd.f32 %v3834_v29, %v3828_v7  ;;  %v3848_v54 = vmul.f32 %v3846_v51, %v8219_v48  ;;  %v4044_v47 = vmul.f32 0.8333333, %v3844_v50 }
 0x71a   :  { %vm3733_vm10 = vcmp.lt.f32.partialorder %v8191_v19, -1.4  ;;  %vm3739_vm15 = vcmp.ge.f32.partialorder %v8191_v19, -1.4  ;;  %vm3747_vm11 = vcmp.ge.f32.partialorder %v8191_v19, -1.0  ;;  %v3729_v39 = vsel %vm3727_vm9, 1.0, %v7212_v6 }
 0x71b   :  { %v8234_v59 = vadd.f32 %v3848_v54, %v3842_v33  ;;  %v3952_v2 = vmul.f32 %v3950_v38, %v3822_v40  ;;  %v3956_v56 = vmul.f32 %v3954_v37, %v3836_v16  ;;  %v3962_v52 = vmul.f32 %v3960_v15, %v3836_v16  ;;  %vm3735_vm2 = vmand %vm3731_vm0, %vm3733_vm10 }
 0x71c   :  { %vm3743_vm13 = vmand %vm3739_vm15, %vm3741_vm5  ;;  %vm3749_vm7 = vcmp.lt.f32.partialorder %v8191_v19, -0.6  ;;  %v6203_v58 = vadd.f32 2.2, %v8191_v19  ;;  %v3831_v17 = vsub.f32 -1.0, %v8191_v19  ;;  %v3737_v27 = vsel %vm3735_vm2, 1.0, %v7212_v6 }
 0x71d   :  { %v3958_v57 = vadd.f32 %v3956_v56, %v3952_v2  ;;  %v3966_v23 = vmul.f32 %v3964_v20, %v8234_v59  ;;  %v3745_v62 = vsel %vm3743_vm13, 1.0, %v7212_v6  ;;  %v3817_v11 = vsub.f32 -1.4, %v8191_v19  ;;  %vm3751_vm8 = vmand %vm3747_vm11, %vm3749_vm7 }
 0x71e   :  { %v3813_v10 = vmul.f32 2.5, %v6203_v58  ;;  %v8249_v9 = vadd.f32 1.8, %v8191_v19  ;;  %v3833_v4 = vmul.f32 2.5, %v3831_v17  ;;  %v8254_v22 = vadd.f32 1.4, %v8191_v19 }
 0x71f   :  { %v8251_v3 = vadd.f32 %v3966_v23, %v3962_v52  ;;  %v4042_v25 = vmul.f32 %v4040_v60, %v3958_v57  ;;  %v3819_v45 = vmul.f32 2.5, %v3817_v11  ;;  %v3845_v26 = vsub.f32 -0.6, %v8191_v19 }
 0x720   :  { %v3815_v24 = vmul.f32 %v3813_v10, %v3729_v39  ;;  %v3827_v12 = vmul.f32 2.5, %v8249_v9  ;;  %v3835_v21 = vmul.f32 %v3833_v4, %v3745_v62  ;;  %v3753_v32 = vsel %vm3751_vm8, 1.0, %v7212_v6 }
 0x721   :  { %v4046_v43 = vmul.f32 %v4044_v47, %v8251_v3  ;;  %v3821_v50 = vmul.f32 %v3819_v45, %v3737_v27  ;;  %v3841_v42 = vmul.f32 2.5, %v8254_v22  ;;  %v3847_v34 = vmul.f32 2.5, %v3845_v26 }
 0x722   :  { %v3829_v29 = vmul.f32 %v3827_v12, %v3737_v27  ;;  %v3951_v38 = vmul.f32 1.25, %v6203_v58  ;;  %v3955_v37 = vmul.f32 1.25, %v3831_v17  ;;  %v3961_v20 = vmul.f32 1.25, %v8249_v9 }
 0x723   :  { %v4048_v30 = vadd.f32 %v4046_v43, %v4042_v25  ;;  %v3823_v7 = vadd.f32 %v3821_v50, %v3815_v24  ;;  %v3843_v51 = vmul.f32 %v3841_v42, %v3745_v62  ;;  %v3849_v15 = vmul.f32 %v3847_v34, %v3753_v32 }
 0x724   :  { %v3837_v33 = vadd.f32 %v3835_v21, %v3829_v29  ;;  %v3965_v60 = vmul.f32 1.25, %v3845_v26  ;;  %v3708_v16 = vmax.f32 %v8193_v0, -30.0  ;;  %v3709_v54 = vmax.f32 %v8191_v19, -30.0 }
 0x725   :  { %6727 = vmatprep.mubr.msk.f32.mxu1 %vm77_vm1, %v4048_v30  ;;  %v3953_v40 = vmul.f32 %v3951_v38, %v3823_v7  ;;  %vm3754_vm0 = vcmp.ge.f32.partialorder %v8193_v0, -0.6  ;;  %v3851_v47 = vadd.f32 %v3849_v15, %v3843_v51  ;;  %vm3756_vm3 = vcmp.lt.f32.partialorder %v8193_v0, -0.2 }
 0x726   :  { %v3957_v2 = vmul.f32 %v3955_v37, %v3837_v33  ;;  %v3963_v56 = vmul.f32 %v3961_v20, %v3837_v33  ;;  %v3710_v52 = vsub.f32 0.0, %v3708_v16  ;;  %v3711_v39 = vsub.f32 0.0, %v3709_v54  ;;  %vm3758_vm4 = vmand %vm3754_vm0, %vm3756_vm3 }
 0x727   :  { %v8268_v17 = vadd.f32 1.0, %v8193_v0  ;;  %v3858_v57 = vsub.f32 -0.2, %v8193_v0  ;;  %v3967_v62 = vmul.f32 %v3965_v60, %v3851_v47  ;;  %v4041_v11 = vmul.f32 0.8333333, %v6203_v58 }
 0x728   :  { %v3959_v23 = vadd.f32 %v3957_v2, %v3953_v40  ;;  %v3760_v27 = vsel %vm3758_vm4, 1.0, %v7212_v6  ;;  %v3712_v10 = vmul.f32 1.442695, %v3710_v52  ;;  %v3714_v4 = vmul.f32 1.442695, %v3711_v39 }
 0x729   :  { %v3854_v25 = vmul.f32 2.5, %v8268_v17  ;;  %v3860_v45 = vmul.f32 2.5, %v3858_v57  ;;  %v3969_v24 = vadd.f32 %v3967_v62, %v3963_v56  ;;  %v4045_v21 = vmul.f32 0.8333333, %v3845_v26 }
 0x72a   :  { %v4043_v12 = vmul.f32 %v4041_v11, %v3959_v23  ;;  %7170 = vpow2.f32 %v3712_v10  ;;  %v3970_v29 = vmul.f32 1.25, %v8216_v61  ;;  %vm3755_vm12 = vcmp.ge.f32.partialorder %v8191_v19, -0.6 }
 0x72b   :  { %v3856_v43 = vmul.f32 %v3854_v25, %v8219_v48  ;;  %v3862_v50 = vmul.f32 %v3860_v45, %v3760_v27  ;;  %v4047_v42 = vmul.f32 %v4045_v21, %v3969_v24  ;;  %7172 = vpow2.f32 %v3714_v4 }
 0x72c   :  { %v3974_v34 = vmul.f32 1.25, %v3858_v57  ;;  %vm3757_vm14 = vcmp.lt.f32.partialorder %v8191_v19, -0.2  ;;  %v8278_v38 = vadd.f32 1.0, %v8191_v19  ;;  %v3972_v26 = vmul.f32 %v3970_v29, %v8234_v59 }
 0x72d   :  { %v3864_v58 = vadd.f32 %v3862_v50, %v3856_v43  ;;  %v4049_v30 = vadd.f32 %v4047_v42, %v4043_v12  ;;  %vm3759_vm6 = vmand %vm3755_vm12, %vm3757_vm14  ;;  %v3859_v48 = vsub.f32 -0.2, %v8191_v19  ;;  %vm3762_vm9 = vcmp.ge.f32.partialorder %v8193_v0, -0.2 }
 0x72e   :  { %v3761_v51 = vsel %vm3759_vm6, 1.0, %v7212_v6  ;;  %v3855_v37 = vmul.f32 2.5, %v8278_v38  ;;  %v4050_v15 = vmul.f32 0.8333333, %v8212_v5  ;;  %vm3764_vm10 = vcmp.lt.f32.partialorder %v8193_v0, 0.2 }
 0x72f   :  { %v3976_v7 = vmul.f32 %v3974_v34, %v3864_v58  ;;  %6728 = vmatmul.mubr.msk.f32.vlgmr.msra.gmra.mrb[14].mxu1 %vm77_vm1, %v4049_v30  ;;  %v3861_v33 = vmul.f32 2.5, %v3859_v48  ;;  %vm3766_vm15 = vmand %vm3762_vm9, %vm3764_vm10  ;;  %v8291_v40 = vadd.f32 0.6, %v8193_v0  ;;  %v3872_v16 = vsub.f32 0.2, %v8193_v0 }
 0x730   :  { %6998 = vmatpush3.bf16.msra.mxu1 %v7443_v49  ;;  %v3857_v20 = vmul.f32 %v3855_v37, %v3753_v32  ;;  %v4052_v54 = vmul.f32 %v4050_v15, %v8251_v3  ;;  %v4054_v2 = vmul.f32 0.8333333, %v3858_v57  ;;  %v3971_v49 = vmul.f32 1.25, %v8254_v22 }
 0x731   :  { %7000 = vmatprep.subr.bf16.mxu1 %v7553_v41  ;;  %v3978_v59 = vadd.f32 %v3976_v7, %v3972_v26  ;;  %v3863_v60 = vmul.f32 %v3861_v33, %v3761_v51  ;;  %v3768_v5 = vsel %vm3766_vm15, 1.0, %v7212_v6  ;;  %v4051_v56 = vmul.f32 0.8333333, %v8249_v9 }
 0x732   :  { %v3868_v52 = vmul.f32 2.5, %v8291_v40  ;;  %v3874_v39 = vmul.f32 2.5, %v3872_v16  ;;  %v3973_v62 = vmul.f32 %v3971_v49, %v3851_v47  ;;  %v3975_v11 = vmul.f32 1.25, %v3859_v48 }
 0x733   :  { %v3865_v32 = vadd.f32 %v3863_v60, %v3857_v20  ;;  %v3980_v10 = vmul.f32 1.25, %v8268_v17  ;;  %vm3763_vm5 = vcmp.ge.f32.partialorder %v8191_v19, -0.2  ;;  %v4056_v57 = vmul.f32 %v4054_v2, %v3978_v59 }
 0x734   :  { %v7171_v23 = vpop.eup %7170  ;;  %v3870_v25 = vmul.f32 %v3868_v52, %v3760_v27  ;;  %v3876_v45 = vmul.f32 %v3874_v39, %v3768_v5  ;;  %vm3765_vm11 = vcmp.lt.f32.partialorder %v8191_v19, 0.2  ;;  %v8303_v9 = vadd.f32 0.6, %v8191_v19 }
 0x735   :  { %v7173_v4 = vpop.eup %7172  ;;  %v3716_v3 = vadd.f32 1.0, %v7171_v23  ;;  %v3977_v21 = vmul.f32 %v3975_v11, %v3865_v32  ;;  %v3984_v47 = vmul.f32 1.25, %v3872_v16  ;;  %vm3767_vm2 = vmand %vm3763_vm5, %vm3765_vm11  ;;  %v3873_v50 = vsub.f32 0.2, %v8191_v19 }
 0x736   :  { %v3717_v12 = vadd.f32 1.0, %v7173_v4  ;;  %v3878_v43 = vadd.f32 %v3876_v45, %v3870_v25  ;;  %v4053_v42 = vmul.f32 %v4051_v56, %v3969_v24  ;;  %v3769_v29 = vsel %vm3767_vm2, 1.0, %v7212_v6 }
 0x737   :  { %7174 = vrcp.f32 %v3716_v3  ;;  %v3869_v27 = vmul.f32 2.5, %v8303_v9  ;;  %v4055_v34 = vmul.f32 0.8333333, %v3859_v48  ;;  %v3982_v30 = vmul.f32 %v3980_v10, %v3864_v58 }
 0x738   :  { %7176 = vrcp.f32 %v3717_v12  ;;  %v3986_v26 = vmul.f32 %v3984_v47, %v3878_v43  ;;  %v3875_v7 = vmul.f32 2.5, %v3873_v50  ;;  %v3979_v37 = vadd.f32 %v3977_v21, %v3973_v62 }
 0x739   :  { %v4060_v33 = vmul.f32 0.8333333, %v8216_v61  ;;  %v3871_v15 = vmul.f32 %v3869_v27, %v3761_v51  ;;  %vm3770_vm13 = vcmp.ge.f32.partialorder %v8193_v0, 0.2  ;;  %v4058_v20 = vadd.f32 %v4056_v57, %v4052_v54 }
 0x73a   :  { %v4064_v60 = vmul.f32 0.8333333, %v3872_v16  ;;  %v3877_v2 = vmul.f32 %v3875_v7, %v3769_v29  ;;  %vm3772_vm7 = vcmp.lt.f32.partialorder %v8193_v0, 0.6  ;;  %v3981_v49 = vmul.f32 1.25, %v8278_v38 }
 0x73b   :  { %v4062_v24 = vmul.f32 %v4060_v33, %v3978_v59  ;;  %vm3774_vm8 = vmand %vm3770_vm13, %vm3772_vm7  ;;  %v8313_v48 = vadd.f32 0.2, %v8193_v0  ;;  %v3886_v58 = vsub.f32 0.6, %v8193_v0  ;;  %v3988_v56 = vadd.f32 %v3986_v26, %v3982_v30 }
 0x73c   :  { %v3879_v52 = vadd.f32 %v3877_v2, %v3871_v15  ;;  %v3985_v61 = vmul.f32 1.25, %v3873_v50  ;;  %v3776_v51 = vsel %vm3774_vm8, 1.0, %v7212_v6  ;;  %v4057_v39 = vmul.f32 %v4055_v34, %v3979_v37 }
 0x73d   :  { %v3983_v54 = vmul.f32 %v3981_v49, %v3865_v32  ;;  %v3882_v16 = vmul.f32 2.5, %v8313_v48  ;;  %v3888_v23 = vmul.f32 2.5, %v3886_v58  ;;  %v4061_v59 = vmul.f32 0.8333333, %v8254_v22 }
 0x73e   :  { %v3987_v62 = vmul.f32 %v3985_v61, %v3879_v52  ;;  %v4065_v11 = vmul.f32 0.8333333, %v3873_v50  ;;  %v3990_v10 = vmul.f32 1.25, %v8291_v40  ;;  %vm3771_vm0 = vcmp.ge.f32.partialorder %v8191_v19, 0.2 }
 0x73f   :  { %v3884_v4 = vmul.f32 %v3882_v16, %v3768_v5  ;;  %v3890_v3 = vmul.f32 %v3888_v23, %v3776_v51  ;;  %vm3773_vm3 = vcmp.lt.f32.partialorder %v8191_v19, 0.6  ;;  %v4066_v25 = vmul.f32 %v4064_v60, %v3988_v56 }
 0x740   :  { %v3994_v45 = vmul.f32 1.25, %v3886_v58  ;;  %vm3775_vm4 = vmand %vm3771_vm0, %vm3773_vm3  ;;  %v8323_v32 = vadd.f32 0.2, %v8191_v19  ;;  %v3887_v12 = vsub.f32 0.6, %v8191_v19  ;;  %v3989_v47 = vadd.f32 %v3987_v62, %v3983_v54 }
 0x741   :  { %v7175_v57 = vpop.eup %7174  ;;  %v3892_v50 = vadd.f32 %v3890_v3, %v3884_v4  ;;  %v8328_v5 = vsel %vm3775_vm4, 1.0, %v7212_v6  ;;  %v3992_v34 = vmul.f32 %v3990_v10, %v3878_v43  ;;  %v4059_v7 = vadd.f32 %v4057_v39, %v4053_v42 }
 0x742   :  { %v7177_v21 = vpop.eup %7176  ;;  %v3720_v22 = vmul.f32 %v7175_v57, %v8193_v0  ;;  %v3883_v30 = vmul.f32 2.5, %v8323_v32  ;;  %v3889_v26 = vmul.f32 2.5, %v3887_v12  ;;  %v4063_v33 = vmul.f32 %v4061_v59, %v3979_v37 }
 0x743   :  { %v3721_v27 = vmul.f32 %v7177_v21, %v8191_v19  ;;  %v3996_v15 = vmul.f32 %v3994_v45, %v3892_v50  ;;  %v4070_v60 = vmul.f32 0.8333333, %v8268_v17  ;;  %v4068_v2 = vadd.f32 %v4066_v25, %v4062_v24 }
 0x744   :  { %6734 = vmatprep.mubr.msk.f32.mxu1 %vm77_vm1, %v3720_v22  ;;  %v3885_v49 = vmul.f32 %v3883_v30, %v3769_v29  ;;  %v3891_v61 = vmul.f32 %v3889_v26, %v8328_v5  ;;  %v3991_v54 = vmul.f32 1.25, %v8303_v9  ;;  %v4067_v43 = vmul.f32 %v4065_v11, %v3989_v47 }
 0x745   :  { %6735 = vmatmul.mubr.msk.f32.vlgmr.msra.gmra.mrb[14].mxu1 %vm77_vm1, %v3721_v27  ;;  %vm3778_vm12 = vcmp.ge.f32.partialorder %v8193_v0, 0.6  ;;  %vm3780_vm14 = vcmp.lt.f32.partialorder %v8193_v0, 1.0  ;;  %v8342_v42 = vadd.f32 -0.2, %v8193_v0  ;;  %v3998_v17 = vadd.f32 %v3996_v15, %v3992_v34 }
 0x746   :  { %7002 = vmatpush3.bf16.msra.mxu1 %v7553_v41  ;;  %6741 = vmatprep.mubr.msk.f32.mxu1 %vm77_vm1, %v4058_v20  ;;  %v3893_v29 = vadd.f32 %v3891_v61, %v3885_v49  ;;  %v3995_v37 = vmul.f32 1.25, %v3887_v12  ;;  %vm3782_vm6 = vmand %vm3778_vm12, %vm3780_vm14  ;;  %v3900_v24 = vsub.f32 1.0, %v8193_v0  ;;  %v4074_v39 = vmul.f32 0.8333333, %v3886_v58 }
 0x747   :  { %7004 = vmatprep.subr.bf16.mxu1 %v7557_v46  ;;  %v4071_v41 = vmul.f32 0.8333333, %v8278_v38  ;;  %v3784_v20 = vsel %vm3782_vm6, 1.0, %v7212_v6  ;;  %v3896_v16 = vmul.f32 2.5, %v8342_v42  ;;  %v3993_v23 = vmul.f32 %v3991_v54, %v3879_v52 }
 0x748   :  { %v3997_v62 = vmul.f32 %v3995_v37, %v3893_v29  ;;  %v3902_v59 = vmul.f32 2.5, %v3900_v24  ;;  %vm3779_vm9 = vcmp.ge.f32.partialorder %v8191_v19, 0.6  ;;  %v4069_v11 = vadd.f32 %v4067_v43, %v4063_v33 }
 0x749   :  { %v4072_v10 = vmul.f32 %v4070_v60, %v3988_v56  ;;  %v4073_v4 = vmul.f32 %v4071_v41, %v3989_v47  ;;  %v3898_v3 = vmul.f32 %v3896_v16, %v3776_v51  ;;  %v4076_v57 = vmul.f32 %v4074_v39, %v3998_v17 }
 0x74a   :  { %v3904_v25 = vmul.f32 %v3902_v59, %v3784_v20  ;;  %vm3781_vm10 = vcmp.lt.f32.partialorder %v8191_v19, 1.0  ;;  %v8352_v58 = vadd.f32 -0.2, %v8191_v19  ;;  %v4000_v38 = vmul.f32 1.25, %v8313_v48 }
 0x74b   :  { %v4004_v45 = vmul.f32 1.25, %v3900_v24  ;;  %v4080_v52 = vmul.f32 0.8333333, %v8291_v40  ;;  %vm3783_vm15 = vmand %vm3779_vm9, %vm3781_vm10  ;;  %v3901_v21 = vsub.f32 1.0, %v8191_v19  ;;  %v3999_v56 = vadd.f32 %v3997_v62, %v3993_v23 }
 0x74c   :  { %v3906_v22 = vadd.f32 %v3904_v25, %v3898_v3  ;;  %v3785_v51 = vsel %vm3783_vm15, 1.0, %v7212_v6  ;;  %v3897_v47 = vmul.f32 2.5, %v8352_v58  ;;  %v4075_v27 = vmul.f32 0.8333333, %v3887_v12 }
 0x74d   :  { %6742 = vmatmul.mubr.msk.f32.vlgmr.msra.gmra.mrb[14].mxu1 %vm77_vm1, %v4059_v7  ;;  %v4002_v34 = vmul.f32 %v4000_v38, %v3892_v50  ;;  %v3903_v30 = vmul.f32 2.5, %v3901_v21  ;;  %vm3786_vm5 = vcmp.ge.f32.partialorder %v8193_v0, 1.0  ;;  %v4078_v40 = vadd.f32 %v4076_v57, %v4072_v10 }
 0x74e   :  { %7006 = vmatpush3.bf16.msra.mxu1 %v7557_v46  ;;  %6748 = vmatprep.mubr.msk.f32.mxu1 %vm77_vm1, %v4068_v2  ;;  %v4006_v26 = vmul.f32 %v4004_v45, %v3906_v22  ;;  %v4082_v7 = vmul.f32 %v4080_v52, %v3998_v17  ;;  %v3899_v33 = vmul.f32 %v3897_v47, %v8328_v5  ;;  %vm3788_vm11 = vcmp.lt.f32.partialorder %v8193_v0, 1.4 }
 0x74f   :  { %7008 = vmatprep.subr.bf16.mxu1 %v7590_v1  ;;  %v3905_v15 = vmul.f32 %v3903_v30, %v3785_v51  ;;  %v8367_v60 = vadd.f32 -0.6, %v8193_v0  ;;  %v3914_v46 = vsub.f32 1.4, %v8193_v0  ;;  %v4077_v12 = vmul.f32 %v4075_v27, %v3999_v56  ;;  %vm3790_vm2 = vmand %vm3786_vm5, %vm3788_vm11 }
 0x750   :  { %v4084_v50 = vmul.f32 0.8333333, %v3900_v24  ;;  %v4001_v2 = vmul.f32 1.25, %v8323_v32  ;;  %v4081_v49 = vmul.f32 0.8333333, %v8303_v9  ;;  %v3792_v54 = vsel %vm3790_vm2, 1.0, %v7212_v6 }
 0x751   :  { %v3907_v61 = vadd.f32 %v3905_v15, %v3899_v33  ;;  %v3910_v5 = vmul.f32 2.5, %v8367_v60  ;;  %v3916_v43 = vmul.f32 2.5, %v3914_v46  ;;  %v4008_v17 = vadd.f32 %v4006_v26, %v4002_v34 }
 0x752   :  { %v4003_v37 = vmul.f32 %v4001_v2, %v3893_v29  ;;  %v4005_v39 = vmul.f32 1.25, %v3901_v21  ;;  %vm3787_vm13 = vcmp.ge.f32.partialorder %v8191_v19, 1.0  ;;  %v4010_v24 = vmul.f32 1.25, %v8342_v42 }
 0x753   :  { %v3912_v41 = vmul.f32 %v3910_v5, %v3784_v20  ;;  %v3918_v16 = vmul.f32 %v3916_v43, %v3792_v54  ;;  %v4090_v23 = vmul.f32 0.8333333, %v8313_v48  ;;  %v4083_v9 = vmul.f32 %v4081_v49, %v3999_v56 }
 0x754   :  { %vm3789_vm7 = vcmp.lt.f32.partialorder %v8191_v19, 1.4  ;;  %v8380_v62 = vadd.f32 -0.6, %v8191_v19  ;;  %v3915_v59 = vsub.f32 1.4, %v8191_v19  ;;  %v4007_v29 = vmul.f32 %v4005_v39, %v3907_v61 }
 0x755   :  { %6749 = vmatmul.mubr.msk.f32.vlgmr.msra.gmra.mrb[14].mxu1 %vm77_vm1, %v4069_v11  ;;  %v3920_v20 = vadd.f32 %v3918_v16, %v3912_v41  ;;  %v4012_v10 = vmul.f32 %v4010_v24, %v3906_v22  ;;  %v4014_v3 = vmul.f32 1.25, %v3914_v46  ;;  %vm3791_vm8 = vmand %vm3787_vm13, %vm3789_vm7  ;;  %v4079_v48 = vadd.f32 %v4077_v12, %v4073_v4 }
 0x756   :  { %7010 = vmatpush3.bf16.msra.mxu1 %v7590_v1  ;;  %6755 = vmatprep.mubr.msk.f32.mxu1 %vm77_vm1, %v4078_v40  ;;  %v3793_v11 = vsel %vm3791_vm8, 1.0, %v7212_v6  ;;  %v3911_v57 = vmul.f32 2.5, %v8380_v62  ;;  %v3917_v25 = vmul.f32 2.5, %v3915_v59  ;;  %v4086_v38 = vmul.f32 %v4084_v50, %v4008_v17 }
 0x757   :  { %7012 = vmatprep.subr.bf16.mxu1 %v7603_v13  ;;  %v4085_v45 = vmul.f32 0.8333333, %v3901_v21  ;;  %v4016_v1 = vmul.f32 %v4014_v3, %v3920_v20  ;;  %v4092_v52 = vmul.f32 %v4090_v23, %v4008_v17  ;;  %v4094_v56 = vmul.f32 0.8333333, %v3914_v46 }
 0x758   :  { %v3913_v47 = vmul.f32 %v3911_v57, %v3785_v51  ;;  %v3919_v27 = vmul.f32 %v3917_v25, %v3793_v11  ;;  %vm3794_vm0 = vcmp.ge.f32.partialorder %v8193_v0, 1.4  ;;  %v4009_v22 = vadd.f32 %v4007_v29, %v4003_v37 }
 0x759   :  { %v4018_v34 = vadd.f32 %v4016_v1, %v4012_v10  ;;  %vm3796_vm3 = vcmp.lt.f32.partialorder %v8193_v0, 1.8  ;;  %v6218_v4 = vadd.f32 -1.0, %v8193_v0  ;;  %v4011_v40 = vmul.f32 1.25, %v8352_v58 }
 0x75a   :  { %v3921_v30 = vadd.f32 %v3919_v27, %v3913_v47  ;;  %v4015_v26 = vmul.f32 1.25, %v3915_v59  ;;  %vm3798_vm4 = vmand %vm3794_vm0, %vm3796_vm3  ;;  %v3928_v21 = vsub.f32 1.8, %v8193_v0  ;;  %v4088_v33 = vadd.f32 %v4086_v38, %v4082_v7 }
 0x75b   :  { %v4091_v15 = vmul.f32 0.8333333, %v8323_v32  ;;  %v3800_v51 = vsel %vm3798_vm4, 1.0, %v7212_v6  ;;  %v3924_v46 = vmul.f32 2.5, %v6218_v4  ;;  %v4013_v12 = vmul.f32 %v4011_v40, %v3907_v61 }
 0x75c   :  { %v4017_v50 = vmul.f32 %v4015_v26, %v3921_v30  ;;  %v3930_v2 = vmul.f32 2.5, %v3928_v21  ;;  %vm3795_vm12 = vcmp.ge.f32.partialorder %v8191_v19, 1.4  ;;  %v4087_v49 = vmul.f32 %v4085_v45, %v4009_v22 }
 0x75d   :  { %6756 = vmatmul.mubr.msk.f32.vlgmr.msra.gmra.mrb[14].mxu1 %vm77_vm1, %v4079_v48  ;;  %v4096_v5 = vmul.f32 %v4094_v56, %v4018_v34  ;;  %v3926_v43 = vmul.f32 %v3924_v46, %v3792_v54  ;;  %v4020_v7 = vmul.f32 1.25, %v8367_v60  ;;  %v4093_v32 = vmul.f32 %v4091_v15, %v4009_v22 }
 0x75e   :  { %7014 = vmatpush3.bf16.msra.mxu1 %v7603_v13  ;;  %6762 = vmatprep.mubr.msk.f32.mxu1 %vm77_vm1, %v4088_v33  ;;  %v3932_v17 = vmul.f32 %v3930_v2, %v3800_v51  ;;  %vm3797_vm14 = vcmp.lt.f32.partialorder %v8191_v19, 1.8  ;;  %v6219_v61 = vadd.f32 -1.0, %v8191_v19  ;;  %v4095_v37 = vmul.f32 0.8333333, %v3915_v59 }
 0x75f   :  { %7016 = vmatprep.subr.bf16.mxu1 %v7605_v14  ;;  %v4022_v39 = vmul.f32 %v4020_v7, %v3920_v20  ;;  %v4024_v41 = vmul.f32 1.25, %v3928_v21  ;;  %vm3799_vm6 = vmand %vm3795_vm12, %vm3797_vm14  ;;  %v3929_v13 = vsub.f32 1.8, %v8191_v19  ;;  %v4019_v16 = vadd.f32 %v4017_v50, %v4013_v12 }
 0x760   :  { %v3934_v54 = vadd.f32 %v3932_v17, %v3926_v43  ;;  %v3801_v24 = vsel %vm3799_vm6, 1.0, %v7212_v6  ;;  %v3925_v23 = vmul.f32 2.5, %v6219_v61  ;;  %v4089_v29 = vadd.f32 %v4087_v49, %v4083_v9 }
 0x761   :  { %v4098_v10 = vadd.f32 %v4096_v5, %v4092_v52  ;;  %v4100_v3 = vmul.f32 0.8333333, %v8342_v42  ;;  %v3931_v48 = vmul.f32 2.5, %v3929_v13  ;;  %v4104_v25 = vmul.f32 0.8333333, %v3928_v21 }
 0x762   :  { %v4026_v57 = vmul.f32 %v4024_v41, %v3934_v54  ;;  %v3927_v59 = vmul.f32 %v3925_v23, %v3793_v11  ;;  %v4021_v20 = vmul.f32 1.25, %v8380_v62  ;;  %vm3802_vm9 = vcmp.ge.f32.partialorder %v8193_v0, 1.8 }
 0x763   :  { %v3933_v38 = vmul.f32 %v3931_v48, %v3801_v24  ;;  %vm3804_vm10 = vcmp.lt.f32.partialorder %v8193_v0, 2.2  ;;  %v6220_v45 = vadd.f32 -1.4, %v8193_v0  ;;  %v4097_v1 = vmul.f32 %v4095_v37, %v4019_v16 }
 0x764   :  { %v4028_v9 = vadd.f32 %v4026_v57, %v4022_v39  ;;  %v4025_v52 = vmul.f32 1.25, %v3929_v13  ;;  %vm3806_vm15 = vmand %vm3802_vm9, %vm3804_vm10  ;;  %v3942_v42 = vsub.f32 2.2, %v8193_v0  ;;  %vm3803_vm5 = vcmp.ge.f32.partialorder %v8191_v19, 1.8 }
 0x765   :  { %6763 = vmatmul.mubr.msk.f32.vlgmr.msra.gmra.mrb[14].mxu1 %vm77_vm1, %v4089_v29  ;;  %v3935_v11 = vadd.f32 %v3933_v38, %v3927_v59  ;;  %v3808_v56 = vsel %vm3806_vm15, 1.0, %v7212_v6  ;;  %v3938_v47 = vmul.f32 2.5, %v6220_v45  ;;  %v4102_v27 = vmul.f32 %v4100_v3, %v4018_v34 }
 0x766   :  { %7018 = vmatpush3.bf16.msra.mxu1 %v7605_v14  ;;  %6769 = vmatprep.mubr.msk.f32.mxu1 %vm77_vm1, %v4098_v10  ;;  %v4023_v22 = vmul.f32 %v4021_v20, %v3921_v30  ;;  %v3944_v40 = vmul.f32 2.5, %v3942_v42  ;;  %v4030_v26 = vmul.f32 1.25, %v6218_v4  ;;  %v4106_v21 = vmul.f32 %v4104_v25, %v4028_v9 }
 0x767   :  { %7020 = vmatprep.subr.bf16.mxu1 %v7612_v18  ;;  %v4027_v33 = vmul.f32 %v4025_v52, %v3935_v11  ;;  %v3940_v15 = vmul.f32 %v3938_v47, %v3800_v51  ;;  %vm3805_vm11 = vcmp.lt.f32.partialorder %v8191_v19, 2.2  ;;  %v6221_v0 = vadd.f32 -1.4, %v8191_v19 }
 0x768   :  { %v3946_v14 = vmul.f32 %v3944_v40, %v3808_v56  ;;  %vm3807_vm2 = vmand %vm3803_vm5, %vm3805_vm11  ;;  %v3943_v46 = vsub.f32 2.2, %v8191_v19  ;;  %v4099_v12 = vadd.f32 %v4097_v1, %v4093_v32  ;;  %v4032_v50 = vmul.f32 %v4030_v26, %v3934_v54 }
 0x769   :  { %v4034_v2 = vmul.f32 1.25, %v3942_v42  ;;  %v3809_v49 = vsel %vm3807_vm2, 1.0, %v7212_v6  ;;  %v4029_v34 = vadd.f32 %v4027_v33, %v4023_v22  ;;  %v3939_v5 = vmul.f32 2.5, %v6221_v0 }
 0x76a   :  { %v3948_v30 = vadd.f32 %v3946_v14, %v3940_v15  ;;  %v3945_v4 = vmul.f32 2.5, %v3943_v46  ;;  %v4108_v43 = vadd.f32 %v4106_v21, %v4102_v27  ;;  %v4101_v51 = vmul.f32 0.8333333, %v8352_v58 }
 0x76b   :  { %v4105_v7 = vmul.f32 0.8333333, %v3929_v13  ;;  %v3941_v37 = vmul.f32 %v3939_v5, %v3801_v24  ;;  %v4031_v41 = vmul.f32 1.25, %v6219_v61  ;;  %v4110_v32 = vmul.f32 0.8333333, %v8367_v60 }
 0x76c   :  { %v4036_v17 = vmul.f32 %v4034_v2, %v3948_v30  ;;  %v3947_v39 = vmul.f32 %v3945_v4, %v3809_v49  ;;  %v4103_v19 = vmul.f32 %v4101_v51, %v4019_v16  ;;  %v4114_v54 = vmul.f32 0.8333333, %v3942_v42 }
 0x76d   :  { %6770 = vmatmul.mubr.msk.f32.vlgmr.msra.gmra.mrb[14].mxu1 %vm77_vm1, %v4099_v12  ;;  %v4035_v23 = vmul.f32 1.25, %v3943_v46  ;;  %v4107_v29 = vmul.f32 %v4105_v7, %v4029_v34  ;;  %v4033_v10 = vmul.f32 %v4031_v41, %v3935_v11  ;;  %vm6018_vm13 = vcmask 7168  }
 0x76e   :  { %7022 = vmatpush3.bf16.msra.mxu1 %v7612_v18  ;;  %6776 = vmatprep.mubr.msk.f32.mxu1 %vm77_vm1, %v4108_v43  ;;  %v4038_v58 = vadd.f32 %v4036_v17, %v4032_v50  ;;  %v3949_v13 = vadd.f32 %v3947_v39, %v3941_v37  ;;  %v4112_v3 = vmul.f32 %v4110_v32, %v4028_v9  ;;  %v4111_v38 = vmul.f32 0.8333333, %v8380_v62 }
 0x76f   :  { %7024 = vmatprep.subr.bf16.mxu1 %v7773_v53  ;;  %v4109_v25 = vadd.f32 %v4107_v29, %v4103_v19  ;;  %v4115_v45 = vmul.f32 0.8333333, %v3943_v46 }
 0x770   :  { %v4116_v24 = vmul.f32 %v4114_v54, %v4038_v58  ;;  %v4037_v48 = vmul.f32 %v4035_v23, %v3949_v13  ;;  %v4113_v1 = vmul.f32 %v4111_v38, %v4029_v34 }
 0x772   :  { %v4039_v16 = vadd.f32 %v4037_v48, %v4033_v10  ;;  %v4118_v59 = vadd.f32 %v4116_v24, %v4112_v3 }
 0x773   :  { %v6693_v61 = vpop.f32.mrb[12].mxu1 }
 0x774   :  { %v6020_v18 = vsel %vm6018_vm13, %v6693_v61, 0.0  ;;  %v3433_v57 = vpop.f32.mrb[13].mxu1  ;;  %v4117_v9 = vmul.f32 %v4115_v45, %v4039_v16 }
 0x775   :  { %v6019_v60 = vsel %vm6018_vm13, %v3433_v57, 0.0  ;;  %6777 = vmatmul.mubr.msk.f32.vlgmr.msra.gmra.mrb[14].mxu1 %vm77_vm1, %v4109_v25 }
 0x776   :  { %v6021_v20 = vadd.f32 %v6020_v18, %v6019_v60  ;;  %7026 = vmatpush3.bf16.msra.mxu1 %v7773_v53  ;;  %6783 = vmatprep.mubr.msk.f32.mxu1 %vm77_vm1, %v4118_v59  ;;  %v4119_v52 = vadd.f32 %v4117_v9, %v4113_v1 }
 0x778   :  { %6022 = vadd.xlane.f32.xlu0 %v6021_v20 }
 0x77d   :  { %6784 = vmatmul.mubr.msk.f32.vlgmr.msra.gmra.mrb[14].mxu1 %vm77_vm1, %v4119_v52 }
 0x805   :  { %v6023_v42 = vpop.xlane.xlu0 %6022 }
 0x806   :  { %v6024_v11 = vrot.slane %v6023_v42, 4 }
 0x808   :  { %v6025_v56 = vadd.f32 %v6024_v11, %v6023_v42 }
 0x80a   :  { %v6026_v47 = vrot.slane %v6025_v56, 2 }
 0x80c   :  { %v6027_v27 = vadd.f32 %v6026_v47, %v6025_v56 }
 0x80e   :  { %v6028_v22 = vrot.slane %v6027_v27, 1 }
 0x810   :  { %v6029_v40 = vadd.f32 %v6028_v22, %v6027_v27 }
 0x812   :  { %7131 = vpush %v6029_v40 }
 0x843   :  { %s7132_s13 = spop %7131 }
 0x850   :  { %v8438_v62 = vpop.f32.mrb[14].mxu1 }
 0x851   :  { %v8440_v26 = vpop.f32.mrb[15].mxu1  ;;  %vm4878_vm7 = vcmp.ge.f32.partialorder %v8438_v62, -2.2  ;;  %vm4880_vm8 = vcmp.lt.f32.partialorder %v8438_v62, -1.8  ;;  %vm4896_vm11 = vcmp.lt.f32.partialorder %v8438_v62, -1.0 }
 0x852   :  { %vm4877_vm0 = vcmp.ge.f32.partialorder %v8440_v26, -2.2  ;;  %vm4879_vm3 = vcmp.lt.f32.partialorder %v8440_v26, -1.8  ;;  %vm4885_vm4 = vcmp.ge.f32.partialorder %v8440_v26, -1.8 }
 0x853   :  { %vm4881_vm12 = vmand %vm4877_vm0, %vm4879_vm3  ;;  %vm4887_vm14 = vcmp.lt.f32.partialorder %v8440_v26, -1.4  ;;  %vm4893_vm6 = vcmp.ge.f32.partialorder %v8440_v26, -1.4  ;;  %vm4895_vm9 = vcmp.lt.f32.partialorder %v8440_v26, -1.0  ;;  %vm4901_vm10 = vcmp.ge.f32.partialorder %v8440_v26, -1.0 }
 0x854   :  { %vm4889_vm15 = vmand %vm4885_vm4, %vm4887_vm14  ;;  %vm4903_vm5 = vcmp.lt.f32.partialorder %v8440_v26, -0.6  ;;  %v6240_v53 = vadd.f32 2.2, %v8440_v26  ;;  %v4985_v21 = vsub.f32 -1.0, %v8440_v26  ;;  %v4883_v33 = vsel %vm4881_vm12, 1.0, %v7212_v6 }
 0x855   :  { %v4891_v15 = vsel %vm4889_vm15, 1.0, %v7212_v6  ;;  %vm4897_vm2 = vmand %vm4893_vm6, %vm4895_vm9  ;;  %v4971_v14 = vsub.f32 -1.4, %v8440_v26  ;;  %v8459_v0 = vadd.f32 1.8, %v8440_v26  ;;  %v4986_v1 = vsub.f32 -1.0, %v8438_v62 }
 0x856   :  { %v4899_v46 = vsel %vm4897_vm2, 1.0, %v7212_v6  ;;  %vm4905_vm0 = vmand %vm4901_vm10, %vm4903_vm5  ;;  %v4967_v12 = vmul.f32 2.5, %v6240_v53  ;;  %v4987_v50 = vmul.f32 2.5, %v4985_v21  ;;  %v8463_v2 = vadd.f32 1.4, %v8440_v26 }
 0x857   :  { %v8466_v49 = vsel %vm4905_vm0, 1.0, %v7212_v6  ;;  %v4973_v34 = vmul.f32 2.5, %v4971_v14  ;;  %v4981_v30 = vmul.f32 2.5, %v8459_v0  ;;  %v4999_v5 = vsub.f32 -0.6, %v8440_v26  ;;  %vm4882_vm3 = vmand %vm4878_vm7, %vm4880_vm8 }
 0x858   :  { %v4969_v4 = vmul.f32 %v4967_v12, %v4883_v33  ;;  %v4989_v43 = vmul.f32 %v4987_v50, %v4899_v46  ;;  %v4995_v51 = vmul.f32 2.5, %v8463_v2  ;;  %v5105_v7 = vmul.f32 1.25, %v6240_v53 }
 0x859   :  { %v4975_v17 = vmul.f32 %v4973_v34, %v4891_v15  ;;  %v4983_v37 = vmul.f32 %v4981_v30, %v4891_v15  ;;  %v5001_v39 = vmul.f32 2.5, %v4999_v5  ;;  %v5109_v41 = vmul.f32 1.25, %v4985_v21 }
 0x85a   :  { %v4997_v19 = vmul.f32 %v4995_v51, %v4899_v46  ;;  %v5115_v32 = vmul.f32 1.25, %v8459_v0  ;;  %v5119_v54 = vmul.f32 1.25, %v4999_v5  ;;  %v5195_v23 = vmul.f32 0.8333333, %v6240_v53 }
 0x85b   :  { %v4977_v29 = vadd.f32 %v4975_v17, %v4969_v4  ;;  %v4991_v58 = vadd.f32 %v4989_v43, %v4983_v37  ;;  %v5003_v13 = vmul.f32 %v5001_v39, %v8466_v49  ;;  %v5199_v10 = vmul.f32 0.8333333, %v4999_v5 }
 0x85c   :  { %vm4886_vm4 = vcmp.ge.f32.partialorder %v8438_v62, -1.8  ;;  %vm4888_vm12 = vcmp.lt.f32.partialorder %v8438_v62, -1.4  ;;  %vm4894_vm14 = vcmp.ge.f32.partialorder %v8438_v62, -1.4 }
 0x85d   :  { %v8480_v3 = vadd.f32 %v5003_v13, %v4997_v19  ;;  %v5107_v24 = vmul.f32 %v5105_v7, %v4977_v29  ;;  %v5111_v48 = vmul.f32 %v5109_v41, %v4991_v58  ;;  %v5117_v61 = vmul.f32 %v5115_v32, %v4991_v58  ;;  %vm4890_vm6 = vmand %vm4886_vm4, %vm4888_vm12 }
 0x85e   :  { %v4884_v18 = vsel %vm4882_vm3, 1.0, %v7212_v6  ;;  %vm4898_vm9 = vmand %vm4894_vm14, %vm4896_vm11  ;;  %vm4902_vm10 = vcmp.ge.f32.partialorder %v8438_v62, -1.0  ;;  %vm4904_vm7 = vcmp.lt.f32.partialorder %v8438_v62, -0.6  ;;  %v6241_v57 = vadd.f32 2.2, %v8438_v62 }
 0x85f   :  { %v5113_v25 = vadd.f32 %v5111_v48, %v5107_v24  ;;  %v5121_v16 = vmul.f32 %v5119_v54, %v8480_v3  ;;  %v4892_v60 = vsel %vm4890_vm6, 1.0, %v7212_v6  ;;  %v4972_v59 = vsub.f32 -1.4, %v8438_v62  ;;  %vm4906_vm8 = vmand %vm4902_vm10, %vm4904_vm7 }
 0x860   :  { %v4900_v20 = vsel %vm4898_vm9, 1.0, %v7212_v6  ;;  %v4968_v38 = vmul.f32 2.5, %v6241_v57  ;;  %v8493_v45 = vadd.f32 1.8, %v8438_v62  ;;  %v8499_v11 = vadd.f32 1.4, %v8438_v62 }
 0x861   :  { %v8496_v9 = vadd.f32 %v5121_v16, %v5117_v61  ;;  %v5197_v52 = vmul.f32 %v5195_v23, %v5113_v25  ;;  %v4974_v42 = vmul.f32 2.5, %v4972_v59  ;;  %v4988_v27 = vmul.f32 2.5, %v4986_v1 }
 0x862   :  { %v4970_v56 = vmul.f32 %v4968_v38, %v4884_v18  ;;  %v4982_v47 = vmul.f32 2.5, %v8493_v45  ;;  %v5000_v22 = vsub.f32 -0.6, %v8438_v62  ;;  %v4908_v53 = vsel %vm4906_vm8, 1.0, %v7212_v6 }
 0x863   :  { %v5201_v40 = vmul.f32 %v5199_v10, %v8496_v9  ;;  %v4976_v21 = vmul.f32 %v4974_v42, %v4892_v60  ;;  %v4996_v33 = vmul.f32 2.5, %v8499_v11  ;;  %v4990_v14 = vmul.f32 %v4988_v27, %v4900_v20 }
 0x864   :  { %v4984_v15 = vmul.f32 %v4982_v47, %v4892_v60  ;;  %v5002_v46 = vmul.f32 2.5, %v5000_v22  ;;  %v5106_v30 = vmul.f32 1.25, %v6241_v57  ;;  %v5110_v43 = vmul.f32 1.25, %v4986_v1 }
 0x865   :  { %v5203_v12 = vadd.f32 %v5201_v40, %v5197_v52  ;;  %v4978_v50 = vadd.f32 %v4976_v21, %v4970_v56  ;;  %v4998_v34 = vmul.f32 %v4996_v33, %v4900_v20  ;;  %v5116_v51 = vmul.f32 1.25, %v8493_v45 }
 0x866   :  { %v4992_v5 = vadd.f32 %v4990_v14, %v4984_v15  ;;  %v5004_v4 = vmul.f32 %v5002_v46, %v4908_v53  ;;  %v5120_v17 = vmul.f32 1.25, %v5000_v22  ;;  %v4863_v37 = vmax.f32 %v8440_v26, -30.0 }
 0x867   :  { %6790 = vmatprep.mubr.msk.f32.mxu0 %vm77_vm1, %v5203_v12  ;;  %v5108_v7 = vmul.f32 %v5106_v30, %v4978_v50  ;;  %v4864_v39 = vmax.f32 %v8438_v62, -30.0  ;;  %vm4909_vm15 = vcmp.ge.f32.partialorder %v8440_v26, -0.6  ;;  %vm4911_vm5 = vcmp.lt.f32.partialorder %v8440_v26, -0.2 }
 0x868   :  { %v5006_v41 = vadd.f32 %v5004_v4, %v4998_v34  ;;  %v5112_v19 = vmul.f32 %v5110_v43, %v4992_v5  ;;  %v5118_v32 = vmul.f32 %v5116_v51, %v4992_v5  ;;  %v4865_v54 = vsub.f32 0.0, %v4863_v37  ;;  %vm4913_vm11 = vmand %vm4909_vm15, %vm4911_vm5 }
 0x869   :  { %v4866_v23 = vsub.f32 0.0, %v4864_v39  ;;  %v8513_v29 = vadd.f32 1.0, %v8440_v26  ;;  %v5196_v10 = vmul.f32 0.8333333, %v6241_v57  ;;  %v5013_v24 = vsub.f32 -0.2, %v8440_v26 }
 0x86a   :  { %v5114_v58 = vadd.f32 %v5112_v19, %v5108_v7  ;;  %v5122_v13 = vmul.f32 %v5120_v17, %v5006_v41  ;;  %v4867_v48 = vmul.f32 1.442695, %v4865_v54  ;;  %v4915_v18 = vsel %vm4913_vm11, 1.0, %v7212_v6 }
 0x86b   :  { %v4869_v61 = vmul.f32 1.442695, %v4866_v23  ;;  %v5009_v25 = vmul.f32 2.5, %v8513_v29  ;;  %v5200_v59 = vmul.f32 0.8333333, %v5000_v22  ;;  %v5015_v20 = vmul.f32 2.5, %v5013_v24 }
 0x86c   :  { %v5124_v16 = vadd.f32 %v5122_v13, %v5118_v32  ;;  %v5198_v60 = vmul.f32 %v5196_v10, %v5114_v58  ;;  %7178 = vpow2.f32 %v4867_v48  ;;  %vm4910_vm2 = vcmp.ge.f32.partialorder %v8438_v62, -0.6 }
 0x86d   :  { %v5011_v38 = vmul.f32 %v5009_v25, %v8466_v49  ;;  %7180 = vpow2.f32 %v4869_v61  ;;  %v5017_v52 = vmul.f32 %v5015_v20, %v4915_v18  ;;  %vm4912_vm0 = vcmp.lt.f32.partialorder %v8438_v62, -0.2 }
 0x86e   :  { %v5202_v1 = vmul.f32 %v5200_v59, %v5124_v16  ;;  %v8522_v57 = vadd.f32 1.0, %v8438_v62  ;;  %vm4914_vm3 = vmand %vm4910_vm2, %vm4912_vm0  ;;  %v5014_v47 = vsub.f32 -0.2, %v8438_v62  ;;  %v5125_v27 = vmul.f32 1.25, %v8463_v2 }
 0x86f   :  { %v5019_v56 = vadd.f32 %v5017_v52, %v5011_v38  ;;  %v4916_v22 = vsel %vm4914_vm3, 1.0, %v7212_v6  ;;  %vm4917_vm4 = vcmp.ge.f32.partialorder %v8440_v26, -0.2  ;;  %v5129_v40 = vmul.f32 1.25, %v5013_v24 }
 0x870   :  { %v5204_v42 = vadd.f32 %v5202_v1, %v5198_v60  ;;  %v5010_v49 = vmul.f32 2.5, %v8522_v57  ;;  %v5016_v21 = vmul.f32 2.5, %v5014_v47  ;;  %v5127_v33 = vmul.f32 %v5125_v27, %v8480_v3 }
 0x871   :  { %v5205_v15 = vmul.f32 0.8333333, %v8459_v0  ;;  %vm4919_vm12 = vcmp.lt.f32.partialorder %v8440_v26, 0.2  ;;  %v5131_v46 = vmul.f32 %v5129_v40, %v5019_v56  ;;  %v8536_v50 = vadd.f32 0.6, %v8440_v26 }
 0x872   :  { %6791 = vmatmul.mubr.msk.f32.vlgmr.msra.gmra.mrb[14].mxu0 %vm77_vm1, %v5204_v42  ;;  %v5012_v14 = vmul.f32 %v5010_v49, %v4908_v53  ;;  %v5018_v12 = vmul.f32 %v5016_v21, %v4916_v22  ;;  %vm4921_vm14 = vmand %vm4917_vm4, %vm4919_vm12  ;;  %v5027_v34 = vsub.f32 0.2, %v8440_v26  ;;  %v5209_v30 = vmul.f32 0.8333333, %v5013_v24 }
 0x873   :  { %7034 = vmatpush3.bf16.msra.mxu0 %v7843_v36  ;;  %v5126_v36 = vmul.f32 1.25, %v8499_v11  ;;  %v5130_v5 = vmul.f32 1.25, %v5014_v47  ;;  %v5206_v3 = vmul.f32 0.8333333, %v8493_v45  ;;  %v4923_v53 = vsel %vm4921_vm14, 1.0, %v7212_v6 }
 0x874   :  { %7036 = vmatprep.subr.bf16.mxu0 %v7964_v55  ;;  %v5020_v0 = vadd.f32 %v5018_v12, %v5012_v14  ;;  %v5023_v4 = vmul.f32 2.5, %v8536_v50  ;;  %v5029_v43 = vmul.f32 2.5, %v5027_v34  ;;  %v8544_v7 = vmul.f32 %v5205_v15, %v8496_v9 }
 0x875   :  { %v5128_v17 = vmul.f32 %v5126_v36, %v5006_v41  ;;  %v8546_v37 = vmul.f32 %v5206_v3, %v5124_v16  ;;  %vm4918_vm6 = vcmp.ge.f32.partialorder %v8438_v62, -0.2  ;;  %v5133_v32 = vadd.f32 %v5131_v46, %v5127_v33 }
 0x876   :  { %v7179_v51 = vpop.eup %7178  ;;  %v5132_v54 = vmul.f32 %v5130_v5, %v5020_v0  ;;  %v5025_v45 = vmul.f32 %v5023_v4, %v4915_v18  ;;  %v5031_v58 = vmul.f32 %v5029_v43, %v4923_v53  ;;  %vm4920_vm9 = vcmp.lt.f32.partialorder %v8438_v62, 0.2 }
 0x877   :  { %v7181_v39 = vpop.eup %7180  ;;  %v4871_v19 = vadd.f32 1.0, %v7179_v51  ;;  %v8551_v13 = vadd.f32 0.6, %v8438_v62  ;;  %v5210_v9 = vmul.f32 0.8333333, %v5014_v47  ;;  %v5135_v41 = vmul.f32 1.25, %v8513_v29  ;;  %vm4922_vm10 = vmand %vm4918_vm6, %vm4920_vm9 }
 0x878   :  { %v4872_v23 = vadd.f32 1.0, %v7181_v39  ;;  %v5028_v10 = vsub.f32 0.2, %v8438_v62  ;;  %v5033_v24 = vadd.f32 %v5031_v58, %v5025_v45  ;;  %v4924_v48 = vsel %vm4922_vm10, 1.0, %v7212_v6 }
 0x879   :  { %7182 = vrcp.f32 %v4871_v19  ;;  %v5024_v61 = vmul.f32 2.5, %v8551_v13  ;;  %v5211_v18 = vmul.f32 %v5209_v30, %v5133_v32  ;;  %v5139_v25 = vmul.f32 1.25, %v5027_v34 }
 0x87a   :  { %7184 = vrcp.f32 %v4872_v23  ;;  %v5215_v16 = vmul.f32 0.8333333, %v8463_v2  ;;  %v5030_v60 = vmul.f32 2.5, %v5028_v10  ;;  %v5134_v59 = vadd.f32 %v5132_v54, %v5128_v17 }
 0x87b   :  { %v5137_v20 = vmul.f32 %v5135_v41, %v5019_v56  ;;  %v5026_v38 = vmul.f32 %v5024_v61, %v4916_v22  ;;  %v5136_v1 = vmul.f32 1.25, %v8522_v57  ;;  %v5141_v52 = vmul.f32 %v5139_v25, %v5033_v24 }
 0x87c   :  { %v5032_v42 = vmul.f32 %v5030_v60, %v4924_v48  ;;  %vm4925_vm7 = vcmp.ge.f32.partialorder %v8440_v26, 0.2  ;;  %vm4927_vm8 = vcmp.lt.f32.partialorder %v8440_v26, 0.6  ;;  %v5217_v47 = vmul.f32 %v5215_v16, %v5133_v32 }
 0x87d   :  { %v5219_v27 = vmul.f32 0.8333333, %v5027_v34  ;;  %vm4929_vm15 = vmand %vm4925_vm7, %vm4927_vm8  ;;  %v8562_v49 = vadd.f32 0.2, %v8440_v26  ;;  %v5041_v2 = vsub.f32 0.6, %v8440_v26  ;;  %v5138_v56 = vmul.f32 %v5136_v1, %v5020_v0 }
 0x87e   :  { %v8565_v40 = vadd.f32 %v5032_v42, %v5026_v38  ;;  %v5140_v22 = vmul.f32 1.25, %v5028_v10  ;;  %v4931_v21 = vsel %vm4929_vm15, 1.0, %v7212_v6  ;;  %v5212_v33 = vmul.f32 %v5210_v9, %v5134_v59 }
 0x87f   :  { %v5216_v15 = vmul.f32 0.8333333, %v8499_v11  ;;  %v5037_v14 = vmul.f32 2.5, %v8562_v49  ;;  %v5043_v46 = vmul.f32 2.5, %v5041_v2  ;;  %v5143_v12 = vadd.f32 %v5141_v52, %v5137_v20 }
 0x880   :  { %v5142_v34 = vmul.f32 %v5140_v22, %v8565_v40  ;;  %v5220_v30 = vmul.f32 0.8333333, %v5028_v10  ;;  %v5145_v36 = vmul.f32 1.25, %v8536_v50  ;;  %v5225_v4 = vmul.f32 0.8333333, %v8513_v29 }
 0x881   :  { %v5039_v5 = vmul.f32 %v5037_v14, %v4923_v53  ;;  %v5045_v3 = vmul.f32 %v5043_v46, %v4931_v21  ;;  %vm4926_vm5 = vcmp.ge.f32.partialorder %v8438_v62, 0.2  ;;  %vm4928_vm11 = vcmp.lt.f32.partialorder %v8438_v62, 0.6 }
 0x882   :  { %v5144_v43 = vadd.f32 %v5142_v34, %v5138_v56  ;;  %v8576_v11 = vadd.f32 0.2, %v8438_v62  ;;  %v5042_v51 = vsub.f32 0.6, %v8438_v62  ;;  %v5147_v32 = vmul.f32 %v5145_v36, %v5033_v24  ;;  %vm4930_vm2 = vmand %vm4926_vm5, %vm4928_vm11 }
 0x883   :  { %v7183_v0 = vpop.eup %7182  ;;  %v5047_v19 = vadd.f32 %v5045_v3, %v5039_v5  ;;  %v5149_v53 = vmul.f32 1.25, %v5041_v2  ;;  %v5221_v54 = vmul.f32 %v5219_v27, %v5143_v12  ;;  %v4932_v45 = vsel %vm4930_vm2, 1.0, %v7212_v6 }
 0x884   :  { %v7185_v17 = vpop.eup %7184  ;;  %v4875_v39 = vmul.f32 %v7183_v0, %v8440_v26  ;;  %v5038_v23 = vmul.f32 2.5, %v8576_v11  ;;  %v5213_v58 = vadd.f32 %v5211_v18, %v8544_v7  ;;  %v5214_v9 = vadd.f32 %v5212_v33, %v8546_v37 }
 0x885   :  { %v4876_v29 = vmul.f32 %v7185_v17, %v8438_v62  ;;  %v5151_v41 = vmul.f32 %v5149_v53, %v5047_v19  ;;  %v5044_v10 = vmul.f32 2.5, %v5042_v51  ;;  %v5218_v24 = vmul.f32 %v5216_v15, %v5134_v59 }
 0x886   :  { %6797 = vmatprep.mubr.msk.f32.mxu0 %vm77_vm1, %v4875_v39  ;;  %v5222_v61 = vmul.f32 %v5220_v30, %v5144_v43  ;;  %v5227_v25 = vmul.f32 %v5225_v4, %v5143_v12  ;;  %v5040_v16 = vmul.f32 %v5038_v23, %v4924_v48  ;;  %vm4933_vm0 = vcmp.ge.f32.partialorder %v8440_v26, 0.6 }
 0x887   :  { %6798 = vmatmul.mubr.msk.f32.vlgmr.msra.gmra.mrb[14].mxu0 %vm77_vm1, %v4876_v29  ;;  %v5153_v60 = vadd.f32 %v5151_v41, %v5147_v32  ;;  %v5046_v20 = vmul.f32 %v5044_v10, %v4932_v45  ;;  %vm4935_vm3 = vcmp.lt.f32.partialorder %v8440_v26, 1.0  ;;  %v5223_v7 = vadd.f32 %v5221_v54, %v5217_v47 }
 0x888   :  { %7038 = vmatpush3.bf16.msra.mxu0 %v7964_v55  ;;  %6804 = vmatprep.mubr.msk.f32.mxu0 %vm77_vm1, %v5213_v58  ;;  %v5229_v37 = vmul.f32 0.8333333, %v5041_v2  ;;  %vm4937_vm4 = vmand %vm4933_vm0, %vm4935_vm3  ;;  %v8593_v18 = vadd.f32 -0.2, %v8440_v26  ;;  %v5055_v48 = vsub.f32 1.0, %v8440_v26  ;;  %v5146_v55 = vmul.f32 1.25, %v8551_v13 }
 0x889   :  { %7040 = vmatprep.subr.bf16.mxu0 %v7988_v8  ;;  %v5048_v59 = vadd.f32 %v5046_v20, %v5040_v16  ;;  %v5150_v38 = vmul.f32 1.25, %v5042_v51  ;;  %v4939_v1 = vsel %vm4937_vm4, 1.0, %v7212_v6  ;;  %v5226_v52 = vmul.f32 0.8333333, %v8522_v57 }
 0x88a   :  { %v5051_v42 = vmul.f32 2.5, %v8593_v18  ;;  %v5057_v27 = vmul.f32 2.5, %v5055_v48  ;;  %vm4934_vm12 = vcmp.ge.f32.partialorder %v8438_v62, 0.6  ;;  %v5224_v47 = vadd.f32 %v5222_v61, %v5218_v24 }
 0x88b   :  { %v5231_v2 = vmul.f32 %v5229_v37, %v5153_v60  ;;  %v5148_v56 = vmul.f32 %v5146_v55, %v8565_v40  ;;  %v5152_v22 = vmul.f32 %v5150_v38, %v5048_v59  ;;  %vm4936_vm14 = vcmp.lt.f32.partialorder %v8438_v62, 1.0 }
 0x88c   :  { %v5053_v33 = vmul.f32 %v5051_v42, %v4931_v21  ;;  %v5059_v15 = vmul.f32 %v5057_v27, %v4939_v1  ;;  %v8604_v14 = vadd.f32 -0.2, %v8438_v62  ;;  %v5228_v46 = vmul.f32 %v5226_v52, %v5144_v43  ;;  %vm4938_vm6 = vmand %vm4934_vm12, %vm4936_vm14 }
 0x88d   :  { %v5230_v12 = vmul.f32 0.8333333, %v5042_v51  ;;  %v5155_v57 = vmul.f32 1.25, %v8562_v49  ;;  %v5056_v34 = vsub.f32 1.0, %v8438_v62  ;;  %v5159_v36 = vmul.f32 1.25, %v5055_v48 }
 0x88e   :  { %v5061_v30 = vadd.f32 %v5059_v15, %v5053_v33  ;;  %v4940_v40 = vsel %vm4938_vm6, 1.0, %v7212_v6  ;;  %v5052_v21 = vmul.f32 2.5, %v8604_v14  ;;  %v5235_v3 = vmul.f32 0.8333333, %v8536_v50 }
 0x88f   :  { %6805 = vmatmul.mubr.msk.f32.vlgmr.msra.gmra.mrb[14].mxu0 %vm77_vm1, %v5214_v9  ;;  %v5157_v5 = vmul.f32 %v5155_v57, %v5047_v19  ;;  %v5058_v4 = vmul.f32 2.5, %v5056_v34  ;;  %vm4941_vm9 = vcmp.ge.f32.partialorder %v8440_v26, 1.0  ;;  %v5233_v0 = vadd.f32 %v5231_v2, %v5227_v25 }
 0x890   :  { %7042 = vmatpush3.bf16.msra.mxu0 %v7988_v8  ;;  %6811 = vmatprep.mubr.msk.f32.mxu0 %vm77_vm1, %v5223_v7  ;;  %v5154_v43 = vadd.f32 %v5152_v22, %v5148_v56  ;;  %v5161_v51 = vmul.f32 %v5159_v36, %v5061_v30  ;;  %v5054_v17 = vmul.f32 %v5052_v21, %v4932_v45  ;;  %v5239_v39 = vmul.f32 0.8333333, %v5055_v48 }
 0x891   :  { %7044 = vmatprep.subr.bf16.mxu0 %v8006_v31  ;;  %v5060_v32 = vmul.f32 %v5058_v4, %v4940_v40  ;;  %vm4943_vm10 = vcmp.lt.f32.partialorder %v8440_v26, 1.4  ;;  %v8618_v8 = vadd.f32 -0.6, %v8440_v26  ;;  %v5237_v53 = vmul.f32 %v5235_v3, %v5153_v60 }
 0x892   :  { %v5156_v19 = vmul.f32 1.25, %v8576_v11  ;;  %v5236_v50 = vmul.f32 0.8333333, %v8551_v13  ;;  %vm4945_vm7 = vmand %vm4941_vm9, %vm4943_vm10  ;;  %v5069_v29 = vsub.f32 1.4, %v8440_v26  ;;  %v5163_v54 = vadd.f32 %v5161_v51, %v5157_v5 }
 0x893   :  { %v5062_v23 = vadd.f32 %v5060_v32, %v5054_v17  ;;  %v4947_v58 = vsel %vm4945_vm7, 1.0, %v7212_v6  ;;  %v5065_v45 = vmul.f32 2.5, %v8618_v8  ;;  %v5232_v9 = vmul.f32 %v5230_v12, %v5154_v43 }
 0x894   :  { %v5158_v41 = vmul.f32 %v5156_v19, %v5048_v59  ;;  %v5071_v10 = vmul.f32 2.5, %v5069_v29  ;;  %vm4942_vm8 = vcmp.ge.f32.partialorder %v8438_v62, 1.0  ;;  %v5160_v24 = vmul.f32 1.25, %v5056_v34 }
 0x895   :  { %v8626_v61 = vmul.f32 %v5236_v50, %v5154_v43  ;;  %v5240_v25 = vmul.f32 0.8333333, %v5056_v34  ;;  %v5067_v16 = vmul.f32 %v5065_v45, %v4939_v1  ;;  %v5165_v60 = vmul.f32 1.25, %v8593_v18 }
 0x896   :  { %v5073_v13 = vmul.f32 %v5071_v10, %v4947_v58  ;;  %vm4944_vm15 = vcmp.lt.f32.partialorder %v8438_v62, 1.4  ;;  %v8632_v20 = vadd.f32 -0.6, %v8438_v62  ;;  %v5241_v7 = vmul.f32 %v5239_v39, %v5163_v54 }
 0x897   :  { %6812 = vmatmul.mubr.msk.f32.vlgmr.msra.gmra.mrb[14].mxu0 %vm77_vm1, %v5224_v47  ;;  %v5162_v37 = vmul.f32 %v5160_v24, %v5062_v23  ;;  %v5245_v48 = vmul.f32 0.8333333, %v8562_v49  ;;  %vm4946_vm5 = vmand %vm4942_vm8, %vm4944_vm15  ;;  %v5070_v59 = vsub.f32 1.4, %v8438_v62  ;;  %v5169_v38 = vmul.f32 1.25, %v5069_v29 }
 0x898   :  { %7046 = vmatpush3.bf16.msra.mxu0 %v8006_v31  ;;  %6818 = vmatprep.mubr.msk.f32.mxu0 %vm77_vm1, %v5233_v0  ;;  %v5075_v55 = vadd.f32 %v5073_v13, %v5067_v16  ;;  %v4948_v1 = vsel %vm4946_vm5, 1.0, %v7212_v6  ;;  %v5066_v52 = vmul.f32 2.5, %v8632_v20  ;;  %v5234_v31 = vadd.f32 %v5232_v9, %v5228_v46 }
 0x899   :  { %7048 = vmatprep.subr.bf16.mxu0 %v8008_v28  ;;  %v5167_v42 = vmul.f32 %v5165_v60, %v5061_v30  ;;  %v5072_v27 = vmul.f32 2.5, %v5070_v59  ;;  %vm4949_vm11 = vcmp.ge.f32.partialorder %v8440_v26, 1.4  ;;  %v5247_v49 = vmul.f32 %v5245_v48, %v5163_v54 }
 0x89a   :  { %v5171_v47 = vmul.f32 %v5169_v38, %v5075_v55  ;;  %v5249_v2 = vmul.f32 0.8333333, %v5069_v29  ;;  %v5068_v56 = vmul.f32 %v5066_v52, %v4940_v40  ;;  %v5164_v22 = vadd.f32 %v5162_v37, %v5158_v41 }
 0x89b   :  { %v5074_v33 = vmul.f32 %v5072_v27, %v4948_v1  ;;  %vm4951_vm2 = vcmp.lt.f32.partialorder %v8440_v26, 1.8  ;;  %v8646_v15 = vadd.f32 -1.0, %v8440_v26  ;;  %v5243_v12 = vadd.f32 %v5241_v7, %v5237_v53 }
 0x89c   :  { %v5166_v57 = vmul.f32 1.25, %v8604_v14  ;;  %v5170_v34 = vmul.f32 1.25, %v5070_v59  ;;  %vm4953_vm0 = vmand %vm4949_vm11, %vm4951_vm2  ;;  %v5083_v46 = vsub.f32 1.8, %v8440_v26  ;;  %v5173_v30 = vadd.f32 %v5171_v47, %v5167_v42 }
 0x89d   :  { %v5076_v36 = vadd.f32 %v5074_v33, %v5068_v56  ;;  %v4955_v21 = vsel %vm4953_vm0, 1.0, %v7212_v6  ;;  %v5079_v40 = vmul.f32 2.5, %v8646_v15  ;;  %v5246_v3 = vmul.f32 0.8333333, %v8576_v11 }
 0x89e   :  { %v5168_v5 = vmul.f32 %v5166_v57, %v5062_v23  ;;  %v5085_v4 = vmul.f32 2.5, %v5083_v46  ;;  %vm4950_vm3 = vcmp.ge.f32.partialorder %v8438_v62, 1.4  ;;  %v5242_v0 = vmul.f32 %v5240_v25, %v5164_v22 }
 0x89f   :  { %6819 = vmatmul.mubr.msk.f32.vlgmr.msra.gmra.mrb[14].mxu0 %vm77_vm1, %v5234_v31  ;;  %v5172_v43 = vmul.f32 %v5170_v34, %v5076_v36  ;;  %v5081_v51 = vmul.f32 %v5079_v40, %v4947_v58  ;;  %v5175_v17 = vmul.f32 1.25, %v8618_v8  ;;  %v5248_v39 = vmul.f32 %v5246_v3, %v5164_v22 }
 0x8a0   :  { %7050 = vmatpush3.bf16.msra.mxu0 %v8008_v28  ;;  %6825 = vmatprep.mubr.msk.f32.mxu0 %vm77_vm1, %v5243_v12  ;;  %v5087_v32 = vmul.f32 %v5085_v4, %v4955_v21  ;;  %vm4952_vm4 = vcmp.lt.f32.partialorder %v8438_v62, 1.8  ;;  %v8661_v11 = vadd.f32 -1.0, %v8438_v62  ;;  %v5251_v53 = vmul.f32 %v5249_v2, %v5173_v30 }
 0x8a1   :  { %7052 = vmatprep.subr.bf16.mxu0 %v8013_v63  ;;  %v5177_v19 = vmul.f32 %v5175_v17, %v5075_v55  ;;  %v5179_v50 = vmul.f32 1.25, %v5083_v46  ;;  %vm4954_vm12 = vmand %vm4950_vm3, %vm4952_vm4  ;;  %v5084_v28 = vsub.f32 1.8, %v8438_v62  ;;  %v5174_v29 = vadd.f32 %v5172_v43, %v5168_v5 }
 0x8a2   :  { %v5089_v54 = vadd.f32 %v5087_v32, %v5081_v51  ;;  %v4956_v23 = vsel %vm4954_vm12, 1.0, %v7212_v6  ;;  %v5080_v58 = vmul.f32 2.5, %v8661_v11  ;;  %v5244_v45 = vadd.f32 %v5242_v0, %v8626_v61 }
 0x8a3   :  { %v5250_v9 = vmul.f32 0.8333333, %v5070_v59  ;;  %v5086_v41 = vmul.f32 2.5, %v5084_v28  ;;  %vm4957_vm14 = vcmp.ge.f32.partialorder %v8440_v26, 1.8  ;;  %v5253_v13 = vadd.f32 %v5251_v53, %v5247_v49 }
 0x8a4   :  { %v5181_v10 = vmul.f32 %v5179_v50, %v5089_v54  ;;  %v5255_v24 = vmul.f32 0.8333333, %v8593_v18  ;;  %v5259_v25 = vmul.f32 0.8333333, %v5083_v46  ;;  %v5082_v16 = vmul.f32 %v5080_v58, %v4948_v1 }
 0x8a5   :  { %v5088_v60 = vmul.f32 %v5086_v41, %v4956_v23  ;;  %vm4959_vm6 = vcmp.lt.f32.partialorder %v8440_v26, 2.2  ;;  %v6258_v7 = vadd.f32 -1.4, %v8440_v26  ;;  %v5252_v37 = vmul.f32 %v5250_v9, %v5174_v29 }
 0x8a6   :  { %v5183_v48 = vadd.f32 %v5181_v10, %v5177_v19  ;;  %v5176_v61 = vmul.f32 1.25, %v8632_v20  ;;  %vm4961_vm9 = vmand %vm4957_vm14, %vm4959_vm6  ;;  %v5097_v59 = vsub.f32 2.2, %v8440_v26  ;;  %v5180_v55 = vmul.f32 1.25, %v5084_v28 }
 0x8a7   :  { %6826 = vmatmul.mubr.msk.f32.vlgmr.msra.gmra.mrb[14].mxu0 %vm77_vm1, %v5244_v45  ;;  %v5090_v18 = vadd.f32 %v5088_v60, %v5082_v16  ;;  %v4963_v38 = vsel %vm4961_vm9, 1.0, %v7212_v6  ;;  %v5093_v1 = vmul.f32 2.5, %v6258_v7  ;;  %v5257_v52 = vmul.f32 %v5255_v24, %v5173_v30 }
 0x8a8   :  { %7054 = vmatpush3.bf16.msra.mxu0 %v8013_v63  ;;  %6832 = vmatprep.mubr.msk.f32.mxu0 %vm77_vm1, %v5253_v13  ;;  %v5178_v31 = vmul.f32 %v5176_v61, %v5076_v36  ;;  %v5099_v42 = vmul.f32 2.5, %v5097_v59  ;;  %vm4958_vm10 = vcmp.ge.f32.partialorder %v8438_v62, 1.8  ;;  %v5261_v27 = vmul.f32 %v5259_v25, %v5183_v48 }
 0x8a9   :  { %7056 = vmatprep.subr.bf16.mxu0 %v8015_v44  ;;  %v5182_v47 = vmul.f32 %v5180_v55, %v5090_v18  ;;  %v5095_v49 = vmul.f32 %v5093_v1, %v4955_v21  ;;  %v5185_v26 = vmul.f32 1.25, %v8646_v15  ;;  %vm4960_vm7 = vcmp.lt.f32.partialorder %v8438_v62, 2.2 }
 0x8aa   :  { %v5101_v63 = vmul.f32 %v5099_v42, %v4963_v38  ;;  %v6259_v2 = vadd.f32 -1.4, %v8438_v62  ;;  %v5254_v56 = vadd.f32 %v5252_v37, %v5248_v39  ;;  %v5189_v33 = vmul.f32 1.25, %v5097_v59  ;;  %vm4962_vm8 = vmand %vm4958_vm10, %vm4960_vm7 }
 0x8ab   :  { %v5187_v22 = vmul.f32 %v5185_v26, %v5089_v54  ;;  %v5098_v12 = vsub.f32 2.2, %v8438_v62  ;;  %v5184_v57 = vadd.f32 %v5182_v47, %v5178_v31  ;;  %v4964_v46 = vsel %vm4962_vm8, 1.0, %v7212_v6 }
 0x8ac   :  { %v5103_v34 = vadd.f32 %v5101_v63, %v5095_v49  ;;  %v5094_v30 = vmul.f32 2.5, %v6259_v2  ;;  %v5263_v36 = vadd.f32 %v5261_v27, %v5257_v52  ;;  %v5256_v15 = vmul.f32 0.8333333, %v8604_v14 }
 0x8ad   :  { %v5100_v21 = vmul.f32 2.5, %v5098_v12  ;;  %v5260_v40 = vmul.f32 0.8333333, %v5084_v28  ;;  %v5265_v62 = vmul.f32 0.8333333, %v8618_v8  ;;  %v5186_v0 = vmul.f32 1.25, %v8661_v11 }
 0x8ae   :  { %v5191_v5 = vmul.f32 %v5189_v33, %v5103_v34  ;;  %v5096_v3 = vmul.f32 %v5094_v30, %v4956_v23  ;;  %v5258_v6 = vmul.f32 %v5256_v15, %v5174_v29  ;;  %v5269_v17 = vmul.f32 0.8333333, %v5097_v59 }
 0x8af   :  { %6833 = vmatmul.mubr.msk.f32.vlgmr.msra.gmra.mrb[14].mxu0 %vm77_vm1, %v5254_v56  ;;  %v5102_v4 = vmul.f32 %v5100_v21, %v4964_v46  ;;  %v5262_v43 = vmul.f32 %v5260_v40, %v5184_v57  ;;  %v5267_v39 = vmul.f32 %v5265_v62, %v5183_v48  ;;  %v5188_v32 = vmul.f32 %v5186_v0, %v5090_v18 }
 0x8b0   :  { %7058 = vmatpush3.bf16.msra.mxu0 %v8015_v44  ;;  %6839 = vmatprep.mubr.msk.f32.mxu0 %vm77_vm1, %v5263_v36  ;;  %v5193_v51 = vadd.f32 %v5191_v5, %v5187_v22  ;;  %v5190_v53 = vmul.f32 1.25, %v5098_v12  ;;  %v5266_v8 = vmul.f32 0.8333333, %v8632_v20  ;;  %v5270_v11 = vmul.f32 0.8333333, %v5098_v12 }
 0x8b1   :  { %7060 = vmatprep.subr.bf16.mxu0 %v8167_v35  ;;  %v5104_v14 = vadd.f32 %v5102_v4, %v5096_v3  ;;  %v5264_v44 = vadd.f32 %v5262_v43, %v5258_v6  ;;  %v6031_v37 = vstv %s7132_s13 }
 0x8b2   :  { %v5271_v19 = vmul.f32 %v5269_v17, %v5193_v51  ;;  %v5268_v29 = vmul.f32 %v5266_v8, %v5184_v57 }
 0x8b3   :  { %v5192_v50 = vmul.f32 %v5190_v53, %v5104_v14 }
 0x8b4   :  { %v5273_v28 = vadd.f32 %v5271_v19, %v5267_v39 }
 0x8b5   :  { %v5194_v54 = vadd.f32 %v5192_v50, %v5188_v32 }
 0x8b7   :  { %6840 = vmatmul.mubr.msk.f32.vlgmr.msra.gmra.mrb[14].mxu0 %vm77_vm1, %v5264_v44  ;;  %v5272_v23 = vmul.f32 %v5270_v11, %v5194_v54 }
 0x8b8   :  { %7062 = vmatpush3.bf16.msra.mxu0 %v8167_v35  ;;  %6846 = vmatprep.mubr.msk.f32.mxu0 %vm77_vm1, %v5273_v28 }
 0x8b9   :  { %v5274_v58 = vadd.f32 %v5272_v23, %v5268_v29 }
 0x8bf   :  { %6847 = vmatmul.mubr.msk.f32.vlgmr.msra.gmra.mrb[14].mxu0 %vm77_vm1, %v5274_v58  ;;  %vm6047_vm1 = vcmask 0  }
 0x992   :  { %v6848_v45 = vpop.f32.mrb[14].mxu0 }
 0x993   :  { %v6033_v9 = vsel %vm6018_vm13, %v6848_v45, 0.0  ;;  %v6007_v41 = vpop.f32.mrb[15].mxu0 }
 0x994   :  { %v6032_v10 = vsel %vm6018_vm13, %v6007_v41, 0.0 }
 0x995   :  { %v6034_v24 = vadd.f32 %v6033_v9, %v6032_v10 }
 0x997   :  { %6035 = vadd.xlane.f32.xlu1 %v6034_v24 }
 0xa24   :  { %v6036_v25 = vpop.xlane.xlu1 %6035 }
 0xa25   :  { %v6037_v20 = vrot.slane %v6036_v25, 4 }
 0xa27   :  { %v6038_v16 = vadd.f32 %v6037_v20, %v6036_v25 }
 0xa29   :  { %v6039_v13 = vrot.slane %v6038_v16, 2 }
 0xa2b   :  { %v6040_v35 = vadd.f32 %v6039_v13, %v6038_v16 }
 0xa2d   :  { %v6041_v60 = vrot.slane %v6040_v35, 1 }
 0xa2f   :  { %v6042_v7 = vadd.f32 %v6041_v60, %v6040_v35 }
 0xa31   :  { %7133 = vpush %v6042_v7 }
 0xa62   :  { %s7134_s0 = spop %7133 }
 0xa63   :  { %v6044_v48 = vstv %s7134_s0 }
 0xa64   :  { %v6045_v61 = vadd.f32 %v6044_v48, %v6031_v37 }
 0xa66   :  { %v6046_v59 = vmul.f32 0.03125, %v6045_v61 }
 0xa68   :  { %6048 = vst.msk [vmem:[#allocation2] sm:$0x1] %vm6047_vm1, %v6046_v59 }
 0xa69   :  { %7199 = shalt.err (!%p7196_p4)
}
 0xa6a   :  { %s7200_s3 = scalar_lea.hbm %s8730_s18, 16 }
 0xa6b   :  { %p7201_p5 = scmp.ne.s32.totalorder %s8730_s18, %s7200_s3  ;;  %p7204_p6 = scmp.lt.u32.totalorder %s7200_s3, %s8730_s18 }
 0xa6d   :  { %p7206_p7 = pnand %p7204_p6, %p7201_p5 }
 0xa6f   :  { %7209 = shalt.err (!%p7206_p7)
}
 0xa70   :  { %6058 = dma.vmem_to_hbm [thread:$0]  %s6056_s9, 16, %s8730_s18, [#allocation3]  }
 0xa71   :  { %7210 = dma.done.wait [#allocation3], 16  }
 0xa72   :  { %7211 = vsyncadd [#allocation3], 4294967280 }
 0xa73   :  { %6062 = vsyncpa [#allocation3], 1 }

</bundles_post_ra>
